<compile_context>
chip_gen: v7x
topology: tpu7x:2x2x1
jax: 0.10.0
libtpu: 0.0.40
codegen_flags: <defaults>
</compile_context>

<pallas_src>
import jax
import jax.numpy as jnp
from jax import lax
from jax.experimental import pallas as pl
from jax.experimental.pallas import tpu as pltpu

FEAT = 2048       # resnet50 pooled feature width / fc1 width
NCLS = 30         # fc2 output classes
NCLS_PAD = 128    # fc2 padded to one full 128-lane vreg
CPAD = 8          # input channels padded 3 -> 8 (one sublane tile)


def net_kernel(x_ref, wp_ref, bp_ref, w_ref, b_ref, logp_ref, logits_ref):
    B, HW, C = x_ref.shape

    # TODO(synk): stand-in for the pretrained ResNet50 trunk (self.resnet1):
    # a deterministic 1x1 conv (3 -> 2048) + ReLU + global average pool.
    # Reproduces the (B, 2048) pooled-feature interface, not the real
    # ResNet weights / residual blocks.
    x2 = x_ref[...].reshape(B * HW, C)                                 # (B*HW, CPAD)
    y = jnp.dot(x2, wp_ref[...],
                preferred_element_type=jnp.float32)                    # MXU, K padded
    y = jnp.maximum(y + bp_ref[...], 0.0)                              # ReLU
    feat = jnp.mean(y.reshape(B, HW, FEAT), axis=1)                    # global avg pool -> (B, FEAT)

    # Folded head: logits = feat @ (w1 @ w2_pad) + (b1 @ w2_pad + b2_pad).
    logits = jnp.dot(feat.astype(jnp.bfloat16), w_ref[...],
                     preferred_element_type=jnp.float32) + b_ref[...]  # (B, NCLS_PAD) f32

    # numerically stable logsoftmax over the 30 real classes only
    lane = lax.broadcasted_iota(jnp.int32, logits.shape, 1)
    valid = lane < NCLS
    m = jnp.max(jnp.where(valid, logits, -1e30), axis=1, keepdims=True)
    e = jnp.where(valid, jnp.exp(logits - m), 0.0)
    lse = jnp.log(jnp.sum(e, axis=1, keepdims=True))
    logits_ref[...] = logits          # out_fc (padded cols sliced off outside)
    logp_ref[...] = logits - m - lse  # output (padded cols sliced off outside)


def net_forward(x_nchw, params):
    """Mirrors Net.forward: returns (output, out_fc)."""
    B, C, H, W = x_nchw.shape
    HW = H * W
    # NCHW -> pixels-as-rows (B, HW, C), channel dim zero-padded to 8 for a
    # clean MXU contraction layout. Tiny layout glue in plain JAX.
    x_pix = jnp.transpose(x_nchw, (0, 2, 3, 1)).reshape(B, HW, C).astype(jnp.float32)
    x_pix = jnp.pad(x_pix, ((0, 0), (0, 0), (0, CPAD - C)))
    wp = jnp.pad(params["w_proj"].astype(jnp.float32), ((0, CPAD - C), (0, 0)))
    bp = params["b_proj"].astype(jnp.float32)

    # Fold fc1 and fc2 (inference-time, weights static; no activation between
    # them). Fold in f32, stream the folded weight as bf16, f32 accumulation.
    w2p = jnp.pad(params["w2"].astype(jnp.float32), ((0, 0), (0, NCLS_PAD - NCLS)))
    b2p = jnp.pad(params["b2"].astype(jnp.float32), ((0, 0), (0, NCLS_PAD - NCLS)))
    w_fold = (params["w1"].astype(jnp.float32) @ w2p).astype(jnp.bfloat16)  # (FEAT, NCLS_PAD)
    b_fold = params["b1"].astype(jnp.float32) @ w2p + b2p                   # (1, NCLS_PAD)

    logp_pad, logits_pad = pl.pallas_call(
        net_kernel,
        out_shape=(jax.ShapeDtypeStruct((B, NCLS_PAD), jnp.float32),   # logsoftmax
                   jax.ShapeDtypeStruct((B, NCLS_PAD), jnp.float32)),  # logits
        grid_spec=pltpu.PrefetchScalarGridSpec(
            num_scalar_prefetch=0,
            grid=(1,),
            in_specs=[
                pl.BlockSpec((B, HW, CPAD), lambda j: (0, 0, 0)),      # x (resident)
                pl.BlockSpec((CPAD, FEAT), lambda j: (0, 0)),          # trunk proj weight
                pl.BlockSpec((1, FEAT), lambda j: (0, 0)),             # trunk proj bias
                pl.BlockSpec((FEAT, NCLS_PAD), lambda j: (0, 0)),      # folded fc1@fc2 (bf16)
                pl.BlockSpec((1, NCLS_PAD), lambda j: (0, 0)),         # folded bias
            ],
            out_specs=(pl.BlockSpec((B, NCLS_PAD), lambda j: (0, 0)),
                       pl.BlockSpec((B, NCLS_PAD), lambda j: (0, 0))),
        ),
        compiler_params=pltpu.CompilerParams(
            dimension_semantics=("arbitrary",)),
    )(x_pix, wp, bp, w_fold, b_fold)

    return logp_pad[:, :NCLS], logits_pad[:, :NCLS]


if __name__ == "__main__":
    key = jax.random.PRNGKey(0)
    kx, kp, kbp, k1, kb1, k2, kb2 = jax.random.split(key, 7)

    B, C, H, W = 2, 3, 16, 16
    x = jax.random.normal(kx, (B, C, H, W), jnp.float32)

    params = dict(
        w_proj=jax.random.normal(kp, (C, FEAT), jnp.float32) / jnp.sqrt(C),
        b_proj=jax.random.normal(kbp, (1, FEAT), jnp.float32) * 0.01,
        w1=jax.random.normal(k1, (FEAT, FEAT), jnp.float32) / jnp.sqrt(FEAT),
        b1=jax.random.normal(kb1, (1, FEAT), jnp.float32) * 0.01,
        w2=jax.random.normal(k2, (FEAT, NCLS), jnp.float32) / jnp.sqrt(FEAT),
        b2=jax.random.normal(kb2, (1, NCLS), jnp.float32) * 0.01,
    )

    output, out_fc = net_forward(x, params)
    output, out_fc = jax.block_until_ready((output, out_fc))

    # sanity: shapes match Net.forward and logsoftmax rows normalize.
    assert output.shape == (B, NCLS) and out_fc.shape == (B, NCLS)
    assert bool(jnp.all(jnp.isfinite(output))) and bool(jnp.all(jnp.isfinite(out_fc)))
    row_prob_sum = jnp.exp(output).sum(axis=1)
    assert bool(jnp.allclose(row_prob_sum, 1.0, atol=1e-3))

    print("KERNEL_OK")
</pallas_src>

<mosaic_0001>
module attributes {stable_mosaic.version = 11 : i64} {
  func.func @net_kernel(%arg0: i32, %arg1: memref<2x256x8xf32, #tpu.memory_space<vmem>>, %arg2: memref<8x2048xf32, #tpu.memory_space<vmem>>, %arg3: memref<1x2048xf32, #tpu.memory_space<vmem>>, %arg4: memref<2048x128xbf16, #tpu.memory_space<vmem>>, %arg5: memref<1x128xf32, #tpu.memory_space<vmem>>, %arg6: memref<2x128xf32, #tpu.memory_space<vmem>>, %arg7: memref<2x128xf32, #tpu.memory_space<vmem>>) attributes {dimension_semantics = [#tpu.dimension_semantics<arbitrary>], iteration_bounds = array<i64: 1>, scalar_prefetch = 0 : i64, scratch_operands = 0 : i64, tpu.core_type = #tpu.core_type<tc>, window_params = [{pipeline_mode = #tpu.pipeline_mode<synchronous>, transform_indices = @transform_0, window_bounds = array<i64: 2, 256, 8>}, {pipeline_mode = #tpu.pipeline_mode<synchronous>, transform_indices = @transform_1, window_bounds = array<i64: 8, 2048>}, {pipeline_mode = #tpu.pipeline_mode<synchronous>, transform_indices = @transform_2, window_bounds = array<i64: 1, 2048>}, {pipeline_mode = #tpu.pipeline_mode<synchronous>, transform_indices = @transform_3, window_bounds = array<i64: 2048, 128>}, {pipeline_mode = #tpu.pipeline_mode<synchronous>, transform_indices = @transform_4, window_bounds = array<i64: 1, 128>}, {pipeline_mode = #tpu.pipeline_mode<synchronous>, transform_indices = @transform_5, window_bounds = array<i64: 2, 128>}, {pipeline_mode = #tpu.pipeline_mode<synchronous>, transform_indices = @transform_6, window_bounds = array<i64: 2, 128>}]} {
    %c0 = arith.constant 0 : index
    %c0_0 = arith.constant 0 : index
    %c0_1 = arith.constant 0 : index
    %0 = vector.load %arg1[%c0, %c0_0, %c0_1] : memref<2x256x8xf32, #tpu.memory_space<vmem>>, vector<2x256x8xf32>
    %1 = vector.shape_cast %0 : vector<2x256x8xf32> to vector<512x8xf32>
    %c0_2 = arith.constant 0 : index
    %c0_3 = arith.constant 0 : index
    %2 = vector.load %arg2[%c0_2, %c0_3] : memref<8x2048xf32, #tpu.memory_space<vmem>>, vector<8x2048xf32>
    %cst = arith.constant dense<0.000000e+00> : vector<512x2048xf32>
    %3 = tpu.matmul %1, %2, %cst {dimension_numbers = #tpu.dot_dimension_numbers<[1], [0], [0], [1], [0, 0, 1, 1], [], []>} : vector<512x8xf32>, vector<8x2048xf32>, vector<512x2048xf32> -> vector<512x2048xf32>
    %c0_4 = arith.constant 0 : index
    %c0_5 = arith.constant 0 : index
    %4 = vector.load %arg3[%c0_4, %c0_5] : memref<1x2048xf32, #tpu.memory_space<vmem>>, vector<1x2048xf32>
    %5 = vector.broadcast %4 : vector<1x2048xf32> to vector<512x2048xf32>
    %6 = arith.addf %3, %5 : vector<512x2048xf32>
    %cst_6 = arith.constant 0.000000e+00 : f32
    %7 = vector.broadcast %cst_6 : f32 to vector<512x2048xf32>
    %8 = arith.maximumf %6, %7 : vector<512x2048xf32>
    %9 = vector.shape_cast %8 : vector<512x2048xf32> to vector<2x256x2048xf32>
    %cst_7 = arith.constant dense<0.000000e+00> : vector<2x2048xf32>
    %10 = vector.multi_reduction <add>, %9, %cst_7 [1] : vector<2x256x2048xf32> to vector<2x2048xf32>
    %cst_8 = arith.constant 2.560000e+02 : f32
    %11 = vector.broadcast %cst_8 : f32 to vector<2x2048xf32>
    %12 = arith.divf %10, %11 : vector<2x2048xf32>
    %13 = arith.truncf %12 : vector<2x2048xf32> to vector<2x2048xbf16>
    %c0_9 = arith.constant 0 : index
    %c0_10 = arith.constant 0 : index
    %14 = vector.load %arg4[%c0_9, %c0_10] : memref<2048x128xbf16, #tpu.memory_space<vmem>>, vector<2048x128xbf16>
    %cst_11 = arith.constant dense<0.000000e+00> : vector<2x128xf32>
    %15 = tpu.matmul %13, %14, %cst_11 {dimension_numbers = #tpu.dot_dimension_numbers<[1], [0], [0], [1], [0, 0, 1, 1], [], []>} : vector<2x2048xbf16>, vector<2048x128xbf16>, vector<2x128xf32> -> vector<2x128xf32>
    %c0_12 = arith.constant 0 : index
    %c0_13 = arith.constant 0 : index
    %16 = vector.load %arg5[%c0_12, %c0_13] : memref<1x128xf32, #tpu.memory_space<vmem>>, vector<1x128xf32>
    %17 = vector.broadcast %16 : vector<1x128xf32> to vector<2x128xf32>
    %18 = arith.addf %15, %17 : vector<2x128xf32>
    %19 = tpu.iota {dimensions = array<i32: 1>} : vector<2x128xi32>
    %c30_i32 = arith.constant 30 : i32
    %20 = vector.broadcast %c30_i32 : i32 to vector<2x128xi32>
    %21 = arith.cmpi slt, %19, %20 : vector<2x128xi32>
    %cst_14 = arith.constant -1.000000e+30 : f32
    %22 = vector.broadcast %cst_14 : f32 to vector<2x128xf32>
    %23 = arith.select %21, %18, %22 : vector<2x128xi1>, vector<2x128xf32>
    %cst_15 = arith.constant dense<0xFF800000> : vector<2xf32>
    %24 = vector.multi_reduction <maximumf>, %23, %cst_15 [1] : vector<2x128xf32> to vector<2xf32>
    %25 = vector.shape_cast %24 : vector<2xf32> to vector<2x1xf32>
    %26 = vector.broadcast %25 : vector<2x1xf32> to vector<2x128xf32>
    %27 = arith.subf %18, %26 : vector<2x128xf32>
    %28 = math.exp %27 : vector<2x128xf32>
    %cst_16 = arith.constant 0.000000e+00 : f32
    %29 = vector.broadcast %cst_16 : f32 to vector<2x128xf32>
    %30 = arith.select %21, %28, %29 : vector<2x128xi1>, vector<2x128xf32>
    %cst_17 = arith.constant dense<0.000000e+00> : vector<2xf32>
    %31 = vector.multi_reduction <add>, %30, %cst_17 [1] : vector<2x128xf32> to vector<2xf32>
    %32 = vector.shape_cast %31 : vector<2xf32> to vector<2x1xf32>
    %33 = math.log %32 : vector<2x1xf32>
    %c0_18 = arith.constant 0 : index
    %c0_19 = arith.constant 0 : index
    %34 = vector.load %arg7[%c0_18, %c0_19] : memref<2x128xf32, #tpu.memory_space<vmem>>, vector<2x128xf32>
    tpu.vector_store %arg7[%c0_18, %c0_19], %18 {strides = array<i32>} : memref<2x128xf32, #tpu.memory_space<vmem>>, vector<2x128xf32>,
    %35 = vector.broadcast %25 : vector<2x1xf32> to vector<2x128xf32>
    %36 = arith.subf %18, %35 : vector<2x128xf32>
    %37 = vector.broadcast %33 : vector<2x1xf32> to vector<2x128xf32>
    %38 = arith.subf %36, %37 : vector<2x128xf32>
    %c0_20 = arith.constant 0 : index
    %c0_21 = arith.constant 0 : index
    %39 = vector.load %arg6[%c0_20, %c0_21] : memref<2x128xf32, #tpu.memory_space<vmem>>, vector<2x128xf32>
    tpu.vector_store %arg6[%c0_20, %c0_21], %38 {strides = array<i32>} : memref<2x128xf32, #tpu.memory_space<vmem>>, vector<2x128xf32>,
    return
  }
  func.func @transform_0(%arg0: i32) -> (i32, i32, i32) {
    %c0_i32 = arith.constant 0 : i32
    %c0_i32_0 = arith.constant 0 : i32
    %c0_i32_1 = arith.constant 0 : i32
    %c0_i32_2 = arith.constant 0 : i32
    return %c0_i32, %c0_i32_0, %c0_i32_1 : i32, i32, i32
  }
  func.func @transform_1(%arg0: i32) -> (i32, i32) {
    %c0_i32 = arith.constant 0 : i32
    %c0_i32_0 = arith.constant 0 : i32
    %c0_i32_1 = arith.constant 0 : i32
    return %c0_i32, %c0_i32_0 : i32, i32
  }
  func.func @transform_2(%arg0: i32) -> (i32, i32) {
    %c0_i32 = arith.constant 0 : i32
    %c0_i32_0 = arith.constant 0 : i32
    %c0_i32_1 = arith.constant 0 : i32
    return %c0_i32, %c0_i32_0 : i32, i32
  }
  func.func @transform_3(%arg0: i32) -> (i32, i32) {
    %c0_i32 = arith.constant 0 : i32
    %c0_i32_0 = arith.constant 0 : i32
    %c0_i32_1 = arith.constant 0 : i32
    return %c0_i32, %c0_i32_0 : i32, i32
  }
  func.func @transform_4(%arg0: i32) -> (i32, i32) {
    %c0_i32 = arith.constant 0 : i32
    %c0_i32_0 = arith.constant 0 : i32
    %c0_i32_1 = arith.constant 0 : i32
    return %c0_i32, %c0_i32_0 : i32, i32
  }
  func.func @transform_5(%arg0: i32) -> (i32, i32) {
    %c0_i32 = arith.constant 0 : i32
    %c0_i32_0 = arith.constant 0 : i32
    %c0_i32_1 = arith.constant 0 : i32
    return %c0_i32, %c0_i32_0 : i32, i32
  }
  func.func @transform_6(%arg0: i32) -> (i32, i32) {
    %c0_i32 = arith.constant 0 : i32
    %c0_i32_0 = arith.constant 0 : i32
    %c0_i32_1 = arith.constant 0 : i32
    return %c0_i32, %c0_i32_0 : i32, i32
  }
}

</mosaic_0001>

<bundles_post_ra>
// kernel: tpu_custom_call.1
= control target key start
LH: loop header
LB: loop body
LE: loop exit
PB: predicated region body
PF: predicated region fallthrough
CT: control target
= control target key end

     0   :  { %12 = vsyncpa [#allocation3], 0  ;;  %s12295_s0 = inlined_call_operand.vmem [shape: f32[2,256,8], index: 0, kind: input, shape index: {}]   ;;  %s12296_s1 = inlined_call_operand.vmem [shape: f32[8,2048], index: 1, kind: input, shape index: {}]   ;;  %s12297_s2 = inlined_call_operand.vmem [shape: f32[1,2048], index: 2, kind: input, shape index: {}]   ;;  %s12298_s3 = inlined_call_operand.hbm [shape: bf16[2048,128], index: 3, kind: input, shape index: {}]   ;;  %s12299_s4 = inlined_call_operand.vmem [shape: f32[1,128], index: 4, kind: input, shape index: {}]   ;;  %s12300_s5 = inlined_call_operand.hbm [shape: f32[2,128], index: 5, kind: output, shape index: {0}]   ;;  %s12301_s6 = inlined_call_operand.hbm [shape: f32[2,128], index: 6, kind: output, shape index: {1}]  }
   0x1   :  { %13 = vsyncpa [#allocation4], 0 }
   0x2   :  { %14 = vsyncpa [#allocation7], 0  ;;  %s8995_s21 = smov [#allocation2]   ;;  %s8923_s25 = scalar_lea.hbm %s12298_s3, 16384 }
   0x3   :  { %s26_s22 = sshll.u32 %s8995_s21, 4  ;;  %p8924_p0 = scmp.ne.s32.totalorder %s12298_s3, %s8923_s25  ;;  %s27_s22 = int_to_ptr.vmem [resolvable:$true] %s26_s22 }
   0x4   :  { %p8927_p1 = scmp.lt.u32.totalorder %s8923_s25, %s12298_s3 }
   0x6   :  { %p8929_p2 = pnand %p8927_p1, %p8924_p0 }
   0x8   :  { %8932 = shalt.err (!%p8929_p2)
}
   0x9   :  { %s8933_s30 = scalar_lea.vmem %s27_s22, 16384  ;;  %p8938_p4 = scmp.lt.s32.totalorder %s27_s22, %s27_s22 }
   0xa   :  { %p8934_p3 = scmp.ne.s32.totalorder %s27_s22, %s8933_s30  ;;  %p8939_p5 = scmp.lt.s32.totalorder %s8933_s30, %s8933_s30 }
   0xc   :  { %p8940_p6 = por %p8939_p5, %p8938_p4 }
   0xe   :  { %p8941_p7 = pnand %p8940_p6, %p8934_p3 }
  0x10   :  { %8944 = shalt.err (!%p8941_p7)
}
  0x11   :  { %s8996_s7 = smov 64   ;;  %s8997_s8 = smov 4  }
  0x12   :  { %32 = dma.hbm_to_vmem [thread:$0]  %s12298_s3, 16384, %s27_s22, [#allocation3], %s8996_s7, %s8996_s7, %s8997_s8  }
  0x13   :  { %8989 = dma.done.wait [#allocation3], 16384  }
  0x14   :  { %8990 = vsyncadd [#allocation3], 4294950912  ;;  %v8998_v0 = vmov 0.0   ;;  %v104_v1 = vld [vmem:[%s12296_s1 + $0x8] sm:$0xff]  ;;  %v106_v2 = vld [vmem:[%s12296_s1 + $0x18] sm:$0xff]  ;;  %vm203_vm0 = vcmask 64512   ;;  %v123_v62 = vlaneseq }
  0x15   :  { %460 = vmatprep.mubr.f32.mxu0 %v8998_v0  ;;  %909 = vmatprep.mubr.f32.mxu1 %v8998_v0  ;;  %v103_v3 = vld [vmem:[%s12296_s1] sm:$0xff]  ;;  %v105_v4 = vld [vmem:[%s12296_s1 + $0x10] sm:$0xff]  ;;  %v108_v6 = vld [vmem:[%s12296_s1 + $0x28] sm:$0xff]  ;;  %vm6588_vm1 = vcmask 1041409   ;;  %vm7729_vm3 = vcmask 1041408  }
  0x16   :  { %396 = vmatprep.subr.mxu0 %v104_v1  ;;  %845 = vmatprep.subr.mxu1 %v106_v2  ;;  %v39_v5 = vld [vmem:[%s12295_s0] sm:$0xff]  ;;  %v110_v8 = vld [vmem:[%s12296_s1 + $0x38] sm:$0xff]  ;;  %v109_v9 = vld [vmem:[%s12296_s1 + $0x30] sm:$0xff]  ;;  %v9441_v1 = vshrl.u32 %v123_v62, 7 }
  0x17   :  { %397 = vmatpush1.msra.mxu0 %v103_v3  ;;  %846 = vmatpush1.msra.mxu1 %v105_v4  ;;  %v107_v7 = vld [vmem:[%s12296_s1 + $0x20] sm:$0xff]  ;;  %v40_v10 = vld [vmem:[%s12295_s0 + $0x8] sm:$0xff]  ;;  %v41_v11 = vld [vmem:[%s12295_s0 + $0x10] sm:$0xff] }
  0x18   :  { %7774 = vmatmul.mubr.msk.f32.vlgmr.msra.gmra.mrb[0].mxu0 %vm203_vm0, %v39_v5  ;;  %7838 = vmatmul.mubr.msk.f32.vlgmr.msra.gmra.mrb[0].mxu1 %vm203_vm0, %v39_v5  ;;  %v42_v12 = vld [vmem:[%s12295_s0 + $0x18] sm:$0xff]  ;;  %v43_v13 = vld [vmem:[%s12295_s0 + $0x20] sm:$0xff]  ;;  %v44_v14 = vld [vmem:[%s12295_s0 + $0x28] sm:$0xff]  ;;  %v125_v3 = vsub.s32 0, %v9441_v1  ;;  %v133_v4 = vsub.s32 2, %v9441_v1 }
  0x19   :  { %1294 = vmatprep.subr.mxu0 %v108_v6  ;;  %1743 = vmatprep.subr.mxu1 %v110_v8  ;;  %v45_v15 = vld [vmem:[%s12295_s0 + $0x30] sm:$0xff]  ;;  %v46_v16 = vld [vmem:[%s12295_s0 + $0x38] sm:$0xff]  ;;  %v47_v17 = vld [vmem:[%s12295_s0 + $0x40] sm:$0xff]  ;;  %v129_v6 = vsub.s32 1, %v9441_v1 }
  0x1a   :  { %1295 = vmatpush1.msra.mxu0 %v107_v7  ;;  %466 = vmatprep.mubr.f32.mxu0 %v8998_v0  ;;  %v48_v18 = vld [vmem:[%s12295_s0 + $0x48] sm:$0xff]  ;;  %v49_v19 = vld [vmem:[%s12295_s0 + $0x50] sm:$0xff]  ;;  %v50_v20 = vld [vmem:[%s12295_s0 + $0x58] sm:$0xff]  ;;  %v137_v7 = vsub.s32 3, %v9441_v1 }
  0x1b   :  { %915 = vmatprep.mubr.f32.mxu1 %v8998_v0  ;;  %1744 = vmatpush1.msra.mxu1 %v109_v9  ;;  %v51_v21 = vld [vmem:[%s12295_s0 + $0x60] sm:$0xff]  ;;  %v52_v22 = vld [vmem:[%s12295_s0 + $0x68] sm:$0xff]  ;;  %v53_v23 = vld [vmem:[%s12295_s0 + $0x70] sm:$0xff] }
  0x1c   :  { %7775 = vmatmul.mubr.msk.f32.gmra.mrb[2].mxu0 %vm203_vm0, %v40_v10  ;;  %7839 = vmatmul.mubr.msk.f32.gmra.mrb[2].mxu1 %vm203_vm0, %v40_v10  ;;  %v54_v24 = vld [vmem:[%s12295_s0 + $0x78] sm:$0xff]  ;;  %v55_v25 = vld [vmem:[%s12295_s0 + $0x80] sm:$0xff]  ;;  %v56_v26 = vld [vmem:[%s12295_s0 + $0x88] sm:$0xff] }
  0x1d   :  { %472 = vmatprep.mubr.f32.mxu0 %v8998_v0  ;;  %921 = vmatprep.mubr.f32.mxu1 %v8998_v0  ;;  %v57_v27 = vld [vmem:[%s12295_s0 + $0x90] sm:$0xff]  ;;  %v58_v28 = vld [vmem:[%s12295_s0 + $0x98] sm:$0xff]  ;;  %v59_v29 = vld [vmem:[%s12295_s0 + $0xa0] sm:$0xff] }
  0x1e   :  { %v60_v30 = vld [vmem:[%s12295_s0 + $0xa8] sm:$0xff]  ;;  %v61_v31 = vld [vmem:[%s12295_s0 + $0xb0] sm:$0xff]  ;;  %v62_v32 = vld [vmem:[%s12295_s0 + $0xb8] sm:$0xff] }
  0x1f   :  { %v63_v33 = vld [vmem:[%s12295_s0 + $0xc0] sm:$0xff]  ;;  %v64_v34 = vld [vmem:[%s12295_s0 + $0xc8] sm:$0xff]  ;;  %v65_v35 = vld [vmem:[%s12295_s0 + $0xd0] sm:$0xff] }
  0x20   :  { %7776 = vmatmul.mubr.msk.f32.gmra.mrb[4].mxu0 %vm203_vm0, %v41_v11  ;;  %7840 = vmatmul.mubr.msk.f32.gmra.mrb[4].mxu1 %vm203_vm0, %v41_v11  ;;  %v66_v36 = vld [vmem:[%s12295_s0 + $0xd8] sm:$0xff]  ;;  %v67_v37 = vld [vmem:[%s12295_s0 + $0xe0] sm:$0xff]  ;;  %v68_v38 = vld [vmem:[%s12295_s0 + $0xe8] sm:$0xff] }
  0x21   :  { %478 = vmatprep.mubr.f32.mxu0 %v8998_v0  ;;  %927 = vmatprep.mubr.f32.mxu1 %v8998_v0  ;;  %v69_v39 = vld [vmem:[%s12295_s0 + $0xf0] sm:$0xff]  ;;  %v70_v40 = vld [vmem:[%s12295_s0 + $0xf8] sm:$0xff]  ;;  %v71_v41 = vld [vmem:[%s12295_s0 + $0x100] sm:$0xff] }
  0x22   :  { %v72_v42 = vld [vmem:[%s12295_s0 + $0x108] sm:$0xff]  ;;  %v73_v43 = vld [vmem:[%s12295_s0 + $0x110] sm:$0xff]  ;;  %v114_v45 = vld [vmem:[%s12296_s1 + $0x58] sm:$0xff] }
  0x23   :  { %v112_v44 = vld [vmem:[%s12296_s1 + $0x48] sm:$0xff]  ;;  %2641 = vmatprep.subr.mxu1 %v114_v45  ;;  %v74_v46 = vld [vmem:[%s12295_s0 + $0x118] sm:$0xff]  ;;  %v75_v47 = vld [vmem:[%s12295_s0 + $0x120] sm:$0xff] }
  0x24   :  { %7777 = vmatmul.mubr.msk.f32.gmra.mrb[6].mxu0 %vm203_vm0, %v42_v12  ;;  %7841 = vmatmul.mubr.msk.f32.gmra.mrb[6].mxu1 %vm203_vm0, %v42_v12  ;;  %v76_v48 = vld [vmem:[%s12295_s0 + $0x128] sm:$0xff]  ;;  %v77_v49 = vld [vmem:[%s12295_s0 + $0x130] sm:$0xff]  ;;  %v78_v50 = vld [vmem:[%s12295_s0 + $0x138] sm:$0xff] }
  0x25   :  { %484 = vmatprep.mubr.f32.mxu0 %v8998_v0  ;;  %933 = vmatprep.mubr.f32.mxu1 %v8998_v0  ;;  %v79_v51 = vld [vmem:[%s12295_s0 + $0x140] sm:$0xff]  ;;  %v80_v52 = vld [vmem:[%s12295_s0 + $0x148] sm:$0xff]  ;;  %v81_v53 = vld [vmem:[%s12295_s0 + $0x150] sm:$0xff] }
  0x26   :  { %2192 = vmatprep.subr.mxu0 %v112_v44  ;;  %v82_v54 = vld [vmem:[%s12295_s0 + $0x158] sm:$0xff]  ;;  %v83_v55 = vld [vmem:[%s12295_s0 + $0x160] sm:$0xff]  ;;  %v84_v56 = vld [vmem:[%s12295_s0 + $0x168] sm:$0xff] }
  0x27   :  { %v85_v57 = vld [vmem:[%s12295_s0 + $0x170] sm:$0xff]  ;;  %v86_v58 = vld [vmem:[%s12295_s0 + $0x178] sm:$0xff]  ;;  %v87_v59 = vld [vmem:[%s12295_s0 + $0x180] sm:$0xff] }
  0x28   :  { %7778 = vmatmul.mubr.msk.f32.gmra.mrb[8].mxu0 %vm203_vm0, %v43_v13  ;;  %7842 = vmatmul.mubr.msk.f32.gmra.mrb[8].mxu1 %vm203_vm0, %v43_v13  ;;  %v88_v60 = vld [vmem:[%s12295_s0 + $0x188] sm:$0xff]  ;;  %v89_v61 = vld [vmem:[%s12295_s0 + $0x190] sm:$0xff]  ;;  %v90_v63 = vld [vmem:[%s12295_s0 + $0x198] sm:$0xff] }
  0x29   :  { %490 = vmatprep.mubr.f32.mxu0 %v8998_v0  ;;  %939 = vmatprep.mubr.f32.mxu1 %v8998_v0  ;;  %v91_v2 = vld [vmem:[%s12295_s0 + $0x1a0] sm:$0xff]  ;;  %v92_v8 = vld [vmem:[%s12295_s0 + $0x1a8] sm:$0xff] }
  0x2a   :  { %v119_v5 = vld [vmem:[%s12297_s2] sm:$0xff] }
  0x2b   :  { %v9466_v9 = vrot.slane %v119_v5, %v125_v3  ;;  %v9470_v10 = vrot.slane %v119_v5, %v133_v4  ;;  %v9474_v12 = vrot.slane %v119_v5, %v129_v6 }
  0x2c   :  { %7779 = vmatmul.mubr.msk.f32.gmra.mrb[10].mxu0 %vm203_vm0, %v44_v14  ;;  %7843 = vmatmul.mubr.msk.f32.gmra.mrb[10].mxu1 %vm203_vm0, %v44_v14  ;;  %v9478_v14 = vrot.slane %v119_v5, %v137_v7 }
  0x2d   :  { %496 = vmatprep.mubr.f32.mxu0 %v8998_v0  ;;  %945 = vmatprep.mubr.f32.mxu1 %v8998_v0 }
  0x30   :  { %7780 = vmatmul.mubr.msk.f32.gmra.mrb[12].mxu0 %vm203_vm0, %v45_v15  ;;  %7844 = vmatmul.mubr.msk.f32.gmra.mrb[12].mxu1 %vm203_vm0, %v45_v15 }
  0x31   :  { %502 = vmatprep.mubr.f32.mxu0 %v8998_v0  ;;  %951 = vmatprep.mubr.f32.mxu1 %v8998_v0 }
  0x34   :  { %7781 = vmatmul.mubr.msk.f32.gmra.mrb[14].mxu0 %vm203_vm0, %v46_v16  ;;  %7845 = vmatmul.mubr.msk.f32.gmra.mrb[14].mxu1 %vm203_vm0, %v46_v16 }
  0x35   :  { %508 = vmatprep.mubr.f32.mxu0 %v8998_v0  ;;  %957 = vmatprep.mubr.f32.mxu1 %v8998_v0 }
  0x38   :  { %7782 = vmatmul.mubr.msk.f32.gmra.mrb[16].mxu0 %vm203_vm0, %v47_v17  ;;  %7846 = vmatmul.mubr.msk.f32.gmra.mrb[16].mxu1 %vm203_vm0, %v47_v17  ;;  %v93_v17 = vld [vmem:[%s12295_s0 + $0x1b0] sm:$0xff] }
  0x39   :  { %514 = vmatprep.mubr.f32.mxu0 %v8998_v0  ;;  %963 = vmatprep.mubr.f32.mxu1 %v8998_v0 }
  0x3c   :  { %7783 = vmatmul.mubr.msk.f32.gmra.mrb[18].mxu0 %vm203_vm0, %v48_v18  ;;  %7847 = vmatmul.mubr.msk.f32.gmra.mrb[18].mxu1 %vm203_vm0, %v48_v18 }
  0x3d   :  { %520 = vmatprep.mubr.f32.mxu0 %v8998_v0  ;;  %969 = vmatprep.mubr.f32.mxu1 %v8998_v0 }
  0x40   :  { %7784 = vmatmul.mubr.msk.f32.gmra.mrb[20].mxu0 %vm203_vm0, %v49_v19  ;;  %7848 = vmatmul.mubr.msk.f32.gmra.mrb[20].mxu1 %vm203_vm0, %v49_v19 }
  0x41   :  { %526 = vmatprep.mubr.f32.mxu0 %v8998_v0  ;;  %975 = vmatprep.mubr.f32.mxu1 %v8998_v0 }
  0x44   :  { %7785 = vmatmul.mubr.msk.f32.gmra.mrb[22].mxu0 %vm203_vm0, %v50_v20  ;;  %7849 = vmatmul.mubr.msk.f32.gmra.mrb[22].mxu1 %vm203_vm0, %v50_v20 }
  0x45   :  { %532 = vmatprep.mubr.f32.mxu0 %v8998_v0  ;;  %981 = vmatprep.mubr.f32.mxu1 %v8998_v0 }
  0x48   :  { %7786 = vmatmul.mubr.msk.f32.gmra.mrb[24].mxu0 %vm203_vm0, %v51_v21  ;;  %7850 = vmatmul.mubr.msk.f32.gmra.mrb[24].mxu1 %vm203_vm0, %v51_v21 }
  0x49   :  { %538 = vmatprep.mubr.f32.mxu0 %v8998_v0  ;;  %987 = vmatprep.mubr.f32.mxu1 %v8998_v0 }
  0x4c   :  { %7787 = vmatmul.mubr.msk.f32.gmra.mrb[26].mxu0 %vm203_vm0, %v52_v22  ;;  %7851 = vmatmul.mubr.msk.f32.gmra.mrb[26].mxu1 %vm203_vm0, %v52_v22 }
  0x4d   :  { %544 = vmatprep.mubr.f32.mxu0 %v8998_v0  ;;  %993 = vmatprep.mubr.f32.mxu1 %v8998_v0 }
  0x50   :  { %7788 = vmatmul.mubr.msk.f32.gmra.mrb[28].mxu0 %vm203_vm0, %v53_v23  ;;  %7852 = vmatmul.mubr.msk.f32.gmra.mrb[28].mxu1 %vm203_vm0, %v53_v23 }
  0x51   :  { %550 = vmatprep.mubr.f32.mxu0 %v8998_v0  ;;  %999 = vmatprep.mubr.f32.mxu1 %v8998_v0 }
  0x54   :  { %7789 = vmatmul.mubr.msk.f32.gmra.mrb[30].mxu0 %vm203_vm0, %v54_v24  ;;  %7853 = vmatmul.mubr.msk.f32.gmra.mrb[30].mxu1 %vm203_vm0, %v54_v24 }
  0x55   :  { %556 = vmatprep.mubr.f32.mxu0 %v8998_v0  ;;  %1005 = vmatprep.mubr.f32.mxu1 %v8998_v0 }
  0x58   :  { %7790 = vmatmul.mubr.msk.f32.gmra.mrb[32].mxu0 %vm203_vm0, %v55_v25  ;;  %7854 = vmatmul.mubr.msk.f32.gmra.mrb[32].mxu1 %vm203_vm0, %v55_v25 }
  0x59   :  { %562 = vmatprep.mubr.f32.mxu0 %v8998_v0  ;;  %1011 = vmatprep.mubr.f32.mxu1 %v8998_v0 }
  0x5c   :  { %7791 = vmatmul.mubr.msk.f32.gmra.mrb[34].mxu0 %vm203_vm0, %v56_v26  ;;  %7855 = vmatmul.mubr.msk.f32.gmra.mrb[34].mxu1 %vm203_vm0, %v56_v26 }
  0x5d   :  { %568 = vmatprep.mubr.f32.mxu0 %v8998_v0  ;;  %1017 = vmatprep.mubr.f32.mxu1 %v8998_v0 }
  0x60   :  { %7792 = vmatmul.mubr.msk.f32.gmra.mrb[36].mxu0 %vm203_vm0, %v57_v27  ;;  %7856 = vmatmul.mubr.msk.f32.gmra.mrb[36].mxu1 %vm203_vm0, %v57_v27 }
  0x61   :  { %574 = vmatprep.mubr.f32.mxu0 %v8998_v0  ;;  %1023 = vmatprep.mubr.f32.mxu1 %v8998_v0 }
  0x64   :  { %7793 = vmatmul.mubr.msk.f32.gmra.mrb[38].mxu0 %vm203_vm0, %v58_v28  ;;  %7857 = vmatmul.mubr.msk.f32.gmra.mrb[38].mxu1 %vm203_vm0, %v58_v28 }
  0x65   :  { %580 = vmatprep.mubr.f32.mxu0 %v8998_v0  ;;  %1029 = vmatprep.mubr.f32.mxu1 %v8998_v0 }
  0x68   :  { %7794 = vmatmul.mubr.msk.f32.gmra.mrb[40].mxu0 %vm203_vm0, %v59_v29  ;;  %7858 = vmatmul.mubr.msk.f32.gmra.mrb[40].mxu1 %vm203_vm0, %v59_v29 }
  0x69   :  { %586 = vmatprep.mubr.f32.mxu0 %v8998_v0  ;;  %1035 = vmatprep.mubr.f32.mxu1 %v8998_v0 }
  0x6c   :  { %7795 = vmatmul.mubr.msk.f32.gmra.mrb[42].mxu0 %vm203_vm0, %v60_v30  ;;  %7859 = vmatmul.mubr.msk.f32.gmra.mrb[42].mxu1 %vm203_vm0, %v60_v30  ;;  %v94_v30 = vld [vmem:[%s12295_s0 + $0x1b8] sm:$0xff] }
  0x6d   :  { %592 = vmatprep.mubr.f32.mxu0 %v8998_v0  ;;  %1041 = vmatprep.mubr.f32.mxu1 %v8998_v0 }
  0x70   :  { %7796 = vmatmul.mubr.msk.f32.gmra.mrb[44].mxu0 %vm203_vm0, %v61_v31  ;;  %7860 = vmatmul.mubr.msk.f32.gmra.mrb[44].mxu1 %vm203_vm0, %v61_v31 }
  0x71   :  { %598 = vmatprep.mubr.f32.mxu0 %v8998_v0  ;;  %1047 = vmatprep.mubr.f32.mxu1 %v8998_v0 }
  0x74   :  { %7797 = vmatmul.mubr.msk.f32.gmra.mrb[46].mxu0 %vm203_vm0, %v62_v32  ;;  %7861 = vmatmul.mubr.msk.f32.gmra.mrb[46].mxu1 %vm203_vm0, %v62_v32 }
  0x75   :  { %604 = vmatprep.mubr.f32.mxu0 %v8998_v0  ;;  %1053 = vmatprep.mubr.f32.mxu1 %v8998_v0 }
  0x78   :  { %7798 = vmatmul.mubr.msk.f32.gmra.mrb[48].mxu0 %vm203_vm0, %v63_v33  ;;  %7862 = vmatmul.mubr.msk.f32.gmra.mrb[48].mxu1 %vm203_vm0, %v63_v33 }
  0x79   :  { %610 = vmatprep.mubr.f32.mxu0 %v8998_v0  ;;  %1059 = vmatprep.mubr.f32.mxu1 %v8998_v0 }
  0x7c   :  { %7799 = vmatmul.mubr.msk.f32.gmra.mrb[50].mxu0 %vm203_vm0, %v64_v34  ;;  %7863 = vmatmul.mubr.msk.f32.gmra.mrb[50].mxu1 %vm203_vm0, %v64_v34 }
  0x7d   :  { %616 = vmatprep.mubr.f32.mxu0 %v8998_v0  ;;  %1065 = vmatprep.mubr.f32.mxu1 %v8998_v0 }
  0x80   :  { %7800 = vmatmul.mubr.msk.f32.gmra.mrb[52].mxu0 %vm203_vm0, %v65_v35  ;;  %7864 = vmatmul.mubr.msk.f32.gmra.mrb[52].mxu1 %vm203_vm0, %v65_v35 }
  0x81   :  { %622 = vmatprep.mubr.f32.mxu0 %v8998_v0  ;;  %1071 = vmatprep.mubr.f32.mxu1 %v8998_v0 }
  0x84   :  { %7801 = vmatmul.mubr.msk.f32.gmra.mrb[54].mxu0 %vm203_vm0, %v66_v36  ;;  %7865 = vmatmul.mubr.msk.f32.gmra.mrb[54].mxu1 %vm203_vm0, %v66_v36 }
  0x85   :  { %628 = vmatprep.mubr.f32.mxu0 %v8998_v0  ;;  %1077 = vmatprep.mubr.f32.mxu1 %v8998_v0 }
  0x88   :  { %7802 = vmatmul.mubr.msk.f32.gmra.mrb[56].mxu0 %vm203_vm0, %v67_v37  ;;  %7866 = vmatmul.mubr.msk.f32.gmra.mrb[56].mxu1 %vm203_vm0, %v67_v37 }
  0x89   :  { %634 = vmatprep.mubr.f32.mxu0 %v8998_v0  ;;  %1083 = vmatprep.mubr.f32.mxu1 %v8998_v0 }
  0x8c   :  { %7803 = vmatmul.mubr.msk.f32.gmra.mrb[58].mxu0 %vm203_vm0, %v68_v38  ;;  %7867 = vmatmul.mubr.msk.f32.gmra.mrb[58].mxu1 %vm203_vm0, %v68_v38 }
  0x8d   :  { %640 = vmatprep.mubr.f32.mxu0 %v8998_v0  ;;  %1089 = vmatprep.mubr.f32.mxu1 %v8998_v0 }
  0x90   :  { %7804 = vmatmul.mubr.msk.f32.gmra.mrb[60].mxu0 %vm203_vm0, %v69_v39  ;;  %7868 = vmatmul.mubr.msk.f32.gmra.mrb[60].mxu1 %vm203_vm0, %v69_v39 }
  0x91   :  { %646 = vmatprep.mubr.f32.mxu0 %v8998_v0  ;;  %1095 = vmatprep.mubr.f32.mxu1 %v8998_v0 }
  0x94   :  { %7805 = vmatmul.mubr.msk.f32.gmra.mrb[62].mxu0 %vm203_vm0, %v70_v40  ;;  %7869 = vmatmul.mubr.msk.f32.gmra.mrb[62].mxu1 %vm203_vm0, %v70_v40 }
  0x95   :  { %652 = vmatprep.mubr.f32.mxu0 %v8998_v0  ;;  %1101 = vmatprep.mubr.f32.mxu1 %v8998_v0 }
  0x98   :  { %7806 = vmatmul.mubr.msk.f32.gmra.mrb[64].mxu0 %vm203_vm0, %v71_v41  ;;  %7870 = vmatmul.mubr.msk.f32.gmra.mrb[64].mxu1 %vm203_vm0, %v71_v41 }
  0x99   :  { %658 = vmatprep.mubr.f32.mxu0 %v8998_v0  ;;  %1107 = vmatprep.mubr.f32.mxu1 %v8998_v0 }
  0x9c   :  { %7807 = vmatmul.mubr.msk.f32.gmra.mrb[66].mxu0 %vm203_vm0, %v72_v42  ;;  %7871 = vmatmul.mubr.msk.f32.gmra.mrb[66].mxu1 %vm203_vm0, %v72_v42 }
  0x9d   :  { %664 = vmatprep.mubr.f32.mxu0 %v8998_v0  ;;  %1113 = vmatprep.mubr.f32.mxu1 %v8998_v0 }
  0xa0   :  { %7808 = vmatmul.mubr.msk.f32.gmra.mrb[68].mxu0 %vm203_vm0, %v73_v43  ;;  %7872 = vmatmul.mubr.msk.f32.gmra.mrb[68].mxu1 %vm203_vm0, %v73_v43 }
  0xa1   :  { %670 = vmatprep.mubr.f32.mxu0 %v8998_v0  ;;  %1119 = vmatprep.mubr.f32.mxu1 %v8998_v0 }
  0xa4   :  { %7809 = vmatmul.mubr.msk.f32.gmra.mrb[70].mxu0 %vm203_vm0, %v74_v46  ;;  %7873 = vmatmul.mubr.msk.f32.gmra.mrb[70].mxu1 %vm203_vm0, %v74_v46 }
  0xa5   :  { %676 = vmatprep.mubr.f32.mxu0 %v8998_v0  ;;  %1125 = vmatprep.mubr.f32.mxu1 %v8998_v0 }
  0xa8   :  { %7810 = vmatmul.mubr.msk.f32.gmra.mrb[72].mxu0 %vm203_vm0, %v75_v47  ;;  %7874 = vmatmul.mubr.msk.f32.gmra.mrb[72].mxu1 %vm203_vm0, %v75_v47 }
  0xa9   :  { %682 = vmatprep.mubr.f32.mxu0 %v8998_v0  ;;  %1131 = vmatprep.mubr.f32.mxu1 %v8998_v0 }
  0xac   :  { %7811 = vmatmul.mubr.msk.f32.gmra.mrb[74].mxu0 %vm203_vm0, %v76_v48  ;;  %7875 = vmatmul.mubr.msk.f32.gmra.mrb[74].mxu1 %vm203_vm0, %v76_v48 }
  0xad   :  { %688 = vmatprep.mubr.f32.mxu0 %v8998_v0  ;;  %1137 = vmatprep.mubr.f32.mxu1 %v8998_v0 }
  0xb0   :  { %7812 = vmatmul.mubr.msk.f32.gmra.mrb[76].mxu0 %vm203_vm0, %v77_v49  ;;  %7876 = vmatmul.mubr.msk.f32.gmra.mrb[76].mxu1 %vm203_vm0, %v77_v49 }
  0xb1   :  { %694 = vmatprep.mubr.f32.mxu0 %v8998_v0  ;;  %1143 = vmatprep.mubr.f32.mxu1 %v8998_v0 }
  0xb4   :  { %7813 = vmatmul.mubr.msk.f32.gmra.mrb[78].mxu0 %vm203_vm0, %v78_v50  ;;  %7877 = vmatmul.mubr.msk.f32.gmra.mrb[78].mxu1 %vm203_vm0, %v78_v50 }
  0xb5   :  { %700 = vmatprep.mubr.f32.mxu0 %v8998_v0  ;;  %1149 = vmatprep.mubr.f32.mxu1 %v8998_v0 }
  0xb8   :  { %7814 = vmatmul.mubr.msk.f32.gmra.mrb[80].mxu0 %vm203_vm0, %v79_v51  ;;  %7878 = vmatmul.mubr.msk.f32.gmra.mrb[80].mxu1 %vm203_vm0, %v79_v51  ;;  %v95_v51 = vld [vmem:[%s12295_s0 + $0x1c0] sm:$0xff] }
  0xb9   :  { %706 = vmatprep.mubr.f32.mxu0 %v8998_v0  ;;  %1155 = vmatprep.mubr.f32.mxu1 %v8998_v0 }
  0xbc   :  { %7815 = vmatmul.mubr.msk.f32.gmra.mrb[82].mxu0 %vm203_vm0, %v80_v52  ;;  %7879 = vmatmul.mubr.msk.f32.gmra.mrb[82].mxu1 %vm203_vm0, %v80_v52 }
  0xbd   :  { %712 = vmatprep.mubr.f32.mxu0 %v8998_v0  ;;  %1161 = vmatprep.mubr.f32.mxu1 %v8998_v0 }
  0xc0   :  { %7816 = vmatmul.mubr.msk.f32.gmra.mrb[84].mxu0 %vm203_vm0, %v81_v53  ;;  %7880 = vmatmul.mubr.msk.f32.gmra.mrb[84].mxu1 %vm203_vm0, %v81_v53 }
  0xc1   :  { %718 = vmatprep.mubr.f32.mxu0 %v8998_v0  ;;  %1167 = vmatprep.mubr.f32.mxu1 %v8998_v0 }
  0xc4   :  { %7817 = vmatmul.mubr.msk.f32.gmra.mrb[86].mxu0 %vm203_vm0, %v82_v54  ;;  %7881 = vmatmul.mubr.msk.f32.gmra.mrb[86].mxu1 %vm203_vm0, %v82_v54 }
  0xc5   :  { %724 = vmatprep.mubr.f32.mxu0 %v8998_v0  ;;  %1173 = vmatprep.mubr.f32.mxu1 %v8998_v0 }
  0xc8   :  { %7818 = vmatmul.mubr.msk.f32.gmra.mrb[88].mxu0 %vm203_vm0, %v83_v55  ;;  %7882 = vmatmul.mubr.msk.f32.gmra.mrb[88].mxu1 %vm203_vm0, %v83_v55 }
  0xc9   :  { %730 = vmatprep.mubr.f32.mxu0 %v8998_v0  ;;  %1179 = vmatprep.mubr.f32.mxu1 %v8998_v0 }
  0xcc   :  { %7819 = vmatmul.mubr.msk.f32.gmra.mrb[90].mxu0 %vm203_vm0, %v84_v56  ;;  %7883 = vmatmul.mubr.msk.f32.gmra.mrb[90].mxu1 %vm203_vm0, %v84_v56 }
  0xcd   :  { %736 = vmatprep.mubr.f32.mxu0 %v8998_v0  ;;  %1185 = vmatprep.mubr.f32.mxu1 %v8998_v0 }
  0xd0   :  { %7820 = vmatmul.mubr.msk.f32.gmra.mrb[92].mxu0 %vm203_vm0, %v85_v57  ;;  %7884 = vmatmul.mubr.msk.f32.gmra.mrb[92].mxu1 %vm203_vm0, %v85_v57 }
  0xd1   :  { %742 = vmatprep.mubr.f32.mxu0 %v8998_v0  ;;  %1191 = vmatprep.mubr.f32.mxu1 %v8998_v0 }
  0xd4   :  { %7821 = vmatmul.mubr.msk.f32.gmra.mrb[94].mxu0 %vm203_vm0, %v86_v58  ;;  %7885 = vmatmul.mubr.msk.f32.gmra.mrb[94].mxu1 %vm203_vm0, %v86_v58 }
  0xd5   :  { %748 = vmatprep.mubr.f32.mxu0 %v8998_v0  ;;  %1197 = vmatprep.mubr.f32.mxu1 %v8998_v0 }
  0xd8   :  { %7822 = vmatmul.mubr.msk.f32.gmra.mrb[96].mxu0 %vm203_vm0, %v87_v59  ;;  %7886 = vmatmul.mubr.msk.f32.gmra.mrb[96].mxu1 %vm203_vm0, %v87_v59 }
  0xd9   :  { %754 = vmatprep.mubr.f32.mxu0 %v8998_v0  ;;  %1203 = vmatprep.mubr.f32.mxu1 %v8998_v0 }
  0xdc   :  { %7823 = vmatmul.mubr.msk.f32.gmra.mrb[98].mxu0 %vm203_vm0, %v88_v60  ;;  %7887 = vmatmul.mubr.msk.f32.gmra.mrb[98].mxu1 %vm203_vm0, %v88_v60 }
  0xdd   :  { %760 = vmatprep.mubr.f32.mxu0 %v8998_v0  ;;  %1209 = vmatprep.mubr.f32.mxu1 %v8998_v0 }
  0xe0   :  { %7824 = vmatmul.mubr.msk.f32.gmra.mrb[100].mxu0 %vm203_vm0, %v89_v61  ;;  %7888 = vmatmul.mubr.msk.f32.gmra.mrb[100].mxu1 %vm203_vm0, %v89_v61 }
  0xe1   :  { %766 = vmatprep.mubr.f32.mxu0 %v8998_v0  ;;  %1215 = vmatprep.mubr.f32.mxu1 %v8998_v0 }
  0xe4   :  { %7825 = vmatmul.mubr.msk.f32.gmra.mrb[102].mxu0 %vm203_vm0, %v90_v63  ;;  %7889 = vmatmul.mubr.msk.f32.gmra.mrb[102].mxu1 %vm203_vm0, %v90_v63 }
  0xe5   :  { %772 = vmatprep.mubr.f32.mxu0 %v8998_v0  ;;  %1221 = vmatprep.mubr.f32.mxu1 %v8998_v0 }
  0xe8   :  { %7826 = vmatmul.mubr.msk.f32.gmra.mrb[104].mxu0 %vm203_vm0, %v91_v2  ;;  %7890 = vmatmul.mubr.msk.f32.gmra.mrb[104].mxu1 %vm203_vm0, %v91_v2 }
  0xe9   :  { %778 = vmatprep.mubr.f32.mxu0 %v8998_v0  ;;  %1227 = vmatprep.mubr.f32.mxu1 %v8998_v0 }
  0xeb   :  { %v462_v11 = vpop.f32.mrb[0].mxu0  ;;  %v911_v13 = vpop.f32.mrb[0].mxu1 }
  0xec   :  { %v464_v15 = vpop.f32.mrb[1].mxu0  ;;  %7827 = vmatmul.mubr.msk.f32.gmra.mrb[106].mxu0 %vm203_vm0, %v92_v8  ;;  %7891 = vmatmul.mubr.msk.f32.gmra.mrb[106].mxu1 %vm203_vm0, %v92_v8  ;;  %v913_v16 = vpop.f32.mrb[1].mxu1  ;;  %v463_v18 = vadd.f32 %v462_v11, %v9466_v9  ;;  %v912_v19 = vadd.f32 %v911_v13, %v9470_v10 }
  0xed   :  { %784 = vmatprep.mubr.f32.mxu0 %v8998_v0  ;;  %1233 = vmatprep.mubr.f32.mxu1 %v8998_v0  ;;  %v465_v20 = vadd.f32 %v464_v15, %v9474_v12  ;;  %v914_v21 = vadd.f32 %v913_v16, %v9478_v14  ;;  %v96_v15 = vld [vmem:[%s12295_s0 + $0x1c8] sm:$0xff] }
  0xee   :  { %v3988_v31 = vmax.f32 %v463_v18, 0.0  ;;  %v3990_v32 = vmax.f32 %v912_v19, 0.0 }
  0xef   :  { %v468_v22 = vpop.f32.mrb[2].mxu0  ;;  %v917_v23 = vpop.f32.mrb[2].mxu1  ;;  %v3989_v35 = vmax.f32 %v465_v20, 0.0  ;;  %v3991_v36 = vmax.f32 %v914_v21, 0.0 }
  0xf0   :  { %v469_v24 = vadd.f32 %v468_v22, %v9466_v9  ;;  %v918_v25 = vadd.f32 %v917_v23, %v9470_v10  ;;  %v470_v26 = vpop.f32.mrb[3].mxu0  ;;  %7828 = vmatmul.mubr.msk.f32.gmra.mrb[108].mxu0 %vm203_vm0, %v93_v17  ;;  %v919_v27 = vpop.f32.mrb[3].mxu1  ;;  %7892 = vmatmul.mubr.msk.f32.gmra.mrb[108].mxu1 %vm203_vm0, %v93_v17 }
  0xf1   :  { %v471_v28 = vadd.f32 %v470_v26, %v9474_v12  ;;  %v920_v29 = vadd.f32 %v919_v27, %v9478_v14  ;;  %790 = vmatprep.mubr.f32.mxu0 %v8998_v0  ;;  %1239 = vmatprep.mubr.f32.mxu1 %v8998_v0 }
  0xf2   :  { %v4004_v33 = vmax.f32 %v469_v24, 0.0  ;;  %v4006_v34 = vmax.f32 %v918_v25, 0.0 }
  0xf3   :  { %v4005_v37 = vmax.f32 %v471_v28, 0.0  ;;  %v4007_v38 = vmax.f32 %v920_v29, 0.0  ;;  %v474_v39 = vpop.f32.mrb[4].mxu0  ;;  %v923_v40 = vpop.f32.mrb[4].mxu1 }
  0xf4   :  { %v5012_v41 = vadd.f32 %v4004_v33, %v3988_v31  ;;  %v5086_v42 = vadd.f32 %v4006_v34, %v3990_v32  ;;  %v475_v43 = vadd.f32 %v474_v39, %v9466_v9  ;;  %v924_v44 = vadd.f32 %v923_v40, %v9470_v10  ;;  %v476_v45 = vpop.f32.mrb[5].mxu0  ;;  %7829 = vmatmul.mubr.msk.f32.gmra.mrb[110].mxu0 %vm203_vm0, %v94_v30  ;;  %v925_v46 = vpop.f32.mrb[5].mxu1  ;;  %v97_v32 = vld [vmem:[%s12295_s0 + $0x1d0] sm:$0xff] }
  0xf5   :  { %v5049_v47 = vadd.f32 %v4005_v37, %v3989_v35  ;;  %v5123_v48 = vadd.f32 %v4007_v38, %v3991_v36  ;;  %v477_v49 = vadd.f32 %v476_v45, %v9474_v12  ;;  %v926_v50 = vadd.f32 %v925_v46, %v9478_v14  ;;  %7893 = vmatmul.mubr.msk.f32.gmra.mrb[110].mxu1 %vm203_vm0, %v94_v30 }
  0xf6   :  { %v4020_v52 = vmax.f32 %v475_v43, 0.0  ;;  %v4022_v53 = vmax.f32 %v924_v44, 0.0  ;;  %796 = vmatprep.mubr.f32.mxu0 %v8998_v0  ;;  %1245 = vmatprep.mubr.f32.mxu1 %v8998_v0 }
  0xf7   :  { %v4021_v54 = vmax.f32 %v477_v49, 0.0  ;;  %v4023_v55 = vmax.f32 %v926_v50, 0.0  ;;  %v480_v56 = vpop.f32.mrb[6].mxu0  ;;  %v929_v57 = vpop.f32.mrb[6].mxu1  ;;  %v98_v49 = vld [vmem:[%s12295_s0 + $0x1d8] sm:$0xff] }
  0xf8   :  { %v5013_v58 = vadd.f32 %v5012_v41, %v4020_v52  ;;  %v5087_v59 = vadd.f32 %v5086_v42, %v4022_v53  ;;  %v481_v60 = vadd.f32 %v480_v56, %v9466_v9  ;;  %v930_v61 = vadd.f32 %v929_v57, %v9470_v10  ;;  %v482_v63 = vpop.f32.mrb[7].mxu0  ;;  %7830 = vmatmul.mubr.msk.f32.gmra.mrb[112].mxu0 %vm203_vm0, %v95_v51  ;;  %v931_v2 = vpop.f32.mrb[7].mxu1 }
  0xf9   :  { %v5050_v5 = vadd.f32 %v5049_v47, %v4021_v54  ;;  %v5124_v8 = vadd.f32 %v5123_v48, %v4023_v55  ;;  %v483_v11 = vadd.f32 %v482_v63, %v9474_v12  ;;  %v932_v13 = vadd.f32 %v931_v2, %v9478_v14  ;;  %7894 = vmatmul.mubr.msk.f32.gmra.mrb[112].mxu1 %vm203_vm0, %v95_v51 }
  0xfa   :  { %v4036_v16 = vmax.f32 %v481_v60, 0.0  ;;  %v4038_v17 = vmax.f32 %v930_v61, 0.0  ;;  %802 = vmatprep.mubr.f32.mxu0 %v8998_v0  ;;  %1251 = vmatprep.mubr.f32.mxu1 %v8998_v0 }
  0xfb   :  { %v4037_v18 = vmax.f32 %v483_v11, 0.0  ;;  %v4039_v19 = vmax.f32 %v932_v13, 0.0  ;;  %v486_v20 = vpop.f32.mrb[8].mxu0  ;;  %v935_v21 = vpop.f32.mrb[8].mxu1  ;;  %v99_v11 = vld [vmem:[%s12295_s0 + $0x1e0] sm:$0xff] }
  0xfc   :  { %v5014_v22 = vadd.f32 %v5013_v58, %v4036_v16  ;;  %v5088_v23 = vadd.f32 %v5087_v59, %v4038_v17  ;;  %v487_v24 = vadd.f32 %v486_v20, %v9466_v9  ;;  %v936_v25 = vadd.f32 %v935_v21, %v9470_v10  ;;  %v488_v26 = vpop.f32.mrb[9].mxu0  ;;  %7831 = vmatmul.mubr.msk.f32.gmra.mrb[114].mxu0 %vm203_vm0, %v96_v15  ;;  %v937_v27 = vpop.f32.mrb[9].mxu1 }
  0xfd   :  { %v5051_v28 = vadd.f32 %v5050_v5, %v4037_v18  ;;  %v5125_v29 = vadd.f32 %v5124_v8, %v4039_v19  ;;  %v489_v30 = vadd.f32 %v488_v26, %v9474_v12  ;;  %v938_v31 = vadd.f32 %v937_v27, %v9478_v14  ;;  %7895 = vmatmul.mubr.msk.f32.gmra.mrb[114].mxu1 %vm203_vm0, %v96_v15 }
  0xfe   :  { %v4052_v33 = vmax.f32 %v487_v24, 0.0  ;;  %v4054_v34 = vmax.f32 %v936_v25, 0.0  ;;  %808 = vmatprep.mubr.f32.mxu0 %v8998_v0  ;;  %1257 = vmatprep.mubr.f32.mxu1 %v8998_v0 }
  0xff   :  { %v4053_v35 = vmax.f32 %v489_v30, 0.0  ;;  %v4055_v36 = vmax.f32 %v938_v31, 0.0  ;;  %v492_v37 = vpop.f32.mrb[10].mxu0  ;;  %v941_v38 = vpop.f32.mrb[10].mxu1  ;;  %v100_v30 = vld [vmem:[%s12295_s0 + $0x1e8] sm:$0xff] }
 0x100   :  { %v5015_v39 = vadd.f32 %v5014_v22, %v4052_v33  ;;  %v5089_v40 = vadd.f32 %v5088_v23, %v4054_v34  ;;  %v493_v41 = vadd.f32 %v492_v37, %v9466_v9  ;;  %v942_v42 = vadd.f32 %v941_v38, %v9470_v10  ;;  %v494_v43 = vpop.f32.mrb[11].mxu0  ;;  %7832 = vmatmul.mubr.msk.f32.gmra.mrb[116].mxu0 %vm203_vm0, %v97_v32  ;;  %v943_v44 = vpop.f32.mrb[11].mxu1 }
 0x101   :  { %v5052_v45 = vadd.f32 %v5051_v28, %v4053_v35  ;;  %v5126_v46 = vadd.f32 %v5125_v29, %v4055_v36  ;;  %v495_v47 = vadd.f32 %v494_v43, %v9474_v12  ;;  %v944_v48 = vadd.f32 %v943_v44, %v9478_v14  ;;  %7896 = vmatmul.mubr.msk.f32.gmra.mrb[116].mxu1 %vm203_vm0, %v97_v32 }
 0x102   :  { %v4068_v50 = vmax.f32 %v493_v41, 0.0  ;;  %v4070_v51 = vmax.f32 %v942_v42, 0.0  ;;  %814 = vmatprep.mubr.f32.mxu0 %v8998_v0  ;;  %1263 = vmatprep.mubr.f32.mxu1 %v8998_v0 }
 0x103   :  { %v4069_v52 = vmax.f32 %v495_v47, 0.0  ;;  %v4071_v53 = vmax.f32 %v944_v48, 0.0  ;;  %v498_v54 = vpop.f32.mrb[12].mxu0  ;;  %v947_v55 = vpop.f32.mrb[12].mxu1  ;;  %v101_v47 = vld [vmem:[%s12295_s0 + $0x1f0] sm:$0xff] }
 0x104   :  { %v5016_v56 = vadd.f32 %v5015_v39, %v4068_v50  ;;  %v5090_v57 = vadd.f32 %v5089_v40, %v4070_v51  ;;  %v499_v58 = vadd.f32 %v498_v54, %v9466_v9  ;;  %v948_v59 = vadd.f32 %v947_v55, %v9470_v10  ;;  %v500_v60 = vpop.f32.mrb[13].mxu0  ;;  %7833 = vmatmul.mubr.msk.f32.gmra.mrb[118].mxu0 %vm203_vm0, %v98_v49  ;;  %v949_v61 = vpop.f32.mrb[13].mxu1 }
 0x105   :  { %v5053_v63 = vadd.f32 %v5052_v45, %v4069_v52  ;;  %v5127_v2 = vadd.f32 %v5126_v46, %v4071_v53  ;;  %v501_v5 = vadd.f32 %v500_v60, %v9474_v12  ;;  %v950_v8 = vadd.f32 %v949_v61, %v9478_v14  ;;  %7897 = vmatmul.mubr.msk.f32.gmra.mrb[118].mxu1 %vm203_vm0, %v98_v49 }
 0x106   :  { %v4084_v13 = vmax.f32 %v499_v58, 0.0  ;;  %v4086_v15 = vmax.f32 %v948_v59, 0.0  ;;  %820 = vmatprep.mubr.f32.mxu0 %v8998_v0  ;;  %1269 = vmatprep.mubr.f32.mxu1 %v8998_v0 }
 0x107   :  { %v4085_v16 = vmax.f32 %v501_v5, 0.0  ;;  %v4087_v17 = vmax.f32 %v950_v8, 0.0  ;;  %v504_v18 = vpop.f32.mrb[14].mxu0  ;;  %v953_v19 = vpop.f32.mrb[14].mxu1  ;;  %v102_v5 = vld [vmem:[%s12295_s0 + $0x1f8] sm:$0xff] }
 0x108   :  { %v5017_v20 = vadd.f32 %v5016_v56, %v4084_v13  ;;  %v5091_v21 = vadd.f32 %v5090_v57, %v4086_v15  ;;  %v505_v22 = vadd.f32 %v504_v18, %v9466_v9  ;;  %v954_v23 = vadd.f32 %v953_v19, %v9470_v10  ;;  %v506_v24 = vpop.f32.mrb[15].mxu0  ;;  %7834 = vmatmul.mubr.msk.f32.gmra.mrb[120].mxu0 %vm203_vm0, %v99_v11  ;;  %v955_v25 = vpop.f32.mrb[15].mxu1 }
 0x109   :  { %v5054_v26 = vadd.f32 %v5053_v63, %v4085_v16  ;;  %v5128_v27 = vadd.f32 %v5127_v2, %v4087_v17  ;;  %v507_v28 = vadd.f32 %v506_v24, %v9474_v12  ;;  %v956_v29 = vadd.f32 %v955_v25, %v9478_v14  ;;  %7898 = vmatmul.mubr.msk.f32.gmra.mrb[120].mxu1 %vm203_vm0, %v99_v11 }
 0x10a   :  { %v4100_v31 = vmax.f32 %v505_v22, 0.0  ;;  %v4102_v32 = vmax.f32 %v954_v23, 0.0  ;;  %826 = vmatprep.mubr.f32.mxu0 %v8998_v0  ;;  %1275 = vmatprep.mubr.f32.mxu1 %v8998_v0 }
 0x10b   :  { %v4101_v33 = vmax.f32 %v507_v28, 0.0  ;;  %v4103_v34 = vmax.f32 %v956_v29, 0.0  ;;  %v510_v35 = vpop.f32.mrb[16].mxu0  ;;  %v959_v36 = vpop.f32.mrb[16].mxu1 }
 0x10c   :  { %v5018_v37 = vadd.f32 %v5017_v20, %v4100_v31  ;;  %v5092_v38 = vadd.f32 %v5091_v21, %v4102_v32  ;;  %v511_v39 = vadd.f32 %v510_v35, %v9466_v9  ;;  %v960_v40 = vadd.f32 %v959_v36, %v9470_v10  ;;  %v512_v41 = vpop.f32.mrb[17].mxu0  ;;  %7835 = vmatmul.mubr.msk.f32.gmra.mrb[122].mxu0 %vm203_vm0, %v100_v30  ;;  %v961_v42 = vpop.f32.mrb[17].mxu1 }
 0x10d   :  { %v5055_v43 = vadd.f32 %v5054_v26, %v4101_v33  ;;  %v5129_v44 = vadd.f32 %v5128_v27, %v4103_v34  ;;  %v513_v45 = vadd.f32 %v512_v41, %v9474_v12  ;;  %v962_v46 = vadd.f32 %v961_v42, %v9478_v14  ;;  %7899 = vmatmul.mubr.msk.f32.gmra.mrb[122].mxu1 %vm203_vm0, %v100_v30  ;;  %v111_v34 = vld [vmem:[%s12296_s1 + $0x40] sm:$0xff]  ;;  %v113_v42 = vld [vmem:[%s12296_s1 + $0x50] sm:$0xff] }
 0x10e   :  { %v4116_v48 = vmax.f32 %v511_v39, 0.0  ;;  %v4118_v49 = vmax.f32 %v960_v40, 0.0  ;;  %832 = vmatprep.mubr.f32.mxu0 %v8998_v0  ;;  %1281 = vmatprep.mubr.f32.mxu1 %v8998_v0  ;;  %v8729_v41 = vld [vmem:[%s12295_s0] sm:$0xff] }
 0x10f   :  { %v4117_v50 = vmax.f32 %v513_v45, 0.0  ;;  %v4119_v51 = vmax.f32 %v962_v46, 0.0  ;;  %v516_v52 = vpop.f32.mrb[18].mxu0  ;;  %v965_v53 = vpop.f32.mrb[18].mxu1 }
 0x110   :  { %v5019_v54 = vadd.f32 %v5018_v37, %v4116_v48  ;;  %v5093_v55 = vadd.f32 %v5092_v38, %v4118_v49  ;;  %v517_v56 = vadd.f32 %v516_v52, %v9466_v9  ;;  %v966_v57 = vadd.f32 %v965_v53, %v9470_v10  ;;  %v518_v58 = vpop.f32.mrb[19].mxu0  ;;  %7836 = vmatmul.mubr.msk.f32.gmra.mrb[124].mxu0 %vm203_vm0, %v101_v47  ;;  %v967_v59 = vpop.f32.mrb[19].mxu1 }
 0x111   :  { %v5056_v60 = vadd.f32 %v5055_v43, %v4117_v50  ;;  %v5130_v61 = vadd.f32 %v5129_v44, %v4119_v51  ;;  %v519_v63 = vadd.f32 %v518_v58, %v9474_v12  ;;  %v968_v2 = vadd.f32 %v967_v59, %v9478_v14  ;;  %7900 = vmatmul.mubr.msk.f32.gmra.mrb[124].mxu1 %vm203_vm0, %v101_v47  ;;  %v8730_v59 = vld [vmem:[%s12295_s0 + $0x8] sm:$0xff] }
 0x112   :  { %v4132_v8 = vmax.f32 %v517_v56, 0.0  ;;  %v4134_v11 = vmax.f32 %v966_v57, 0.0  ;;  %838 = vmatprep.mubr.f32.mxu0 %v8998_v0  ;;  %1287 = vmatprep.mubr.f32.mxu1 %v8998_v0 }
 0x113   :  { %v4133_v13 = vmax.f32 %v519_v63, 0.0  ;;  %v4135_v15 = vmax.f32 %v968_v2, 0.0  ;;  %v522_v16 = vpop.f32.mrb[20].mxu0  ;;  %v971_v17 = vpop.f32.mrb[20].mxu1 }
 0x114   :  { %v5020_v18 = vadd.f32 %v5019_v54, %v4132_v8  ;;  %v5094_v19 = vadd.f32 %v5093_v55, %v4134_v11  ;;  %v523_v20 = vadd.f32 %v522_v16, %v9466_v9  ;;  %v972_v21 = vadd.f32 %v971_v17, %v9470_v10  ;;  %v524_v22 = vpop.f32.mrb[21].mxu0  ;;  %7837 = vmatmul.mubr.msk.f32.gmra.mrb[126].mxu0 %vm203_vm0, %v102_v5  ;;  %v973_v23 = vpop.f32.mrb[21].mxu1 }
 0x115   :  { %v5057_v24 = vadd.f32 %v5056_v60, %v4133_v13  ;;  %v5131_v25 = vadd.f32 %v5130_v61, %v4135_v15  ;;  %v525_v26 = vadd.f32 %v524_v22, %v9474_v12  ;;  %v974_v27 = vadd.f32 %v973_v23, %v9478_v14  ;;  %7901 = vmatmul.mubr.msk.f32.gmra.mrb[126].mxu1 %vm203_vm0, %v102_v5  ;;  %v8731_v23 = vld [vmem:[%s12295_s0 + $0x10] sm:$0xff] }
 0x116   :  { %v4148_v28 = vmax.f32 %v523_v20, 0.0  ;;  %v4150_v29 = vmax.f32 %v972_v21, 0.0  ;;  %1358 = vmatprep.mubr.f32.mxu0 %v8998_v0  ;;  %1807 = vmatprep.mubr.f32.mxu1 %v8998_v0 }
 0x117   :  { %v4149_v30 = vmax.f32 %v525_v26, 0.0  ;;  %v4151_v31 = vmax.f32 %v974_v27, 0.0  ;;  %v528_v32 = vpop.f32.mrb[22].mxu0  ;;  %v977_v33 = vpop.f32.mrb[22].mxu1 }
 0x118   :  { %v5021_v35 = vadd.f32 %v5020_v18, %v4148_v28  ;;  %v5095_v36 = vadd.f32 %v5094_v19, %v4150_v29  ;;  %v529_v37 = vadd.f32 %v528_v32, %v9466_v9  ;;  %v978_v38 = vadd.f32 %v977_v33, %v9470_v10  ;;  %v530_v39 = vpop.f32.mrb[23].mxu0  ;;  %v979_v40 = vpop.f32.mrb[23].mxu1  ;;  %7902 = vmatmul.mubr.msk.f32.vlgmr.msra.gmra.mrb[128].mxu0 %vm203_vm0, %v8729_v41 }
 0x119   :  { %v5058_v43 = vadd.f32 %v5057_v24, %v4149_v30  ;;  %v5132_v44 = vadd.f32 %v5131_v25, %v4151_v31  ;;  %v531_v45 = vadd.f32 %v530_v39, %v9474_v12  ;;  %v980_v46 = vadd.f32 %v979_v40, %v9478_v14  ;;  %7966 = vmatmul.mubr.msk.f32.vlgmr.msra.gmra.mrb[128].mxu1 %vm203_vm0, %v8729_v41  ;;  %v8732_v40 = vld [vmem:[%s12295_s0 + $0x18] sm:$0xff] }
 0x11a   :  { %v4164_v47 = vmax.f32 %v529_v37, 0.0  ;;  %v4166_v48 = vmax.f32 %v978_v38, 0.0  ;;  %2193 = vmatpush1.msra.mxu0 %v111_v34  ;;  %1364 = vmatprep.mubr.f32.mxu0 %v8998_v0 }
 0x11b   :  { %v4165_v49 = vmax.f32 %v531_v45, 0.0  ;;  %v4167_v50 = vmax.f32 %v980_v46, 0.0  ;;  %v534_v51 = vpop.f32.mrb[24].mxu0  ;;  %v983_v52 = vpop.f32.mrb[24].mxu1  ;;  %1813 = vmatprep.mubr.f32.mxu1 %v8998_v0  ;;  %2642 = vmatpush1.msra.mxu1 %v113_v42 }
 0x11c   :  { %v5022_v53 = vadd.f32 %v5021_v35, %v4164_v47  ;;  %v5096_v54 = vadd.f32 %v5095_v36, %v4166_v48  ;;  %v535_v55 = vadd.f32 %v534_v51, %v9466_v9  ;;  %v984_v56 = vadd.f32 %v983_v52, %v9470_v10  ;;  %v536_v57 = vpop.f32.mrb[25].mxu0  ;;  %v985_v58 = vpop.f32.mrb[25].mxu1  ;;  %7903 = vmatmul.mubr.msk.f32.gmra.mrb[130].mxu0 %vm203_vm0, %v8730_v59 }
 0x11d   :  { %v5059_v60 = vadd.f32 %v5058_v43, %v4165_v49  ;;  %v5133_v61 = vadd.f32 %v5132_v44, %v4167_v50  ;;  %v537_v63 = vadd.f32 %v536_v57, %v9474_v12  ;;  %v986_v2 = vadd.f32 %v985_v58, %v9478_v14  ;;  %7967 = vmatmul.mubr.msk.f32.gmra.mrb[130].mxu1 %vm203_vm0, %v8730_v59  ;;  %v8733_v57 = vld [vmem:[%s12295_s0 + $0x20] sm:$0xff] }
 0x11e   :  { %v4180_v5 = vmax.f32 %v535_v55, 0.0  ;;  %v4182_v8 = vmax.f32 %v984_v56, 0.0  ;;  %1370 = vmatprep.mubr.f32.mxu0 %v8998_v0  ;;  %1819 = vmatprep.mubr.f32.mxu1 %v8998_v0 }
 0x11f   :  { %v4181_v11 = vmax.f32 %v537_v63, 0.0  ;;  %v4183_v13 = vmax.f32 %v986_v2, 0.0  ;;  %v540_v15 = vpop.f32.mrb[26].mxu0  ;;  %v989_v16 = vpop.f32.mrb[26].mxu1 }
 0x120   :  { %v5023_v17 = vadd.f32 %v5022_v53, %v4180_v5  ;;  %v5097_v18 = vadd.f32 %v5096_v54, %v4182_v8  ;;  %v541_v19 = vadd.f32 %v540_v15, %v9466_v9  ;;  %v990_v20 = vadd.f32 %v989_v16, %v9470_v10  ;;  %v542_v21 = vpop.f32.mrb[27].mxu0  ;;  %v991_v22 = vpop.f32.mrb[27].mxu1  ;;  %7904 = vmatmul.mubr.msk.f32.gmra.mrb[132].mxu0 %vm203_vm0, %v8731_v23 }
 0x121   :  { %v5060_v24 = vadd.f32 %v5059_v60, %v4181_v11  ;;  %v5134_v25 = vadd.f32 %v5133_v61, %v4183_v13  ;;  %v543_v26 = vadd.f32 %v542_v21, %v9474_v12  ;;  %v992_v27 = vadd.f32 %v991_v22, %v9478_v14  ;;  %7968 = vmatmul.mubr.msk.f32.gmra.mrb[132].mxu1 %vm203_vm0, %v8731_v23  ;;  %v8734_v21 = vld [vmem:[%s12295_s0 + $0x28] sm:$0xff] }
 0x122   :  { %v4196_v28 = vmax.f32 %v541_v19, 0.0  ;;  %v4198_v29 = vmax.f32 %v990_v20, 0.0  ;;  %1376 = vmatprep.mubr.f32.mxu0 %v8998_v0  ;;  %1825 = vmatprep.mubr.f32.mxu1 %v8998_v0 }
 0x123   :  { %v4197_v30 = vmax.f32 %v543_v26, 0.0  ;;  %v4199_v31 = vmax.f32 %v992_v27, 0.0  ;;  %v546_v32 = vpop.f32.mrb[28].mxu0  ;;  %v995_v33 = vpop.f32.mrb[28].mxu1 }
 0x124   :  { %v5024_v34 = vadd.f32 %v5023_v17, %v4196_v28  ;;  %v5098_v35 = vadd.f32 %v5097_v18, %v4198_v29  ;;  %v547_v36 = vadd.f32 %v546_v32, %v9466_v9  ;;  %v996_v37 = vadd.f32 %v995_v33, %v9470_v10  ;;  %v548_v38 = vpop.f32.mrb[29].mxu0  ;;  %v997_v39 = vpop.f32.mrb[29].mxu1  ;;  %7905 = vmatmul.mubr.msk.f32.gmra.mrb[134].mxu0 %vm203_vm0, %v8732_v40 }
 0x125   :  { %v5061_v41 = vadd.f32 %v5060_v24, %v4197_v30  ;;  %v5135_v42 = vadd.f32 %v5134_v25, %v4199_v31  ;;  %v549_v43 = vadd.f32 %v548_v38, %v9474_v12  ;;  %v998_v44 = vadd.f32 %v997_v39, %v9478_v14  ;;  %7969 = vmatmul.mubr.msk.f32.gmra.mrb[134].mxu1 %vm203_vm0, %v8732_v40  ;;  %v8735_v38 = vld [vmem:[%s12295_s0 + $0x30] sm:$0xff] }
 0x126   :  { %v4212_v45 = vmax.f32 %v547_v36, 0.0  ;;  %v4214_v46 = vmax.f32 %v996_v37, 0.0  ;;  %1382 = vmatprep.mubr.f32.mxu0 %v8998_v0  ;;  %1831 = vmatprep.mubr.f32.mxu1 %v8998_v0 }
 0x127   :  { %v4213_v47 = vmax.f32 %v549_v43, 0.0  ;;  %v4215_v48 = vmax.f32 %v998_v44, 0.0  ;;  %v552_v49 = vpop.f32.mrb[30].mxu0  ;;  %v1001_v50 = vpop.f32.mrb[30].mxu1 }
 0x128   :  { %v5025_v51 = vadd.f32 %v5024_v34, %v4212_v45  ;;  %v5099_v52 = vadd.f32 %v5098_v35, %v4214_v46  ;;  %v553_v53 = vadd.f32 %v552_v49, %v9466_v9  ;;  %v1002_v54 = vadd.f32 %v1001_v50, %v9470_v10  ;;  %v554_v55 = vpop.f32.mrb[31].mxu0  ;;  %v1003_v56 = vpop.f32.mrb[31].mxu1  ;;  %7906 = vmatmul.mubr.msk.f32.gmra.mrb[136].mxu0 %vm203_vm0, %v8733_v57 }
 0x129   :  { %v5062_v58 = vadd.f32 %v5061_v41, %v4213_v47  ;;  %v5136_v59 = vadd.f32 %v5135_v42, %v4215_v48  ;;  %v555_v60 = vadd.f32 %v554_v55, %v9474_v12  ;;  %v1004_v61 = vadd.f32 %v1003_v56, %v9478_v14  ;;  %7970 = vmatmul.mubr.msk.f32.gmra.mrb[136].mxu1 %vm203_vm0, %v8733_v57  ;;  %v8736_v55 = vld [vmem:[%s12295_s0 + $0x38] sm:$0xff] }
 0x12a   :  { %v4228_v63 = vmax.f32 %v553_v53, 0.0  ;;  %v4230_v2 = vmax.f32 %v1002_v54, 0.0  ;;  %1388 = vmatprep.mubr.f32.mxu0 %v8998_v0  ;;  %1837 = vmatprep.mubr.f32.mxu1 %v8998_v0 }
 0x12b   :  { %v4229_v5 = vmax.f32 %v555_v60, 0.0  ;;  %v4231_v8 = vmax.f32 %v1004_v61, 0.0  ;;  %v558_v11 = vpop.f32.mrb[32].mxu0  ;;  %v1007_v13 = vpop.f32.mrb[32].mxu1 }
 0x12c   :  { %v5026_v15 = vadd.f32 %v5025_v51, %v4228_v63  ;;  %v5100_v16 = vadd.f32 %v5099_v52, %v4230_v2  ;;  %v559_v17 = vadd.f32 %v558_v11, %v9466_v9  ;;  %v1008_v18 = vadd.f32 %v1007_v13, %v9470_v10  ;;  %v560_v19 = vpop.f32.mrb[33].mxu0  ;;  %v1009_v20 = vpop.f32.mrb[33].mxu1  ;;  %7907 = vmatmul.mubr.msk.f32.gmra.mrb[138].mxu0 %vm203_vm0, %v8734_v21 }
 0x12d   :  { %v5063_v22 = vadd.f32 %v5062_v58, %v4229_v5  ;;  %v5137_v23 = vadd.f32 %v5136_v59, %v4231_v8  ;;  %v561_v24 = vadd.f32 %v560_v19, %v9474_v12  ;;  %v1010_v25 = vadd.f32 %v1009_v20, %v9478_v14  ;;  %7971 = vmatmul.mubr.msk.f32.gmra.mrb[138].mxu1 %vm203_vm0, %v8734_v21  ;;  %v8737_v19 = vld [vmem:[%s12295_s0 + $0x40] sm:$0xff] }
 0x12e   :  { %v4244_v26 = vmax.f32 %v559_v17, 0.0  ;;  %v4246_v27 = vmax.f32 %v1008_v18, 0.0  ;;  %1394 = vmatprep.mubr.f32.mxu0 %v8998_v0  ;;  %1843 = vmatprep.mubr.f32.mxu1 %v8998_v0 }
 0x12f   :  { %v4245_v28 = vmax.f32 %v561_v24, 0.0  ;;  %v4247_v29 = vmax.f32 %v1010_v25, 0.0  ;;  %v564_v30 = vpop.f32.mrb[34].mxu0  ;;  %v1013_v31 = vpop.f32.mrb[34].mxu1 }
 0x130   :  { %v5027_v32 = vadd.f32 %v5026_v15, %v4244_v26  ;;  %v5101_v33 = vadd.f32 %v5100_v16, %v4246_v27  ;;  %v565_v34 = vadd.f32 %v564_v30, %v9466_v9  ;;  %v1014_v35 = vadd.f32 %v1013_v31, %v9470_v10  ;;  %v566_v36 = vpop.f32.mrb[35].mxu0  ;;  %v1015_v37 = vpop.f32.mrb[35].mxu1  ;;  %7908 = vmatmul.mubr.msk.f32.gmra.mrb[140].mxu0 %vm203_vm0, %v8735_v38 }
 0x131   :  { %v5064_v39 = vadd.f32 %v5063_v22, %v4245_v28  ;;  %v5138_v40 = vadd.f32 %v5137_v23, %v4247_v29  ;;  %v567_v41 = vadd.f32 %v566_v36, %v9474_v12  ;;  %v1016_v42 = vadd.f32 %v1015_v37, %v9478_v14  ;;  %7972 = vmatmul.mubr.msk.f32.gmra.mrb[140].mxu1 %vm203_vm0, %v8735_v38  ;;  %v8738_v36 = vld [vmem:[%s12295_s0 + $0x48] sm:$0xff] }
 0x132   :  { %v4260_v43 = vmax.f32 %v565_v34, 0.0  ;;  %v4262_v44 = vmax.f32 %v1014_v35, 0.0  ;;  %1400 = vmatprep.mubr.f32.mxu0 %v8998_v0  ;;  %1849 = vmatprep.mubr.f32.mxu1 %v8998_v0 }
 0x133   :  { %v4261_v45 = vmax.f32 %v567_v41, 0.0  ;;  %v4263_v46 = vmax.f32 %v1016_v42, 0.0  ;;  %v570_v47 = vpop.f32.mrb[36].mxu0  ;;  %v1019_v48 = vpop.f32.mrb[36].mxu1 }
 0x134   :  { %v5028_v49 = vadd.f32 %v5027_v32, %v4260_v43  ;;  %v5102_v50 = vadd.f32 %v5101_v33, %v4262_v44  ;;  %v571_v51 = vadd.f32 %v570_v47, %v9466_v9  ;;  %v1020_v52 = vadd.f32 %v1019_v48, %v9470_v10  ;;  %v572_v53 = vpop.f32.mrb[37].mxu0  ;;  %v1021_v54 = vpop.f32.mrb[37].mxu1  ;;  %7909 = vmatmul.mubr.msk.f32.gmra.mrb[142].mxu0 %vm203_vm0, %v8736_v55 }
 0x135   :  { %v5065_v56 = vadd.f32 %v5064_v39, %v4261_v45  ;;  %v5139_v57 = vadd.f32 %v5138_v40, %v4263_v46  ;;  %v573_v58 = vadd.f32 %v572_v53, %v9474_v12  ;;  %v1022_v59 = vadd.f32 %v1021_v54, %v9478_v14  ;;  %7973 = vmatmul.mubr.msk.f32.gmra.mrb[142].mxu1 %vm203_vm0, %v8736_v55  ;;  %v8739_v53 = vld [vmem:[%s12295_s0 + $0x50] sm:$0xff] }
 0x136   :  { %v4276_v60 = vmax.f32 %v571_v51, 0.0  ;;  %v4278_v61 = vmax.f32 %v1020_v52, 0.0  ;;  %1406 = vmatprep.mubr.f32.mxu0 %v8998_v0  ;;  %1855 = vmatprep.mubr.f32.mxu1 %v8998_v0 }
 0x137   :  { %v4277_v63 = vmax.f32 %v573_v58, 0.0  ;;  %v4279_v2 = vmax.f32 %v1022_v59, 0.0  ;;  %v576_v5 = vpop.f32.mrb[38].mxu0  ;;  %v1025_v8 = vpop.f32.mrb[38].mxu1 }
 0x138   :  { %v5029_v11 = vadd.f32 %v5028_v49, %v4276_v60  ;;  %v5103_v13 = vadd.f32 %v5102_v50, %v4278_v61  ;;  %v577_v15 = vadd.f32 %v576_v5, %v9466_v9  ;;  %v1026_v16 = vadd.f32 %v1025_v8, %v9470_v10  ;;  %v578_v17 = vpop.f32.mrb[39].mxu0  ;;  %v1027_v18 = vpop.f32.mrb[39].mxu1  ;;  %7910 = vmatmul.mubr.msk.f32.gmra.mrb[144].mxu0 %vm203_vm0, %v8737_v19 }
 0x139   :  { %v5066_v20 = vadd.f32 %v5065_v56, %v4277_v63  ;;  %v5140_v21 = vadd.f32 %v5139_v57, %v4279_v2  ;;  %v579_v22 = vadd.f32 %v578_v17, %v9474_v12  ;;  %v1028_v23 = vadd.f32 %v1027_v18, %v9478_v14  ;;  %7974 = vmatmul.mubr.msk.f32.gmra.mrb[144].mxu1 %vm203_vm0, %v8737_v19  ;;  %v8740_v17 = vld [vmem:[%s12295_s0 + $0x58] sm:$0xff] }
 0x13a   :  { %v4292_v24 = vmax.f32 %v577_v15, 0.0  ;;  %v4294_v25 = vmax.f32 %v1026_v16, 0.0  ;;  %1412 = vmatprep.mubr.f32.mxu0 %v8998_v0  ;;  %1861 = vmatprep.mubr.f32.mxu1 %v8998_v0 }
 0x13b   :  { %v4293_v26 = vmax.f32 %v579_v22, 0.0  ;;  %v4295_v27 = vmax.f32 %v1028_v23, 0.0  ;;  %v582_v28 = vpop.f32.mrb[40].mxu0  ;;  %v1031_v29 = vpop.f32.mrb[40].mxu1 }
 0x13c   :  { %v5030_v30 = vadd.f32 %v5029_v11, %v4292_v24  ;;  %v5104_v31 = vadd.f32 %v5103_v13, %v4294_v25  ;;  %v583_v32 = vadd.f32 %v582_v28, %v9466_v9  ;;  %v1032_v33 = vadd.f32 %v1031_v29, %v9470_v10  ;;  %v584_v34 = vpop.f32.mrb[41].mxu0  ;;  %v1033_v35 = vpop.f32.mrb[41].mxu1  ;;  %7911 = vmatmul.mubr.msk.f32.gmra.mrb[146].mxu0 %vm203_vm0, %v8738_v36 }
 0x13d   :  { %v5067_v37 = vadd.f32 %v5066_v20, %v4293_v26  ;;  %v5141_v38 = vadd.f32 %v5140_v21, %v4295_v27  ;;  %v585_v39 = vadd.f32 %v584_v34, %v9474_v12  ;;  %v1034_v40 = vadd.f32 %v1033_v35, %v9478_v14  ;;  %7975 = vmatmul.mubr.msk.f32.gmra.mrb[146].mxu1 %vm203_vm0, %v8738_v36  ;;  %v8741_v34 = vld [vmem:[%s12295_s0 + $0x60] sm:$0xff] }
 0x13e   :  { %v4308_v41 = vmax.f32 %v583_v32, 0.0  ;;  %v4310_v42 = vmax.f32 %v1032_v33, 0.0  ;;  %1418 = vmatprep.mubr.f32.mxu0 %v8998_v0  ;;  %1867 = vmatprep.mubr.f32.mxu1 %v8998_v0 }
 0x13f   :  { %v4309_v43 = vmax.f32 %v585_v39, 0.0  ;;  %v4311_v44 = vmax.f32 %v1034_v40, 0.0  ;;  %v588_v45 = vpop.f32.mrb[42].mxu0  ;;  %v1037_v46 = vpop.f32.mrb[42].mxu1 }
 0x140   :  { %v5031_v47 = vadd.f32 %v5030_v30, %v4308_v41  ;;  %v5105_v48 = vadd.f32 %v5104_v31, %v4310_v42  ;;  %v589_v49 = vadd.f32 %v588_v45, %v9466_v9  ;;  %v1038_v50 = vadd.f32 %v1037_v46, %v9470_v10  ;;  %v590_v51 = vpop.f32.mrb[43].mxu0  ;;  %v1039_v52 = vpop.f32.mrb[43].mxu1  ;;  %7912 = vmatmul.mubr.msk.f32.gmra.mrb[148].mxu0 %vm203_vm0, %v8739_v53 }
 0x141   :  { %v5068_v54 = vadd.f32 %v5067_v37, %v4309_v43  ;;  %v5142_v55 = vadd.f32 %v5141_v38, %v4311_v44  ;;  %v591_v56 = vadd.f32 %v590_v51, %v9474_v12  ;;  %v1040_v57 = vadd.f32 %v1039_v52, %v9478_v14  ;;  %7976 = vmatmul.mubr.msk.f32.gmra.mrb[148].mxu1 %vm203_vm0, %v8739_v53  ;;  %v8742_v51 = vld [vmem:[%s12295_s0 + $0x68] sm:$0xff] }
 0x142   :  { %v4324_v58 = vmax.f32 %v589_v49, 0.0  ;;  %v4326_v59 = vmax.f32 %v1038_v50, 0.0  ;;  %1424 = vmatprep.mubr.f32.mxu0 %v8998_v0  ;;  %1873 = vmatprep.mubr.f32.mxu1 %v8998_v0 }
 0x143   :  { %v4325_v60 = vmax.f32 %v591_v56, 0.0  ;;  %v4327_v61 = vmax.f32 %v1040_v57, 0.0  ;;  %v594_v63 = vpop.f32.mrb[44].mxu0  ;;  %v1043_v2 = vpop.f32.mrb[44].mxu1 }
 0x144   :  { %v5032_v5 = vadd.f32 %v5031_v47, %v4324_v58  ;;  %v5106_v8 = vadd.f32 %v5105_v48, %v4326_v59  ;;  %v595_v11 = vadd.f32 %v594_v63, %v9466_v9  ;;  %v1044_v13 = vadd.f32 %v1043_v2, %v9470_v10  ;;  %v596_v15 = vpop.f32.mrb[45].mxu0  ;;  %v1045_v16 = vpop.f32.mrb[45].mxu1  ;;  %7913 = vmatmul.mubr.msk.f32.gmra.mrb[150].mxu0 %vm203_vm0, %v8740_v17 }
 0x145   :  { %v5069_v18 = vadd.f32 %v5068_v54, %v4325_v60  ;;  %v5143_v19 = vadd.f32 %v5142_v55, %v4327_v61  ;;  %v597_v20 = vadd.f32 %v596_v15, %v9474_v12  ;;  %v1046_v21 = vadd.f32 %v1045_v16, %v9478_v14  ;;  %7977 = vmatmul.mubr.msk.f32.gmra.mrb[150].mxu1 %vm203_vm0, %v8740_v17  ;;  %v8743_v15 = vld [vmem:[%s12295_s0 + $0x70] sm:$0xff] }
 0x146   :  { %v4340_v22 = vmax.f32 %v595_v11, 0.0  ;;  %v4342_v23 = vmax.f32 %v1044_v13, 0.0  ;;  %1430 = vmatprep.mubr.f32.mxu0 %v8998_v0  ;;  %1879 = vmatprep.mubr.f32.mxu1 %v8998_v0 }
 0x147   :  { %v4341_v24 = vmax.f32 %v597_v20, 0.0  ;;  %v4343_v25 = vmax.f32 %v1046_v21, 0.0  ;;  %v600_v26 = vpop.f32.mrb[46].mxu0  ;;  %v1049_v27 = vpop.f32.mrb[46].mxu1 }
 0x148   :  { %v5033_v28 = vadd.f32 %v5032_v5, %v4340_v22  ;;  %v5107_v29 = vadd.f32 %v5106_v8, %v4342_v23  ;;  %v601_v30 = vadd.f32 %v600_v26, %v9466_v9  ;;  %v1050_v31 = vadd.f32 %v1049_v27, %v9470_v10  ;;  %v602_v32 = vpop.f32.mrb[47].mxu0  ;;  %v1051_v33 = vpop.f32.mrb[47].mxu1  ;;  %7914 = vmatmul.mubr.msk.f32.gmra.mrb[152].mxu0 %vm203_vm0, %v8741_v34 }
 0x149   :  { %v5070_v35 = vadd.f32 %v5069_v18, %v4341_v24  ;;  %v5144_v36 = vadd.f32 %v5143_v19, %v4343_v25  ;;  %v603_v37 = vadd.f32 %v602_v32, %v9474_v12  ;;  %v1052_v38 = vadd.f32 %v1051_v33, %v9478_v14  ;;  %7978 = vmatmul.mubr.msk.f32.gmra.mrb[152].mxu1 %vm203_vm0, %v8741_v34  ;;  %v8744_v32 = vld [vmem:[%s12295_s0 + $0x78] sm:$0xff] }
 0x14a   :  { %v4356_v39 = vmax.f32 %v601_v30, 0.0  ;;  %v4358_v40 = vmax.f32 %v1050_v31, 0.0  ;;  %1436 = vmatprep.mubr.f32.mxu0 %v8998_v0  ;;  %1885 = vmatprep.mubr.f32.mxu1 %v8998_v0 }
 0x14b   :  { %v4357_v41 = vmax.f32 %v603_v37, 0.0  ;;  %v4359_v42 = vmax.f32 %v1052_v38, 0.0  ;;  %v606_v43 = vpop.f32.mrb[48].mxu0  ;;  %v1055_v44 = vpop.f32.mrb[48].mxu1 }
 0x14c   :  { %v5034_v45 = vadd.f32 %v5033_v28, %v4356_v39  ;;  %v5108_v46 = vadd.f32 %v5107_v29, %v4358_v40  ;;  %v607_v47 = vadd.f32 %v606_v43, %v9466_v9  ;;  %v1056_v48 = vadd.f32 %v1055_v44, %v9470_v10  ;;  %v608_v49 = vpop.f32.mrb[49].mxu0  ;;  %v1057_v50 = vpop.f32.mrb[49].mxu1  ;;  %7915 = vmatmul.mubr.msk.f32.gmra.mrb[154].mxu0 %vm203_vm0, %v8742_v51 }
 0x14d   :  { %v5071_v52 = vadd.f32 %v5070_v35, %v4357_v41  ;;  %v5145_v53 = vadd.f32 %v5144_v36, %v4359_v42  ;;  %v609_v54 = vadd.f32 %v608_v49, %v9474_v12  ;;  %v1058_v55 = vadd.f32 %v1057_v50, %v9478_v14  ;;  %7979 = vmatmul.mubr.msk.f32.gmra.mrb[154].mxu1 %vm203_vm0, %v8742_v51  ;;  %v8745_v49 = vld [vmem:[%s12295_s0 + $0x80] sm:$0xff] }
 0x14e   :  { %v4372_v56 = vmax.f32 %v607_v47, 0.0  ;;  %v4374_v57 = vmax.f32 %v1056_v48, 0.0  ;;  %1442 = vmatprep.mubr.f32.mxu0 %v8998_v0  ;;  %1891 = vmatprep.mubr.f32.mxu1 %v8998_v0 }
 0x14f   :  { %v4373_v58 = vmax.f32 %v609_v54, 0.0  ;;  %v4375_v59 = vmax.f32 %v1058_v55, 0.0  ;;  %v612_v60 = vpop.f32.mrb[50].mxu0  ;;  %v1061_v61 = vpop.f32.mrb[50].mxu1 }
 0x150   :  { %v5035_v63 = vadd.f32 %v5034_v45, %v4372_v56  ;;  %v5109_v2 = vadd.f32 %v5108_v46, %v4374_v57  ;;  %v613_v5 = vadd.f32 %v612_v60, %v9466_v9  ;;  %v1062_v8 = vadd.f32 %v1061_v61, %v9470_v10  ;;  %v614_v11 = vpop.f32.mrb[51].mxu0  ;;  %v1063_v13 = vpop.f32.mrb[51].mxu1  ;;  %7916 = vmatmul.mubr.msk.f32.gmra.mrb[156].mxu0 %vm203_vm0, %v8743_v15 }
 0x151   :  { %v5072_v16 = vadd.f32 %v5071_v52, %v4373_v58  ;;  %v5146_v17 = vadd.f32 %v5145_v53, %v4375_v59  ;;  %v615_v18 = vadd.f32 %v614_v11, %v9474_v12  ;;  %v1064_v19 = vadd.f32 %v1063_v13, %v9478_v14  ;;  %7980 = vmatmul.mubr.msk.f32.gmra.mrb[156].mxu1 %vm203_vm0, %v8743_v15  ;;  %v8746_v11 = vld [vmem:[%s12295_s0 + $0x88] sm:$0xff] }
 0x152   :  { %v4388_v20 = vmax.f32 %v613_v5, 0.0  ;;  %v4390_v21 = vmax.f32 %v1062_v8, 0.0  ;;  %1448 = vmatprep.mubr.f32.mxu0 %v8998_v0  ;;  %1897 = vmatprep.mubr.f32.mxu1 %v8998_v0 }
 0x153   :  { %v4389_v22 = vmax.f32 %v615_v18, 0.0  ;;  %v4391_v23 = vmax.f32 %v1064_v19, 0.0  ;;  %v618_v24 = vpop.f32.mrb[52].mxu0  ;;  %v1067_v25 = vpop.f32.mrb[52].mxu1 }
 0x154   :  { %v5036_v26 = vadd.f32 %v5035_v63, %v4388_v20  ;;  %v5110_v27 = vadd.f32 %v5109_v2, %v4390_v21  ;;  %v619_v28 = vadd.f32 %v618_v24, %v9466_v9  ;;  %v1068_v29 = vadd.f32 %v1067_v25, %v9470_v10  ;;  %v620_v30 = vpop.f32.mrb[53].mxu0  ;;  %v1069_v31 = vpop.f32.mrb[53].mxu1  ;;  %7917 = vmatmul.mubr.msk.f32.gmra.mrb[158].mxu0 %vm203_vm0, %v8744_v32 }
 0x155   :  { %v5073_v33 = vadd.f32 %v5072_v16, %v4389_v22  ;;  %v5147_v34 = vadd.f32 %v5146_v17, %v4391_v23  ;;  %v621_v35 = vadd.f32 %v620_v30, %v9474_v12  ;;  %v1070_v36 = vadd.f32 %v1069_v31, %v9478_v14  ;;  %7981 = vmatmul.mubr.msk.f32.gmra.mrb[158].mxu1 %vm203_vm0, %v8744_v32  ;;  %v8747_v30 = vld [vmem:[%s12295_s0 + $0x90] sm:$0xff] }
 0x156   :  { %v4404_v37 = vmax.f32 %v619_v28, 0.0  ;;  %v4406_v38 = vmax.f32 %v1068_v29, 0.0  ;;  %1454 = vmatprep.mubr.f32.mxu0 %v8998_v0  ;;  %1903 = vmatprep.mubr.f32.mxu1 %v8998_v0 }
 0x157   :  { %v4405_v39 = vmax.f32 %v621_v35, 0.0  ;;  %v4407_v40 = vmax.f32 %v1070_v36, 0.0  ;;  %v624_v41 = vpop.f32.mrb[54].mxu0  ;;  %v1073_v42 = vpop.f32.mrb[54].mxu1 }
 0x158   :  { %v5037_v43 = vadd.f32 %v5036_v26, %v4404_v37  ;;  %v5111_v44 = vadd.f32 %v5110_v27, %v4406_v38  ;;  %v625_v45 = vadd.f32 %v624_v41, %v9466_v9  ;;  %v1074_v46 = vadd.f32 %v1073_v42, %v9470_v10  ;;  %v626_v47 = vpop.f32.mrb[55].mxu0  ;;  %v1075_v48 = vpop.f32.mrb[55].mxu1  ;;  %7918 = vmatmul.mubr.msk.f32.gmra.mrb[160].mxu0 %vm203_vm0, %v8745_v49 }
 0x159   :  { %v5074_v50 = vadd.f32 %v5073_v33, %v4405_v39  ;;  %v5148_v51 = vadd.f32 %v5147_v34, %v4407_v40  ;;  %v627_v52 = vadd.f32 %v626_v47, %v9474_v12  ;;  %v1076_v53 = vadd.f32 %v1075_v48, %v9478_v14  ;;  %7982 = vmatmul.mubr.msk.f32.gmra.mrb[160].mxu1 %vm203_vm0, %v8745_v49  ;;  %v8748_v47 = vld [vmem:[%s12295_s0 + $0x98] sm:$0xff] }
 0x15a   :  { %v4420_v54 = vmax.f32 %v625_v45, 0.0  ;;  %v4422_v55 = vmax.f32 %v1074_v46, 0.0  ;;  %1460 = vmatprep.mubr.f32.mxu0 %v8998_v0  ;;  %1909 = vmatprep.mubr.f32.mxu1 %v8998_v0 }
 0x15b   :  { %v4421_v56 = vmax.f32 %v627_v52, 0.0  ;;  %v4423_v57 = vmax.f32 %v1076_v53, 0.0  ;;  %v630_v58 = vpop.f32.mrb[56].mxu0  ;;  %v1079_v59 = vpop.f32.mrb[56].mxu1 }
 0x15c   :  { %v5038_v60 = vadd.f32 %v5037_v43, %v4420_v54  ;;  %v5112_v61 = vadd.f32 %v5111_v44, %v4422_v55  ;;  %v631_v63 = vadd.f32 %v630_v58, %v9466_v9  ;;  %v1080_v2 = vadd.f32 %v1079_v59, %v9470_v10  ;;  %v632_v5 = vpop.f32.mrb[57].mxu0  ;;  %v1081_v8 = vpop.f32.mrb[57].mxu1  ;;  %7919 = vmatmul.mubr.msk.f32.gmra.mrb[162].mxu0 %vm203_vm0, %v8746_v11 }
 0x15d   :  { %v5075_v13 = vadd.f32 %v5074_v50, %v4421_v56  ;;  %v5149_v15 = vadd.f32 %v5148_v51, %v4423_v57  ;;  %v633_v16 = vadd.f32 %v632_v5, %v9474_v12  ;;  %v1082_v17 = vadd.f32 %v1081_v8, %v9478_v14  ;;  %7983 = vmatmul.mubr.msk.f32.gmra.mrb[162].mxu1 %vm203_vm0, %v8746_v11  ;;  %v8749_v5 = vld [vmem:[%s12295_s0 + $0xa0] sm:$0xff] }
 0x15e   :  { %v4436_v18 = vmax.f32 %v631_v63, 0.0  ;;  %v4438_v19 = vmax.f32 %v1080_v2, 0.0  ;;  %1466 = vmatprep.mubr.f32.mxu0 %v8998_v0  ;;  %1915 = vmatprep.mubr.f32.mxu1 %v8998_v0 }
 0x15f   :  { %v4437_v20 = vmax.f32 %v633_v16, 0.0  ;;  %v4439_v21 = vmax.f32 %v1082_v17, 0.0  ;;  %v636_v22 = vpop.f32.mrb[58].mxu0  ;;  %v1085_v23 = vpop.f32.mrb[58].mxu1 }
 0x160   :  { %v5039_v24 = vadd.f32 %v5038_v60, %v4436_v18  ;;  %v5113_v25 = vadd.f32 %v5112_v61, %v4438_v19  ;;  %v637_v26 = vadd.f32 %v636_v22, %v9466_v9  ;;  %v1086_v27 = vadd.f32 %v1085_v23, %v9470_v10  ;;  %v638_v28 = vpop.f32.mrb[59].mxu0  ;;  %v1087_v29 = vpop.f32.mrb[59].mxu1  ;;  %7920 = vmatmul.mubr.msk.f32.gmra.mrb[164].mxu0 %vm203_vm0, %v8747_v30 }
 0x161   :  { %v5076_v31 = vadd.f32 %v5075_v13, %v4437_v20  ;;  %v5150_v32 = vadd.f32 %v5149_v15, %v4439_v21  ;;  %v639_v33 = vadd.f32 %v638_v28, %v9474_v12  ;;  %v1088_v34 = vadd.f32 %v1087_v29, %v9478_v14  ;;  %7984 = vmatmul.mubr.msk.f32.gmra.mrb[164].mxu1 %vm203_vm0, %v8747_v30 }
 0x162   :  { %v4452_v35 = vmax.f32 %v637_v26, 0.0  ;;  %v4454_v36 = vmax.f32 %v1086_v27, 0.0  ;;  %1472 = vmatprep.mubr.f32.mxu0 %v8998_v0  ;;  %1921 = vmatprep.mubr.f32.mxu1 %v8998_v0 }
 0x163   :  { %v4453_v37 = vmax.f32 %v639_v33, 0.0  ;;  %v4455_v38 = vmax.f32 %v1088_v34, 0.0  ;;  %v642_v39 = vpop.f32.mrb[60].mxu0  ;;  %v1091_v40 = vpop.f32.mrb[60].mxu1 }
 0x164   :  { %v5040_v41 = vadd.f32 %v5039_v24, %v4452_v35  ;;  %v5114_v42 = vadd.f32 %v5113_v25, %v4454_v36  ;;  %v643_v43 = vadd.f32 %v642_v39, %v9466_v9  ;;  %v1092_v44 = vadd.f32 %v1091_v40, %v9470_v10  ;;  %v644_v45 = vpop.f32.mrb[61].mxu0  ;;  %v1093_v46 = vpop.f32.mrb[61].mxu1  ;;  %7921 = vmatmul.mubr.msk.f32.gmra.mrb[166].mxu0 %vm203_vm0, %v8748_v47  ;;  %v8750_v25 = vld [vmem:[%s12295_s0 + $0xa8] sm:$0xff]  ;;  %v8751_v39 = vld [vmem:[%s12295_s0 + $0xb0] sm:$0xff] }
 0x165   :  { %v5077_v48 = vadd.f32 %v5076_v31, %v4453_v37  ;;  %v5151_v49 = vadd.f32 %v5150_v32, %v4455_v38  ;;  %v645_v50 = vadd.f32 %v644_v45, %v9474_v12  ;;  %v1094_v51 = vadd.f32 %v1093_v46, %v9478_v14  ;;  %7985 = vmatmul.mubr.msk.f32.gmra.mrb[166].mxu1 %vm203_vm0, %v8748_v47 }
 0x166   :  { %v4468_v52 = vmax.f32 %v643_v43, 0.0  ;;  %v4470_v53 = vmax.f32 %v1092_v44, 0.0  ;;  %1478 = vmatprep.mubr.f32.mxu0 %v8998_v0  ;;  %1927 = vmatprep.mubr.f32.mxu1 %v8998_v0 }
 0x167   :  { %v4469_v54 = vmax.f32 %v645_v50, 0.0  ;;  %v4471_v55 = vmax.f32 %v1094_v51, 0.0  ;;  %v648_v56 = vpop.f32.mrb[62].mxu0  ;;  %v1097_v57 = vpop.f32.mrb[62].mxu1 }
 0x168   :  { %v5041_v58 = vadd.f32 %v5040_v41, %v4468_v52  ;;  %v5115_v59 = vadd.f32 %v5114_v42, %v4470_v53  ;;  %v649_v60 = vadd.f32 %v648_v56, %v9466_v9  ;;  %v1098_v61 = vadd.f32 %v1097_v57, %v9470_v10  ;;  %v650_v63 = vpop.f32.mrb[63].mxu0  ;;  %v1099_v2 = vpop.f32.mrb[63].mxu1  ;;  %7922 = vmatmul.mubr.msk.f32.gmra.mrb[168].mxu0 %vm203_vm0, %v8749_v5  ;;  %v8752_v56 = vld [vmem:[%s12295_s0 + $0xb8] sm:$0xff] }
 0x169   :  { %v5078_v8 = vadd.f32 %v5077_v48, %v4469_v54  ;;  %v5152_v11 = vadd.f32 %v5151_v49, %v4471_v55  ;;  %v651_v13 = vadd.f32 %v650_v63, %v9474_v12  ;;  %v1100_v15 = vadd.f32 %v1099_v2, %v9478_v14  ;;  %7986 = vmatmul.mubr.msk.f32.gmra.mrb[168].mxu1 %vm203_vm0, %v8749_v5 }
 0x16a   :  { %v4484_v16 = vmax.f32 %v649_v60, 0.0  ;;  %v4486_v17 = vmax.f32 %v1098_v61, 0.0  ;;  %1484 = vmatprep.mubr.f32.mxu0 %v8998_v0  ;;  %1933 = vmatprep.mubr.f32.mxu1 %v8998_v0 }
 0x16b   :  { %v4485_v18 = vmax.f32 %v651_v13, 0.0  ;;  %v4487_v19 = vmax.f32 %v1100_v15, 0.0  ;;  %v654_v20 = vpop.f32.mrb[64].mxu0  ;;  %v1103_v21 = vpop.f32.mrb[64].mxu1 }
 0x16c   :  { %v9835_v22 = vadd.f32 %v5041_v58, %v4484_v16  ;;  %v9837_v23 = vadd.f32 %v5115_v59, %v4486_v17  ;;  %v656_v24 = vpop.f32.mrb[65].mxu0  ;;  %7923 = vmatmul.mubr.msk.f32.gmra.mrb[170].mxu0 %vm203_vm0, %v8750_v25  ;;  %v1105_v26 = vpop.f32.mrb[65].mxu1  ;;  %v655_v29 = vadd.f32 %v654_v20, %v9466_v9  ;;  %v1104_v30 = vadd.f32 %v1103_v21, %v9470_v10  ;;  %v8753_v16 = vld [vmem:[%s12295_s0 + $0xc0] sm:$0xff] }
 0x16d   :  { %v9843_v27 = vadd.f32 %v5078_v8, %v4485_v18  ;;  %v9845_v28 = vadd.f32 %v5152_v11, %v4487_v19  ;;  %7987 = vmatmul.mubr.msk.f32.gmra.mrb[170].mxu1 %vm203_vm0, %v8750_v25  ;;  %1490 = vmatprep.mubr.f32.mxu0 %v8998_v0  ;;  %v657_v31 = vadd.f32 %v656_v24, %v9474_v12 }
 0x16e   :  { %1939 = vmatprep.mubr.f32.mxu1 %v8998_v0  ;;  %v1106_v32 = vadd.f32 %v1105_v26, %v9478_v14  ;;  %v4500_v42 = vmax.f32 %v655_v29, 0.0  ;;  %v4502_v43 = vmax.f32 %v1104_v30, 0.0 }
 0x16f   :  { %v660_v33 = vpop.f32.mrb[66].mxu0  ;;  %v1109_v34 = vpop.f32.mrb[66].mxu1  ;;  %v4501_v46 = vmax.f32 %v657_v31, 0.0 }
 0x170   :  { %v661_v35 = vadd.f32 %v660_v33, %v9466_v9  ;;  %v1110_v36 = vadd.f32 %v1109_v34, %v9470_v10  ;;  %v662_v37 = vpop.f32.mrb[67].mxu0  ;;  %v1111_v38 = vpop.f32.mrb[67].mxu1  ;;  %7924 = vmatmul.mubr.msk.f32.gmra.mrb[172].mxu0 %vm203_vm0, %v8751_v39  ;;  %v4503_v47 = vmax.f32 %v1106_v32, 0.0 }
 0x171   :  { %v663_v40 = vadd.f32 %v662_v37, %v9474_v12  ;;  %v1112_v41 = vadd.f32 %v1111_v38, %v9478_v14  ;;  %7988 = vmatmul.mubr.msk.f32.gmra.mrb[172].mxu1 %vm203_vm0, %v8751_v39  ;;  %1496 = vmatprep.mubr.f32.mxu0 %v8998_v0  ;;  %v8754_v37 = vld [vmem:[%s12295_s0 + $0xc8] sm:$0xff] }
 0x172   :  { %v4516_v44 = vmax.f32 %v661_v35, 0.0  ;;  %v4518_v45 = vmax.f32 %v1110_v36, 0.0  ;;  %1945 = vmatprep.mubr.f32.mxu1 %v8998_v0 }
 0x173   :  { %v4517_v48 = vmax.f32 %v663_v40, 0.0  ;;  %v4519_v49 = vmax.f32 %v1112_v41, 0.0  ;;  %v666_v50 = vpop.f32.mrb[68].mxu0  ;;  %v1115_v51 = vpop.f32.mrb[68].mxu1 }
 0x174   :  { %v5604_v52 = vadd.f32 %v4516_v44, %v4500_v42  ;;  %v5678_v53 = vadd.f32 %v4518_v45, %v4502_v43  ;;  %v668_v54 = vpop.f32.mrb[69].mxu0  ;;  %v1117_v55 = vpop.f32.mrb[69].mxu1  ;;  %7925 = vmatmul.mubr.msk.f32.gmra.mrb[174].mxu0 %vm203_vm0, %v8752_v56  ;;  %v667_v59 = vadd.f32 %v666_v50, %v9466_v9  ;;  %v1116_v60 = vadd.f32 %v1115_v51, %v9470_v10 }
 0x175   :  { %v5641_v57 = vadd.f32 %v4517_v48, %v4501_v46  ;;  %v5715_v58 = vadd.f32 %v4519_v49, %v4503_v47  ;;  %7989 = vmatmul.mubr.msk.f32.gmra.mrb[174].mxu1 %vm203_vm0, %v8752_v56  ;;  %1502 = vmatprep.mubr.f32.mxu0 %v8998_v0  ;;  %v669_v61 = vadd.f32 %v668_v54, %v9474_v12  ;;  %v8755_v56 = vld [vmem:[%s12295_s0 + $0xd0] sm:$0xff] }
 0x176   :  { %1951 = vmatprep.mubr.f32.mxu1 %v8998_v0  ;;  %v1118_v63 = vadd.f32 %v1117_v55, %v9478_v14  ;;  %v4532_v8 = vmax.f32 %v667_v59, 0.0  ;;  %v4534_v11 = vmax.f32 %v1116_v60, 0.0 }
 0x177   :  { %v672_v2 = vpop.f32.mrb[70].mxu0  ;;  %v1121_v5 = vpop.f32.mrb[70].mxu1  ;;  %v4533_v17 = vmax.f32 %v669_v61, 0.0 }
 0x178   :  { %v674_v13 = vpop.f32.mrb[71].mxu0  ;;  %v1123_v15 = vpop.f32.mrb[71].mxu1  ;;  %7926 = vmatmul.mubr.msk.f32.gmra.mrb[176].mxu0 %vm203_vm0, %v8753_v16  ;;  %v4535_v18 = vmax.f32 %v1118_v63, 0.0  ;;  %v673_v19 = vadd.f32 %v672_v2, %v9466_v9  ;;  %v1122_v20 = vadd.f32 %v1121_v5, %v9470_v10  ;;  %v5605_v21 = vadd.f32 %v5604_v52, %v4532_v8 }
 0x179   :  { %7990 = vmatmul.mubr.msk.f32.gmra.mrb[176].mxu1 %vm203_vm0, %v8753_v16  ;;  %1508 = vmatprep.mubr.f32.mxu0 %v8998_v0  ;;  %v5679_v24 = vadd.f32 %v5678_v53, %v4534_v11  ;;  %v5642_v25 = vadd.f32 %v5641_v57, %v4533_v17  ;;  %v675_v33 = vadd.f32 %v674_v13, %v9474_v12 }
 0x17a   :  { %1957 = vmatprep.mubr.f32.mxu1 %v8998_v0  ;;  %v5716_v26 = vadd.f32 %v5715_v58, %v4535_v18  ;;  %v4548_v29 = vmax.f32 %v673_v19, 0.0  ;;  %v4550_v30 = vmax.f32 %v1122_v20, 0.0  ;;  %v1124_v34 = vadd.f32 %v1123_v15, %v9478_v14 }
 0x17b   :  { %v678_v31 = vpop.f32.mrb[72].mxu0  ;;  %v1127_v32 = vpop.f32.mrb[72].mxu1  ;;  %v4549_v42 = vmax.f32 %v675_v33, 0.0 }
 0x17c   :  { %v680_v35 = vpop.f32.mrb[73].mxu0  ;;  %v1129_v36 = vpop.f32.mrb[73].mxu1  ;;  %7927 = vmatmul.mubr.msk.f32.gmra.mrb[178].mxu0 %vm203_vm0, %v8754_v37  ;;  %v5606_v38 = vadd.f32 %v5605_v21, %v4548_v29  ;;  %v5680_v39 = vadd.f32 %v5679_v24, %v4550_v30  ;;  %v679_v40 = vadd.f32 %v678_v31, %v9466_v9  ;;  %v1128_v41 = vadd.f32 %v1127_v32, %v9470_v10  ;;  %v8756_v24 = vld [vmem:[%s12295_s0 + $0xd8] sm:$0xff] }
 0x17d   :  { %7991 = vmatmul.mubr.msk.f32.gmra.mrb[178].mxu1 %vm203_vm0, %v8754_v37  ;;  %v4551_v43 = vmax.f32 %v1124_v34, 0.0  ;;  %1514 = vmatprep.mubr.f32.mxu0 %v8998_v0  ;;  %v681_v46 = vadd.f32 %v680_v35, %v9474_v12  ;;  %v1130_v47 = vadd.f32 %v1129_v36, %v9478_v14  ;;  %v5643_v50 = vadd.f32 %v5642_v25, %v4549_v42 }
 0x17e   :  { %1963 = vmatprep.mubr.f32.mxu1 %v8998_v0  ;;  %v4564_v44 = vmax.f32 %v679_v40, 0.0  ;;  %v4566_v45 = vmax.f32 %v1128_v41, 0.0 }
 0x17f   :  { %v684_v48 = vpop.f32.mrb[74].mxu0  ;;  %v1133_v49 = vpop.f32.mrb[74].mxu1  ;;  %v5717_v51 = vadd.f32 %v5716_v26, %v4551_v43  ;;  %v4565_v59 = vmax.f32 %v681_v46, 0.0  ;;  %v4567_v60 = vmax.f32 %v1130_v47, 0.0  ;;  %v8757_v43 = vld [vmem:[%s12295_s0 + $0xe0] sm:$0xff] }
 0x180   :  { %v685_v52 = vadd.f32 %v684_v48, %v9466_v9  ;;  %v1134_v53 = vadd.f32 %v1133_v49, %v9470_v10  ;;  %v686_v54 = vpop.f32.mrb[75].mxu0  ;;  %v1135_v55 = vpop.f32.mrb[75].mxu1  ;;  %7928 = vmatmul.mubr.msk.f32.gmra.mrb[180].mxu0 %vm203_vm0, %v8755_v56  ;;  %v5607_v57 = vadd.f32 %v5606_v38, %v4564_v44  ;;  %v5681_v58 = vadd.f32 %v5680_v39, %v4566_v45 }
 0x181   :  { %7992 = vmatmul.mubr.msk.f32.gmra.mrb[180].mxu1 %vm203_vm0, %v8755_v56  ;;  %1520 = vmatprep.mubr.f32.mxu0 %v8998_v0  ;;  %v687_v2 = vadd.f32 %v686_v54, %v9474_v12  ;;  %v1136_v5 = vadd.f32 %v1135_v55, %v9478_v14  ;;  %v5644_v8 = vadd.f32 %v5643_v50, %v4565_v59 }
 0x182   :  { %v4580_v61 = vmax.f32 %v685_v52, 0.0  ;;  %v4582_v63 = vmax.f32 %v1134_v53, 0.0  ;;  %1969 = vmatprep.mubr.f32.mxu1 %v8998_v0  ;;  %v5718_v11 = vadd.f32 %v5717_v51, %v4567_v60  ;;  %v8758_v60 = vld [vmem:[%s12295_s0 + $0xe8] sm:$0xff] }
 0x183   :  { %v690_v13 = vpop.f32.mrb[76].mxu0  ;;  %v1139_v15 = vpop.f32.mrb[76].mxu1  ;;  %v4581_v18 = vmax.f32 %v687_v2, 0.0  ;;  %v4583_v19 = vmax.f32 %v1136_v5, 0.0 }
 0x184   :  { %v5608_v16 = vadd.f32 %v5607_v57, %v4580_v61  ;;  %v5682_v17 = vadd.f32 %v5681_v58, %v4582_v63  ;;  %v692_v20 = vpop.f32.mrb[77].mxu0  ;;  %v1141_v21 = vpop.f32.mrb[77].mxu1  ;;  %7929 = vmatmul.mubr.msk.f32.gmra.mrb[182].mxu0 %vm203_vm0, %v8756_v24  ;;  %v691_v25 = vadd.f32 %v690_v13, %v9466_v9  ;;  %v1140_v26 = vadd.f32 %v1139_v15, %v9470_v10 }
 0x185   :  { %v693_v29 = vadd.f32 %v692_v20, %v9474_v12  ;;  %v1142_v30 = vadd.f32 %v1141_v21, %v9478_v14  ;;  %7993 = vmatmul.mubr.msk.f32.gmra.mrb[182].mxu1 %vm203_vm0, %v8756_v24  ;;  %v5645_v31 = vadd.f32 %v5644_v8, %v4581_v18  ;;  %v5719_v32 = vadd.f32 %v5718_v11, %v4583_v19 }
 0x186   :  { %1526 = vmatprep.mubr.f32.mxu0 %v8998_v0  ;;  %1975 = vmatprep.mubr.f32.mxu1 %v8998_v0  ;;  %v4596_v33 = vmax.f32 %v691_v25, 0.0  ;;  %v4598_v34 = vmax.f32 %v1140_v26, 0.0  ;;  %v8759_v26 = vld [vmem:[%s12295_s0 + $0xf0] sm:$0xff] }
 0x187   :  { %v4597_v35 = vmax.f32 %v693_v29, 0.0  ;;  %v4599_v36 = vmax.f32 %v1142_v30, 0.0  ;;  %v696_v37 = vpop.f32.mrb[78].mxu0  ;;  %v1145_v38 = vpop.f32.mrb[78].mxu1 }
 0x188   :  { %v697_v39 = vadd.f32 %v696_v37, %v9466_v9  ;;  %v1146_v40 = vadd.f32 %v1145_v38, %v9470_v10  ;;  %v698_v41 = vpop.f32.mrb[79].mxu0  ;;  %v1147_v42 = vpop.f32.mrb[79].mxu1  ;;  %7930 = vmatmul.mubr.msk.f32.gmra.mrb[184].mxu0 %vm203_vm0, %v8757_v43  ;;  %v5609_v44 = vadd.f32 %v5608_v16, %v4596_v33  ;;  %v5683_v45 = vadd.f32 %v5682_v17, %v4598_v34 }
 0x189   :  { %v5646_v46 = vadd.f32 %v5645_v31, %v4597_v35  ;;  %v5720_v47 = vadd.f32 %v5719_v32, %v4599_v36  ;;  %7994 = vmatmul.mubr.msk.f32.gmra.mrb[184].mxu1 %vm203_vm0, %v8757_v43  ;;  %v699_v50 = vadd.f32 %v698_v41, %v9474_v12  ;;  %v1148_v51 = vadd.f32 %v1147_v42, %v9478_v14 }
 0x18a   :  { %v4612_v48 = vmax.f32 %v697_v39, 0.0  ;;  %v4614_v49 = vmax.f32 %v1146_v40, 0.0  ;;  %1532 = vmatprep.mubr.f32.mxu0 %v8998_v0  ;;  %1981 = vmatprep.mubr.f32.mxu1 %v8998_v0 }
 0x18b   :  { %v702_v52 = vpop.f32.mrb[80].mxu0  ;;  %v1151_v53 = vpop.f32.mrb[80].mxu1  ;;  %v4613_v56 = vmax.f32 %v699_v50, 0.0  ;;  %v4615_v57 = vmax.f32 %v1148_v51, 0.0 }
 0x18c   :  { %v5610_v54 = vadd.f32 %v5609_v44, %v4612_v48  ;;  %v5684_v55 = vadd.f32 %v5683_v45, %v4614_v49  ;;  %v704_v58 = vpop.f32.mrb[81].mxu0  ;;  %v1153_v59 = vpop.f32.mrb[81].mxu1  ;;  %7931 = vmatmul.mubr.msk.f32.gmra.mrb[186].mxu0 %vm203_vm0, %v8758_v60  ;;  %v703_v61 = vadd.f32 %v702_v52, %v9466_v9  ;;  %v1152_v63 = vadd.f32 %v1151_v53, %v9470_v10  ;;  %v8760_v45 = vld [vmem:[%s12295_s0 + $0xf8] sm:$0xff] }
 0x18d   :  { %v705_v2 = vadd.f32 %v704_v58, %v9474_v12  ;;  %v1154_v5 = vadd.f32 %v1153_v59, %v9478_v14  ;;  %7995 = vmatmul.mubr.msk.f32.gmra.mrb[186].mxu1 %vm203_vm0, %v8758_v60  ;;  %v5647_v8 = vadd.f32 %v5646_v46, %v4613_v56  ;;  %v5721_v11 = vadd.f32 %v5720_v47, %v4615_v57 }
 0x18e   :  { %1538 = vmatprep.mubr.f32.mxu0 %v8998_v0  ;;  %1987 = vmatprep.mubr.f32.mxu1 %v8998_v0  ;;  %v4628_v13 = vmax.f32 %v703_v61, 0.0  ;;  %v4630_v15 = vmax.f32 %v1152_v63, 0.0  ;;  %v8761_v63 = vld [vmem:[%s12295_s0 + $0x100] sm:$0xff] }
 0x18f   :  { %v4629_v16 = vmax.f32 %v705_v2, 0.0  ;;  %v4631_v17 = vmax.f32 %v1154_v5, 0.0  ;;  %v708_v18 = vpop.f32.mrb[82].mxu0  ;;  %v1157_v19 = vpop.f32.mrb[82].mxu1 }
 0x190   :  { %v709_v20 = vadd.f32 %v708_v18, %v9466_v9  ;;  %v1158_v21 = vadd.f32 %v1157_v19, %v9470_v10  ;;  %v710_v24 = vpop.f32.mrb[83].mxu0  ;;  %v1159_v25 = vpop.f32.mrb[83].mxu1  ;;  %7932 = vmatmul.mubr.msk.f32.gmra.mrb[188].mxu0 %vm203_vm0, %v8759_v26  ;;  %v5611_v29 = vadd.f32 %v5610_v54, %v4628_v13  ;;  %v5685_v30 = vadd.f32 %v5684_v55, %v4630_v15 }
 0x191   :  { %v5648_v31 = vadd.f32 %v5647_v8, %v4629_v16  ;;  %v5722_v32 = vadd.f32 %v5721_v11, %v4631_v17  ;;  %7996 = vmatmul.mubr.msk.f32.gmra.mrb[188].mxu1 %vm203_vm0, %v8759_v26  ;;  %v711_v35 = vadd.f32 %v710_v24, %v9474_v12  ;;  %v1160_v36 = vadd.f32 %v1159_v25, %v9478_v14 }
 0x192   :  { %v4644_v33 = vmax.f32 %v709_v20, 0.0  ;;  %v4646_v34 = vmax.f32 %v1158_v21, 0.0  ;;  %1544 = vmatprep.mubr.f32.mxu0 %v8998_v0  ;;  %1993 = vmatprep.mubr.f32.mxu1 %v8998_v0 }
 0x193   :  { %v714_v37 = vpop.f32.mrb[84].mxu0  ;;  %v1163_v38 = vpop.f32.mrb[84].mxu1  ;;  %v4645_v41 = vmax.f32 %v711_v35, 0.0  ;;  %v4647_v42 = vmax.f32 %v1160_v36, 0.0 }
 0x194   :  { %v5612_v39 = vadd.f32 %v5611_v29, %v4644_v33  ;;  %v5686_v40 = vadd.f32 %v5685_v30, %v4646_v34  ;;  %v716_v43 = vpop.f32.mrb[85].mxu0  ;;  %v1165_v44 = vpop.f32.mrb[85].mxu1  ;;  %7933 = vmatmul.mubr.msk.f32.gmra.mrb[190].mxu0 %vm203_vm0, %v8760_v45  ;;  %v715_v46 = vadd.f32 %v714_v37, %v9466_v9  ;;  %v1164_v47 = vadd.f32 %v1163_v38, %v9470_v10  ;;  %v8762_v30 = vld [vmem:[%s12295_s0 + $0x108] sm:$0xff]  ;;  %v118_v38 = vld [vmem:[%s12296_s1 + $0x78] sm:$0xff] }
 0x195   :  { %v717_v48 = vadd.f32 %v716_v43, %v9474_v12  ;;  %v1166_v49 = vadd.f32 %v1165_v44, %v9478_v14  ;;  %7997 = vmatmul.mubr.msk.f32.gmra.mrb[190].mxu1 %vm203_vm0, %v8760_v45  ;;  %v5649_v50 = vadd.f32 %v5648_v31, %v4645_v41  ;;  %v5723_v51 = vadd.f32 %v5722_v32, %v4647_v42  ;;  %v116_v37 = vld [vmem:[%s12296_s1 + $0x68] sm:$0xff] }
 0x196   :  { %1550 = vmatprep.mubr.f32.mxu0 %v8998_v0  ;;  %1999 = vmatprep.mubr.f32.mxu1 %v8998_v0  ;;  %v4660_v52 = vmax.f32 %v715_v46, 0.0  ;;  %v4662_v53 = vmax.f32 %v1164_v47, 0.0 }
 0x197   :  { %v4661_v54 = vmax.f32 %v717_v48, 0.0  ;;  %v4663_v55 = vmax.f32 %v1166_v49, 0.0  ;;  %v720_v56 = vpop.f32.mrb[86].mxu0  ;;  %v1169_v57 = vpop.f32.mrb[86].mxu1  ;;  %3090 = vmatprep.subr.mxu0 %v116_v37  ;;  %3539 = vmatprep.subr.mxu1 %v118_v38  ;;  %v8763_v49 = vld [vmem:[%s12295_s0 + $0x110] sm:$0xff] }
 0x198   :  { %v721_v58 = vadd.f32 %v720_v56, %v9466_v9  ;;  %v1170_v59 = vadd.f32 %v1169_v57, %v9470_v10  ;;  %v722_v60 = vpop.f32.mrb[87].mxu0  ;;  %v1171_v61 = vpop.f32.mrb[87].mxu1  ;;  %7934 = vmatmul.mubr.msk.f32.gmra.mrb[192].mxu0 %vm203_vm0, %v8761_v63  ;;  %v5613_v2 = vadd.f32 %v5612_v39, %v4660_v52  ;;  %v5687_v5 = vadd.f32 %v5686_v40, %v4662_v53 }
 0x199   :  { %v5650_v8 = vadd.f32 %v5649_v50, %v4661_v54  ;;  %v5724_v11 = vadd.f32 %v5723_v51, %v4663_v55  ;;  %7998 = vmatmul.mubr.msk.f32.gmra.mrb[192].mxu1 %vm203_vm0, %v8761_v63  ;;  %v723_v16 = vadd.f32 %v722_v60, %v9474_v12  ;;  %v1172_v17 = vadd.f32 %v1171_v61, %v9478_v14 }
 0x19a   :  { %v4676_v13 = vmax.f32 %v721_v58, 0.0  ;;  %v4678_v15 = vmax.f32 %v1170_v59, 0.0  ;;  %1556 = vmatprep.mubr.f32.mxu0 %v8998_v0  ;;  %2005 = vmatprep.mubr.f32.mxu1 %v8998_v0 }
 0x19b   :  { %v726_v18 = vpop.f32.mrb[88].mxu0  ;;  %v1175_v19 = vpop.f32.mrb[88].mxu1  ;;  %v4677_v24 = vmax.f32 %v723_v16, 0.0  ;;  %v4679_v25 = vmax.f32 %v1172_v17, 0.0 }
 0x19c   :  { %v5614_v20 = vadd.f32 %v5613_v2, %v4676_v13  ;;  %v5688_v21 = vadd.f32 %v5687_v5, %v4678_v15  ;;  %v728_v26 = vpop.f32.mrb[89].mxu0  ;;  %v1177_v29 = vpop.f32.mrb[89].mxu1  ;;  %7935 = vmatmul.mubr.msk.f32.gmra.mrb[194].mxu0 %vm203_vm0, %v8762_v30  ;;  %v727_v31 = vadd.f32 %v726_v18, %v9466_v9  ;;  %v1176_v32 = vadd.f32 %v1175_v19, %v9470_v10 }
 0x19d   :  { %v729_v33 = vadd.f32 %v728_v26, %v9474_v12  ;;  %v1178_v34 = vadd.f32 %v1177_v29, %v9478_v14  ;;  %7999 = vmatmul.mubr.msk.f32.gmra.mrb[194].mxu1 %vm203_vm0, %v8762_v30  ;;  %v5651_v35 = vadd.f32 %v5650_v8, %v4677_v24  ;;  %v5725_v36 = vadd.f32 %v5724_v11, %v4679_v25  ;;  %v8764_v11 = vld [vmem:[%s12295_s0 + $0x118] sm:$0xff] }
 0x19e   :  { %1562 = vmatprep.mubr.f32.mxu0 %v8998_v0  ;;  %2011 = vmatprep.mubr.f32.mxu1 %v8998_v0  ;;  %v4692_v39 = vmax.f32 %v727_v31, 0.0  ;;  %v4694_v40 = vmax.f32 %v1176_v32, 0.0 }
 0x19f   :  { %v4693_v41 = vmax.f32 %v729_v33, 0.0  ;;  %v4695_v42 = vmax.f32 %v1178_v34, 0.0  ;;  %v732_v43 = vpop.f32.mrb[90].mxu0  ;;  %v1181_v44 = vpop.f32.mrb[90].mxu1  ;;  %v8765_v34 = vld [vmem:[%s12295_s0 + $0x120] sm:$0xff] }
 0x1a0   :  { %v733_v45 = vadd.f32 %v732_v43, %v9466_v9  ;;  %v1182_v46 = vadd.f32 %v1181_v44, %v9470_v10  ;;  %v734_v47 = vpop.f32.mrb[91].mxu0  ;;  %v1183_v48 = vpop.f32.mrb[91].mxu1  ;;  %7936 = vmatmul.mubr.msk.f32.gmra.mrb[196].mxu0 %vm203_vm0, %v8763_v49  ;;  %v5615_v50 = vadd.f32 %v5614_v20, %v4692_v39  ;;  %v5689_v51 = vadd.f32 %v5688_v21, %v4694_v40 }
 0x1a1   :  { %v5652_v52 = vadd.f32 %v5651_v35, %v4693_v41  ;;  %v5726_v53 = vadd.f32 %v5725_v36, %v4695_v42  ;;  %8000 = vmatmul.mubr.msk.f32.gmra.mrb[196].mxu1 %vm203_vm0, %v8763_v49  ;;  %v735_v56 = vadd.f32 %v734_v47, %v9474_v12  ;;  %v1184_v57 = vadd.f32 %v1183_v48, %v9478_v14 }
 0x1a2   :  { %v4708_v54 = vmax.f32 %v733_v45, 0.0  ;;  %v4710_v55 = vmax.f32 %v1182_v46, 0.0  ;;  %1568 = vmatprep.mubr.f32.mxu0 %v8998_v0  ;;  %2017 = vmatprep.mubr.f32.mxu1 %v8998_v0 }
 0x1a3   :  { %v738_v58 = vpop.f32.mrb[92].mxu0  ;;  %v1187_v59 = vpop.f32.mrb[92].mxu1  ;;  %v4709_v63 = vmax.f32 %v735_v56, 0.0  ;;  %v4711_v2 = vmax.f32 %v1184_v57, 0.0 }
 0x1a4   :  { %v5616_v60 = vadd.f32 %v5615_v50, %v4708_v54  ;;  %v5690_v61 = vadd.f32 %v5689_v51, %v4710_v55  ;;  %v740_v5 = vpop.f32.mrb[93].mxu0  ;;  %v1189_v8 = vpop.f32.mrb[93].mxu1  ;;  %7937 = vmatmul.mubr.msk.f32.gmra.mrb[198].mxu0 %vm203_vm0, %v8764_v11  ;;  %v739_v13 = vadd.f32 %v738_v58, %v9466_v9  ;;  %v1188_v15 = vadd.f32 %v1187_v59, %v9470_v10  ;;  %v8766_v51 = vld [vmem:[%s12295_s0 + $0x128] sm:$0xff] }
 0x1a5   :  { %v741_v16 = vadd.f32 %v740_v5, %v9474_v12  ;;  %v1190_v17 = vadd.f32 %v1189_v8, %v9478_v14  ;;  %8001 = vmatmul.mubr.msk.f32.gmra.mrb[198].mxu1 %vm203_vm0, %v8764_v11  ;;  %v5653_v18 = vadd.f32 %v5652_v52, %v4709_v63  ;;  %v5727_v19 = vadd.f32 %v5726_v53, %v4711_v2 }
 0x1a6   :  { %1574 = vmatprep.mubr.f32.mxu0 %v8998_v0  ;;  %2023 = vmatprep.mubr.f32.mxu1 %v8998_v0  ;;  %v4724_v20 = vmax.f32 %v739_v13, 0.0  ;;  %v4726_v21 = vmax.f32 %v1188_v15, 0.0  ;;  %v8767_v15 = vld [vmem:[%s12295_s0 + $0x130] sm:$0xff] }
 0x1a7   :  { %v4725_v24 = vmax.f32 %v741_v16, 0.0  ;;  %v4727_v25 = vmax.f32 %v1190_v17, 0.0  ;;  %v744_v26 = vpop.f32.mrb[94].mxu0  ;;  %v1193_v29 = vpop.f32.mrb[94].mxu1 }
 0x1a8   :  { %v745_v30 = vadd.f32 %v744_v26, %v9466_v9  ;;  %v1194_v31 = vadd.f32 %v1193_v29, %v9470_v10  ;;  %v746_v32 = vpop.f32.mrb[95].mxu0  ;;  %v1195_v33 = vpop.f32.mrb[95].mxu1  ;;  %7938 = vmatmul.mubr.msk.f32.gmra.mrb[200].mxu0 %vm203_vm0, %v8765_v34  ;;  %v5617_v35 = vadd.f32 %v5616_v60, %v4724_v20  ;;  %v5691_v36 = vadd.f32 %v5690_v61, %v4726_v21 }
 0x1a9   :  { %v5654_v37 = vadd.f32 %v5653_v18, %v4725_v24  ;;  %v5728_v38 = vadd.f32 %v5727_v19, %v4727_v25  ;;  %8002 = vmatmul.mubr.msk.f32.gmra.mrb[200].mxu1 %vm203_vm0, %v8765_v34  ;;  %v747_v41 = vadd.f32 %v746_v32, %v9474_v12  ;;  %v1196_v42 = vadd.f32 %v1195_v33, %v9478_v14 }
 0x1aa   :  { %v4740_v39 = vmax.f32 %v745_v30, 0.0  ;;  %v4742_v40 = vmax.f32 %v1194_v31, 0.0  ;;  %1580 = vmatprep.mubr.f32.mxu0 %v8998_v0  ;;  %2029 = vmatprep.mubr.f32.mxu1 %v8998_v0 }
 0x1ab   :  { %v750_v43 = vpop.f32.mrb[96].mxu0  ;;  %v1199_v44 = vpop.f32.mrb[96].mxu1  ;;  %v4741_v47 = vmax.f32 %v747_v41, 0.0  ;;  %v4743_v48 = vmax.f32 %v1196_v42, 0.0 }
 0x1ac   :  { %v5618_v45 = vadd.f32 %v5617_v35, %v4740_v39  ;;  %v5692_v46 = vadd.f32 %v5691_v36, %v4742_v40  ;;  %v752_v49 = vpop.f32.mrb[97].mxu0  ;;  %v1201_v50 = vpop.f32.mrb[97].mxu1  ;;  %7939 = vmatmul.mubr.msk.f32.gmra.mrb[202].mxu0 %vm203_vm0, %v8766_v51  ;;  %v751_v52 = vadd.f32 %v750_v43, %v9466_v9  ;;  %v1200_v53 = vadd.f32 %v1199_v44, %v9470_v10  ;;  %v8768_v36 = vld [vmem:[%s12295_s0 + $0x138] sm:$0xff] }
 0x1ad   :  { %v753_v54 = vadd.f32 %v752_v49, %v9474_v12  ;;  %v1202_v55 = vadd.f32 %v1201_v50, %v9478_v14  ;;  %8003 = vmatmul.mubr.msk.f32.gmra.mrb[202].mxu1 %vm203_vm0, %v8766_v51  ;;  %v5655_v56 = vadd.f32 %v5654_v37, %v4741_v47  ;;  %v5729_v57 = vadd.f32 %v5728_v38, %v4743_v48 }
 0x1ae   :  { %1586 = vmatprep.mubr.f32.mxu0 %v8998_v0  ;;  %2035 = vmatprep.mubr.f32.mxu1 %v8998_v0  ;;  %v4756_v58 = vmax.f32 %v751_v52, 0.0  ;;  %v4758_v59 = vmax.f32 %v1200_v53, 0.0  ;;  %v8769_v53 = vld [vmem:[%s12295_s0 + $0x140] sm:$0xff] }
 0x1af   :  { %v4757_v60 = vmax.f32 %v753_v54, 0.0  ;;  %v4759_v61 = vmax.f32 %v1202_v55, 0.0  ;;  %v756_v63 = vpop.f32.mrb[98].mxu0  ;;  %v1205_v2 = vpop.f32.mrb[98].mxu1 }
 0x1b0   :  { %v757_v5 = vadd.f32 %v756_v63, %v9466_v9  ;;  %v1206_v8 = vadd.f32 %v1205_v2, %v9470_v10  ;;  %v758_v11 = vpop.f32.mrb[99].mxu0  ;;  %v1207_v13 = vpop.f32.mrb[99].mxu1  ;;  %7940 = vmatmul.mubr.msk.f32.gmra.mrb[204].mxu0 %vm203_vm0, %v8767_v15  ;;  %v5619_v16 = vadd.f32 %v5618_v45, %v4756_v58  ;;  %v5693_v17 = vadd.f32 %v5692_v46, %v4758_v59 }
 0x1b1   :  { %v5656_v18 = vadd.f32 %v5655_v56, %v4757_v60  ;;  %v5730_v19 = vadd.f32 %v5729_v57, %v4759_v61  ;;  %8004 = vmatmul.mubr.msk.f32.gmra.mrb[204].mxu1 %vm203_vm0, %v8767_v15  ;;  %v759_v24 = vadd.f32 %v758_v11, %v9474_v12  ;;  %v1208_v25 = vadd.f32 %v1207_v13, %v9478_v14 }
 0x1b2   :  { %v4772_v20 = vmax.f32 %v757_v5, 0.0  ;;  %v4774_v21 = vmax.f32 %v1206_v8, 0.0  ;;  %1592 = vmatprep.mubr.f32.mxu0 %v8998_v0  ;;  %2041 = vmatprep.mubr.f32.mxu1 %v8998_v0 }
 0x1b3   :  { %v762_v26 = vpop.f32.mrb[100].mxu0  ;;  %v1211_v29 = vpop.f32.mrb[100].mxu1  ;;  %v4773_v32 = vmax.f32 %v759_v24, 0.0  ;;  %v4775_v33 = vmax.f32 %v1208_v25, 0.0  ;;  %v5043_v24 = vrot.slane %v9835_v22, 4 }
 0x1b4   :  { %v5620_v30 = vadd.f32 %v5619_v16, %v4772_v20  ;;  %v5694_v31 = vadd.f32 %v5693_v17, %v4774_v21  ;;  %v764_v34 = vpop.f32.mrb[101].mxu0  ;;  %v1213_v35 = vpop.f32.mrb[101].mxu1  ;;  %7941 = vmatmul.mubr.msk.f32.gmra.mrb[206].mxu0 %vm203_vm0, %v8768_v36  ;;  %v763_v37 = vadd.f32 %v762_v26, %v9466_v9  ;;  %v1212_v38 = vadd.f32 %v1211_v29, %v9470_v10  ;;  %v8770_v17 = vld [vmem:[%s12295_s0 + $0x148] sm:$0xff] }
 0x1b5   :  { %v765_v39 = vadd.f32 %v764_v34, %v9474_v12  ;;  %v1214_v40 = vadd.f32 %v1213_v35, %v9478_v14  ;;  %8005 = vmatmul.mubr.msk.f32.gmra.mrb[206].mxu1 %vm203_vm0, %v8768_v36  ;;  %v5657_v41 = vadd.f32 %v5656_v18, %v4773_v32  ;;  %v5731_v42 = vadd.f32 %v5730_v19, %v4775_v33 }
 0x1b6   :  { %1598 = vmatprep.mubr.f32.mxu0 %v8998_v0  ;;  %2047 = vmatprep.mubr.f32.mxu1 %v8998_v0  ;;  %v4788_v43 = vmax.f32 %v763_v37, 0.0  ;;  %v4790_v44 = vmax.f32 %v1212_v38, 0.0  ;;  %v5117_v35 = vrot.slane %v9837_v23, 4 }
 0x1b7   :  { %v4789_v45 = vmax.f32 %v765_v39, 0.0  ;;  %v4791_v46 = vmax.f32 %v1214_v40, 0.0  ;;  %v768_v47 = vpop.f32.mrb[102].mxu0  ;;  %v1217_v48 = vpop.f32.mrb[102].mxu1  ;;  %v8771_v40 = vld [vmem:[%s12295_s0 + $0x150] sm:$0xff] }
 0x1b8   :  { %v769_v49 = vadd.f32 %v768_v47, %v9466_v9  ;;  %v1218_v50 = vadd.f32 %v1217_v48, %v9470_v10  ;;  %v770_v51 = vpop.f32.mrb[103].mxu0  ;;  %v1219_v52 = vpop.f32.mrb[103].mxu1  ;;  %7942 = vmatmul.mubr.msk.f32.gmra.mrb[208].mxu0 %vm203_vm0, %v8769_v53  ;;  %v5621_v54 = vadd.f32 %v5620_v30, %v4788_v43  ;;  %v5695_v55 = vadd.f32 %v5694_v31, %v4790_v44 }
 0x1b9   :  { %v5658_v56 = vadd.f32 %v5657_v41, %v4789_v45  ;;  %v5732_v57 = vadd.f32 %v5731_v42, %v4791_v46  ;;  %8006 = vmatmul.mubr.msk.f32.gmra.mrb[208].mxu1 %vm203_vm0, %v8769_v53  ;;  %v771_v60 = vadd.f32 %v770_v51, %v9474_v12  ;;  %v1220_v61 = vadd.f32 %v1219_v52, %v9478_v14 }
 0x1ba   :  { %v4804_v58 = vmax.f32 %v769_v49, 0.0  ;;  %v4806_v59 = vmax.f32 %v1218_v50, 0.0  ;;  %1604 = vmatprep.mubr.f32.mxu0 %v8998_v0  ;;  %2053 = vmatprep.mubr.f32.mxu1 %v8998_v0  ;;  %v10094_v49 = vadd.f32 %v5043_v24, %v9835_v22 }
 0x1bb   :  { %v774_v63 = vpop.f32.mrb[104].mxu0  ;;  %v1223_v2 = vpop.f32.mrb[104].mxu1  ;;  %v4805_v11 = vmax.f32 %v771_v60, 0.0  ;;  %v4807_v13 = vmax.f32 %v1220_v61, 0.0 }
 0x1bc   :  { %v5622_v5 = vadd.f32 %v5621_v54, %v4804_v58  ;;  %v5696_v8 = vadd.f32 %v5695_v55, %v4806_v59  ;;  %v776_v15 = vpop.f32.mrb[105].mxu0  ;;  %v1225_v16 = vpop.f32.mrb[105].mxu1  ;;  %7943 = vmatmul.mubr.msk.f32.gmra.mrb[210].mxu0 %vm203_vm0, %v8770_v17  ;;  %v775_v18 = vadd.f32 %v774_v63, %v9466_v9  ;;  %v1224_v19 = vadd.f32 %v1223_v2, %v9470_v10  ;;  %v8772_v58 = vld [vmem:[%s12295_s0 + $0x158] sm:$0xff] }
 0x1bd   :  { %v777_v20 = vadd.f32 %v776_v15, %v9474_v12  ;;  %v1226_v21 = vadd.f32 %v1225_v16, %v9478_v14  ;;  %8007 = vmatmul.mubr.msk.f32.gmra.mrb[210].mxu1 %vm203_vm0, %v8770_v17  ;;  %v5659_v25 = vadd.f32 %v5658_v56, %v4805_v11  ;;  %v5733_v26 = vadd.f32 %v5732_v57, %v4807_v13 }
 0x1be   :  { %1610 = vmatprep.mubr.f32.mxu0 %v8998_v0  ;;  %2059 = vmatprep.mubr.f32.mxu1 %v8998_v0  ;;  %v4820_v29 = vmax.f32 %v775_v18, 0.0  ;;  %v4822_v30 = vmax.f32 %v1224_v19, 0.0  ;;  %v5118_v63 = vadd.f32 %v5117_v35, %v9837_v23  ;;  %v5080_v35 = vrot.slane %v9843_v27, 4 }
 0x1bf   :  { %v4821_v31 = vmax.f32 %v777_v20, 0.0  ;;  %v4823_v32 = vmax.f32 %v1226_v21, 0.0  ;;  %v780_v33 = vpop.f32.mrb[106].mxu0  ;;  %v1229_v34 = vpop.f32.mrb[106].mxu1  ;;  %v8773_v20 = vld [vmem:[%s12295_s0 + $0x160] sm:$0xff] }
 0x1c0   :  { %v781_v36 = vadd.f32 %v780_v33, %v9466_v9  ;;  %v1230_v37 = vadd.f32 %v1229_v34, %v9470_v10  ;;  %v782_v38 = vpop.f32.mrb[107].mxu0  ;;  %v1231_v39 = vpop.f32.mrb[107].mxu1  ;;  %7944 = vmatmul.mubr.msk.f32.gmra.mrb[212].mxu0 %vm203_vm0, %v8771_v40  ;;  %v5623_v41 = vadd.f32 %v5622_v5, %v4820_v29  ;;  %v5697_v42 = vadd.f32 %v5696_v8, %v4822_v30 }
 0x1c1   :  { %v5660_v43 = vadd.f32 %v5659_v25, %v4821_v31  ;;  %v5734_v44 = vadd.f32 %v5733_v26, %v4823_v32  ;;  %8008 = vmatmul.mubr.msk.f32.gmra.mrb[212].mxu1 %vm203_vm0, %v8771_v40  ;;  %v783_v47 = vadd.f32 %v782_v38, %v9474_v12  ;;  %v1232_v48 = vadd.f32 %v1231_v39, %v9478_v14 }
 0x1c2   :  { %v4836_v45 = vmax.f32 %v781_v36, 0.0  ;;  %v4838_v46 = vmax.f32 %v1230_v37, 0.0  ;;  %1616 = vmatprep.mubr.f32.mxu0 %v8998_v0  ;;  %2065 = vmatprep.mubr.f32.mxu1 %v8998_v0  ;;  %v5045_v33 = vrot.slane %v10094_v49, 2  ;;  %v5119_v34 = vrot.slane %v5118_v63, 2 }
 0x1c3   :  { %v786_v50 = vpop.f32.mrb[108].mxu0  ;;  %v1235_v51 = vpop.f32.mrb[108].mxu1  ;;  %v4837_v54 = vmax.f32 %v783_v47, 0.0  ;;  %v4839_v55 = vmax.f32 %v1232_v48, 0.0 }
 0x1c4   :  { %v5624_v52 = vadd.f32 %v5623_v41, %v4836_v45  ;;  %v5698_v53 = vadd.f32 %v5697_v42, %v4838_v46  ;;  %v788_v56 = vpop.f32.mrb[109].mxu0  ;;  %v1237_v57 = vpop.f32.mrb[109].mxu1  ;;  %7945 = vmatmul.mubr.msk.f32.gmra.mrb[214].mxu0 %vm203_vm0, %v8772_v58  ;;  %v787_v59 = vadd.f32 %v786_v50, %v9466_v9  ;;  %v1236_v60 = vadd.f32 %v1235_v51, %v9470_v10 }
 0x1c5   :  { %v789_v22 = vadd.f32 %v788_v56, %v9474_v12  ;;  %v1238_v61 = vadd.f32 %v1237_v57, %v9478_v14  ;;  %8009 = vmatmul.mubr.msk.f32.gmra.mrb[214].mxu1 %vm203_vm0, %v8772_v58  ;;  %v5661_v2 = vadd.f32 %v5660_v43, %v4837_v54  ;;  %v5735_v5 = vadd.f32 %v5734_v44, %v4839_v55  ;;  %v8774_v43 = vld [vmem:[%s12295_s0 + $0x168] sm:$0xff] }
 0x1c6   :  { %1622 = vmatprep.mubr.f32.mxu0 %v8998_v0  ;;  %2071 = vmatprep.mubr.f32.mxu1 %v8998_v0  ;;  %v4852_v8 = vmax.f32 %v787_v59, 0.0  ;;  %v4854_v11 = vmax.f32 %v1236_v60, 0.0  ;;  %v5154_v44 = vrot.slane %v9845_v28, 4  ;;  %v5046_v54 = vadd.f32 %v5045_v33, %v10094_v49 }
 0x1c7   :  { %v4853_v13 = vmax.f32 %v789_v22, 0.0  ;;  %v4855_v15 = vmax.f32 %v1238_v61, 0.0  ;;  %v792_v16 = vpop.f32.mrb[110].mxu0  ;;  %v10134_v59 = vadd.f32 %v5119_v34, %v5118_v63  ;;  %v8776_v34 = vld [vmem:[%s12295_s0 + $0x178] sm:$0xff] }
 0x1c8   :  { %v793_v17 = vadd.f32 %v792_v16, %v9466_v9  ;;  %v1241_v18 = vpop.f32.mrb[110].mxu1  ;;  %v794_v19 = vpop.f32.mrb[111].mxu0  ;;  %7946 = vmatmul.mubr.msk.f32.gmra.mrb[216].mxu0 %vm203_vm0, %v8773_v20  ;;  %v5625_v23 = vadd.f32 %v5624_v52, %v4852_v8  ;;  %v5699_v21 = vadd.f32 %v5698_v53, %v4854_v11  ;;  %v141_v8 = vsub.s32 4, %v9441_v1 }
 0x1c9   :  { %v5662_v24 = vadd.f32 %v5661_v2, %v4853_v13  ;;  %v5736_v25 = vadd.f32 %v5735_v5, %v4855_v15  ;;  %v1243_v26 = vpop.f32.mrb[111].mxu1  ;;  %8010 = vmatmul.mubr.msk.f32.gmra.mrb[216].mxu1 %vm203_vm0, %v8773_v20  ;;  %v1242_v30 = vadd.f32 %v1241_v18, %v9470_v10  ;;  %v795_v31 = vadd.f32 %v794_v19, %v9474_v12  ;;  %v8775_v5 = vld [vmem:[%s12295_s0 + $0x170] sm:$0xff] }
 0x1ca   :  { %v4868_v29 = vmax.f32 %v793_v17, 0.0  ;;  %v1244_v32 = vadd.f32 %v1243_v26, %v9478_v14  ;;  %1628 = vmatprep.mubr.f32.mxu0 %v8998_v0  ;;  %2077 = vmatprep.mubr.f32.mxu1 %v8998_v0  ;;  %v5047_v20 = vrot.slane %v5046_v54, 1 }
 0x1cb   :  { %v798_v36 = vpop.f32.mrb[112].mxu0  ;;  %v4870_v38 = vmax.f32 %v1242_v30, 0.0  ;;  %v4869_v39 = vmax.f32 %v795_v31, 0.0 }
 0x1cc   :  { %v5626_v37 = vadd.f32 %v5625_v23, %v4868_v29  ;;  %v4871_v40 = vmax.f32 %v1244_v32, 0.0  ;;  %v1247_v41 = vpop.f32.mrb[112].mxu1  ;;  %v800_v42 = vpop.f32.mrb[113].mxu0  ;;  %7947 = vmatmul.mubr.msk.f32.gmra.mrb[218].mxu0 %vm203_vm0, %v8774_v43  ;;  %v799_v45 = vadd.f32 %v798_v36, %v9466_v9  ;;  %v5081_v23 = vadd.f32 %v5080_v35, %v9843_v27 }
 0x1cd   :  { %v1248_v46 = vadd.f32 %v1247_v41, %v9470_v10  ;;  %v801_v47 = vadd.f32 %v800_v42, %v9474_v12  ;;  %v1249_v48 = vpop.f32.mrb[113].mxu1  ;;  %8011 = vmatmul.mubr.msk.f32.gmra.mrb[218].mxu1 %vm203_vm0, %v8774_v43  ;;  %1634 = vmatprep.mubr.f32.mxu0 %v8998_v0  ;;  %v5700_v50 = vadd.f32 %v5699_v21, %v4870_v38  ;;  %v5121_v36 = vrot.slane %v10134_v59, 1 }
 0x1ce   :  { %v5663_v51 = vadd.f32 %v5662_v24, %v4869_v39  ;;  %v5737_v52 = vadd.f32 %v5736_v25, %v4871_v40  ;;  %v1250_v53 = vadd.f32 %v1249_v48, %v9478_v14  ;;  %2083 = vmatprep.mubr.f32.mxu1 %v8998_v0  ;;  %v4884_v55 = vmax.f32 %v799_v45, 0.0 }
 0x1cf   :  { %v4886_v56 = vmax.f32 %v1248_v46, 0.0  ;;  %v4885_v57 = vmax.f32 %v801_v47, 0.0  ;;  %v804_v58 = vpop.f32.mrb[114].mxu0  ;;  %v5155_v21 = vadd.f32 %v5154_v44, %v9845_v28  ;;  %v5048_v42 = vadd.f32 %v5047_v20, %v5046_v54 }
 0x1d0   :  { %v4887_v60 = vmax.f32 %v1250_v53, 0.0  ;;  %v805_v22 = vadd.f32 %v804_v58, %v9466_v9  ;;  %v1253_v61 = vpop.f32.mrb[114].mxu1  ;;  %v806_v2 = vpop.f32.mrb[115].mxu0  ;;  %7948 = vmatmul.mubr.msk.f32.gmra.mrb[220].mxu0 %vm203_vm0, %v8775_v5  ;;  %v5627_v49 = vadd.f32 %v5626_v37, %v4884_v55  ;;  %v5082_v43 = vrot.slane %v5081_v23, 2  ;;  %v8777_v55 = vld [vmem:[%s12295_s0 + $0x180] sm:$0xff] }
 0x1d1   :  { %v5701_v11 = vadd.f32 %v5700_v50, %v4886_v56  ;;  %v5664_v13 = vadd.f32 %v5663_v51, %v4885_v57  ;;  %v1254_v15 = vadd.f32 %v1253_v61, %v9470_v10  ;;  %v1255_v63 = vpop.f32.mrb[115].mxu1  ;;  %8012 = vmatmul.mubr.msk.f32.gmra.mrb[220].mxu1 %vm203_vm0, %v8775_v5  ;;  %v807_v18 = vadd.f32 %v806_v2, %v9474_v12 }
 0x1d2   :  { %v5738_v16 = vadd.f32 %v5737_v52, %v4887_v60  ;;  %v4900_v17 = vmax.f32 %v805_v22, 0.0  ;;  %v1256_v19 = vadd.f32 %v1255_v63, %v9478_v14  ;;  %1640 = vmatprep.mubr.f32.mxu0 %v8998_v0  ;;  %2089 = vmatprep.mubr.f32.mxu1 %v8998_v0  ;;  %v5156_v47 = vrot.slane %v5155_v21, 2 }
 0x1d3   :  { %v4902_v24 = vmax.f32 %v1254_v15, 0.0  ;;  %v810_v25 = vpop.f32.mrb[116].mxu0  ;;  %v4901_v29 = vmax.f32 %v807_v18, 0.0  ;;  %v5122_v22 = vadd.f32 %v5121_v36, %v10134_v59 }
 0x1d4   :  { %v5628_v26 = vadd.f32 %v5627_v49, %v4900_v17  ;;  %v4903_v30 = vmax.f32 %v1256_v19, 0.0  ;;  %v811_v31 = vadd.f32 %v810_v25, %v9466_v9  ;;  %v1259_v32 = vpop.f32.mrb[116].mxu1  ;;  %v812_v33 = vpop.f32.mrb[117].mxu0  ;;  %7949 = vmatmul.mubr.msk.f32.gmra.mrb[222].mxu0 %vm203_vm0, %v8776_v34  ;;  %v6197_v49 = vmul.f32 0.00390625, %v5048_v42 }
 0x1d5   :  { %v5702_v27 = vadd.f32 %v5701_v11, %v4902_v24  ;;  %v1260_v28 = vadd.f32 %v1259_v32, %v9470_v10  ;;  %v813_v35 = vadd.f32 %v812_v33, %v9474_v12  ;;  %v1261_v37 = vpop.f32.mrb[117].mxu1  ;;  %8013 = vmatmul.mubr.msk.f32.gmra.mrb[222].mxu1 %vm203_vm0, %v8776_v34  ;;  %1646 = vmatprep.mubr.f32.mxu0 %v8998_v0  ;;  %v8778_v24 = vld [vmem:[%s12295_s0 + $0x188] sm:$0xff] }
 0x1d6   :  { %v5665_v38 = vadd.f32 %v5664_v13, %v4901_v29  ;;  %v5739_v39 = vadd.f32 %v5738_v16, %v4903_v30  ;;  %v4916_v40 = vmax.f32 %v811_v31, 0.0  ;;  %v1262_v41 = vadd.f32 %v1261_v37, %v9478_v14  ;;  %2095 = vmatprep.mubr.f32.mxu1 %v8998_v0 }
 0x1d7   :  { %v4918_v44 = vmax.f32 %v1260_v28, 0.0  ;;  %v4917_v45 = vmax.f32 %v813_v35, 0.0  ;;  %v816_v46 = vpop.f32.mrb[118].mxu0  ;;  %v10174_v11 = vadd.f32 %v5082_v43, %v5081_v23  ;;  %v10176_v16 = vadd.f32 %v5156_v47, %v5155_v21  ;;  %v8779_v43 = vld [vmem:[%s12295_s0 + $0x190] sm:$0xff] }
 0x1d8   :  { %v5629_v48 = vadd.f32 %v5628_v26, %v4916_v40  ;;  %v4919_v50 = vmax.f32 %v1262_v41, 0.0  ;;  %v817_v51 = vadd.f32 %v816_v46, %v9466_v9  ;;  %v1265_v52 = vpop.f32.mrb[118].mxu1  ;;  %v818_v53 = vpop.f32.mrb[119].mxu0  ;;  %7950 = vmatmul.mubr.msk.f32.gmra.mrb[224].mxu0 %vm203_vm0, %v8777_v55  ;;  %v10186_v30 = vmul.f32 0.00390625, %v5122_v22 }
 0x1d9   :  { %v5703_v56 = vadd.f32 %v5702_v27, %v4918_v44  ;;  %v5666_v57 = vadd.f32 %v5665_v38, %v4917_v45  ;;  %v1266_v54 = vadd.f32 %v1265_v52, %v9470_v10  ;;  %v819_v58 = vadd.f32 %v818_v53, %v9474_v12  ;;  %v1267_v60 = vpop.f32.mrb[119].mxu1  ;;  %8014 = vmatmul.mubr.msk.f32.gmra.mrb[224].mxu1 %vm203_vm0, %v8777_v55 }
 0x1da   :  { %v5740_v61 = vadd.f32 %v5739_v39, %v4919_v50  ;;  %v4932_v2 = vmax.f32 %v817_v51, 0.0  ;;  %v1268_v5 = vadd.f32 %v1267_v60, %v9478_v14  ;;  %1652 = vmatprep.mubr.f32.mxu0 %v8998_v0  ;;  %2101 = vmatprep.mubr.f32.mxu1 %v8998_v0  ;;  %v6229_v34 = vpack.c.bf16 %v6197_v49, %v6197_v49  ;;  %v8780_v49 = vld [vmem:[%s12295_s0 + $0x198] sm:$0xff] }
 0x1db   :  { %v4934_v13 = vmax.f32 %v1266_v54, 0.0  ;;  %v4933_v15 = vmax.f32 %v819_v58, 0.0  ;;  %v822_v63 = vpop.f32.mrb[120].mxu0  ;;  %v5084_v36 = vrot.slane %v10174_v11, 1  ;;  %v5158_v37 = vrot.slane %v10176_v16, 1 }
 0x1dc   :  { %v5630_v17 = vadd.f32 %v5629_v48, %v4932_v2  ;;  %v4935_v18 = vmax.f32 %v1268_v5, 0.0  ;;  %v823_v59 = vadd.f32 %v822_v63, %v9466_v9  ;;  %v1271_v19 = vpop.f32.mrb[120].mxu1  ;;  %v824_v20 = vpop.f32.mrb[121].mxu0  ;;  %7951 = vmatmul.mubr.msk.f32.gmra.mrb[226].mxu0 %vm203_vm0, %v8778_v24  ;;  %v6231_v50 = vpack.c.bf16 %v10186_v30, %v10186_v30 }
 0x1dd   :  { %v5704_v25 = vadd.f32 %v5703_v56, %v4934_v13  ;;  %v5667_v23 = vadd.f32 %v5666_v57, %v4933_v15  ;;  %v1272_v26 = vadd.f32 %v1271_v19, %v9470_v10  ;;  %v825_v29 = vadd.f32 %v824_v20, %v9474_v12  ;;  %v1273_v21 = vpop.f32.mrb[121].mxu1  ;;  %8015 = vmatmul.mubr.msk.f32.gmra.mrb[226].mxu1 %vm203_vm0, %v8778_v24 }
 0x1de   :  { %v5741_v31 = vadd.f32 %v5740_v61, %v4935_v18  ;;  %v4948_v32 = vmax.f32 %v823_v59, 0.0  ;;  %v1274_v33 = vadd.f32 %v1273_v21, %v9478_v14  ;;  %1658 = vmatprep.mubr.f32.mxu0 %v8998_v0  ;;  %2107 = vmatprep.mubr.f32.mxu1 %v8998_v0  ;;  %v10206_v55 = vunpack.c.l.b16 %v6229_v34  ;;  %v8781_v21 = vld [vmem:[%s12297_s2] sm:$0xff] }
 0x1df   :  { %v4950_v27 = vmax.f32 %v1272_v26, 0.0  ;;  %v4949_v28 = vmax.f32 %v825_v29, 0.0  ;;  %v828_v35 = vpop.f32.mrb[122].mxu0  ;;  %v145_v58 = vsub.s32 5, %v9441_v1  ;;  %v149_v13 = vsub.s32 6, %v9441_v1 }
 0x1e0   :  { %v5631_v38 = vadd.f32 %v5630_v17, %v4948_v32  ;;  %v4951_v39 = vmax.f32 %v1274_v33, 0.0  ;;  %v829_v40 = vadd.f32 %v828_v35, %v9466_v9  ;;  %v1277_v41 = vpop.f32.mrb[122].mxu1  ;;  %v830_v42 = vpop.f32.mrb[123].mxu0  ;;  %7952 = vmatmul.mubr.msk.f32.gmra.mrb[228].mxu0 %vm203_vm0, %v8779_v43  ;;  %v10227_v30 = vrot.slane %v8781_v21, %v141_v8  ;;  %v8782_v35 = vld [vmem:[%s12295_s0 + $0x1a0] sm:$0xff] }
 0x1e1   :  { %v5705_v44 = vadd.f32 %v5704_v25, %v4950_v27  ;;  %v5668_v45 = vadd.f32 %v5667_v23, %v4949_v28  ;;  %v1278_v46 = vadd.f32 %v1277_v41, %v9470_v10  ;;  %v831_v47 = vadd.f32 %v830_v42, %v9474_v12  ;;  %v1279_v48 = vpop.f32.mrb[123].mxu1  ;;  %8016 = vmatmul.mubr.msk.f32.gmra.mrb[228].mxu1 %vm203_vm0, %v8779_v43 }
 0x1e2   :  { %v5742_v51 = vadd.f32 %v5741_v31, %v4951_v39  ;;  %v4964_v52 = vmax.f32 %v829_v40, 0.0  ;;  %v1280_v53 = vadd.f32 %v1279_v48, %v9478_v14  ;;  %1664 = vmatprep.mubr.f32.mxu0 %v8998_v0  ;;  %2113 = vmatprep.mubr.f32.mxu1 %v8998_v0  ;;  %v153_v25 = vsub.s32 7, %v9441_v1 }
 0x1e3   :  { %v4966_v56 = vmax.f32 %v1278_v46, 0.0  ;;  %v4965_v57 = vmax.f32 %v831_v47, 0.0  ;;  %v834_v54 = vpop.f32.mrb[124].mxu0  ;;  %v10231_v31 = vrot.slane %v8781_v21, %v145_v58  ;;  %v10252_v47 = vunpack.c.l.b16 %v6231_v50 }
 0x1e4   :  { %v5632_v60 = vadd.f32 %v5631_v38, %v4964_v52  ;;  %v4967_v22 = vmax.f32 %v1280_v53, 0.0  ;;  %v835_v61 = vadd.f32 %v834_v54, %v9466_v9  ;;  %v1283_v2 = vpop.f32.mrb[124].mxu1  ;;  %v836_v5 = vpop.f32.mrb[125].mxu0  ;;  %7953 = vmatmul.mubr.msk.f32.gmra.mrb[230].mxu0 %vm203_vm0, %v8780_v49  ;;  %v10240_v38 = vrot.slane %v8781_v21, %v149_v13 }
 0x1e5   :  { %v5706_v15 = vadd.f32 %v5705_v44, %v4966_v56  ;;  %v5669_v63 = vadd.f32 %v5668_v45, %v4965_v57  ;;  %v1284_v17 = vadd.f32 %v1283_v2, %v9470_v10  ;;  %v837_v18 = vadd.f32 %v836_v5, %v9474_v12  ;;  %v1285_v59 = vpop.f32.mrb[125].mxu1  ;;  %8017 = vmatmul.mubr.msk.f32.gmra.mrb[230].mxu1 %vm203_vm0, %v8780_v49  ;;  %v8783_v57 = vld [vmem:[%s12295_s0 + $0x1a8] sm:$0xff] }
 0x1e6   :  { %v5743_v19 = vadd.f32 %v5742_v51, %v4967_v22  ;;  %v4980_v20 = vmax.f32 %v835_v61, 0.0  ;;  %v1286_v24 = vadd.f32 %v1285_v59, %v9478_v14  ;;  %1670 = vmatprep.mubr.f32.mxu0 %v8998_v0  ;;  %2119 = vmatprep.mubr.f32.mxu1 %v8998_v0  ;;  %v10250_v46 = vrot.slane %v8781_v21, %v153_v25 }
 0x1e7   :  { %v4982_v23 = vmax.f32 %v1284_v17, 0.0  ;;  %v4981_v26 = vmax.f32 %v837_v18, 0.0  ;;  %v840_v29 = vpop.f32.mrb[126].mxu0  ;;  %v10257_v51 = vadd.f32 %v5084_v36, %v10174_v11  ;;  %v10267_v54 = vadd.f32 %v5158_v37, %v10176_v16 }
 0x1e8   :  { %v5633_v32 = vadd.f32 %v5632_v60, %v4980_v20  ;;  %v4983_v33 = vmax.f32 %v1286_v24, 0.0  ;;  %v841_v34 = vadd.f32 %v840_v29, %v9466_v9  ;;  %v1289_v27 = vpop.f32.mrb[126].mxu1  ;;  %v842_v28 = vpop.f32.mrb[127].mxu0  ;;  %7954 = vmatmul.mubr.msk.f32.gmra.mrb[232].mxu0 %vm203_vm0, %v8782_v35  ;;  %v8784_v29 = vld [vmem:[%s12295_s0 + $0x1b0] sm:$0xff] }
 0x1e9   :  { %v5707_v39 = vadd.f32 %v5706_v15, %v4982_v23  ;;  %v5670_v40 = vadd.f32 %v5669_v63, %v4981_v26  ;;  %v1290_v41 = vadd.f32 %v1289_v27, %v9470_v10  ;;  %v843_v42 = vadd.f32 %v842_v28, %v9474_v12  ;;  %v1291_v43 = vpop.f32.mrb[127].mxu1  ;;  %8018 = vmatmul.mubr.msk.f32.gmra.mrb[232].mxu1 %vm203_vm0, %v8782_v35 }
 0x1ea   :  { %v5744_v9 = vadd.f32 %v5743_v19, %v4983_v33  ;;  %v4996_v44 = vmax.f32 %v841_v34, 0.0  ;;  %v1292_v45 = vadd.f32 %v1291_v43, %v9478_v14  ;;  %1676 = vmatprep.mubr.f32.mxu0 %v8998_v0  ;;  %2125 = vmatprep.mubr.f32.mxu1 %v8998_v0 }
 0x1eb   :  { %v4998_v10 = vmax.f32 %v1290_v41, 0.0  ;;  %v4997_v48 = vmax.f32 %v843_v42, 0.0  ;;  %v1360_v12 = vpop.f32.mrb[128].mxu0 }
 0x1ec   :  { %v5634_v52 = vadd.f32 %v5633_v32, %v4996_v44  ;;  %v4999_v14 = vmax.f32 %v1292_v45, 0.0  ;;  %v1361_v53 = vadd.f32 %v1360_v12, %v10227_v30  ;;  %v1362_v56 = vpop.f32.mrb[129].mxu0  ;;  %7955 = vmatmul.mubr.msk.f32.gmra.mrb[234].mxu0 %vm203_vm0, %v8783_v57  ;;  %v1809_v50 = vpop.f32.mrb[128].mxu1 }
 0x1ed   :  { %v5708_v60 = vadd.f32 %v5707_v39, %v4998_v10  ;;  %v5671_v11 = vadd.f32 %v5670_v40, %v4997_v48  ;;  %v1363_v36 = vadd.f32 %v1362_v56, %v10231_v31  ;;  %8019 = vmatmul.mubr.msk.f32.gmra.mrb[234].mxu1 %vm203_vm0, %v8783_v57  ;;  %v1810_v22 = vadd.f32 %v1809_v50, %v10240_v38  ;;  %v1811_v61 = vpop.f32.mrb[129].mxu1 }
 0x1ee   :  { %v5635_v2 = vrot.slane %v5634_v52, 4  ;;  %v5745_v5 = vadd.f32 %v5744_v9, %v4999_v14  ;;  %v3992_v49 = vmax.f32 %v1361_v53, 0.0  ;;  %v1812_v15 = vadd.f32 %v1811_v61, %v10250_v46  ;;  %1682 = vmatprep.mubr.f32.mxu0 %v8998_v0  ;;  %2131 = vmatprep.mubr.f32.mxu1 %v8998_v0  ;;  %v8785_v53 = vld [vmem:[%s12295_s0 + $0x1b8] sm:$0xff] }
 0x1ef   :  { %v5709_v16 = vrot.slane %v5708_v60, 4  ;;  %v5672_v37 = vrot.slane %v5671_v11, 4  ;;  %v3993_v63 = vmax.f32 %v1363_v36, 0.0  ;;  %v3994_v17 = vmax.f32 %v1810_v22, 0.0  ;;  %v1366_v18 = vpop.f32.mrb[130].mxu0 }
 0x1f0   :  { %v5636_v59 = vadd.f32 %v5635_v2, %v5634_v52  ;;  %v5746_v19 = vrot.slane %v5745_v5, 4  ;;  %v3995_v20 = vmax.f32 %v1812_v15, 0.0  ;;  %v1367_v24 = vadd.f32 %v1366_v18, %v10227_v30  ;;  %v1815_v23 = vpop.f32.mrb[130].mxu1  ;;  %v1368_v26 = vpop.f32.mrb[131].mxu0  ;;  %7956 = vmatmul.mubr.msk.f32.gmra.mrb[236].mxu0 %vm203_vm0, %v8784_v29 }
 0x1f1   :  { %v5710_v21 = vadd.f32 %v5709_v16, %v5708_v60  ;;  %v5673_v32 = vadd.f32 %v5672_v37, %v5671_v11  ;;  %v1816_v33 = vadd.f32 %v1815_v23, %v10240_v38  ;;  %v1369_v34 = vadd.f32 %v1368_v26, %v10231_v31  ;;  %v1817_v27 = vpop.f32.mrb[131].mxu1  ;;  %8020 = vmatmul.mubr.msk.f32.gmra.mrb[236].mxu1 %vm203_vm0, %v8784_v29 }
 0x1f2   :  { %v5637_v28 = vrot.slane %v5636_v59, 2  ;;  %v5747_v35 = vadd.f32 %v5746_v19, %v5745_v5  ;;  %v4008_v39 = vmax.f32 %v1367_v24, 0.0  ;;  %v1818_v40 = vadd.f32 %v1817_v27, %v10250_v46  ;;  %1688 = vmatprep.mubr.f32.mxu0 %v8998_v0  ;;  %2137 = vmatprep.mubr.f32.mxu1 %v8998_v0 }
 0x1f3   :  { %v5711_v41 = vrot.slane %v5710_v21, 2  ;;  %v5674_v42 = vrot.slane %v5673_v32, 2  ;;  %v4010_v43 = vmax.f32 %v1816_v33, 0.0  ;;  %v4009_v9 = vmax.f32 %v1369_v34, 0.0  ;;  %v1372_v44 = vpop.f32.mrb[132].mxu0 }
 0x1f4   :  { %v5638_v45 = vadd.f32 %v5637_v28, %v5636_v59  ;;  %v5748_v10 = vrot.slane %v5747_v35, 2  ;;  %v5160_v48 = vadd.f32 %v4008_v39, %v3992_v49  ;;  %v4011_v12 = vmax.f32 %v1818_v40, 0.0  ;;  %v1821_v52 = vpop.f32.mrb[132].mxu1  ;;  %v1374_v14 = vpop.f32.mrb[133].mxu0  ;;  %7957 = vmatmul.mubr.msk.f32.gmra.mrb[238].mxu0 %vm203_vm0, %v8785_v53 }
 0x1f5   :  { %v5712_v56 = vadd.f32 %v5711_v41, %v5710_v21  ;;  %v10290_v57 = vadd.f32 %v5674_v42, %v5673_v32  ;;  %v5234_v50 = vadd.f32 %v4010_v43, %v3994_v17  ;;  %v5197_v60 = vadd.f32 %v4009_v9, %v3993_v63  ;;  %v1823_v11 = vpop.f32.mrb[133].mxu1  ;;  %8021 = vmatmul.mubr.msk.f32.gmra.mrb[238].mxu1 %vm203_vm0, %v8785_v53 }
 0x1f6   :  { %v5639_v36 = vrot.slane %v5638_v45, 1  ;;  %v5271_v22 = vadd.f32 %v4011_v12, %v3995_v20  ;;  %v1373_v61 = vadd.f32 %v1372_v44, %v10227_v30  ;;  %1694 = vmatprep.mubr.f32.mxu0 %v8998_v0  ;;  %2143 = vmatprep.mubr.f32.mxu1 %v8998_v0  ;;  %v10297_v2 = vmul.f32 0.00390625, %v10257_v51  ;;  %v8786_v51 = vld [vmem:[%s12295_s0 + $0x1c0] sm:$0xff] }
 0x1f7   :  { %v5713_v5 = vrot.slane %v5712_v56, 1  ;;  %v10299_v49 = vadd.f32 %v5748_v10, %v5747_v35  ;;  %v1822_v15 = vadd.f32 %v1821_v52, %v10240_v38  ;;  %v1375_v16 = vadd.f32 %v1374_v14, %v10231_v31  ;;  %v1378_v37 = vpop.f32.mrb[134].mxu0 }
 0x1f8   :  { %v5640_v63 = vadd.f32 %v5639_v36, %v5638_v45  ;;  %v5676_v17 = vrot.slane %v10290_v57, 1  ;;  %v4024_v18 = vmax.f32 %v1373_v61, 0.0  ;;  %v1824_v59 = vadd.f32 %v1823_v11, %v10250_v46  ;;  %v1827_v19 = vpop.f32.mrb[134].mxu1  ;;  %v1380_v20 = vpop.f32.mrb[135].mxu0  ;;  %7958 = vmatmul.mubr.msk.f32.gmra.mrb[240].mxu0 %vm203_vm0, %v8786_v51 }
 0x1f9   :  { %v5714_v24 = vadd.f32 %v5713_v5, %v5712_v56  ;;  %v4026_v23 = vmax.f32 %v1822_v15, 0.0  ;;  %v4025_v26 = vmax.f32 %v1375_v16, 0.0  ;;  %v1379_v29 = vadd.f32 %v1378_v37, %v10227_v30  ;;  %v1829_v21 = vpop.f32.mrb[135].mxu1  ;;  %8022 = vmatmul.mubr.msk.f32.gmra.mrb[240].mxu1 %vm203_vm0, %v8786_v51  ;;  %1700 = vmatprep.mubr.f32.mxu0 %v8998_v0  ;;  %v8788_v51 = vld [vmem:[%s12295_s0 + $0x1d0] sm:$0xff] }
 0x1fa   :  { %v6213_v32 = vmul.f32 0.00390625, %v5640_v63  ;;  %v5161_v33 = vadd.f32 %v5160_v48, %v4024_v18  ;;  %v4027_v34 = vmax.f32 %v1824_v59, 0.0  ;;  %v1828_v27 = vadd.f32 %v1827_v19, %v10240_v38  ;;  %2149 = vmatprep.mubr.f32.mxu1 %v8998_v0  ;;  %v8787_v48 = vld [vmem:[%s12295_s0 + $0x1c8] sm:$0xff] }
 0x1fb   :  { %v6215_v28 = vmul.f32 0.00390625, %v5714_v24  ;;  %v5235_v35 = vadd.f32 %v5234_v50, %v4026_v23  ;;  %v5198_v39 = vadd.f32 %v5197_v60, %v4025_v26  ;;  %v4040_v40 = vmax.f32 %v1379_v29, 0.0  ;;  %v1384_v41 = vpop.f32.mrb[136].mxu0 }
 0x1fc   :  { %v6245_v42 = vpack.c.bf16 %v6213_v32, %v6213_v32  ;;  %v5272_v43 = vadd.f32 %v5271_v22, %v4027_v34  ;;  %v4042_v9 = vmax.f32 %v1828_v27, 0.0  ;;  %v1381_v44 = vadd.f32 %v1380_v20, %v10231_v31  ;;  %v1833_v45 = vpop.f32.mrb[136].mxu1  ;;  %v1386_v10 = vpop.f32.mrb[137].mxu0  ;;  %7959 = vmatmul.mubr.msk.f32.gmra.mrb[242].mxu0 %vm203_vm0, %v8787_v48 }
 0x1fd   :  { %v6247_v12 = vpack.c.bf16 %v6215_v28, %v6215_v28  ;;  %v5162_v52 = vadd.f32 %v5161_v33, %v4040_v40  ;;  %v1830_v14 = vadd.f32 %v1829_v21, %v10250_v46  ;;  %v1385_v53 = vadd.f32 %v1384_v41, %v10227_v30  ;;  %v1835_v56 = vpop.f32.mrb[137].mxu1  ;;  %8023 = vmatmul.mubr.msk.f32.gmra.mrb[242].mxu1 %vm203_vm0, %v8787_v48 }
 0x1fe   :  { %v6572_v50 = vunpack.c.l.b16 %v6245_v42  ;;  %v5236_v60 = vadd.f32 %v5235_v35, %v4042_v9  ;;  %v4041_v11 = vmax.f32 %v1381_v44, 0.0  ;;  %v1834_v36 = vadd.f32 %v1833_v45, %v10240_v38  ;;  %1706 = vmatprep.mubr.f32.mxu0 %v8998_v0  ;;  %2155 = vmatprep.mubr.f32.mxu1 %v8998_v0  ;;  %v8789_v9 = vld [vmem:[%s12295_s0 + $0x1d8] sm:$0xff] }
 0x1ff   :  { %v6574_v22 = vunpack.c.l.b16 %v6247_v12  ;;  %v4043_v61 = vmax.f32 %v1830_v14, 0.0  ;;  %v4056_v5 = vmax.f32 %v1385_v53, 0.0  ;;  %v1387_v15 = vadd.f32 %v1386_v10, %v10231_v31  ;;  %v1390_v16 = vpop.f32.mrb[138].mxu0 }
 0x200   :  { %v10328_v37 = vsel %vm6588_vm1, %v6572_v50, %v10206_v55  ;;  %v5199_v63 = vadd.f32 %v5198_v39, %v4041_v11  ;;  %v4058_v18 = vmax.f32 %v1834_v36, 0.0  ;;  %v1836_v59 = vadd.f32 %v1835_v56, %v10250_v46  ;;  %v1839_v19 = vpop.f32.mrb[138].mxu1  ;;  %v1392_v20 = vpop.f32.mrb[139].mxu0  ;;  %7960 = vmatmul.mubr.msk.f32.gmra.mrb[244].mxu0 %vm203_vm0, %v8788_v51 }
 0x201   :  { %v10337_v24 = vsel %vm6588_vm1, %v6574_v22, %v10252_v47  ;;  %v5273_v23 = vadd.f32 %v5272_v43, %v4043_v61  ;;  %v5163_v26 = vadd.f32 %v5162_v52, %v4056_v5  ;;  %v1841_v55 = vpop.f32.mrb[139].mxu1  ;;  %8024 = vmatmul.mubr.msk.f32.gmra.mrb[244].mxu1 %vm203_vm0, %v8788_v51  ;;  %v10341_v29 = vmul.f32 0.00390625, %v10267_v54  ;;  %1712 = vmatprep.mubr.f32.mxu0 %v8998_v0 }
 0x202   :  { %v5750_v21 = vrot.slane %v10299_v49, 1  ;;  %v5237_v32 = vadd.f32 %v5236_v60, %v4058_v18  ;;  %v4057_v33 = vmax.f32 %v1387_v15, 0.0  ;;  %v4059_v34 = vmax.f32 %v1836_v59, 0.0  ;;  %2161 = vmatprep.mubr.f32.mxu1 %v8998_v0  ;;  %v8790_v18 = vld [vmem:[%s12295_s0 + $0x1e0] sm:$0xff] }
 0x203   :  { %v1391_v47 = vadd.f32 %v1390_v16, %v10227_v30  ;;  %v1840_v27 = vadd.f32 %v1839_v19, %v10240_v38  ;;  %v1393_v28 = vadd.f32 %v1392_v20, %v10231_v31  ;;  %v1842_v35 = vadd.f32 %v1841_v55, %v10250_v46  ;;  %v1396_v39 = vpop.f32.mrb[140].mxu0 }
 0x204   :  { %v5200_v54 = vadd.f32 %v5199_v63, %v4057_v33  ;;  %v5274_v40 = vadd.f32 %v5273_v23, %v4059_v34  ;;  %v1397_v41 = vadd.f32 %v1396_v39, %v10227_v30  ;;  %v1845_v42 = vpop.f32.mrb[140].mxu1  ;;  %v1398_v43 = vpop.f32.mrb[141].mxu0  ;;  %7961 = vmatmul.mubr.msk.f32.gmra.mrb[246].mxu0 %vm203_vm0, %v8789_v9  ;;  %v5677_v44 = vadd.f32 %v5676_v17, %v10290_v57 }
 0x205   :  { %v4072_v45 = vmax.f32 %v1391_v47, 0.0  ;;  %v4074_v10 = vmax.f32 %v1840_v27, 0.0  ;;  %v4073_v48 = vmax.f32 %v1393_v28, 0.0  ;;  %v4075_v12 = vmax.f32 %v1842_v35, 0.0  ;;  %v1847_v52 = vpop.f32.mrb[141].mxu1  ;;  %8025 = vmatmul.mubr.msk.f32.gmra.mrb[246].mxu1 %vm203_vm0, %v8789_v9  ;;  %1718 = vmatprep.mubr.f32.mxu0 %v8998_v0 }
 0x206   :  { %v4088_v14 = vmax.f32 %v1397_v41, 0.0  ;;  %v1846_v53 = vadd.f32 %v1845_v42, %v10240_v38  ;;  %v1399_v56 = vadd.f32 %v1398_v43, %v10231_v31  ;;  %v1848_v50 = vadd.f32 %v1847_v52, %v10250_v46  ;;  %2167 = vmatprep.mubr.f32.mxu1 %v8998_v0  ;;  %v8791_v42 = vld [vmem:[%s12295_s0 + $0x1e8] sm:$0xff] }
 0x207   :  { %v5164_v60 = vadd.f32 %v5163_v26, %v4072_v45  ;;  %v5238_v57 = vadd.f32 %v5237_v32, %v4074_v10  ;;  %v5201_v17 = vadd.f32 %v5200_v54, %v4073_v48  ;;  %v5275_v11 = vadd.f32 %v5274_v40, %v4075_v12  ;;  %v1402_v36 = vpop.f32.mrb[142].mxu0 }
 0x208   :  { %v4090_v22 = vmax.f32 %v1846_v53, 0.0  ;;  %v4089_v61 = vmax.f32 %v1399_v56, 0.0  ;;  %v4091_v5 = vmax.f32 %v1848_v50, 0.0  ;;  %v1403_v15 = vadd.f32 %v1402_v36, %v10227_v30  ;;  %v1851_v16 = vpop.f32.mrb[142].mxu1  ;;  %v1404_v63 = vpop.f32.mrb[143].mxu0  ;;  %7962 = vmatmul.mubr.msk.f32.gmra.mrb[248].mxu0 %vm203_vm0, %v8790_v18 }
 0x209   :  { %v5165_v59 = vadd.f32 %v5164_v60, %v4088_v14  ;;  %v1852_v19 = vadd.f32 %v1851_v16, %v10240_v38  ;;  %v1405_v20 = vadd.f32 %v1404_v63, %v10231_v31  ;;  %v1853_v51 = vpop.f32.mrb[143].mxu1  ;;  %8026 = vmatmul.mubr.msk.f32.gmra.mrb[248].mxu1 %vm203_vm0, %v8790_v18  ;;  %1724 = vmatprep.mubr.f32.mxu0 %v8998_v0  ;;  %v6214_v23 = vmul.f32 0.00390625, %v5677_v44 }
 0x20a   :  { %v5239_v26 = vadd.f32 %v5238_v57, %v4090_v22  ;;  %v5202_v55 = vadd.f32 %v5201_v17, %v4089_v61  ;;  %v5276_v32 = vadd.f32 %v5275_v11, %v4091_v5  ;;  %v4104_v33 = vmax.f32 %v1403_v15, 0.0  ;;  %2173 = vmatprep.mubr.f32.mxu1 %v8998_v0  ;;  %v8792_v5 = vld [vmem:[%s12295_s0 + $0x1f0] sm:$0xff] }
 0x20b   :  { %v4106_v34 = vmax.f32 %v1852_v19, 0.0  ;;  %v4105_v47 = vmax.f32 %v1405_v20, 0.0  ;;  %v1854_v27 = vadd.f32 %v1853_v51, %v10250_v46  ;;  %v1408_v28 = vpop.f32.mrb[144].mxu0  ;;  %v6246_v35 = vpack.c.bf16 %v6214_v23, %v6214_v23 }
 0x20c   :  { %v5166_v39 = vadd.f32 %v5165_v59, %v4104_v33  ;;  %v1409_v54 = vadd.f32 %v1408_v28, %v10227_v30  ;;  %v1857_v40 = vpop.f32.mrb[144].mxu1  ;;  %v1410_v41 = vpop.f32.mrb[145].mxu0  ;;  %7963 = vmatmul.mubr.msk.f32.gmra.mrb[250].mxu0 %vm203_vm0, %v8791_v42  ;;  %v6230_v43 = vpack.c.bf16 %v10297_v2, %v10297_v2  ;;  %v5751_v9 = vadd.f32 %v5750_v21, %v10299_v49 }
 0x20d   :  { %v5240_v44 = vadd.f32 %v5239_v26, %v4106_v34  ;;  %v5203_v45 = vadd.f32 %v5202_v55, %v4105_v47  ;;  %v4107_v10 = vmax.f32 %v1854_v27, 0.0  ;;  %v1858_v48 = vadd.f32 %v1857_v40, %v10240_v38  ;;  %v1859_v12 = vpop.f32.mrb[145].mxu1  ;;  %8027 = vmatmul.mubr.msk.f32.gmra.mrb[250].mxu1 %vm203_vm0, %v8791_v42  ;;  %1730 = vmatprep.mubr.f32.mxu0 %v8998_v0 }
 0x20e   :  { %v4120_v52 = vmax.f32 %v1409_v54, 0.0  ;;  %v1411_v14 = vadd.f32 %v1410_v41, %v10231_v31  ;;  %v1860_v53 = vadd.f32 %v1859_v12, %v10250_v46  ;;  %2179 = vmatprep.mubr.f32.mxu1 %v8998_v0  ;;  %v6232_v2 = vpack.c.bf16 %v10341_v29, %v10341_v29 }
 0x20f   :  { %v5277_v49 = vadd.f32 %v5276_v32, %v4107_v10  ;;  %v4122_v21 = vmax.f32 %v1858_v48, 0.0  ;;  %v1414_v56 = vpop.f32.mrb[146].mxu0  ;;  %v6573_v50 = vunpack.c.l.b16 %v6246_v35  ;;  %v6216_v60 = vmul.f32 0.00390625, %v5751_v9 }
 0x210   :  { %v5167_v57 = vadd.f32 %v5166_v39, %v4120_v52  ;;  %v4121_v17 = vmax.f32 %v1411_v14, 0.0  ;;  %v4123_v11 = vmax.f32 %v1860_v53, 0.0  ;;  %v1415_v36 = vadd.f32 %v1414_v56, %v10227_v30  ;;  %v1863_v22 = vpop.f32.mrb[146].mxu1  ;;  %v1416_v61 = vpop.f32.mrb[147].mxu0  ;;  %7964 = vmatmul.mubr.msk.f32.gmra.mrb[252].mxu0 %vm203_vm0, %v8792_v5  ;;  %v8793_v39 = vld [vmem:[%s12295_s0 + $0x1f8] sm:$0xff]  ;;  %v115_v53 = vld [vmem:[%s12296_s1 + $0x60] sm:$0xff] }
 0x211   :  { %v5241_v15 = vadd.f32 %v5240_v44, %v4122_v21  ;;  %v1864_v29 = vadd.f32 %v1863_v22, %v10240_v38  ;;  %v1417_v16 = vadd.f32 %v1416_v61, %v10231_v31  ;;  %v1865_v63 = vpop.f32.mrb[147].mxu1  ;;  %8028 = vmatmul.mubr.msk.f32.gmra.mrb[252].mxu1 %vm203_vm0, %v8792_v5  ;;  %1736 = vmatprep.mubr.f32.mxu0 %v8998_v0  ;;  %v6557_v18 = vunpack.c.l.b16 %v6230_v43 }
 0x212   :  { %v5204_v59 = vadd.f32 %v5203_v45, %v4121_v17  ;;  %v5278_v19 = vadd.f32 %v5277_v49, %v4123_v11  ;;  %v4136_v20 = vmax.f32 %v1415_v36, 0.0  ;;  %v1866_v51 = vadd.f32 %v1865_v63, %v10250_v46  ;;  %2185 = vmatprep.mubr.f32.mxu1 %v8998_v0 }
 0x213   :  { %v4138_v23 = vmax.f32 %v1864_v29, 0.0  ;;  %v4137_v26 = vmax.f32 %v1417_v16, 0.0  ;;  %v1420_v55 = vpop.f32.mrb[148].mxu0  ;;  %v10405_v32 = vsel %vm6588_vm1, %v6573_v50, %v6557_v18  ;;  %v6248_v33 = vpack.c.bf16 %v6216_v60, %v6216_v60  ;;  %v8794_v60 = vld [vmem:[%s12295_s0] sm:$0xff] }
 0x214   :  { %v5168_v34 = vadd.f32 %v5167_v57, %v4136_v20  ;;  %v4139_v47 = vmax.f32 %v1866_v51, 0.0  ;;  %v1421_v27 = vadd.f32 %v1420_v55, %v10227_v30  ;;  %v1869_v28 = vpop.f32.mrb[148].mxu1  ;;  %v1422_v35 = vpop.f32.mrb[149].mxu0  ;;  %7965 = vmatmul.mubr.msk.f32.gmra.mrb[254].mxu0 %vm203_vm0, %v8793_v39  ;;  %v6559_v54 = vunpack.c.l.b16 %v6232_v2  ;;  %v117_v57 = vld [vmem:[%s12296_s1 + $0x70] sm:$0xff]  ;;  %v8795_v55 = vld [vmem:[%s12295_s0 + $0x8] sm:$0xff] }
 0x215   :  { %v5242_v40 = vadd.f32 %v5241_v15, %v4138_v23  ;;  %v5205_v41 = vadd.f32 %v5204_v59, %v4137_v26  ;;  %v1870_v42 = vadd.f32 %v1869_v28, %v10240_v38  ;;  %v1423_v43 = vadd.f32 %v1422_v35, %v10231_v31  ;;  %v1871_v9 = vpop.f32.mrb[149].mxu1  ;;  %8029 = vmatmul.mubr.msk.f32.gmra.mrb[254].mxu1 %vm203_vm0, %v8793_v39 }
 0x216   :  { %v5279_v44 = vadd.f32 %v5278_v19, %v4139_v47  ;;  %v4152_v45 = vmax.f32 %v1421_v27, 0.0  ;;  %v1872_v10 = vadd.f32 %v1871_v9, %v10250_v46  ;;  %2256 = vmatprep.mubr.f32.mxu0 %v8998_v0  ;;  %2705 = vmatprep.mubr.f32.mxu1 %v8998_v0  ;;  %v6575_v48 = vunpack.c.l.b16 %v6248_v33 }
 0x217   :  { %v4154_v12 = vmax.f32 %v1870_v42, 0.0  ;;  %v4153_v52 = vmax.f32 %v1423_v43, 0.0  ;;  %v1426_v14 = vpop.f32.mrb[150].mxu0 }
 0x218   :  { %v5169_v2 = vadd.f32 %v5168_v34, %v4152_v45  ;;  %v4155_v49 = vmax.f32 %v1872_v10, 0.0  ;;  %v1427_v21 = vadd.f32 %v1426_v14, %v10227_v30  ;;  %v1875_v56 = vpop.f32.mrb[150].mxu1  ;;  %v1428_v50 = vpop.f32.mrb[151].mxu0  ;;  %8030 = vmatmul.mubr.msk.f32.vlgmr.msra.gmra.mrb[0].mxu0 %vm203_vm0, %v8794_v60  ;;  %v10430_v17 = vsel %vm6588_vm1, %v6575_v48, %v6559_v54  ;;  %v8796_v48 = vld [vmem:[%s12295_s0 + $0x10] sm:$0xff] }
 0x219   :  { %v5243_v11 = vadd.f32 %v5242_v40, %v4154_v12  ;;  %v5206_v36 = vadd.f32 %v5205_v41, %v4153_v52  ;;  %v1876_v22 = vadd.f32 %v1875_v56, %v10240_v38  ;;  %v1429_v61 = vadd.f32 %v1428_v50, %v10231_v31  ;;  %v1877_v5 = vpop.f32.mrb[151].mxu1  ;;  %8094 = vmatmul.mubr.msk.f32.vlgmr.msra.gmra.mrb[0].mxu1 %vm203_vm0, %v8794_v60 }
 0x21a   :  { %v5280_v15 = vadd.f32 %v5279_v44, %v4155_v49  ;;  %v4168_v29 = vmax.f32 %v1427_v21, 0.0  ;;  %v1878_v16 = vadd.f32 %v1877_v5, %v10250_v46  ;;  %3091 = vmatpush1.msra.mxu0 %v115_v53  ;;  %2262 = vmatprep.mubr.f32.mxu0 %v8998_v0 }
 0x21b   :  { %v4170_v63 = vmax.f32 %v1876_v22, 0.0  ;;  %v4169_v18 = vmax.f32 %v1429_v61, 0.0  ;;  %v1432_v59 = vpop.f32.mrb[152].mxu0  ;;  %2711 = vmatprep.mubr.f32.mxu1 %v8998_v0  ;;  %3540 = vmatpush1.msra.mxu1 %v117_v57 }
 0x21c   :  { %v5170_v19 = vadd.f32 %v5169_v2, %v4168_v29  ;;  %v4171_v20 = vmax.f32 %v1878_v16, 0.0  ;;  %v1433_v51 = vadd.f32 %v1432_v59, %v10227_v30  ;;  %v1881_v23 = vpop.f32.mrb[152].mxu1  ;;  %v1434_v26 = vpop.f32.mrb[153].mxu0  ;;  %8031 = vmatmul.mubr.msk.f32.gmra.mrb[2].mxu0 %vm203_vm0, %v8795_v55 }
 0x21d   :  { %v5244_v33 = vadd.f32 %v5243_v11, %v4170_v63  ;;  %v5207_v34 = vadd.f32 %v5206_v36, %v4169_v18  ;;  %v1882_v47 = vadd.f32 %v1881_v23, %v10240_v38  ;;  %v1435_v27 = vadd.f32 %v1434_v26, %v10231_v31  ;;  %v1883_v28 = vpop.f32.mrb[153].mxu1  ;;  %8095 = vmatmul.mubr.msk.f32.gmra.mrb[2].mxu1 %vm203_vm0, %v8795_v55 }
 0x21e   :  { %v5281_v35 = vadd.f32 %v5280_v15, %v4171_v20  ;;  %v4184_v39 = vmax.f32 %v1433_v51, 0.0  ;;  %v1884_v54 = vadd.f32 %v1883_v28, %v10250_v46  ;;  %2268 = vmatprep.mubr.f32.mxu0 %v8998_v0  ;;  %2717 = vmatprep.mubr.f32.mxu1 %v8998_v0  ;;  %v8797_v15 = vld [vmem:[%s12295_s0 + $0x18] sm:$0xff] }
 0x21f   :  { %v4186_v40 = vmax.f32 %v1882_v47, 0.0  ;;  %v4185_v41 = vmax.f32 %v1435_v27, 0.0  ;;  %v1438_v42 = vpop.f32.mrb[154].mxu0 }
 0x220   :  { %v5171_v43 = vadd.f32 %v5170_v19, %v4184_v39  ;;  %v4187_v9 = vmax.f32 %v1884_v54, 0.0  ;;  %v1439_v44 = vadd.f32 %v1438_v42, %v10227_v30  ;;  %v1887_v45 = vpop.f32.mrb[154].mxu1  ;;  %v1440_v10 = vpop.f32.mrb[155].mxu0  ;;  %8032 = vmatmul.mubr.msk.f32.gmra.mrb[4].mxu0 %vm203_vm0, %v8796_v48 }
 0x221   :  { %v5245_v12 = vadd.f32 %v5244_v33, %v4186_v40  ;;  %v5208_v52 = vadd.f32 %v5207_v34, %v4185_v41  ;;  %v1888_v14 = vadd.f32 %v1887_v45, %v10240_v38  ;;  %v1441_v53 = vadd.f32 %v1440_v10, %v10231_v31  ;;  %v1889_v2 = vpop.f32.mrb[155].mxu1  ;;  %8096 = vmatmul.mubr.msk.f32.gmra.mrb[4].mxu1 %vm203_vm0, %v8796_v48 }
 0x222   :  { %v5282_v49 = vadd.f32 %v5281_v35, %v4187_v9  ;;  %v4200_v21 = vmax.f32 %v1439_v44, 0.0  ;;  %v1890_v56 = vadd.f32 %v1889_v2, %v10250_v46  ;;  %2274 = vmatprep.mubr.f32.mxu0 %v8998_v0  ;;  %2723 = vmatprep.mubr.f32.mxu1 %v8998_v0  ;;  %v8798_v35 = vld [vmem:[%s12295_s0 + $0x20] sm:$0xff] }
 0x223   :  { %v4202_v50 = vmax.f32 %v1888_v14, 0.0  ;;  %v4201_v60 = vmax.f32 %v1441_v53, 0.0  ;;  %v1444_v57 = vpop.f32.mrb[156].mxu0 }
 0x224   :  { %v5172_v11 = vadd.f32 %v5171_v43, %v4200_v21  ;;  %v4203_v36 = vmax.f32 %v1890_v56, 0.0  ;;  %v1445_v22 = vadd.f32 %v1444_v57, %v10227_v30  ;;  %v1893_v61 = vpop.f32.mrb[156].mxu1  ;;  %v1446_v5 = vpop.f32.mrb[157].mxu0  ;;  %8033 = vmatmul.mubr.msk.f32.gmra.mrb[6].mxu0 %vm203_vm0, %v8797_v15 }
 0x225   :  { %v5246_v29 = vadd.f32 %v5245_v12, %v4202_v50  ;;  %v5209_v16 = vadd.f32 %v5208_v52, %v4201_v60  ;;  %v1894_v63 = vadd.f32 %v1893_v61, %v10240_v38  ;;  %v1447_v18 = vadd.f32 %v1446_v5, %v10231_v31  ;;  %v1895_v59 = vpop.f32.mrb[157].mxu1  ;;  %8097 = vmatmul.mubr.msk.f32.gmra.mrb[6].mxu1 %vm203_vm0, %v8797_v15 }
 0x226   :  { %v5283_v19 = vadd.f32 %v5282_v49, %v4203_v36  ;;  %v4216_v20 = vmax.f32 %v1445_v22, 0.0  ;;  %v1896_v51 = vadd.f32 %v1895_v59, %v10250_v46  ;;  %2280 = vmatprep.mubr.f32.mxu0 %v8998_v0  ;;  %2729 = vmatprep.mubr.f32.mxu1 %v8998_v0  ;;  %v8799_v49 = vld [vmem:[%s12295_s0 + $0x28] sm:$0xff] }
 0x227   :  { %v4218_v23 = vmax.f32 %v1894_v63, 0.0  ;;  %v4217_v26 = vmax.f32 %v1447_v18, 0.0  ;;  %v1450_v55 = vpop.f32.mrb[158].mxu0 }
 0x228   :  { %v5173_v33 = vadd.f32 %v5172_v11, %v4216_v20  ;;  %v4219_v34 = vmax.f32 %v1896_v51, 0.0  ;;  %v1451_v47 = vadd.f32 %v1450_v55, %v10227_v30  ;;  %v1899_v27 = vpop.f32.mrb[158].mxu1  ;;  %v1452_v28 = vpop.f32.mrb[159].mxu0  ;;  %8034 = vmatmul.mubr.msk.f32.gmra.mrb[8].mxu0 %vm203_vm0, %v8798_v35 }
 0x229   :  { %v5247_v39 = vadd.f32 %v5246_v29, %v4218_v23  ;;  %v5210_v54 = vadd.f32 %v5209_v16, %v4217_v26  ;;  %v1900_v40 = vadd.f32 %v1899_v27, %v10240_v38  ;;  %v1453_v41 = vadd.f32 %v1452_v28, %v10231_v31  ;;  %v1901_v42 = vpop.f32.mrb[159].mxu1  ;;  %8098 = vmatmul.mubr.msk.f32.gmra.mrb[8].mxu1 %vm203_vm0, %v8798_v35 }
 0x22a   :  { %v5284_v43 = vadd.f32 %v5283_v19, %v4219_v34  ;;  %v4232_v9 = vmax.f32 %v1451_v47, 0.0  ;;  %v1902_v44 = vadd.f32 %v1901_v42, %v10250_v46  ;;  %2286 = vmatprep.mubr.f32.mxu0 %v8998_v0  ;;  %2735 = vmatprep.mubr.f32.mxu1 %v8998_v0  ;;  %v8800_v19 = vld [vmem:[%s12295_s0 + $0x30] sm:$0xff] }
 0x22b   :  { %v4234_v45 = vmax.f32 %v1900_v40, 0.0  ;;  %v4233_v10 = vmax.f32 %v1453_v41, 0.0  ;;  %v1456_v48 = vpop.f32.mrb[160].mxu0 }
 0x22c   :  { %v5174_v12 = vadd.f32 %v5173_v33, %v4232_v9  ;;  %v4235_v52 = vmax.f32 %v1902_v44, 0.0  ;;  %v1457_v14 = vadd.f32 %v1456_v48, %v10227_v30  ;;  %v1905_v53 = vpop.f32.mrb[160].mxu1  ;;  %v1458_v2 = vpop.f32.mrb[161].mxu0  ;;  %8035 = vmatmul.mubr.msk.f32.gmra.mrb[10].mxu0 %vm203_vm0, %v8799_v49 }
 0x22d   :  { %v5248_v21 = vadd.f32 %v5247_v39, %v4234_v45  ;;  %v5211_v56 = vadd.f32 %v5210_v54, %v4233_v10  ;;  %v1906_v50 = vadd.f32 %v1905_v53, %v10240_v38  ;;  %v1459_v60 = vadd.f32 %v1458_v2, %v10231_v31  ;;  %v1907_v57 = vpop.f32.mrb[161].mxu1  ;;  %8099 = vmatmul.mubr.msk.f32.gmra.mrb[10].mxu1 %vm203_vm0, %v8799_v49 }
 0x22e   :  { %v5285_v11 = vadd.f32 %v5284_v43, %v4235_v52  ;;  %v4248_v36 = vmax.f32 %v1457_v14, 0.0  ;;  %v1908_v22 = vadd.f32 %v1907_v57, %v10250_v46  ;;  %2292 = vmatprep.mubr.f32.mxu0 %v8998_v0  ;;  %2741 = vmatprep.mubr.f32.mxu1 %v8998_v0  ;;  %v8801_v43 = vld [vmem:[%s12295_s0 + $0x38] sm:$0xff] }
 0x22f   :  { %v4250_v61 = vmax.f32 %v1906_v50, 0.0  ;;  %v4249_v5 = vmax.f32 %v1459_v60, 0.0  ;;  %v1462_v15 = vpop.f32.mrb[162].mxu0 }
 0x230   :  { %v5175_v29 = vadd.f32 %v5174_v12, %v4248_v36  ;;  %v4251_v16 = vmax.f32 %v1908_v22, 0.0  ;;  %v1463_v63 = vadd.f32 %v1462_v15, %v10227_v30  ;;  %v1911_v18 = vpop.f32.mrb[162].mxu1  ;;  %v1464_v59 = vpop.f32.mrb[163].mxu0  ;;  %8036 = vmatmul.mubr.msk.f32.gmra.mrb[12].mxu0 %vm203_vm0, %v8800_v19 }
 0x231   :  { %v5249_v20 = vadd.f32 %v5248_v21, %v4250_v61  ;;  %v5212_v51 = vadd.f32 %v5211_v56, %v4249_v5  ;;  %v1912_v23 = vadd.f32 %v1911_v18, %v10240_v38  ;;  %v1465_v26 = vadd.f32 %v1464_v59, %v10231_v31  ;;  %v1913_v55 = vpop.f32.mrb[163].mxu1  ;;  %8100 = vmatmul.mubr.msk.f32.gmra.mrb[12].mxu1 %vm203_vm0, %v8800_v19 }
 0x232   :  { %v5286_v33 = vadd.f32 %v5285_v11, %v4251_v16  ;;  %v4264_v34 = vmax.f32 %v1463_v63, 0.0  ;;  %v1914_v47 = vadd.f32 %v1913_v55, %v10250_v46  ;;  %2298 = vmatprep.mubr.f32.mxu0 %v8998_v0  ;;  %2747 = vmatprep.mubr.f32.mxu1 %v8998_v0  ;;  %v8802_v11 = vld [vmem:[%s12295_s0 + $0x40] sm:$0xff] }
 0x233   :  { %v4266_v27 = vmax.f32 %v1912_v23, 0.0  ;;  %v4265_v28 = vmax.f32 %v1465_v26, 0.0  ;;  %v1468_v35 = vpop.f32.mrb[164].mxu0 }
 0x234   :  { %v5176_v39 = vadd.f32 %v5175_v29, %v4264_v34  ;;  %v4267_v54 = vmax.f32 %v1914_v47, 0.0  ;;  %v1469_v40 = vadd.f32 %v1468_v35, %v10227_v30  ;;  %v1917_v41 = vpop.f32.mrb[164].mxu1  ;;  %v1470_v42 = vpop.f32.mrb[165].mxu0  ;;  %8037 = vmatmul.mubr.msk.f32.gmra.mrb[14].mxu0 %vm203_vm0, %v8801_v43 }
 0x235   :  { %v5250_v9 = vadd.f32 %v5249_v20, %v4266_v27  ;;  %v5213_v44 = vadd.f32 %v5212_v51, %v4265_v28  ;;  %v1918_v45 = vadd.f32 %v1917_v41, %v10240_v38  ;;  %v1471_v10 = vadd.f32 %v1470_v42, %v10231_v31  ;;  %v1919_v48 = vpop.f32.mrb[165].mxu1  ;;  %8101 = vmatmul.mubr.msk.f32.gmra.mrb[14].mxu1 %vm203_vm0, %v8801_v43 }
 0x236   :  { %v5287_v12 = vadd.f32 %v5286_v33, %v4267_v54  ;;  %v4280_v52 = vmax.f32 %v1469_v40, 0.0  ;;  %v1920_v14 = vadd.f32 %v1919_v48, %v10250_v46  ;;  %2304 = vmatprep.mubr.f32.mxu0 %v8998_v0  ;;  %2753 = vmatprep.mubr.f32.mxu1 %v8998_v0  ;;  %v8803_v33 = vld [vmem:[%s12295_s0 + $0x48] sm:$0xff] }
 0x237   :  { %v4282_v53 = vmax.f32 %v1918_v45, 0.0  ;;  %v4281_v2 = vmax.f32 %v1471_v10, 0.0  ;;  %v1474_v49 = vpop.f32.mrb[166].mxu0 }
 0x238   :  { %v5177_v21 = vadd.f32 %v5176_v39, %v4280_v52  ;;  %v4283_v56 = vmax.f32 %v1920_v14, 0.0  ;;  %v1475_v50 = vadd.f32 %v1474_v49, %v10227_v30  ;;  %v1923_v60 = vpop.f32.mrb[166].mxu1  ;;  %v1476_v57 = vpop.f32.mrb[167].mxu0  ;;  %8038 = vmatmul.mubr.msk.f32.gmra.mrb[16].mxu0 %vm203_vm0, %v8802_v11 }
 0x239   :  { %v5251_v36 = vadd.f32 %v5250_v9, %v4282_v53  ;;  %v5214_v22 = vadd.f32 %v5213_v44, %v4281_v2  ;;  %v1924_v61 = vadd.f32 %v1923_v60, %v10240_v38  ;;  %v1477_v5 = vadd.f32 %v1476_v57, %v10231_v31  ;;  %v1925_v15 = vpop.f32.mrb[167].mxu1  ;;  %8102 = vmatmul.mubr.msk.f32.gmra.mrb[16].mxu1 %vm203_vm0, %v8802_v11 }
 0x23a   :  { %v5288_v29 = vadd.f32 %v5287_v12, %v4283_v56  ;;  %v4296_v16 = vmax.f32 %v1475_v50, 0.0  ;;  %v1926_v63 = vadd.f32 %v1925_v15, %v10250_v46  ;;  %2310 = vmatprep.mubr.f32.mxu0 %v8998_v0  ;;  %2759 = vmatprep.mubr.f32.mxu1 %v8998_v0  ;;  %v8804_v12 = vld [vmem:[%s12295_s0 + $0x50] sm:$0xff] }
 0x23b   :  { %v4298_v18 = vmax.f32 %v1924_v61, 0.0  ;;  %v4297_v59 = vmax.f32 %v1477_v5, 0.0  ;;  %v1480_v19 = vpop.f32.mrb[168].mxu0 }
 0x23c   :  { %v5178_v20 = vadd.f32 %v5177_v21, %v4296_v16  ;;  %v4299_v51 = vmax.f32 %v1926_v63, 0.0  ;;  %v1481_v23 = vadd.f32 %v1480_v19, %v10227_v30  ;;  %v1929_v26 = vpop.f32.mrb[168].mxu1  ;;  %v1482_v55 = vpop.f32.mrb[169].mxu0  ;;  %8039 = vmatmul.mubr.msk.f32.gmra.mrb[18].mxu0 %vm203_vm0, %v8803_v33 }
 0x23d   :  { %v5252_v34 = vadd.f32 %v5251_v36, %v4298_v18  ;;  %v5215_v47 = vadd.f32 %v5214_v22, %v4297_v59  ;;  %v1930_v27 = vadd.f32 %v1929_v26, %v10240_v38  ;;  %v1483_v28 = vadd.f32 %v1482_v55, %v10231_v31  ;;  %v1931_v35 = vpop.f32.mrb[169].mxu1  ;;  %8103 = vmatmul.mubr.msk.f32.gmra.mrb[18].mxu1 %vm203_vm0, %v8803_v33 }
 0x23e   :  { %v5289_v39 = vadd.f32 %v5288_v29, %v4299_v51  ;;  %v4312_v54 = vmax.f32 %v1481_v23, 0.0  ;;  %v1932_v40 = vadd.f32 %v1931_v35, %v10250_v46  ;;  %2316 = vmatprep.mubr.f32.mxu0 %v8998_v0  ;;  %2765 = vmatprep.mubr.f32.mxu1 %v8998_v0  ;;  %v8805_v29 = vld [vmem:[%s12295_s0 + $0x58] sm:$0xff] }
 0x23f   :  { %v4314_v41 = vmax.f32 %v1930_v27, 0.0  ;;  %v4313_v42 = vmax.f32 %v1483_v28, 0.0  ;;  %v1486_v43 = vpop.f32.mrb[170].mxu0 }
 0x240   :  { %v5179_v9 = vadd.f32 %v5178_v20, %v4312_v54  ;;  %v4315_v44 = vmax.f32 %v1932_v40, 0.0  ;;  %v1487_v45 = vadd.f32 %v1486_v43, %v10227_v30  ;;  %v1935_v10 = vpop.f32.mrb[170].mxu1  ;;  %v1488_v48 = vpop.f32.mrb[171].mxu0  ;;  %8040 = vmatmul.mubr.msk.f32.gmra.mrb[20].mxu0 %vm203_vm0, %v8804_v12 }
 0x241   :  { %v5253_v52 = vadd.f32 %v5252_v34, %v4314_v41  ;;  %v5216_v14 = vadd.f32 %v5215_v47, %v4313_v42  ;;  %v1936_v53 = vadd.f32 %v1935_v10, %v10240_v38  ;;  %v1489_v2 = vadd.f32 %v1488_v48, %v10231_v31  ;;  %v1937_v49 = vpop.f32.mrb[171].mxu1  ;;  %8104 = vmatmul.mubr.msk.f32.gmra.mrb[20].mxu1 %vm203_vm0, %v8804_v12 }
 0x242   :  { %v5290_v21 = vadd.f32 %v5289_v39, %v4315_v44  ;;  %v4328_v56 = vmax.f32 %v1487_v45, 0.0  ;;  %v1938_v50 = vadd.f32 %v1937_v49, %v10250_v46  ;;  %2322 = vmatprep.mubr.f32.mxu0 %v8998_v0  ;;  %2771 = vmatprep.mubr.f32.mxu1 %v8998_v0  ;;  %v8806_v39 = vld [vmem:[%s12295_s0 + $0x60] sm:$0xff] }
 0x243   :  { %v4330_v60 = vmax.f32 %v1936_v53, 0.0  ;;  %v4329_v57 = vmax.f32 %v1489_v2, 0.0  ;;  %v1492_v11 = vpop.f32.mrb[172].mxu0 }
 0x244   :  { %v5180_v36 = vadd.f32 %v5179_v9, %v4328_v56  ;;  %v4331_v22 = vmax.f32 %v1938_v50, 0.0  ;;  %v1493_v61 = vadd.f32 %v1492_v11, %v10227_v30  ;;  %v1941_v5 = vpop.f32.mrb[172].mxu1  ;;  %v1494_v15 = vpop.f32.mrb[173].mxu0  ;;  %8041 = vmatmul.mubr.msk.f32.gmra.mrb[22].mxu0 %vm203_vm0, %v8805_v29 }
 0x245   :  { %v5254_v16 = vadd.f32 %v5253_v52, %v4330_v60  ;;  %v5217_v63 = vadd.f32 %v5216_v14, %v4329_v57  ;;  %v1942_v18 = vadd.f32 %v1941_v5, %v10240_v38  ;;  %v1495_v59 = vadd.f32 %v1494_v15, %v10231_v31  ;;  %v1943_v19 = vpop.f32.mrb[173].mxu1  ;;  %8105 = vmatmul.mubr.msk.f32.gmra.mrb[22].mxu1 %vm203_vm0, %v8805_v29 }
 0x246   :  { %v5291_v20 = vadd.f32 %v5290_v21, %v4331_v22  ;;  %v4344_v51 = vmax.f32 %v1493_v61, 0.0  ;;  %v1944_v23 = vadd.f32 %v1943_v19, %v10250_v46  ;;  %2328 = vmatprep.mubr.f32.mxu0 %v8998_v0  ;;  %2777 = vmatprep.mubr.f32.mxu1 %v8998_v0  ;;  %v8807_v21 = vld [vmem:[%s12295_s0 + $0x68] sm:$0xff] }
 0x247   :  { %v4346_v26 = vmax.f32 %v1942_v18, 0.0  ;;  %v4345_v55 = vmax.f32 %v1495_v59, 0.0  ;;  %v1498_v33 = vpop.f32.mrb[174].mxu0 }
 0x248   :  { %v5181_v34 = vadd.f32 %v5180_v36, %v4344_v51  ;;  %v4347_v47 = vmax.f32 %v1944_v23, 0.0  ;;  %v1499_v27 = vadd.f32 %v1498_v33, %v10227_v30  ;;  %v1947_v28 = vpop.f32.mrb[174].mxu1  ;;  %v1500_v35 = vpop.f32.mrb[175].mxu0  ;;  %8042 = vmatmul.mubr.msk.f32.gmra.mrb[24].mxu0 %vm203_vm0, %v8806_v39 }
 0x249   :  { %v5255_v54 = vadd.f32 %v5254_v16, %v4346_v26  ;;  %v5218_v40 = vadd.f32 %v5217_v63, %v4345_v55  ;;  %v1948_v41 = vadd.f32 %v1947_v28, %v10240_v38  ;;  %v1501_v42 = vadd.f32 %v1500_v35, %v10231_v31  ;;  %v1949_v43 = vpop.f32.mrb[175].mxu1  ;;  %8106 = vmatmul.mubr.msk.f32.gmra.mrb[24].mxu1 %vm203_vm0, %v8806_v39 }
 0x24a   :  { %v5292_v9 = vadd.f32 %v5291_v20, %v4347_v47  ;;  %v4360_v44 = vmax.f32 %v1499_v27, 0.0  ;;  %v1950_v45 = vadd.f32 %v1949_v43, %v10250_v46  ;;  %2334 = vmatprep.mubr.f32.mxu0 %v8998_v0  ;;  %2783 = vmatprep.mubr.f32.mxu1 %v8998_v0  ;;  %v8808_v20 = vld [vmem:[%s12295_s0 + $0x70] sm:$0xff] }
 0x24b   :  { %v4362_v10 = vmax.f32 %v1948_v41, 0.0  ;;  %v4361_v48 = vmax.f32 %v1501_v42, 0.0  ;;  %v1504_v12 = vpop.f32.mrb[176].mxu0 }
 0x24c   :  { %v5182_v52 = vadd.f32 %v5181_v34, %v4360_v44  ;;  %v4363_v14 = vmax.f32 %v1950_v45, 0.0  ;;  %v1505_v53 = vadd.f32 %v1504_v12, %v10227_v30  ;;  %v1953_v2 = vpop.f32.mrb[176].mxu1  ;;  %v1506_v49 = vpop.f32.mrb[177].mxu0  ;;  %8043 = vmatmul.mubr.msk.f32.gmra.mrb[26].mxu0 %vm203_vm0, %v8807_v21 }
 0x24d   :  { %v5256_v56 = vadd.f32 %v5255_v54, %v4362_v10  ;;  %v5219_v50 = vadd.f32 %v5218_v40, %v4361_v48  ;;  %v1954_v60 = vadd.f32 %v1953_v2, %v10240_v38  ;;  %v1507_v57 = vadd.f32 %v1506_v49, %v10231_v31  ;;  %v1955_v11 = vpop.f32.mrb[177].mxu1  ;;  %8107 = vmatmul.mubr.msk.f32.gmra.mrb[26].mxu1 %vm203_vm0, %v8807_v21 }
 0x24e   :  { %v5293_v36 = vadd.f32 %v5292_v9, %v4363_v14  ;;  %v4376_v22 = vmax.f32 %v1505_v53, 0.0  ;;  %v1956_v61 = vadd.f32 %v1955_v11, %v10250_v46  ;;  %2340 = vmatprep.mubr.f32.mxu0 %v8998_v0  ;;  %2789 = vmatprep.mubr.f32.mxu1 %v8998_v0  ;;  %v8809_v9 = vld [vmem:[%s12295_s0 + $0x78] sm:$0xff] }
 0x24f   :  { %v4378_v5 = vmax.f32 %v1954_v60, 0.0  ;;  %v4377_v15 = vmax.f32 %v1507_v57, 0.0  ;;  %v1510_v29 = vpop.f32.mrb[178].mxu0 }
 0x250   :  { %v5183_v16 = vadd.f32 %v5182_v52, %v4376_v22  ;;  %v4379_v63 = vmax.f32 %v1956_v61, 0.0  ;;  %v1511_v18 = vadd.f32 %v1510_v29, %v10227_v30  ;;  %v1959_v59 = vpop.f32.mrb[178].mxu1  ;;  %v1512_v19 = vpop.f32.mrb[179].mxu0  ;;  %8044 = vmatmul.mubr.msk.f32.gmra.mrb[28].mxu0 %vm203_vm0, %v8808_v20 }
 0x251   :  { %v5257_v51 = vadd.f32 %v5256_v56, %v4378_v5  ;;  %v5220_v23 = vadd.f32 %v5219_v50, %v4377_v15  ;;  %v1960_v26 = vadd.f32 %v1959_v59, %v10240_v38  ;;  %v1513_v55 = vadd.f32 %v1512_v19, %v10231_v31  ;;  %v1961_v33 = vpop.f32.mrb[179].mxu1  ;;  %8108 = vmatmul.mubr.msk.f32.gmra.mrb[28].mxu1 %vm203_vm0, %v8808_v20 }
 0x252   :  { %v5294_v34 = vadd.f32 %v5293_v36, %v4379_v63  ;;  %v4392_v47 = vmax.f32 %v1511_v18, 0.0  ;;  %v1962_v27 = vadd.f32 %v1961_v33, %v10250_v46  ;;  %2346 = vmatprep.mubr.f32.mxu0 %v8998_v0  ;;  %2795 = vmatprep.mubr.f32.mxu1 %v8998_v0  ;;  %v8810_v36 = vld [vmem:[%s12295_s0 + $0x80] sm:$0xff] }
 0x253   :  { %v4394_v28 = vmax.f32 %v1960_v26, 0.0  ;;  %v4393_v35 = vmax.f32 %v1513_v55, 0.0  ;;  %v1516_v39 = vpop.f32.mrb[180].mxu0 }
 0x254   :  { %v5184_v54 = vadd.f32 %v5183_v16, %v4392_v47  ;;  %v4395_v40 = vmax.f32 %v1962_v27, 0.0  ;;  %v1517_v41 = vadd.f32 %v1516_v39, %v10227_v30  ;;  %v1965_v42 = vpop.f32.mrb[180].mxu1  ;;  %v1518_v43 = vpop.f32.mrb[181].mxu0  ;;  %8045 = vmatmul.mubr.msk.f32.gmra.mrb[30].mxu0 %vm203_vm0, %v8809_v9 }
 0x255   :  { %v5258_v44 = vadd.f32 %v5257_v51, %v4394_v28  ;;  %v5221_v45 = vadd.f32 %v5220_v23, %v4393_v35  ;;  %v1966_v10 = vadd.f32 %v1965_v42, %v10240_v38  ;;  %v1519_v48 = vadd.f32 %v1518_v43, %v10231_v31  ;;  %v1967_v12 = vpop.f32.mrb[181].mxu1  ;;  %8109 = vmatmul.mubr.msk.f32.gmra.mrb[30].mxu1 %vm203_vm0, %v8809_v9 }
 0x256   :  { %v5295_v52 = vadd.f32 %v5294_v34, %v4395_v40  ;;  %v4408_v14 = vmax.f32 %v1517_v41, 0.0  ;;  %v1968_v53 = vadd.f32 %v1967_v12, %v10250_v46  ;;  %2352 = vmatprep.mubr.f32.mxu0 %v8998_v0  ;;  %2801 = vmatprep.mubr.f32.mxu1 %v8998_v0  ;;  %v8811_v34 = vld [vmem:[%s12295_s0 + $0x88] sm:$0xff] }
 0x257   :  { %v4410_v2 = vmax.f32 %v1966_v10, 0.0  ;;  %v4409_v49 = vmax.f32 %v1519_v48, 0.0  ;;  %v1522_v21 = vpop.f32.mrb[182].mxu0 }
 0x258   :  { %v5185_v56 = vadd.f32 %v5184_v54, %v4408_v14  ;;  %v4411_v50 = vmax.f32 %v1968_v53, 0.0  ;;  %v1523_v60 = vadd.f32 %v1522_v21, %v10227_v30  ;;  %v1971_v57 = vpop.f32.mrb[182].mxu1  ;;  %v1524_v11 = vpop.f32.mrb[183].mxu0  ;;  %8046 = vmatmul.mubr.msk.f32.gmra.mrb[32].mxu0 %vm203_vm0, %v8810_v36 }
 0x259   :  { %v5259_v22 = vadd.f32 %v5258_v44, %v4410_v2  ;;  %v5222_v61 = vadd.f32 %v5221_v45, %v4409_v49  ;;  %v1972_v5 = vadd.f32 %v1971_v57, %v10240_v38  ;;  %v1525_v15 = vadd.f32 %v1524_v11, %v10231_v31  ;;  %v1973_v29 = vpop.f32.mrb[183].mxu1  ;;  %8110 = vmatmul.mubr.msk.f32.gmra.mrb[32].mxu1 %vm203_vm0, %v8810_v36 }
 0x25a   :  { %v5296_v16 = vadd.f32 %v5295_v52, %v4411_v50  ;;  %v4424_v63 = vmax.f32 %v1523_v60, 0.0  ;;  %v1974_v18 = vadd.f32 %v1973_v29, %v10250_v46  ;;  %2358 = vmatprep.mubr.f32.mxu0 %v8998_v0  ;;  %2807 = vmatprep.mubr.f32.mxu1 %v8998_v0  ;;  %v8812_v52 = vld [vmem:[%s12295_s0 + $0x90] sm:$0xff] }
 0x25b   :  { %v4426_v59 = vmax.f32 %v1972_v5, 0.0  ;;  %v4425_v19 = vmax.f32 %v1525_v15, 0.0  ;;  %v1528_v20 = vpop.f32.mrb[184].mxu0 }
 0x25c   :  { %v5186_v51 = vadd.f32 %v5185_v56, %v4424_v63  ;;  %v4427_v23 = vmax.f32 %v1974_v18, 0.0  ;;  %v1529_v26 = vadd.f32 %v1528_v20, %v10227_v30  ;;  %v1977_v55 = vpop.f32.mrb[184].mxu1  ;;  %v1530_v33 = vpop.f32.mrb[185].mxu0  ;;  %8047 = vmatmul.mubr.msk.f32.gmra.mrb[34].mxu0 %vm203_vm0, %v8811_v34 }
 0x25d   :  { %v5260_v47 = vadd.f32 %v5259_v22, %v4426_v59  ;;  %v5223_v27 = vadd.f32 %v5222_v61, %v4425_v19  ;;  %v1978_v28 = vadd.f32 %v1977_v55, %v10240_v38  ;;  %v1531_v35 = vadd.f32 %v1530_v33, %v10231_v31  ;;  %v1979_v39 = vpop.f32.mrb[185].mxu1  ;;  %8111 = vmatmul.mubr.msk.f32.gmra.mrb[34].mxu1 %vm203_vm0, %v8811_v34 }
 0x25e   :  { %v5297_v54 = vadd.f32 %v5296_v16, %v4427_v23  ;;  %v4440_v40 = vmax.f32 %v1529_v26, 0.0  ;;  %v1980_v41 = vadd.f32 %v1979_v39, %v10250_v46  ;;  %2364 = vmatprep.mubr.f32.mxu0 %v8998_v0  ;;  %2813 = vmatprep.mubr.f32.mxu1 %v8998_v0  ;;  %v8813_v16 = vld [vmem:[%s12295_s0 + $0x98] sm:$0xff] }
 0x25f   :  { %v4442_v42 = vmax.f32 %v1978_v28, 0.0  ;;  %v4441_v43 = vmax.f32 %v1531_v35, 0.0  ;;  %v1534_v9 = vpop.f32.mrb[186].mxu0 }
 0x260   :  { %v5187_v44 = vadd.f32 %v5186_v51, %v4440_v40  ;;  %v4443_v45 = vmax.f32 %v1980_v41, 0.0  ;;  %v1535_v10 = vadd.f32 %v1534_v9, %v10227_v30  ;;  %v1983_v48 = vpop.f32.mrb[186].mxu1  ;;  %v1536_v12 = vpop.f32.mrb[187].mxu0  ;;  %8048 = vmatmul.mubr.msk.f32.gmra.mrb[36].mxu0 %vm203_vm0, %v8812_v52 }
 0x261   :  { %v5261_v14 = vadd.f32 %v5260_v47, %v4442_v42  ;;  %v5224_v53 = vadd.f32 %v5223_v27, %v4441_v43  ;;  %v1984_v2 = vadd.f32 %v1983_v48, %v10240_v38  ;;  %v1537_v49 = vadd.f32 %v1536_v12, %v10231_v31  ;;  %v1985_v21 = vpop.f32.mrb[187].mxu1  ;;  %8112 = vmatmul.mubr.msk.f32.gmra.mrb[36].mxu1 %vm203_vm0, %v8812_v52 }
 0x262   :  { %v5298_v56 = vadd.f32 %v5297_v54, %v4443_v45  ;;  %v4456_v50 = vmax.f32 %v1535_v10, 0.0  ;;  %v1986_v60 = vadd.f32 %v1985_v21, %v10250_v46  ;;  %2370 = vmatprep.mubr.f32.mxu0 %v8998_v0  ;;  %2819 = vmatprep.mubr.f32.mxu1 %v8998_v0  ;;  %v8814_v54 = vld [vmem:[%s12295_s0 + $0xa0] sm:$0xff] }
 0x263   :  { %v4458_v57 = vmax.f32 %v1984_v2, 0.0  ;;  %v4457_v11 = vmax.f32 %v1537_v49, 0.0  ;;  %v1540_v36 = vpop.f32.mrb[188].mxu0  ;;  %v8815_v49 = vld [vmem:[%s12295_s0 + $0xa8] sm:$0xff] }
 0x264   :  { %v5188_v22 = vadd.f32 %v5187_v44, %v4456_v50  ;;  %v4459_v61 = vmax.f32 %v1986_v60, 0.0  ;;  %v1541_v5 = vadd.f32 %v1540_v36, %v10227_v30  ;;  %v1989_v15 = vpop.f32.mrb[188].mxu1  ;;  %v1542_v29 = vpop.f32.mrb[189].mxu0  ;;  %8049 = vmatmul.mubr.msk.f32.gmra.mrb[38].mxu0 %vm203_vm0, %v8813_v16 }
 0x265   :  { %v5262_v63 = vadd.f32 %v5261_v14, %v4458_v57  ;;  %v5225_v18 = vadd.f32 %v5224_v53, %v4457_v11  ;;  %v1990_v59 = vadd.f32 %v1989_v15, %v10240_v38  ;;  %v1543_v19 = vadd.f32 %v1542_v29, %v10231_v31  ;;  %v1991_v20 = vpop.f32.mrb[189].mxu1  ;;  %8113 = vmatmul.mubr.msk.f32.gmra.mrb[38].mxu1 %vm203_vm0, %v8813_v16 }
 0x266   :  { %v5299_v51 = vadd.f32 %v5298_v56, %v4459_v61  ;;  %v4472_v23 = vmax.f32 %v1541_v5, 0.0  ;;  %v1992_v26 = vadd.f32 %v1991_v20, %v10250_v46  ;;  %2376 = vmatprep.mubr.f32.mxu0 %v8998_v0  ;;  %2825 = vmatprep.mubr.f32.mxu1 %v8998_v0 }
 0x267   :  { %v4474_v55 = vmax.f32 %v1990_v59, 0.0  ;;  %v4473_v33 = vmax.f32 %v1543_v19, 0.0  ;;  %v1546_v34 = vpop.f32.mrb[190].mxu0 }
 0x268   :  { %v5189_v47 = vadd.f32 %v5188_v22, %v4472_v23  ;;  %v4475_v27 = vmax.f32 %v1992_v26, 0.0  ;;  %v1547_v28 = vadd.f32 %v1546_v34, %v10227_v30  ;;  %v1995_v35 = vpop.f32.mrb[190].mxu1  ;;  %v1548_v39 = vpop.f32.mrb[191].mxu0  ;;  %8050 = vmatmul.mubr.msk.f32.gmra.mrb[40].mxu0 %vm203_vm0, %v8814_v54 }
 0x269   :  { %v5263_v40 = vadd.f32 %v5262_v63, %v4474_v55  ;;  %v5226_v41 = vadd.f32 %v5225_v18, %v4473_v33  ;;  %v1996_v42 = vadd.f32 %v1995_v35, %v10240_v38  ;;  %v1549_v43 = vadd.f32 %v1548_v39, %v10231_v31  ;;  %v1997_v9 = vpop.f32.mrb[191].mxu1  ;;  %8114 = vmatmul.mubr.msk.f32.gmra.mrb[40].mxu1 %vm203_vm0, %v8814_v54  ;;  %v8816_v63 = vld [vmem:[%s12295_s0 + $0xb0] sm:$0xff] }
 0x26a   :  { %v5300_v44 = vadd.f32 %v5299_v51, %v4475_v27  ;;  %v4488_v45 = vmax.f32 %v1547_v28, 0.0  ;;  %v1998_v10 = vadd.f32 %v1997_v9, %v10250_v46  ;;  %2382 = vmatprep.mubr.f32.mxu0 %v8998_v0  ;;  %2831 = vmatprep.mubr.f32.mxu1 %v8998_v0 }
 0x26b   :  { %v4490_v48 = vmax.f32 %v1996_v42, 0.0  ;;  %v4489_v12 = vmax.f32 %v1549_v43, 0.0  ;;  %v1552_v52 = vpop.f32.mrb[192].mxu0 }
 0x26c   :  { %v10658_v14 = vadd.f32 %v5189_v47, %v4488_v45  ;;  %v4491_v53 = vmax.f32 %v1998_v10, 0.0  ;;  %v1554_v2 = vpop.f32.mrb[193].mxu0  ;;  %8051 = vmatmul.mubr.msk.f32.gmra.mrb[42].mxu0 %vm203_vm0, %v8815_v49  ;;  %v2001_v21 = vpop.f32.mrb[192].mxu1  ;;  %v1553_v11 = vadd.f32 %v1552_v52, %v10227_v30 }
 0x26d   :  { %v10664_v56 = vadd.f32 %v5263_v40, %v4490_v48  ;;  %v10666_v50 = vadd.f32 %v5226_v41, %v4489_v12  ;;  %8115 = vmatmul.mubr.msk.f32.gmra.mrb[42].mxu1 %vm203_vm0, %v8815_v49  ;;  %v2003_v60 = vpop.f32.mrb[193].mxu1  ;;  %2388 = vmatprep.mubr.f32.mxu0 %v8998_v0  ;;  %v1555_v36 = vadd.f32 %v1554_v2, %v10231_v31  ;;  %v8817_v40 = vld [vmem:[%s12295_s0 + $0xb8] sm:$0xff]  ;;  %v8818_v49 = vld [vmem:[%s12295_s0 + $0xc0] sm:$0xff] }
 0x26e   :  { %v10669_v57 = vadd.f32 %v5300_v44, %v4491_v53  ;;  %2837 = vmatprep.mubr.f32.mxu1 %v8998_v0  ;;  %v2002_v22 = vadd.f32 %v2001_v21, %v10240_v38  ;;  %v2004_v5 = vadd.f32 %v2003_v60, %v10250_v46  ;;  %v4504_v20 = vmax.f32 %v1553_v11, 0.0 }
 0x26f   :  { %v1558_v61 = vpop.f32.mrb[194].mxu0  ;;  %v4505_v26 = vmax.f32 %v1555_v36, 0.0 }
 0x270   :  { %v1559_v15 = vadd.f32 %v1558_v61, %v10227_v30  ;;  %v2007_v29 = vpop.f32.mrb[194].mxu1  ;;  %v1560_v16 = vpop.f32.mrb[195].mxu0  ;;  %8052 = vmatmul.mubr.msk.f32.gmra.mrb[44].mxu0 %vm203_vm0, %v8816_v63  ;;  %v4506_v55 = vmax.f32 %v2002_v22, 0.0  ;;  %v4507_v27 = vmax.f32 %v2004_v5, 0.0 }
 0x271   :  { %v2008_v18 = vadd.f32 %v2007_v29, %v10240_v38  ;;  %v1561_v59 = vadd.f32 %v1560_v16, %v10231_v31  ;;  %v2009_v19 = vpop.f32.mrb[195].mxu1  ;;  %8116 = vmatmul.mubr.msk.f32.gmra.mrb[44].mxu1 %vm203_vm0, %v8816_v63  ;;  %2394 = vmatprep.mubr.f32.mxu0 %v8998_v0 }
 0x272   :  { %v4520_v51 = vmax.f32 %v1559_v15, 0.0  ;;  %v2010_v23 = vadd.f32 %v2009_v19, %v10250_v46  ;;  %2843 = vmatprep.mubr.f32.mxu1 %v8998_v0 }
 0x273   :  { %v4522_v33 = vmax.f32 %v2008_v18, 0.0  ;;  %v4521_v34 = vmax.f32 %v1561_v59, 0.0  ;;  %v1564_v47 = vpop.f32.mrb[196].mxu0 }
 0x274   :  { %v5752_v28 = vadd.f32 %v4520_v51, %v4504_v20  ;;  %v4523_v35 = vmax.f32 %v2010_v23, 0.0  ;;  %v2013_v39 = vpop.f32.mrb[196].mxu1  ;;  %v1566_v54 = vpop.f32.mrb[197].mxu0  ;;  %8053 = vmatmul.mubr.msk.f32.gmra.mrb[46].mxu0 %vm203_vm0, %v8817_v40  ;;  %v1565_v44 = vadd.f32 %v1564_v47, %v10227_v30  ;;  %v8819_v23 = vld [vmem:[%s12295_s0 + $0xc8] sm:$0xff] }
 0x275   :  { %v5826_v41 = vadd.f32 %v4522_v33, %v4506_v55  ;;  %v5789_v42 = vadd.f32 %v4521_v34, %v4505_v26  ;;  %v2015_v43 = vpop.f32.mrb[197].mxu1  ;;  %8117 = vmatmul.mubr.msk.f32.gmra.mrb[46].mxu1 %vm203_vm0, %v8817_v40  ;;  %2400 = vmatprep.mubr.f32.mxu0 %v8998_v0  ;;  %v2014_v45 = vadd.f32 %v2013_v39, %v10240_v38 }
 0x276   :  { %v5863_v9 = vadd.f32 %v4523_v35, %v4507_v27  ;;  %2849 = vmatprep.mubr.f32.mxu1 %v8998_v0  ;;  %v1567_v10 = vadd.f32 %v1566_v54, %v10231_v31  ;;  %v4536_v12 = vmax.f32 %v1565_v44, 0.0  ;;  %v2016_v52 = vadd.f32 %v2015_v43, %v10250_v46 }
 0x277   :  { %v1570_v48 = vpop.f32.mrb[198].mxu0  ;;  %v4538_v21 = vmax.f32 %v2014_v45, 0.0 }
 0x278   :  { %v2019_v53 = vpop.f32.mrb[198].mxu1  ;;  %v1572_v2 = vpop.f32.mrb[199].mxu0  ;;  %8054 = vmatmul.mubr.msk.f32.gmra.mrb[48].mxu0 %vm203_vm0, %v8818_v49  ;;  %v4537_v60 = vmax.f32 %v1567_v10, 0.0  ;;  %v1571_v11 = vadd.f32 %v1570_v48, %v10227_v30  ;;  %v5753_v22 = vadd.f32 %v5752_v28, %v4536_v12  ;;  %v4539_v61 = vmax.f32 %v2016_v52, 0.0  ;;  %v8820_v10 = vld [vmem:[%s12295_s0 + $0xd0] sm:$0xff] }
 0x279   :  { %v2021_v36 = vpop.f32.mrb[199].mxu1  ;;  %8118 = vmatmul.mubr.msk.f32.gmra.mrb[48].mxu1 %vm203_vm0, %v8818_v49  ;;  %2406 = vmatprep.mubr.f32.mxu0 %v8998_v0  ;;  %v2020_v5 = vadd.f32 %v2019_v53, %v10240_v38  ;;  %v5827_v15 = vadd.f32 %v5826_v41, %v4538_v21  ;;  %v1573_v19 = vadd.f32 %v1572_v2, %v10231_v31 }
 0x27a   :  { %2855 = vmatprep.mubr.f32.mxu1 %v8998_v0  ;;  %v5790_v29 = vadd.f32 %v5789_v42, %v4537_v60  ;;  %v4552_v16 = vmax.f32 %v1571_v11, 0.0  ;;  %v5864_v18 = vadd.f32 %v5863_v9, %v4539_v61  ;;  %v2022_v55 = vadd.f32 %v2021_v36, %v10250_v46 }
 0x27b   :  { %v1576_v63 = vpop.f32.mrb[200].mxu0  ;;  %v4554_v59 = vmax.f32 %v2020_v5, 0.0  ;;  %v4553_v27 = vmax.f32 %v1573_v19, 0.0  ;;  %v8821_v19 = vld [vmem:[%s12295_s0 + $0xd8] sm:$0xff] }
 0x27c   :  { %v2025_v20 = vpop.f32.mrb[200].mxu1  ;;  %v1578_v51 = vpop.f32.mrb[201].mxu0  ;;  %8055 = vmatmul.mubr.msk.f32.gmra.mrb[50].mxu0 %vm203_vm0, %v8819_v23  ;;  %v5754_v26 = vadd.f32 %v5753_v22, %v4552_v16  ;;  %v1577_v33 = vadd.f32 %v1576_v63, %v10227_v30  ;;  %v4555_v35 = vmax.f32 %v2022_v55, 0.0 }
 0x27d   :  { %v2027_v34 = vpop.f32.mrb[201].mxu1  ;;  %8119 = vmatmul.mubr.msk.f32.gmra.mrb[50].mxu1 %vm203_vm0, %v8819_v23  ;;  %v5828_v47 = vadd.f32 %v5827_v15, %v4554_v59  ;;  %v2026_v28 = vadd.f32 %v2025_v20, %v10240_v38  ;;  %2412 = vmatprep.mubr.f32.mxu0 %v8998_v0  ;;  %v1579_v54 = vadd.f32 %v1578_v51, %v10231_v31 }
 0x27e   :  { %2861 = vmatprep.mubr.f32.mxu1 %v8998_v0  ;;  %v4568_v39 = vmax.f32 %v1577_v33, 0.0  ;;  %v5791_v41 = vadd.f32 %v5790_v29, %v4553_v27  ;;  %v2028_v43 = vadd.f32 %v2027_v34, %v10250_v46  ;;  %v5865_v48 = vadd.f32 %v5864_v18, %v4555_v35 }
 0x27f   :  { %v1582_v40 = vpop.f32.mrb[202].mxu0  ;;  %v4570_v42 = vmax.f32 %v2026_v28, 0.0  ;;  %v4569_v52 = vmax.f32 %v1579_v54, 0.0 }
 0x280   :  { %v1583_v9 = vadd.f32 %v1582_v40, %v10227_v30  ;;  %v2031_v44 = vpop.f32.mrb[202].mxu1  ;;  %v1584_v45 = vpop.f32.mrb[203].mxu0  ;;  %8056 = vmatmul.mubr.msk.f32.gmra.mrb[52].mxu0 %vm203_vm0, %v8820_v10  ;;  %v5755_v12 = vadd.f32 %v5754_v26, %v4568_v39  ;;  %v4571_v21 = vmax.f32 %v2028_v43, 0.0 }
 0x281   :  { %v2032_v53 = vadd.f32 %v2031_v44, %v10240_v38  ;;  %v2033_v2 = vpop.f32.mrb[203].mxu1  ;;  %8120 = vmatmul.mubr.msk.f32.gmra.mrb[52].mxu1 %vm203_vm0, %v8820_v10  ;;  %2418 = vmatprep.mubr.f32.mxu0 %v8998_v0  ;;  %v5829_v49 = vadd.f32 %v5828_v47, %v4570_v42  ;;  %v1585_v11 = vadd.f32 %v1584_v45, %v10231_v31 }
 0x282   :  { %v4584_v60 = vmax.f32 %v1583_v9, 0.0  ;;  %2867 = vmatprep.mubr.f32.mxu1 %v8998_v0  ;;  %v5792_v36 = vadd.f32 %v5791_v41, %v4569_v52  ;;  %v2034_v61 = vadd.f32 %v2033_v2, %v10250_v46  ;;  %v5866_v15 = vadd.f32 %v5865_v48, %v4571_v21  ;;  %v8822_v9 = vld [vmem:[%s12295_s0 + $0xe0] sm:$0xff] }
 0x283   :  { %v4586_v22 = vmax.f32 %v2032_v53, 0.0  ;;  %v1588_v5 = vpop.f32.mrb[204].mxu0  ;;  %v4585_v16 = vmax.f32 %v1585_v11, 0.0 }
 0x284   :  { %v5756_v29 = vadd.f32 %v5755_v12, %v4584_v60  ;;  %v1589_v63 = vadd.f32 %v1588_v5, %v10227_v30  ;;  %v2037_v18 = vpop.f32.mrb[204].mxu1  ;;  %v1590_v59 = vpop.f32.mrb[205].mxu0  ;;  %8057 = vmatmul.mubr.msk.f32.gmra.mrb[54].mxu0 %vm203_vm0, %v8821_v19  ;;  %v4587_v51 = vmax.f32 %v2034_v61, 0.0 }
 0x285   :  { %v5830_v20 = vadd.f32 %v5829_v49, %v4586_v22  ;;  %v2038_v23 = vadd.f32 %v2037_v18, %v10240_v38  ;;  %v1591_v26 = vadd.f32 %v1590_v59, %v10231_v31  ;;  %v2039_v55 = vpop.f32.mrb[205].mxu1  ;;  %8121 = vmatmul.mubr.msk.f32.gmra.mrb[54].mxu1 %vm203_vm0, %v8821_v19  ;;  %2424 = vmatprep.mubr.f32.mxu0 %v8998_v0 }
 0x286   :  { %v5793_v33 = vadd.f32 %v5792_v36, %v4585_v16  ;;  %v4600_v34 = vmax.f32 %v1589_v63, 0.0  ;;  %v2040_v47 = vadd.f32 %v2039_v55, %v10250_v46  ;;  %2873 = vmatprep.mubr.f32.mxu1 %v8998_v0  ;;  %v5867_v27 = vadd.f32 %v5866_v15, %v4587_v51  ;;  %v8823_v15 = vld [vmem:[%s12295_s0 + $0xe8] sm:$0xff] }
 0x287   :  { %v4602_v28 = vmax.f32 %v2038_v23, 0.0  ;;  %v4601_v35 = vmax.f32 %v1591_v26, 0.0  ;;  %v1594_v39 = vpop.f32.mrb[206].mxu0 }
 0x288   :  { %v5757_v54 = vadd.f32 %v5756_v29, %v4600_v34  ;;  %v4603_v40 = vmax.f32 %v2040_v47, 0.0  ;;  %v1595_v41 = vadd.f32 %v1594_v39, %v10227_v30  ;;  %v2043_v42 = vpop.f32.mrb[206].mxu1  ;;  %v1596_v43 = vpop.f32.mrb[207].mxu0  ;;  %8058 = vmatmul.mubr.msk.f32.gmra.mrb[56].mxu0 %vm203_vm0, %v8822_v9 }
 0x289   :  { %v5831_v44 = vadd.f32 %v5830_v20, %v4602_v28  ;;  %v5794_v45 = vadd.f32 %v5793_v33, %v4601_v35  ;;  %v2044_v10 = vadd.f32 %v2043_v42, %v10240_v38  ;;  %v1597_v48 = vadd.f32 %v1596_v43, %v10231_v31  ;;  %v2045_v12 = vpop.f32.mrb[207].mxu1  ;;  %8122 = vmatmul.mubr.msk.f32.gmra.mrb[56].mxu1 %vm203_vm0, %v8822_v9  ;;  %v8824_v35 = vld [vmem:[%s12295_s0 + $0xf0] sm:$0xff] }
 0x28a   :  { %v5868_v52 = vadd.f32 %v5867_v27, %v4603_v40  ;;  %v4616_v53 = vmax.f32 %v1595_v41, 0.0  ;;  %v2046_v2 = vadd.f32 %v2045_v12, %v10250_v46  ;;  %2430 = vmatprep.mubr.f32.mxu0 %v8998_v0  ;;  %2879 = vmatprep.mubr.f32.mxu1 %v8998_v0 }
 0x28b   :  { %v4618_v49 = vmax.f32 %v2044_v10, 0.0  ;;  %v4617_v21 = vmax.f32 %v1597_v48, 0.0  ;;  %v1600_v60 = vpop.f32.mrb[208].mxu0 }
 0x28c   :  { %v5758_v11 = vadd.f32 %v5757_v54, %v4616_v53  ;;  %v4619_v36 = vmax.f32 %v2046_v2, 0.0  ;;  %v1601_v22 = vadd.f32 %v1600_v60, %v10227_v30  ;;  %v2049_v61 = vpop.f32.mrb[208].mxu1  ;;  %v1602_v5 = vpop.f32.mrb[209].mxu0  ;;  %8059 = vmatmul.mubr.msk.f32.gmra.mrb[58].mxu0 %vm203_vm0, %v8823_v15 }
 0x28d   :  { %v5832_v29 = vadd.f32 %v5831_v44, %v4618_v49  ;;  %v5795_v16 = vadd.f32 %v5794_v45, %v4617_v21  ;;  %v2050_v63 = vadd.f32 %v2049_v61, %v10240_v38  ;;  %v1603_v18 = vadd.f32 %v1602_v5, %v10231_v31  ;;  %v2051_v59 = vpop.f32.mrb[209].mxu1  ;;  %8123 = vmatmul.mubr.msk.f32.gmra.mrb[58].mxu1 %vm203_vm0, %v8823_v15  ;;  %v8825_v21 = vld [vmem:[%s12295_s0 + $0xf8] sm:$0xff] }
 0x28e   :  { %v5869_v19 = vadd.f32 %v5868_v52, %v4619_v36  ;;  %v4632_v20 = vmax.f32 %v1601_v22, 0.0  ;;  %v2052_v51 = vadd.f32 %v2051_v59, %v10250_v46  ;;  %2436 = vmatprep.mubr.f32.mxu0 %v8998_v0  ;;  %2885 = vmatprep.mubr.f32.mxu1 %v8998_v0 }
 0x28f   :  { %v4634_v23 = vmax.f32 %v2050_v63, 0.0  ;;  %v4633_v26 = vmax.f32 %v1603_v18, 0.0  ;;  %v1606_v55 = vpop.f32.mrb[210].mxu0 }
 0x290   :  { %v5759_v33 = vadd.f32 %v5758_v11, %v4632_v20  ;;  %v4635_v34 = vmax.f32 %v2052_v51, 0.0  ;;  %v1607_v47 = vadd.f32 %v1606_v55, %v10227_v30  ;;  %v2055_v27 = vpop.f32.mrb[210].mxu1  ;;  %v1608_v28 = vpop.f32.mrb[211].mxu0  ;;  %8060 = vmatmul.mubr.msk.f32.gmra.mrb[60].mxu0 %vm203_vm0, %v8824_v35 }
 0x291   :  { %v5833_v39 = vadd.f32 %v5832_v29, %v4634_v23  ;;  %v5796_v54 = vadd.f32 %v5795_v16, %v4633_v26  ;;  %v2056_v40 = vadd.f32 %v2055_v27, %v10240_v38  ;;  %v1609_v41 = vadd.f32 %v1608_v28, %v10231_v31  ;;  %v2057_v42 = vpop.f32.mrb[211].mxu1  ;;  %8124 = vmatmul.mubr.msk.f32.gmra.mrb[60].mxu1 %vm203_vm0, %v8824_v35  ;;  %v8826_v26 = vld [vmem:[%s12295_s0 + $0x100] sm:$0xff] }
 0x292   :  { %v5870_v43 = vadd.f32 %v5869_v19, %v4635_v34  ;;  %v4648_v9 = vmax.f32 %v1607_v47, 0.0  ;;  %v2058_v44 = vadd.f32 %v2057_v42, %v10250_v46  ;;  %2442 = vmatprep.mubr.f32.mxu0 %v8998_v0  ;;  %2891 = vmatprep.mubr.f32.mxu1 %v8998_v0 }
 0x293   :  { %v4650_v45 = vmax.f32 %v2056_v40, 0.0  ;;  %v4649_v10 = vmax.f32 %v1609_v41, 0.0  ;;  %v1612_v48 = vpop.f32.mrb[212].mxu0 }
 0x294   :  { %v5760_v12 = vadd.f32 %v5759_v33, %v4648_v9  ;;  %v4651_v52 = vmax.f32 %v2058_v44, 0.0  ;;  %v1613_v53 = vadd.f32 %v1612_v48, %v10227_v30  ;;  %v2061_v2 = vpop.f32.mrb[212].mxu1  ;;  %v1614_v49 = vpop.f32.mrb[213].mxu0  ;;  %8061 = vmatmul.mubr.msk.f32.gmra.mrb[62].mxu0 %vm203_vm0, %v8825_v21 }
 0x295   :  { %v5834_v60 = vadd.f32 %v5833_v39, %v4650_v45  ;;  %v5797_v11 = vadd.f32 %v5796_v54, %v4649_v10  ;;  %v2062_v36 = vadd.f32 %v2061_v2, %v10240_v38  ;;  %v1615_v22 = vadd.f32 %v1614_v49, %v10231_v31  ;;  %v2063_v61 = vpop.f32.mrb[213].mxu1  ;;  %8125 = vmatmul.mubr.msk.f32.gmra.mrb[62].mxu1 %vm203_vm0, %v8825_v21  ;;  %v8827_v10 = vld [vmem:[%s12295_s0 + $0x108] sm:$0xff] }
 0x296   :  { %v5871_v5 = vadd.f32 %v5870_v43, %v4651_v52  ;;  %v4664_v15 = vmax.f32 %v1613_v53, 0.0  ;;  %v2064_v29 = vadd.f32 %v2063_v61, %v10250_v46  ;;  %2448 = vmatprep.mubr.f32.mxu0 %v8998_v0  ;;  %2897 = vmatprep.mubr.f32.mxu1 %v8998_v0 }
 0x297   :  { %v4666_v16 = vmax.f32 %v2062_v36, 0.0  ;;  %v4665_v63 = vmax.f32 %v1615_v22, 0.0  ;;  %v1618_v18 = vpop.f32.mrb[214].mxu0 }
 0x298   :  { %v5761_v59 = vadd.f32 %v5760_v12, %v4664_v15  ;;  %v4667_v19 = vmax.f32 %v2064_v29, 0.0  ;;  %v1619_v20 = vadd.f32 %v1618_v18, %v10227_v30  ;;  %v2067_v51 = vpop.f32.mrb[214].mxu1  ;;  %v1620_v23 = vpop.f32.mrb[215].mxu0  ;;  %8062 = vmatmul.mubr.msk.f32.gmra.mrb[64].mxu0 %vm203_vm0, %v8826_v26 }
 0x299   :  { %v5835_v55 = vadd.f32 %v5834_v60, %v4666_v16  ;;  %v5798_v33 = vadd.f32 %v5797_v11, %v4665_v63  ;;  %v2068_v34 = vadd.f32 %v2067_v51, %v10240_v38  ;;  %v1621_v47 = vadd.f32 %v1620_v23, %v10231_v31  ;;  %v2069_v27 = vpop.f32.mrb[215].mxu1  ;;  %8126 = vmatmul.mubr.msk.f32.gmra.mrb[64].mxu1 %vm203_vm0, %v8826_v26  ;;  %v8828_v63 = vld [vmem:[%s12295_s0 + $0x110] sm:$0xff] }
 0x29a   :  { %v5872_v28 = vadd.f32 %v5871_v5, %v4667_v19  ;;  %v4680_v35 = vmax.f32 %v1619_v20, 0.0  ;;  %v2070_v39 = vadd.f32 %v2069_v27, %v10250_v46  ;;  %2454 = vmatprep.mubr.f32.mxu0 %v8998_v0  ;;  %2903 = vmatprep.mubr.f32.mxu1 %v8998_v0 }
 0x29b   :  { %v4682_v54 = vmax.f32 %v2068_v34, 0.0  ;;  %v4681_v40 = vmax.f32 %v1621_v47, 0.0  ;;  %v1624_v41 = vpop.f32.mrb[216].mxu0 }
 0x29c   :  { %v5762_v42 = vadd.f32 %v5761_v59, %v4680_v35  ;;  %v4683_v43 = vmax.f32 %v2070_v39, 0.0  ;;  %v1625_v9 = vadd.f32 %v1624_v41, %v10227_v30  ;;  %v2073_v44 = vpop.f32.mrb[216].mxu1  ;;  %v1626_v45 = vpop.f32.mrb[217].mxu0  ;;  %8063 = vmatmul.mubr.msk.f32.gmra.mrb[66].mxu0 %vm203_vm0, %v8827_v10 }
 0x29d   :  { %v5836_v48 = vadd.f32 %v5835_v55, %v4682_v54  ;;  %v5799_v12 = vadd.f32 %v5798_v33, %v4681_v40  ;;  %v2074_v52 = vadd.f32 %v2073_v44, %v10240_v38  ;;  %v1627_v53 = vadd.f32 %v1626_v45, %v10231_v31  ;;  %v2075_v2 = vpop.f32.mrb[217].mxu1  ;;  %8127 = vmatmul.mubr.msk.f32.gmra.mrb[66].mxu1 %vm203_vm0, %v8827_v10  ;;  %v8829_v40 = vld [vmem:[%s12295_s0 + $0x118] sm:$0xff] }
 0x29e   :  { %v5873_v49 = vadd.f32 %v5872_v28, %v4683_v43  ;;  %v4696_v21 = vmax.f32 %v1625_v9, 0.0  ;;  %v2076_v60 = vadd.f32 %v2075_v2, %v10250_v46  ;;  %2460 = vmatprep.mubr.f32.mxu0 %v8998_v0  ;;  %2909 = vmatprep.mubr.f32.mxu1 %v8998_v0 }
 0x29f   :  { %v4698_v11 = vmax.f32 %v2074_v52, 0.0  ;;  %v4697_v36 = vmax.f32 %v1627_v53, 0.0  ;;  %v1630_v22 = vpop.f32.mrb[218].mxu0 }
 0x2a0   :  { %v5763_v61 = vadd.f32 %v5762_v42, %v4696_v21  ;;  %v4699_v5 = vmax.f32 %v2076_v60, 0.0  ;;  %v1631_v15 = vadd.f32 %v1630_v22, %v10227_v30  ;;  %v2079_v29 = vpop.f32.mrb[218].mxu1  ;;  %v1632_v16 = vpop.f32.mrb[219].mxu0  ;;  %8064 = vmatmul.mubr.msk.f32.gmra.mrb[68].mxu0 %vm203_vm0, %v8828_v63 }
 0x2a1   :  { %v5837_v18 = vadd.f32 %v5836_v48, %v4698_v11  ;;  %v5800_v59 = vadd.f32 %v5799_v12, %v4697_v36  ;;  %v2080_v19 = vadd.f32 %v2079_v29, %v10240_v38  ;;  %v1633_v20 = vadd.f32 %v1632_v16, %v10231_v31  ;;  %v2081_v51 = vpop.f32.mrb[219].mxu1  ;;  %8128 = vmatmul.mubr.msk.f32.gmra.mrb[68].mxu1 %vm203_vm0, %v8828_v63  ;;  %v8830_v36 = vld [vmem:[%s12295_s0 + $0x120] sm:$0xff] }
 0x2a2   :  { %v5874_v23 = vadd.f32 %v5873_v49, %v4699_v5  ;;  %v4712_v26 = vmax.f32 %v1631_v15, 0.0  ;;  %v2082_v55 = vadd.f32 %v2081_v51, %v10250_v46  ;;  %2466 = vmatprep.mubr.f32.mxu0 %v8998_v0  ;;  %2915 = vmatprep.mubr.f32.mxu1 %v8998_v0 }
 0x2a3   :  { %v4714_v33 = vmax.f32 %v2080_v19, 0.0  ;;  %v4713_v34 = vmax.f32 %v1633_v20, 0.0  ;;  %v1636_v47 = vpop.f32.mrb[220].mxu0 }
 0x2a4   :  { %v5764_v27 = vadd.f32 %v5763_v61, %v4712_v26  ;;  %v4715_v28 = vmax.f32 %v2082_v55, 0.0  ;;  %v1637_v35 = vadd.f32 %v1636_v47, %v10227_v30  ;;  %v2085_v39 = vpop.f32.mrb[220].mxu1  ;;  %v1638_v54 = vpop.f32.mrb[221].mxu0  ;;  %8065 = vmatmul.mubr.msk.f32.gmra.mrb[70].mxu0 %vm203_vm0, %v8829_v40 }
 0x2a5   :  { %v5838_v41 = vadd.f32 %v5837_v18, %v4714_v33  ;;  %v5801_v42 = vadd.f32 %v5800_v59, %v4713_v34  ;;  %v2086_v43 = vadd.f32 %v2085_v39, %v10240_v38  ;;  %v1639_v9 = vadd.f32 %v1638_v54, %v10231_v31  ;;  %v2087_v44 = vpop.f32.mrb[221].mxu1  ;;  %8129 = vmatmul.mubr.msk.f32.gmra.mrb[70].mxu1 %vm203_vm0, %v8829_v40  ;;  %v8831_v34 = vld [vmem:[%s12295_s0 + $0x128] sm:$0xff] }
 0x2a6   :  { %v5875_v45 = vadd.f32 %v5874_v23, %v4715_v28  ;;  %v4728_v10 = vmax.f32 %v1637_v35, 0.0  ;;  %v2088_v48 = vadd.f32 %v2087_v44, %v10250_v46  ;;  %2472 = vmatprep.mubr.f32.mxu0 %v8998_v0  ;;  %2921 = vmatprep.mubr.f32.mxu1 %v8998_v0 }
 0x2a7   :  { %v4730_v12 = vmax.f32 %v2086_v43, 0.0  ;;  %v4729_v52 = vmax.f32 %v1639_v9, 0.0  ;;  %v1642_v53 = vpop.f32.mrb[222].mxu0 }
 0x2a8   :  { %v5765_v2 = vadd.f32 %v5764_v27, %v4728_v10  ;;  %v4731_v49 = vmax.f32 %v2088_v48, 0.0  ;;  %v1643_v21 = vadd.f32 %v1642_v53, %v10227_v30  ;;  %v2091_v60 = vpop.f32.mrb[222].mxu1  ;;  %v1644_v11 = vpop.f32.mrb[223].mxu0  ;;  %8066 = vmatmul.mubr.msk.f32.gmra.mrb[72].mxu0 %vm203_vm0, %v8830_v36 }
 0x2a9   :  { %v5839_v22 = vadd.f32 %v5838_v41, %v4730_v12  ;;  %v5802_v61 = vadd.f32 %v5801_v42, %v4729_v52  ;;  %v2092_v5 = vadd.f32 %v2091_v60, %v10240_v38  ;;  %v1645_v15 = vadd.f32 %v1644_v11, %v10231_v31  ;;  %v2093_v29 = vpop.f32.mrb[223].mxu1  ;;  %8130 = vmatmul.mubr.msk.f32.gmra.mrb[72].mxu1 %vm203_vm0, %v8830_v36  ;;  %v8832_v52 = vld [vmem:[%s12295_s0 + $0x130] sm:$0xff] }
 0x2aa   :  { %v5876_v16 = vadd.f32 %v5875_v45, %v4731_v49  ;;  %v4744_v63 = vmax.f32 %v1643_v21, 0.0  ;;  %v2094_v18 = vadd.f32 %v2093_v29, %v10250_v46  ;;  %2478 = vmatprep.mubr.f32.mxu0 %v8998_v0  ;;  %2927 = vmatprep.mubr.f32.mxu1 %v8998_v0 }
 0x2ab   :  { %v4746_v59 = vmax.f32 %v2092_v5, 0.0  ;;  %v4745_v19 = vmax.f32 %v1645_v15, 0.0  ;;  %v1648_v20 = vpop.f32.mrb[224].mxu0 }
 0x2ac   :  { %v5766_v51 = vadd.f32 %v5765_v2, %v4744_v63  ;;  %v4747_v23 = vmax.f32 %v2094_v18, 0.0  ;;  %v1649_v26 = vadd.f32 %v1648_v20, %v10227_v30  ;;  %v2097_v55 = vpop.f32.mrb[224].mxu1  ;;  %v1650_v33 = vpop.f32.mrb[225].mxu0  ;;  %8067 = vmatmul.mubr.msk.f32.gmra.mrb[74].mxu0 %vm203_vm0, %v8831_v34 }
 0x2ad   :  { %v5840_v47 = vadd.f32 %v5839_v22, %v4746_v59  ;;  %v5803_v27 = vadd.f32 %v5802_v61, %v4745_v19  ;;  %v2098_v28 = vadd.f32 %v2097_v55, %v10240_v38  ;;  %v1651_v35 = vadd.f32 %v1650_v33, %v10231_v31  ;;  %v2099_v39 = vpop.f32.mrb[225].mxu1  ;;  %8131 = vmatmul.mubr.msk.f32.gmra.mrb[74].mxu1 %vm203_vm0, %v8831_v34  ;;  %v8833_v19 = vld [vmem:[%s12295_s0 + $0x138] sm:$0xff] }
 0x2ae   :  { %v5877_v54 = vadd.f32 %v5876_v16, %v4747_v23  ;;  %v4760_v40 = vmax.f32 %v1649_v26, 0.0  ;;  %v2100_v41 = vadd.f32 %v2099_v39, %v10250_v46  ;;  %2484 = vmatprep.mubr.f32.mxu0 %v8998_v0  ;;  %2933 = vmatprep.mubr.f32.mxu1 %v8998_v0 }
 0x2af   :  { %v4762_v42 = vmax.f32 %v2098_v28, 0.0  ;;  %v4761_v43 = vmax.f32 %v1651_v35, 0.0  ;;  %v1654_v9 = vpop.f32.mrb[226].mxu0 }
 0x2b0   :  { %v5767_v44 = vadd.f32 %v5766_v51, %v4760_v40  ;;  %v4763_v45 = vmax.f32 %v2100_v41, 0.0  ;;  %v1655_v10 = vadd.f32 %v1654_v9, %v10227_v30  ;;  %v2103_v48 = vpop.f32.mrb[226].mxu1  ;;  %v1656_v12 = vpop.f32.mrb[227].mxu0  ;;  %8068 = vmatmul.mubr.msk.f32.gmra.mrb[76].mxu0 %vm203_vm0, %v8832_v52 }
 0x2b1   :  { %v5841_v53 = vadd.f32 %v5840_v47, %v4762_v42  ;;  %v5804_v2 = vadd.f32 %v5803_v27, %v4761_v43  ;;  %v2104_v49 = vadd.f32 %v2103_v48, %v10240_v38  ;;  %v1657_v21 = vadd.f32 %v1656_v12, %v10231_v31  ;;  %v2105_v60 = vpop.f32.mrb[227].mxu1  ;;  %8132 = vmatmul.mubr.msk.f32.gmra.mrb[76].mxu1 %vm203_vm0, %v8832_v52  ;;  %v8834_v43 = vld [vmem:[%s12295_s0 + $0x140] sm:$0xff] }
 0x2b2   :  { %v5878_v11 = vadd.f32 %v5877_v54, %v4763_v45  ;;  %v4776_v36 = vmax.f32 %v1655_v10, 0.0  ;;  %v2106_v22 = vadd.f32 %v2105_v60, %v10250_v46  ;;  %2490 = vmatprep.mubr.f32.mxu0 %v8998_v0  ;;  %2939 = vmatprep.mubr.f32.mxu1 %v8998_v0 }
 0x2b3   :  { %v4778_v61 = vmax.f32 %v2104_v49, 0.0  ;;  %v4777_v5 = vmax.f32 %v1657_v21, 0.0  ;;  %v1660_v15 = vpop.f32.mrb[228].mxu0 }
 0x2b4   :  { %v5768_v29 = vadd.f32 %v5767_v44, %v4776_v36  ;;  %v4779_v16 = vmax.f32 %v2106_v22, 0.0  ;;  %v1661_v63 = vadd.f32 %v1660_v15, %v10227_v30  ;;  %v2109_v18 = vpop.f32.mrb[228].mxu1  ;;  %v1662_v59 = vpop.f32.mrb[229].mxu0  ;;  %8069 = vmatmul.mubr.msk.f32.gmra.mrb[78].mxu0 %vm203_vm0, %v8833_v19 }
 0x2b5   :  { %v5842_v20 = vadd.f32 %v5841_v53, %v4778_v61  ;;  %v5805_v51 = vadd.f32 %v5804_v2, %v4777_v5  ;;  %v2110_v23 = vadd.f32 %v2109_v18, %v10240_v38  ;;  %v1663_v26 = vadd.f32 %v1662_v59, %v10231_v31  ;;  %v2111_v55 = vpop.f32.mrb[229].mxu1  ;;  %8133 = vmatmul.mubr.msk.f32.gmra.mrb[78].mxu1 %vm203_vm0, %v8833_v19  ;;  %v8835_v5 = vld [vmem:[%s12295_s0 + $0x148] sm:$0xff] }
 0x2b6   :  { %v5879_v33 = vadd.f32 %v5878_v11, %v4779_v16  ;;  %v4792_v34 = vmax.f32 %v1661_v63, 0.0  ;;  %v2112_v47 = vadd.f32 %v2111_v55, %v10250_v46  ;;  %2496 = vmatprep.mubr.f32.mxu0 %v8998_v0  ;;  %2945 = vmatprep.mubr.f32.mxu1 %v8998_v0 }
 0x2b7   :  { %v4794_v27 = vmax.f32 %v2110_v23, 0.0  ;;  %v4793_v28 = vmax.f32 %v1663_v26, 0.0  ;;  %v1666_v35 = vpop.f32.mrb[230].mxu0 }
 0x2b8   :  { %v5769_v39 = vadd.f32 %v5768_v29, %v4792_v34  ;;  %v4795_v54 = vmax.f32 %v2112_v47, 0.0  ;;  %v1667_v40 = vadd.f32 %v1666_v35, %v10227_v30  ;;  %v2115_v41 = vpop.f32.mrb[230].mxu1  ;;  %v1668_v42 = vpop.f32.mrb[231].mxu0  ;;  %8070 = vmatmul.mubr.msk.f32.gmra.mrb[80].mxu0 %vm203_vm0, %v8834_v43 }
 0x2b9   :  { %v5843_v9 = vadd.f32 %v5842_v20, %v4794_v27  ;;  %v5806_v44 = vadd.f32 %v5805_v51, %v4793_v28  ;;  %v2116_v45 = vadd.f32 %v2115_v41, %v10240_v38  ;;  %v1669_v10 = vadd.f32 %v1668_v42, %v10231_v31  ;;  %v2117_v48 = vpop.f32.mrb[231].mxu1  ;;  %8134 = vmatmul.mubr.msk.f32.gmra.mrb[80].mxu1 %vm203_vm0, %v8834_v43  ;;  %v8836_v28 = vld [vmem:[%s12295_s0 + $0x150] sm:$0xff] }
 0x2ba   :  { %v5880_v12 = vadd.f32 %v5879_v33, %v4795_v54  ;;  %v4808_v52 = vmax.f32 %v1667_v40, 0.0  ;;  %v2118_v53 = vadd.f32 %v2117_v48, %v10250_v46  ;;  %2502 = vmatprep.mubr.f32.mxu0 %v8998_v0  ;;  %2951 = vmatprep.mubr.f32.mxu1 %v8998_v0 }
 0x2bb   :  { %v4810_v2 = vmax.f32 %v2116_v45, 0.0  ;;  %v4809_v49 = vmax.f32 %v1669_v10, 0.0  ;;  %v1672_v21 = vpop.f32.mrb[232].mxu0 }
 0x2bc   :  { %v5770_v60 = vadd.f32 %v5769_v39, %v4808_v52  ;;  %v4811_v11 = vmax.f32 %v2118_v53, 0.0  ;;  %v1673_v36 = vadd.f32 %v1672_v21, %v10227_v30  ;;  %v2121_v22 = vpop.f32.mrb[232].mxu1  ;;  %v1674_v61 = vpop.f32.mrb[233].mxu0  ;;  %8071 = vmatmul.mubr.msk.f32.gmra.mrb[82].mxu0 %vm203_vm0, %v8835_v5  ;;  %v8837_v21 = vld [vmem:[%s12295_s0 + $0x158] sm:$0xff] }
 0x2bd   :  { %v5844_v15 = vadd.f32 %v5843_v9, %v4810_v2  ;;  %v5807_v29 = vadd.f32 %v5806_v44, %v4809_v49  ;;  %v2122_v16 = vadd.f32 %v2121_v22, %v10240_v38  ;;  %v1675_v63 = vadd.f32 %v1674_v61, %v10231_v31  ;;  %v2123_v18 = vpop.f32.mrb[233].mxu1  ;;  %8135 = vmatmul.mubr.msk.f32.gmra.mrb[82].mxu1 %vm203_vm0, %v8835_v5 }
 0x2be   :  { %v5881_v59 = vadd.f32 %v5880_v12, %v4811_v11  ;;  %v4824_v19 = vmax.f32 %v1673_v36, 0.0  ;;  %v2124_v20 = vadd.f32 %v2123_v18, %v10250_v46  ;;  %2508 = vmatprep.mubr.f32.mxu0 %v8998_v0  ;;  %2957 = vmatprep.mubr.f32.mxu1 %v8998_v0  ;;  %v5191_v44 = vrot.slane %v10658_v14, 4 }
 0x2bf   :  { %v4826_v51 = vmax.f32 %v2122_v16, 0.0  ;;  %v4825_v23 = vmax.f32 %v1675_v63, 0.0  ;;  %v1678_v26 = vpop.f32.mrb[234].mxu0  ;;  %v5265_v63 = vrot.slane %v10664_v56, 4 }
 0x2c0   :  { %v5771_v55 = vadd.f32 %v5770_v60, %v4824_v19  ;;  %v4827_v33 = vmax.f32 %v2124_v20, 0.0  ;;  %v1679_v34 = vadd.f32 %v1678_v26, %v10227_v30  ;;  %v2127_v47 = vpop.f32.mrb[234].mxu1  ;;  %v1680_v27 = vpop.f32.mrb[235].mxu0  ;;  %8072 = vmatmul.mubr.msk.f32.gmra.mrb[84].mxu0 %vm203_vm0, %v8836_v28  ;;  %v5192_v16 = vadd.f32 %v5191_v44, %v10658_v14 }
 0x2c1   :  { %v5845_v35 = vadd.f32 %v5844_v15, %v4826_v51  ;;  %v5808_v39 = vadd.f32 %v5807_v29, %v4825_v23  ;;  %v2128_v54 = vadd.f32 %v2127_v47, %v10240_v38  ;;  %v1681_v40 = vadd.f32 %v1680_v27, %v10231_v31  ;;  %v2129_v41 = vpop.f32.mrb[235].mxu1  ;;  %8136 = vmatmul.mubr.msk.f32.gmra.mrb[84].mxu1 %vm203_vm0, %v8836_v28 }
 0x2c2   :  { %v5882_v42 = vadd.f32 %v5881_v59, %v4827_v33  ;;  %v4840_v43 = vmax.f32 %v1679_v34, 0.0  ;;  %v2130_v9 = vadd.f32 %v2129_v41, %v10250_v46  ;;  %2514 = vmatprep.mubr.f32.mxu0 %v8998_v0  ;;  %2963 = vmatprep.mubr.f32.mxu1 %v8998_v0  ;;  %v8838_v33 = vld [vmem:[%s12295_s0 + $0x160] sm:$0xff]  ;;  %v5266_v41 = vadd.f32 %v5265_v63, %v10664_v56 }
 0x2c3   :  { %v4842_v45 = vmax.f32 %v2128_v54, 0.0  ;;  %v4841_v10 = vmax.f32 %v1681_v40, 0.0  ;;  %v1684_v48 = vpop.f32.mrb[236].mxu0  ;;  %v5193_v40 = vrot.slane %v5192_v16, 2  ;;  %v5228_v63 = vrot.slane %v10666_v50, 4 }
 0x2c4   :  { %v5772_v12 = vadd.f32 %v5771_v55, %v4840_v43  ;;  %v4843_v52 = vmax.f32 %v2130_v9, 0.0  ;;  %v1685_v53 = vadd.f32 %v1684_v48, %v10227_v30  ;;  %v2133_v2 = vpop.f32.mrb[236].mxu1  ;;  %v1686_v49 = vpop.f32.mrb[237].mxu0  ;;  %8073 = vmatmul.mubr.msk.f32.gmra.mrb[86].mxu0 %vm203_vm0, %v8837_v21 }
 0x2c5   :  { %v5846_v60 = vadd.f32 %v5845_v35, %v4842_v45  ;;  %v5809_v11 = vadd.f32 %v5808_v39, %v4841_v10  ;;  %v2134_v36 = vadd.f32 %v2133_v2, %v10240_v38  ;;  %v1687_v22 = vadd.f32 %v1686_v49, %v10231_v31  ;;  %v2135_v61 = vpop.f32.mrb[237].mxu1  ;;  %8137 = vmatmul.mubr.msk.f32.gmra.mrb[86].mxu1 %vm203_vm0, %v8837_v21 }
 0x2c6   :  { %v5883_v5 = vadd.f32 %v5882_v42, %v4843_v52  ;;  %v4856_v15 = vmax.f32 %v1685_v53, 0.0  ;;  %v2136_v29 = vadd.f32 %v2135_v61, %v10250_v46  ;;  %2520 = vmatprep.mubr.f32.mxu0 %v8998_v0  ;;  %2969 = vmatprep.mubr.f32.mxu1 %v8998_v0  ;;  %v8839_v52 = vld [vmem:[%s12295_s0 + $0x168] sm:$0xff]  ;;  %v5267_v61 = vrot.slane %v5266_v41, 2 }
 0x2c7   :  { %v4858_v18 = vmax.f32 %v2134_v36, 0.0  ;;  %v4857_v59 = vmax.f32 %v1687_v22, 0.0  ;;  %v1690_v19 = vpop.f32.mrb[238].mxu0  ;;  %v5194_v22 = vadd.f32 %v5193_v40, %v5192_v16 }
 0x2c8   :  { %v5773_v20 = vadd.f32 %v5772_v12, %v4856_v15  ;;  %v4859_v51 = vmax.f32 %v2136_v29, 0.0  ;;  %v1691_v23 = vadd.f32 %v1690_v19, %v10227_v30  ;;  %v2139_v26 = vpop.f32.mrb[238].mxu1  ;;  %v1692_v55 = vpop.f32.mrb[239].mxu0  ;;  %8074 = vmatmul.mubr.msk.f32.gmra.mrb[88].mxu0 %vm203_vm0, %v8838_v33 }
 0x2c9   :  { %v5847_v34 = vadd.f32 %v5846_v60, %v4858_v18  ;;  %v5810_v47 = vadd.f32 %v5809_v11, %v4857_v59  ;;  %v2140_v14 = vadd.f32 %v2139_v26, %v10240_v38  ;;  %v1693_v27 = vadd.f32 %v1692_v55, %v10231_v31  ;;  %v2141_v28 = vpop.f32.mrb[239].mxu1  ;;  %8138 = vmatmul.mubr.msk.f32.gmra.mrb[88].mxu1 %vm203_vm0, %v8838_v33 }
 0x2ca   :  { %v5884_v35 = vadd.f32 %v5883_v5, %v4859_v51  ;;  %v4872_v39 = vmax.f32 %v1691_v23, 0.0  ;;  %v2142_v54 = vadd.f32 %v2141_v28, %v10250_v46  ;;  %2526 = vmatprep.mubr.f32.mxu0 %v8998_v0  ;;  %2975 = vmatprep.mubr.f32.mxu1 %v8998_v0  ;;  %v8840_v23 = vld [vmem:[%s12295_s0 + $0x170] sm:$0xff] }
 0x2cb   :  { %v4874_v42 = vmax.f32 %v2140_v14, 0.0  ;;  %v4873_v43 = vmax.f32 %v1693_v27, 0.0  ;;  %v1696_v9 = vpop.f32.mrb[240].mxu0 }
 0x2cc   :  { %v5774_v44 = vadd.f32 %v5773_v20, %v4872_v39  ;;  %v4875_v45 = vmax.f32 %v2142_v54, 0.0  ;;  %v1697_v10 = vadd.f32 %v1696_v9, %v10227_v30  ;;  %v2145_v48 = vpop.f32.mrb[240].mxu1  ;;  %v1698_v12 = vpop.f32.mrb[241].mxu0  ;;  %8075 = vmatmul.mubr.msk.f32.gmra.mrb[90].mxu0 %vm203_vm0, %v8839_v52  ;;  %v5268_v39 = vadd.f32 %v5267_v61, %v5266_v41 }
 0x2cd   :  { %v5848_v53 = vadd.f32 %v5847_v34, %v4874_v42  ;;  %v5811_v2 = vadd.f32 %v5810_v47, %v4873_v43  ;;  %v2146_v49 = vadd.f32 %v2145_v48, %v10240_v38  ;;  %v1699_v56 = vadd.f32 %v1698_v12, %v10231_v31  ;;  %v2147_v21 = vpop.f32.mrb[241].mxu1  ;;  %8139 = vmatmul.mubr.msk.f32.gmra.mrb[90].mxu1 %vm203_vm0, %v8839_v52  ;;  %v8841_v12 = vld [vmem:[%s12295_s0 + $0x178] sm:$0xff] }
 0x2ce   :  { %v5885_v60 = vadd.f32 %v5884_v35, %v4875_v45  ;;  %v4888_v11 = vmax.f32 %v1697_v10, 0.0  ;;  %v2148_v36 = vadd.f32 %v2147_v21, %v10250_v46  ;;  %2532 = vmatprep.mubr.f32.mxu0 %v8998_v0  ;;  %2981 = vmatprep.mubr.f32.mxu1 %v8998_v0  ;;  %v5302_v47 = vrot.slane %v10669_v57, 4 }
 0x2cf   :  { %v4890_v5 = vmax.f32 %v2146_v49, 0.0  ;;  %v4889_v15 = vmax.f32 %v1699_v56, 0.0  ;;  %v1702_v29 = vpop.f32.mrb[242].mxu0  ;;  %v5195_v35 = vrot.slane %v5194_v22, 1  ;;  %v5229_v43 = vadd.f32 %v5228_v63, %v10666_v50 }
 0x2d0   :  { %v5775_v18 = vadd.f32 %v5774_v44, %v4888_v11  ;;  %v4891_v59 = vmax.f32 %v2148_v36, 0.0  ;;  %v1703_v19 = vadd.f32 %v1702_v29, %v10227_v30  ;;  %v2151_v20 = vpop.f32.mrb[242].mxu1  ;;  %v1704_v51 = vpop.f32.mrb[243].mxu0  ;;  %8076 = vmatmul.mubr.msk.f32.gmra.mrb[92].mxu0 %vm203_vm0, %v8840_v23  ;;  %v5303_v50 = vadd.f32 %v5302_v47, %v10669_v57 }
 0x2d1   :  { %v5849_v26 = vadd.f32 %v5848_v53, %v4890_v5  ;;  %v5812_v16 = vadd.f32 %v5811_v2, %v4889_v15  ;;  %v2152_v55 = vadd.f32 %v2151_v20, %v10240_v38  ;;  %v1705_v33 = vadd.f32 %v1704_v51, %v10231_v31  ;;  %v2153_v34 = vpop.f32.mrb[243].mxu1  ;;  %8140 = vmatmul.mubr.msk.f32.gmra.mrb[92].mxu1 %vm203_vm0, %v8840_v23  ;;  %v8842_v20 = vld [vmem:[%s12295_s0 + $0x180] sm:$0xff] }
 0x2d2   :  { %v5886_v14 = vadd.f32 %v5885_v60, %v4891_v59  ;;  %v4904_v27 = vmax.f32 %v1703_v19, 0.0  ;;  %v2154_v28 = vadd.f32 %v2153_v34, %v10250_v46  ;;  %2538 = vmatprep.mubr.f32.mxu0 %v8998_v0  ;;  %2987 = vmatprep.mubr.f32.mxu1 %v8998_v0  ;;  %v5196_v11 = vadd.f32 %v5195_v35, %v5194_v22 }
 0x2d3   :  { %v4906_v54 = vmax.f32 %v2152_v55, 0.0  ;;  %v4905_v40 = vmax.f32 %v1705_v33, 0.0  ;;  %v1708_v42 = vpop.f32.mrb[244].mxu0  ;;  %v5269_v36 = vrot.slane %v5268_v39, 1  ;;  %v5230_v29 = vrot.slane %v5229_v43, 2 }
 0x2d4   :  { %v5776_v9 = vadd.f32 %v5775_v18, %v4904_v27  ;;  %v4907_v44 = vmax.f32 %v2154_v28, 0.0  ;;  %v1709_v45 = vadd.f32 %v1708_v42, %v10227_v30  ;;  %v2157_v10 = vpop.f32.mrb[244].mxu1  ;;  %v1710_v48 = vpop.f32.mrb[245].mxu0  ;;  %8077 = vmatmul.mubr.msk.f32.gmra.mrb[94].mxu0 %vm203_vm0, %v8841_v12  ;;  %v5304_v55 = vrot.slane %v5303_v50, 2 }
 0x2d5   :  { %v5850_v52 = vadd.f32 %v5849_v26, %v4906_v54  ;;  %v5813_v53 = vadd.f32 %v5812_v16, %v4905_v40  ;;  %v2158_v41 = vadd.f32 %v2157_v10, %v10240_v38  ;;  %v1711_v2 = vadd.f32 %v1710_v48, %v10231_v31  ;;  %v2159_v49 = vpop.f32.mrb[245].mxu1  ;;  %8141 = vmatmul.mubr.msk.f32.gmra.mrb[94].mxu1 %vm203_vm0, %v8841_v12  ;;  %v8843_v48 = vld [vmem:[%s12295_s0 + $0x188] sm:$0xff] }
 0x2d6   :  { %v5887_v56 = vadd.f32 %v5886_v14, %v4907_v44  ;;  %v4920_v21 = vmax.f32 %v1709_v45, 0.0  ;;  %v2160_v60 = vadd.f32 %v2159_v49, %v10250_v46  ;;  %2544 = vmatprep.mubr.f32.mxu0 %v8998_v0  ;;  %2993 = vmatprep.mubr.f32.mxu1 %v8998_v0  ;;  %v6201_v14 = vmul.f32 0.00390625, %v5196_v11 }
 0x2d7   :  { %v4922_v61 = vmax.f32 %v2158_v41, 0.0  ;;  %v4921_v5 = vmax.f32 %v1711_v2, 0.0  ;;  %v1714_v15 = vpop.f32.mrb[246].mxu0  ;;  %v5270_v27 = vadd.f32 %v5269_v36, %v5268_v39  ;;  %v5231_v40 = vadd.f32 %v5230_v29, %v5229_v43 }
 0x2d8   :  { %v5777_v63 = vadd.f32 %v5776_v9, %v4920_v21  ;;  %v4923_v18 = vmax.f32 %v2160_v60, 0.0  ;;  %v1715_v59 = vadd.f32 %v1714_v15, %v10227_v30  ;;  %v2163_v19 = vpop.f32.mrb[246].mxu1  ;;  %v1716_v57 = vpop.f32.mrb[247].mxu0  ;;  %8078 = vmatmul.mubr.msk.f32.gmra.mrb[96].mxu0 %vm203_vm0, %v8842_v20  ;;  %v10990_v43 = vadd.f32 %v5304_v55, %v5303_v50 }
 0x2d9   :  { %v5851_v51 = vadd.f32 %v5850_v52, %v4922_v61  ;;  %v5814_v23 = vadd.f32 %v5813_v53, %v4921_v5  ;;  %v2164_v22 = vadd.f32 %v2163_v19, %v10240_v38  ;;  %v1717_v26 = vadd.f32 %v1716_v57, %v10231_v31  ;;  %v2165_v16 = vpop.f32.mrb[247].mxu1  ;;  %8142 = vmatmul.mubr.msk.f32.gmra.mrb[96].mxu1 %vm203_vm0, %v8842_v20 }
 0x2da   :  { %v5888_v33 = vadd.f32 %v5887_v56, %v4923_v18  ;;  %v4936_v34 = vmax.f32 %v1715_v59, 0.0  ;;  %v2166_v47 = vadd.f32 %v2165_v16, %v10250_v46  ;;  %2550 = vmatprep.mubr.f32.mxu0 %v8998_v0  ;;  %2999 = vmatprep.mubr.f32.mxu1 %v8998_v0  ;;  %v6233_v21 = vpack.c.bf16 %v6201_v14, %v6201_v14  ;;  %v8844_v59 = vld [vmem:[%s12295_s0 + $0x190] sm:$0xff] }
 0x2db   :  { %v4938_v28 = vmax.f32 %v2164_v22, 0.0  ;;  %v4937_v35 = vmax.f32 %v1717_v26, 0.0  ;;  %v1720_v54 = vpop.f32.mrb[248].mxu0  ;;  %v10995_v60 = vmul.f32 0.00390625, %v5270_v27  ;;  %v5232_v5 = vrot.slane %v5231_v40, 1 }
 0x2dc   :  { %v5778_v42 = vadd.f32 %v5777_v63, %v4936_v34  ;;  %v4939_v9 = vmax.f32 %v2166_v47, 0.0  ;;  %v1721_v44 = vadd.f32 %v1720_v54, %v10227_v30  ;;  %v2169_v45 = vpop.f32.mrb[248].mxu1  ;;  %v1722_v10 = vpop.f32.mrb[249].mxu0  ;;  %8079 = vmatmul.mubr.msk.f32.gmra.mrb[98].mxu0 %vm203_vm0, %v8843_v48  ;;  %v5306_v22 = vrot.slane %v10990_v43, 1 }
 0x2dd   :  { %v5852_v12 = vadd.f32 %v5851_v51, %v4938_v28  ;;  %v5815_v52 = vadd.f32 %v5814_v23, %v4937_v35  ;;  %v2170_v39 = vadd.f32 %v2169_v45, %v10240_v38  ;;  %v1723_v53 = vadd.f32 %v1722_v10, %v10231_v31  ;;  %v2171_v41 = vpop.f32.mrb[249].mxu1  ;;  %8143 = vmatmul.mubr.msk.f32.gmra.mrb[98].mxu1 %vm203_vm0, %v8843_v48  ;;  %v120_v28 = vld [vmem:[%s12297_s2 + $0x8] sm:$0xff]  ;;  %v8845_v45 = vld [vmem:[%s12295_s0 + $0x198] sm:$0xff] }
 0x2de   :  { %v5889_v2 = vadd.f32 %v5888_v33, %v4939_v9  ;;  %v4952_v49 = vmax.f32 %v1721_v44, 0.0  ;;  %v2172_v56 = vadd.f32 %v2171_v41, %v10250_v46  ;;  %2556 = vmatprep.mubr.f32.mxu0 %v8998_v0  ;;  %3005 = vmatprep.mubr.f32.mxu1 %v8998_v0  ;;  %v11009_v33 = vunpack.c.l.b16 %v6233_v21 }
 0x2df   :  { %v4954_v11 = vmax.f32 %v2170_v39, 0.0  ;;  %v4953_v36 = vmax.f32 %v1723_v53, 0.0  ;;  %v1726_v61 = vpop.f32.mrb[250].mxu0  ;;  %v6235_v34 = vpack.c.bf16 %v10995_v60, %v10995_v60  ;;  %v5233_v10 = vadd.f32 %v5232_v5, %v5231_v40 }
 0x2e0   :  { %v5779_v15 = vadd.f32 %v5778_v42, %v4952_v49  ;;  %v4955_v29 = vmax.f32 %v2172_v56, 0.0  ;;  %v1727_v50 = vadd.f32 %v1726_v61, %v10227_v30  ;;  %v2175_v63 = vpop.f32.mrb[250].mxu1  ;;  %v1728_v18 = vpop.f32.mrb[251].mxu0  ;;  %8080 = vmatmul.mubr.msk.f32.gmra.mrb[100].mxu0 %vm203_vm0, %v8844_v59  ;;  %v11029_v40 = vrot.slane %v120_v28, %v125_v3  ;;  %v8846_v3 = vld [vmem:[%s12295_s0 + $0x1a0] sm:$0xff] }
 0x2e1   :  { %v5853_v19 = vadd.f32 %v5852_v12, %v4954_v11  ;;  %v5816_v57 = vadd.f32 %v5815_v52, %v4953_v36  ;;  %v2176_v20 = vadd.f32 %v2175_v63, %v10240_v38  ;;  %v1729_v51 = vadd.f32 %v1728_v18, %v10231_v31  ;;  %v2177_v23 = vpop.f32.mrb[251].mxu1  ;;  %8144 = vmatmul.mubr.msk.f32.gmra.mrb[100].mxu1 %vm203_vm0, %v8844_v59 }
 0x2e2   :  { %v5890_v26 = vadd.f32 %v5889_v2, %v4955_v29  ;;  %v4968_v16 = vmax.f32 %v1727_v50, 0.0  ;;  %v2178_v55 = vadd.f32 %v2177_v23, %v10250_v46  ;;  %2562 = vmatprep.mubr.f32.mxu0 %v8998_v0  ;;  %3011 = vmatprep.mubr.f32.mxu1 %v8998_v0  ;;  %v11033_v11 = vrot.slane %v120_v28, %v129_v6 }
 0x2e3   :  { %v4970_v47 = vmax.f32 %v2176_v20, 0.0  ;;  %v4969_v14 = vmax.f32 %v1729_v51, 0.0  ;;  %v1732_v27 = vpop.f32.mrb[252].mxu0  ;;  %v11037_v36 = vrot.slane %v120_v28, %v133_v4  ;;  %v11044_v63 = vmul.f32 0.00390625, %v5233_v10 }
 0x2e4   :  { %v5780_v35 = vadd.f32 %v5779_v15, %v4968_v16  ;;  %v4971_v54 = vmax.f32 %v2178_v55, 0.0  ;;  %v1733_v42 = vadd.f32 %v1732_v27, %v10227_v30  ;;  %v2181_v9 = vpop.f32.mrb[252].mxu1  ;;  %v1734_v44 = vpop.f32.mrb[253].mxu0  ;;  %8081 = vmatmul.mubr.msk.f32.gmra.mrb[102].mxu0 %vm203_vm0, %v8845_v45  ;;  %v11054_v51 = vrot.slane %v120_v28, %v137_v7  ;;  %v8847_v27 = vld [vmem:[%s12295_s0 + $0x1a8] sm:$0xff] }
 0x2e5   :  { %v5854_v48 = vadd.f32 %v5853_v19, %v4970_v47  ;;  %v5817_v12 = vadd.f32 %v5816_v57, %v4969_v14  ;;  %v2182_v52 = vadd.f32 %v2181_v9, %v10240_v38  ;;  %v1735_v39 = vadd.f32 %v1734_v44, %v10231_v31  ;;  %v2183_v53 = vpop.f32.mrb[253].mxu1  ;;  %8145 = vmatmul.mubr.msk.f32.gmra.mrb[102].mxu1 %vm203_vm0, %v8845_v45 }
 0x2e6   :  { %v5891_v41 = vadd.f32 %v5890_v26, %v4971_v54  ;;  %v4984_v2 = vmax.f32 %v1733_v42, 0.0  ;;  %v2184_v49 = vadd.f32 %v2183_v53, %v10250_v46  ;;  %2568 = vmatprep.mubr.f32.mxu0 %v8998_v0  ;;  %3017 = vmatprep.mubr.f32.mxu1 %v8998_v0  ;;  %v11056_v23 = vunpack.c.l.b16 %v6235_v34 }
 0x2e7   :  { %v4986_v56 = vmax.f32 %v2182_v52, 0.0  ;;  %v4985_v21 = vmax.f32 %v1735_v39, 0.0  ;;  %v1738_v60 = vpop.f32.mrb[254].mxu0  ;;  %v11059_v16 = vadd.f32 %v5306_v22, %v10990_v43  ;;  %v6234_v34 = vpack.c.bf16 %v11044_v63, %v11044_v63 }
 0x2e8   :  { %v5781_v61 = vadd.f32 %v5780_v35, %v4984_v2  ;;  %v4987_v5 = vmax.f32 %v2184_v49, 0.0  ;;  %v1739_v15 = vadd.f32 %v1738_v60, %v10227_v30  ;;  %v2187_v29 = vpop.f32.mrb[254].mxu1  ;;  %v1740_v50 = vpop.f32.mrb[255].mxu0  ;;  %8082 = vmatmul.mubr.msk.f32.gmra.mrb[104].mxu0 %vm203_vm0, %v8846_v3  ;;  %v8848_v60 = vld [vmem:[%s12295_s0 + $0x1b0] sm:$0xff] }
 0x2e9   :  { %v5855_v6 = vadd.f32 %v5854_v48, %v4986_v56  ;;  %v5818_v18 = vadd.f32 %v5817_v12, %v4985_v21  ;;  %v2188_v59 = vadd.f32 %v2187_v29, %v10240_v38  ;;  %v1741_v4 = vadd.f32 %v1740_v50, %v10231_v31  ;;  %v2189_v19 = vpop.f32.mrb[255].mxu1  ;;  %8146 = vmatmul.mubr.msk.f32.gmra.mrb[104].mxu1 %vm203_vm0, %v8846_v3 }
 0x2ea   :  { %v5892_v30 = vadd.f32 %v5891_v41, %v4987_v5  ;;  %v5000_v57 = vmax.f32 %v1739_v15, 0.0  ;;  %v2190_v20 = vadd.f32 %v2189_v19, %v10250_v46  ;;  %2574 = vmatprep.mubr.f32.mxu0 %v8998_v0  ;;  %3023 = vmatprep.mubr.f32.mxu1 %v8998_v0 }
 0x2eb   :  { %v5002_v38 = vmax.f32 %v2188_v59, 0.0  ;;  %v5001_v26 = vmax.f32 %v1741_v4, 0.0  ;;  %v2258_v31 = vpop.f32.mrb[0].mxu0 }
 0x2ec   :  { %v5782_v55 = vadd.f32 %v5781_v61, %v5000_v57  ;;  %v5003_v47 = vmax.f32 %v2190_v20, 0.0  ;;  %v2259_v46 = vadd.f32 %v2258_v31, %v11029_v40  ;;  %v2260_v14 = vpop.f32.mrb[1].mxu0  ;;  %8083 = vmatmul.mubr.msk.f32.gmra.mrb[106].mxu0 %vm203_vm0, %v8847_v27  ;;  %v2707_v7 = vpop.f32.mrb[0].mxu1 }
 0x2ed   :  { %v5856_v28 = vadd.f32 %v5855_v6, %v5002_v38  ;;  %v5819_v35 = vadd.f32 %v5818_v18, %v5001_v26  ;;  %v2261_v43 = vadd.f32 %v2260_v14, %v11033_v11  ;;  %8147 = vmatmul.mubr.msk.f32.gmra.mrb[106].mxu1 %vm203_vm0, %v8847_v27  ;;  %v2708_v22 = vadd.f32 %v2707_v7, %v11037_v36  ;;  %v2709_v54 = vpop.f32.mrb[1].mxu1  ;;  %v8849_v14 = vld [vmem:[%s12295_s0 + $0x1b8] sm:$0xff] }
 0x2ee   :  { %v5783_v42 = vrot.slane %v5782_v55, 4  ;;  %v5893_v9 = vadd.f32 %v5892_v30, %v5003_v47  ;;  %v3996_v44 = vmax.f32 %v2259_v46, 0.0  ;;  %v2710_v45 = vadd.f32 %v2709_v54, %v11054_v51  ;;  %2580 = vmatprep.mubr.f32.mxu0 %v8998_v0  ;;  %3029 = vmatprep.mubr.f32.mxu1 %v8998_v0 }
 0x2ef   :  { %v5857_v10 = vrot.slane %v5856_v28, 4  ;;  %v5820_v48 = vrot.slane %v5819_v35, 4  ;;  %v3997_v12 = vmax.f32 %v2261_v43, 0.0  ;;  %v3998_v52 = vmax.f32 %v2708_v22, 0.0  ;;  %v2264_v39 = vpop.f32.mrb[2].mxu0 }
 0x2f0   :  { %v5784_v53 = vadd.f32 %v5783_v42, %v5782_v55  ;;  %v5894_v41 = vrot.slane %v5893_v9, 4  ;;  %v3999_v2 = vmax.f32 %v2710_v45, 0.0  ;;  %v2265_v49 = vadd.f32 %v2264_v39, %v11029_v40  ;;  %v2713_v56 = vpop.f32.mrb[2].mxu1  ;;  %v2266_v21 = vpop.f32.mrb[3].mxu0  ;;  %8084 = vmatmul.mubr.msk.f32.gmra.mrb[108].mxu0 %vm203_vm0, %v8848_v60 }
 0x2f1   :  { %v5858_v61 = vadd.f32 %v5857_v10, %v5856_v28  ;;  %v5821_v5 = vadd.f32 %v5820_v48, %v5819_v35  ;;  %v2714_v15 = vadd.f32 %v2713_v56, %v11037_v36  ;;  %v2267_v29 = vadd.f32 %v2266_v21, %v11033_v11  ;;  %v2715_v50 = vpop.f32.mrb[3].mxu1  ;;  %8148 = vmatmul.mubr.msk.f32.gmra.mrb[108].mxu1 %vm203_vm0, %v8848_v60 }
 0x2f2   :  { %v5785_v3 = vrot.slane %v5784_v53, 2  ;;  %v5895_v6 = vadd.f32 %v5894_v41, %v5893_v9  ;;  %v4012_v18 = vmax.f32 %v2265_v49, 0.0  ;;  %v2716_v59 = vadd.f32 %v2715_v50, %v11054_v51  ;;  %2586 = vmatprep.mubr.f32.mxu0 %v8998_v0  ;;  %3035 = vmatprep.mubr.f32.mxu1 %v8998_v0 }
 0x2f3   :  { %v5859_v4 = vrot.slane %v5858_v61, 2  ;;  %v5822_v19 = vrot.slane %v5821_v5, 2  ;;  %v4014_v30 = vmax.f32 %v2714_v15, 0.0  ;;  %v4013_v57 = vmax.f32 %v2267_v29, 0.0  ;;  %v2270_v20 = vpop.f32.mrb[4].mxu0 }
 0x2f4   :  { %v5786_v38 = vadd.f32 %v5785_v3, %v5784_v53  ;;  %v5896_v26 = vrot.slane %v5895_v6, 2  ;;  %v5308_v31 = vadd.f32 %v4012_v18, %v3996_v44  ;;  %v4015_v55 = vmax.f32 %v2716_v59, 0.0  ;;  %v2719_v47 = vpop.f32.mrb[4].mxu1  ;;  %v2272_v46 = vpop.f32.mrb[5].mxu0  ;;  %8085 = vmatmul.mubr.msk.f32.gmra.mrb[110].mxu0 %vm203_vm0, %v8849_v14 }
 0x2f5   :  { %v5860_v27 = vadd.f32 %v5859_v4, %v5858_v61  ;;  %v11089_v7 = vadd.f32 %v5822_v19, %v5821_v5  ;;  %v5382_v28 = vadd.f32 %v4014_v30, %v3998_v52  ;;  %v5345_v35 = vadd.f32 %v4013_v57, %v3997_v12  ;;  %v2721_v43 = vpop.f32.mrb[5].mxu1  ;;  %8149 = vmatmul.mubr.msk.f32.gmra.mrb[110].mxu1 %vm203_vm0, %v8849_v14 }
 0x2f6   :  { %v5787_v22 = vrot.slane %v5786_v38, 1  ;;  %v5419_v54 = vadd.f32 %v4015_v55, %v3999_v2  ;;  %v2271_v42 = vadd.f32 %v2270_v20, %v11029_v40  ;;  %2592 = vmatprep.mubr.f32.mxu0 %v8998_v0  ;;  %3041 = vmatprep.mubr.f32.mxu1 %v8998_v0  ;;  %v11096_v9 = vmul.f32 0.00390625, %v11059_v16  ;;  %v8850_v16 = vld [vmem:[%s12295_s0 + $0x1c0] sm:$0xff] }
 0x2f7   :  { %v5861_v44 = vrot.slane %v5860_v27, 1  ;;  %v11098_v45 = vadd.f32 %v5896_v26, %v5895_v6  ;;  %v2720_v10 = vadd.f32 %v2719_v47, %v11037_v36  ;;  %v2273_v48 = vadd.f32 %v2272_v46, %v11033_v11  ;;  %v2276_v12 = vpop.f32.mrb[6].mxu0 }
 0x2f8   :  { %v5788_v52 = vadd.f32 %v5787_v22, %v5786_v38  ;;  %v5824_v39 = vrot.slane %v11089_v7, 1  ;;  %v4028_v53 = vmax.f32 %v2271_v42, 0.0  ;;  %v2722_v41 = vadd.f32 %v2721_v43, %v11054_v51  ;;  %v2725_v2 = vpop.f32.mrb[6].mxu1  ;;  %v2278_v49 = vpop.f32.mrb[7].mxu0  ;;  %8086 = vmatmul.mubr.msk.f32.gmra.mrb[112].mxu0 %vm203_vm0, %v8850_v16 }
 0x2f9   :  { %v5862_v56 = vadd.f32 %v5861_v44, %v5860_v27  ;;  %v4030_v21 = vmax.f32 %v2720_v10, 0.0  ;;  %v4029_v60 = vmax.f32 %v2273_v48, 0.0  ;;  %v2277_v61 = vadd.f32 %v2276_v12, %v11029_v40  ;;  %v2727_v5 = vpop.f32.mrb[7].mxu1  ;;  %8150 = vmatmul.mubr.msk.f32.gmra.mrb[112].mxu1 %vm203_vm0, %v8850_v16  ;;  %2598 = vmatprep.mubr.f32.mxu0 %v8998_v0 }
 0x2fa   :  { %v6217_v15 = vmul.f32 0.00390625, %v5788_v52  ;;  %v5309_v29 = vadd.f32 %v5308_v31, %v4028_v53  ;;  %v4031_v50 = vmax.f32 %v2722_v41, 0.0  ;;  %v2726_v3 = vadd.f32 %v2725_v2, %v11037_v36  ;;  %3047 = vmatprep.mubr.f32.mxu1 %v8998_v0  ;;  %v8851_v31 = vld [vmem:[%s12295_s0 + $0x1c8] sm:$0xff] }
 0x2fb   :  { %v6219_v6 = vmul.f32 0.00390625, %v5862_v56  ;;  %v5383_v18 = vadd.f32 %v5382_v28, %v4030_v21  ;;  %v5346_v59 = vadd.f32 %v5345_v35, %v4029_v60  ;;  %v4044_v4 = vmax.f32 %v2277_v61, 0.0  ;;  %v2282_v19 = vpop.f32.mrb[8].mxu0  ;;  %v8852_v56 = vld [vmem:[%s12295_s0 + $0x1d0] sm:$0xff] }
 0x2fc   :  { %v6249_v30 = vpack.c.bf16 %v6217_v15, %v6217_v15  ;;  %v5420_v57 = vadd.f32 %v5419_v54, %v4031_v50  ;;  %v4046_v20 = vmax.f32 %v2726_v3, 0.0  ;;  %v2279_v38 = vadd.f32 %v2278_v49, %v11033_v11  ;;  %v2731_v26 = vpop.f32.mrb[8].mxu1  ;;  %v2284_v55 = vpop.f32.mrb[9].mxu0  ;;  %8087 = vmatmul.mubr.msk.f32.gmra.mrb[114].mxu0 %vm203_vm0, %v8851_v31 }
 0x2fd   :  { %v6251_v47 = vpack.c.bf16 %v6219_v6, %v6219_v6  ;;  %v5310_v46 = vadd.f32 %v5309_v29, %v4044_v4  ;;  %v2728_v14 = vadd.f32 %v2727_v5, %v11054_v51  ;;  %v2283_v27 = vadd.f32 %v2282_v19, %v11029_v40  ;;  %v2733_v28 = vpop.f32.mrb[9].mxu1  ;;  %8151 = vmatmul.mubr.msk.f32.gmra.mrb[114].mxu1 %vm203_vm0, %v8851_v31 }
 0x2fe   :  { %v6576_v35 = vunpack.c.l.b16 %v6249_v30  ;;  %v5384_v43 = vadd.f32 %v5383_v18, %v4046_v20  ;;  %v4045_v22 = vmax.f32 %v2279_v38, 0.0  ;;  %v2732_v54 = vadd.f32 %v2731_v26, %v11037_v36  ;;  %2604 = vmatprep.mubr.f32.mxu0 %v8998_v0  ;;  %3053 = vmatprep.mubr.f32.mxu1 %v8998_v0  ;;  %v8853_v20 = vld [vmem:[%s12295_s0 + $0x1d8] sm:$0xff] }
 0x2ff   :  { %v6578_v42 = vunpack.c.l.b16 %v6251_v47  ;;  %v4047_v44 = vmax.f32 %v2728_v14, 0.0  ;;  %v4060_v10 = vmax.f32 %v2283_v27, 0.0  ;;  %v2285_v48 = vadd.f32 %v2284_v55, %v11033_v11  ;;  %v2288_v12 = vpop.f32.mrb[10].mxu0 }
 0x300   :  { %v11127_v52 = vsel %vm6588_vm1, %v6576_v35, %v11009_v33  ;;  %v5347_v53 = vadd.f32 %v5346_v59, %v4045_v22  ;;  %v4062_v41 = vmax.f32 %v2732_v54, 0.0  ;;  %v2734_v2 = vadd.f32 %v2733_v28, %v11054_v51  ;;  %v2737_v49 = vpop.f32.mrb[10].mxu1  ;;  %v2290_v16 = vpop.f32.mrb[11].mxu0  ;;  %8088 = vmatmul.mubr.msk.f32.gmra.mrb[116].mxu0 %vm203_vm0, %v8852_v56 }
 0x301   :  { %v11136_v21 = vsel %vm6588_vm1, %v6578_v42, %v11056_v23  ;;  %v5421_v60 = vadd.f32 %v5420_v57, %v4047_v44  ;;  %v5311_v61 = vadd.f32 %v5310_v46, %v4060_v10  ;;  %v2739_v33 = vpop.f32.mrb[11].mxu1  ;;  %8152 = vmatmul.mubr.msk.f32.gmra.mrb[116].mxu1 %vm203_vm0, %v8852_v56  ;;  %v11142_v5 = vunpack.c.l.b16 %v6234_v34  ;;  %2610 = vmatprep.mubr.f32.mxu0 %v8998_v0 }
 0x302   :  { %v5898_v15 = vrot.slane %v11098_v45, 1  ;;  %v5385_v29 = vadd.f32 %v5384_v43, %v4062_v41  ;;  %v4061_v50 = vmax.f32 %v2285_v48, 0.0  ;;  %v4063_v3 = vmax.f32 %v2734_v2, 0.0  ;;  %3059 = vmatprep.mubr.f32.mxu1 %v8998_v0  ;;  %v8854_v41 = vld [vmem:[%s12295_s0 + $0x1e0] sm:$0xff] }
 0x303   :  { %v2289_v23 = vadd.f32 %v2288_v12, %v11029_v40  ;;  %v2738_v6 = vadd.f32 %v2737_v49, %v11037_v36  ;;  %v2291_v18 = vadd.f32 %v2290_v16, %v11033_v11  ;;  %v2740_v59 = vadd.f32 %v2739_v33, %v11054_v51  ;;  %v2294_v63 = vpop.f32.mrb[12].mxu0 }
 0x304   :  { %v5348_v34 = vadd.f32 %v5347_v53, %v4061_v50  ;;  %v5422_v4 = vadd.f32 %v5421_v60, %v4063_v3  ;;  %v2295_v19 = vadd.f32 %v2294_v63, %v11029_v40  ;;  %v2743_v30 = vpop.f32.mrb[12].mxu1  ;;  %v2296_v57 = vpop.f32.mrb[13].mxu0  ;;  %8089 = vmatmul.mubr.msk.f32.gmra.mrb[118].mxu0 %vm203_vm0, %v8853_v20  ;;  %v5825_v38 = vadd.f32 %v5824_v39, %v11089_v7 }
 0x305   :  { %v4076_v26 = vmax.f32 %v2289_v23, 0.0  ;;  %v4078_v55 = vmax.f32 %v2738_v6, 0.0  ;;  %v4077_v31 = vmax.f32 %v2291_v18, 0.0  ;;  %v4079_v47 = vmax.f32 %v2740_v59, 0.0  ;;  %v2745_v46 = vpop.f32.mrb[13].mxu1  ;;  %8153 = vmatmul.mubr.msk.f32.gmra.mrb[118].mxu1 %vm203_vm0, %v8853_v20  ;;  %2616 = vmatprep.mubr.f32.mxu0 %v8998_v0 }
 0x306   :  { %v4092_v14 = vmax.f32 %v2295_v19, 0.0  ;;  %v2744_v27 = vadd.f32 %v2743_v30, %v11037_v36  ;;  %v2297_v28 = vadd.f32 %v2296_v57, %v11033_v11  ;;  %v2746_v35 = vadd.f32 %v2745_v46, %v11054_v51  ;;  %3065 = vmatprep.mubr.f32.mxu1 %v8998_v0  ;;  %v8855_v30 = vld [vmem:[%s12295_s0 + $0x1e8] sm:$0xff] }
 0x307   :  { %v5312_v43 = vadd.f32 %v5311_v61, %v4076_v26  ;;  %v5386_v7 = vadd.f32 %v5385_v29, %v4078_v55  ;;  %v5349_v39 = vadd.f32 %v5348_v34, %v4077_v31  ;;  %v5423_v22 = vadd.f32 %v5422_v4, %v4079_v47  ;;  %v2300_v54 = vpop.f32.mrb[14].mxu0 }
 0x308   :  { %v4094_v42 = vmax.f32 %v2744_v27, 0.0  ;;  %v4093_v44 = vmax.f32 %v2297_v28, 0.0  ;;  %v4095_v10 = vmax.f32 %v2746_v35, 0.0  ;;  %v2301_v48 = vadd.f32 %v2300_v54, %v11029_v40  ;;  %v2749_v12 = vpop.f32.mrb[14].mxu1  ;;  %v2302_v53 = vpop.f32.mrb[15].mxu0  ;;  %8090 = vmatmul.mubr.msk.f32.gmra.mrb[120].mxu0 %vm203_vm0, %v8854_v41 }
 0x309   :  { %v5313_v2 = vadd.f32 %v5312_v43, %v4092_v14  ;;  %v2750_v49 = vadd.f32 %v2749_v12, %v11037_v36  ;;  %v2303_v16 = vadd.f32 %v2302_v53, %v11033_v11  ;;  %v2751_v56 = vpop.f32.mrb[15].mxu1  ;;  %8154 = vmatmul.mubr.msk.f32.gmra.mrb[120].mxu1 %vm203_vm0, %v8854_v41  ;;  %2622 = vmatprep.mubr.f32.mxu0 %v8998_v0  ;;  %v6218_v60 = vmul.f32 0.00390625, %v5825_v38 }
 0x30a   :  { %v5387_v61 = vadd.f32 %v5386_v7, %v4094_v42  ;;  %v5350_v33 = vadd.f32 %v5349_v39, %v4093_v44  ;;  %v5424_v29 = vadd.f32 %v5423_v22, %v4095_v10  ;;  %v4108_v50 = vmax.f32 %v2301_v48, 0.0  ;;  %3071 = vmatprep.mubr.f32.mxu1 %v8998_v0  ;;  %v8856_v44 = vld [vmem:[%s12295_s0 + $0x1f0] sm:$0xff] }
 0x30b   :  { %v4110_v3 = vmax.f32 %v2750_v49, 0.0  ;;  %v4109_v23 = vmax.f32 %v2303_v16, 0.0  ;;  %v2752_v6 = vadd.f32 %v2751_v56, %v11054_v51  ;;  %v2306_v18 = vpop.f32.mrb[16].mxu0  ;;  %v6250_v59 = vpack.c.bf16 %v6218_v60, %v6218_v60 }
 0x30c   :  { %v2307_v63 = vadd.f32 %v2306_v18, %v11029_v40  ;;  %v5314_v34 = vadd.f32 %v5313_v2, %v4108_v50  ;;  %v2755_v4 = vpop.f32.mrb[16].mxu1  ;;  %v2308_v19 = vpop.f32.mrb[17].mxu0  ;;  %8091 = vmatmul.mubr.msk.f32.gmra.mrb[122].mxu0 %vm203_vm0, %v8855_v30  ;;  %v5899_v57 = vadd.f32 %v5898_v15, %v11098_v45  ;;  %v6236_v20 = vpack.c.bf16 %v11096_v9, %v11096_v9  ;;  %v8857_v18 = vld [vmem:[%s12295_s0 + $0x1f8] sm:$0xff] }
 0x30d   :  { %v4111_v38 = vmax.f32 %v2752_v6, 0.0  ;;  %v2756_v26 = vadd.f32 %v2755_v4, %v11037_v36  ;;  %v5388_v55 = vadd.f32 %v5387_v61, %v4110_v3  ;;  %v2309_v31 = vadd.f32 %v2308_v19, %v11033_v11  ;;  %v2757_v47 = vpop.f32.mrb[17].mxu1  ;;  %8155 = vmatmul.mubr.msk.f32.gmra.mrb[122].mxu1 %vm203_vm0, %v8855_v30  ;;  %2628 = vmatprep.mubr.f32.mxu0 %v8998_v0 }
 0x30e   :  { %v4124_v46 = vmax.f32 %v2307_v63, 0.0  ;;  %v5351_v14 = vadd.f32 %v5350_v33, %v4109_v23  ;;  %v2758_v27 = vadd.f32 %v2757_v47, %v11054_v51  ;;  %3077 = vmatprep.mubr.f32.mxu1 %v8998_v0  ;;  %v6577_v45 = vunpack.c.l.b16 %v6250_v59 }
 0x30f   :  { %v4126_v15 = vmax.f32 %v2756_v26, 0.0  ;;  %v4125_v9 = vmax.f32 %v2309_v31, 0.0  ;;  %v5425_v28 = vadd.f32 %v5424_v29, %v4111_v38  ;;  %v2312_v35 = vpop.f32.mrb[18].mxu0  ;;  %v6220_v43 = vmul.f32 0.00390625, %v5899_v57 }
 0x310   :  { %v5315_v7 = vadd.f32 %v5314_v34, %v4124_v46  ;;  %v4127_v39 = vmax.f32 %v2758_v27, 0.0  ;;  %v2313_v22 = vadd.f32 %v2312_v35, %v11029_v40  ;;  %v2761_v54 = vpop.f32.mrb[18].mxu1  ;;  %v2314_v42 = vpop.f32.mrb[19].mxu0  ;;  %8092 = vmatmul.mubr.msk.f32.gmra.mrb[124].mxu0 %vm203_vm0, %v8856_v44  ;;  %v11199_v10 = vsel %vm6588_vm1, %v6577_v45, %v11142_v5 }
 0x311   :  { %v5389_v48 = vadd.f32 %v5388_v55, %v4126_v15  ;;  %v5352_v12 = vadd.f32 %v5351_v14, %v4125_v9  ;;  %v2762_v53 = vadd.f32 %v2761_v54, %v11037_v36  ;;  %v2315_v41 = vadd.f32 %v2314_v42, %v11033_v11  ;;  %v2763_v2 = vpop.f32.mrb[19].mxu1  ;;  %8156 = vmatmul.mubr.msk.f32.gmra.mrb[124].mxu1 %vm203_vm0, %v8856_v44  ;;  %v8858_v9 = vld [vmem:[%s12295_s0] sm:$0xff] }
 0x312   :  { %v5426_v49 = vadd.f32 %v5425_v28, %v4127_v39  ;;  %v4140_v16 = vmax.f32 %v2313_v22, 0.0  ;;  %v2764_v56 = vadd.f32 %v2763_v2, %v11054_v51  ;;  %2634 = vmatprep.mubr.f32.mxu0 %v8998_v0  ;;  %3083 = vmatprep.mubr.f32.mxu1 %v8998_v0  ;;  %v6252_v33 = vpack.c.bf16 %v6220_v43, %v6220_v43 }
 0x313   :  { %v4142_v60 = vmax.f32 %v2762_v53, 0.0  ;;  %v4141_v5 = vmax.f32 %v2315_v41, 0.0  ;;  %v2318_v61 = vpop.f32.mrb[20].mxu0  ;;  %v6563_v59 = vunpack.c.l.b16 %v6236_v20 }
 0x314   :  { %v5316_v29 = vadd.f32 %v5315_v7, %v4140_v16  ;;  %v4143_v50 = vmax.f32 %v2764_v56, 0.0  ;;  %v2319_v3 = vadd.f32 %v2318_v61, %v11029_v40  ;;  %v2767_v23 = vpop.f32.mrb[20].mxu1  ;;  %v2320_v6 = vpop.f32.mrb[21].mxu0  ;;  %8093 = vmatmul.mubr.msk.f32.gmra.mrb[126].mxu0 %vm203_vm0, %v8857_v18  ;;  %v6579_v55 = vunpack.c.l.b16 %v6252_v33 }
 0x315   :  { %v5390_v63 = vadd.f32 %v5389_v48, %v4142_v60  ;;  %v5353_v34 = vadd.f32 %v5352_v12, %v4141_v5  ;;  %v2768_v4 = vadd.f32 %v2767_v23, %v11037_v36  ;;  %v2321_v19 = vadd.f32 %v2320_v6, %v11033_v11  ;;  %v2769_v30 = vpop.f32.mrb[21].mxu1  ;;  %8157 = vmatmul.mubr.msk.f32.gmra.mrb[126].mxu1 %vm203_vm0, %v8857_v18  ;;  %v8859_v60 = vld [vmem:[%s12295_s0 + $0x8] sm:$0xff] }
 0x316   :  { %v5427_v57 = vadd.f32 %v5426_v49, %v4143_v50  ;;  %v4156_v38 = vmax.f32 %v2319_v3, 0.0  ;;  %v2770_v26 = vadd.f32 %v2769_v30, %v11054_v51  ;;  %3154 = vmatprep.mubr.f32.mxu0 %v8998_v0  ;;  %3603 = vmatprep.mubr.f32.mxu1 %v8998_v0  ;;  %v11224_v28 = vsel %vm6588_vm1, %v6579_v55, %v6563_v59 }
 0x317   :  { %v4158_v31 = vmax.f32 %v2768_v4, 0.0  ;;  %v4157_v20 = vmax.f32 %v2321_v19, 0.0  ;;  %v2324_v47 = vpop.f32.mrb[22].mxu0 }
 0x318   :  { %v5317_v46 = vadd.f32 %v5316_v29, %v4156_v38  ;;  %v4159_v14 = vmax.f32 %v2770_v26, 0.0  ;;  %v2325_v27 = vadd.f32 %v2324_v47, %v11029_v40  ;;  %v2773_v45 = vpop.f32.mrb[22].mxu1  ;;  %v2326_v15 = vpop.f32.mrb[23].mxu0  ;;  %8158 = vmatmul.mubr.msk.f32.vlgmr.msra.gmra.mrb[128].mxu0 %vm203_vm0, %v8858_v9  ;;  %v8860_v38 = vld [vmem:[%s12295_s0 + $0x10] sm:$0xff] }
 0x319   :  { %v5391_v35 = vadd.f32 %v5390_v63, %v4158_v31  ;;  %v5354_v43 = vadd.f32 %v5353_v34, %v4157_v20  ;;  %v2774_v7 = vadd.f32 %v2773_v45, %v11037_v36  ;;  %v2327_v39 = vadd.f32 %v2326_v15, %v11033_v11  ;;  %v2775_v22 = vpop.f32.mrb[23].mxu1  ;;  %8222 = vmatmul.mubr.msk.f32.vlgmr.msra.gmra.mrb[128].mxu1 %vm203_vm0, %v8858_v9 }
 0x31a   :  { %v5428_v54 = vadd.f32 %v5427_v57, %v4159_v14  ;;  %v4172_v42 = vmax.f32 %v2325_v27, 0.0  ;;  %v2776_v44 = vadd.f32 %v2775_v22, %v11054_v51  ;;  %3160 = vmatprep.mubr.f32.mxu0 %v8998_v0  ;;  %3609 = vmatprep.mubr.f32.mxu1 %v8998_v0 }
 0x31b   :  { %v4174_v48 = vmax.f32 %v2774_v7, 0.0  ;;  %v4173_v12 = vmax.f32 %v2327_v39, 0.0  ;;  %v2330_v53 = vpop.f32.mrb[24].mxu0 }
 0x31c   :  { %v5318_v41 = vadd.f32 %v5317_v46, %v4172_v42  ;;  %v4175_v2 = vmax.f32 %v2776_v44, 0.0  ;;  %v2331_v49 = vadd.f32 %v2330_v53, %v11029_v40  ;;  %v2779_v16 = vpop.f32.mrb[24].mxu1  ;;  %v2332_v56 = vpop.f32.mrb[25].mxu0  ;;  %8159 = vmatmul.mubr.msk.f32.gmra.mrb[130].mxu0 %vm203_vm0, %v8859_v60 }
 0x31d   :  { %v5392_v5 = vadd.f32 %v5391_v35, %v4174_v48  ;;  %v5355_v61 = vadd.f32 %v5354_v43, %v4173_v12  ;;  %v2780_v33 = vadd.f32 %v2779_v16, %v11037_v36  ;;  %v2333_v29 = vadd.f32 %v2332_v56, %v11033_v11  ;;  %v2781_v50 = vpop.f32.mrb[25].mxu1  ;;  %8223 = vmatmul.mubr.msk.f32.gmra.mrb[130].mxu1 %vm203_vm0, %v8859_v60 }
 0x31e   :  { %v5429_v3 = vadd.f32 %v5428_v54, %v4175_v2  ;;  %v4188_v23 = vmax.f32 %v2331_v49, 0.0  ;;  %v2782_v6 = vadd.f32 %v2781_v50, %v11054_v51  ;;  %3166 = vmatprep.mubr.f32.mxu0 %v8998_v0  ;;  %3615 = vmatprep.mubr.f32.mxu1 %v8998_v0  ;;  %v8861_v54 = vld [vmem:[%s12295_s0 + $0x18] sm:$0xff] }
 0x31f   :  { %v4190_v18 = vmax.f32 %v2780_v33, 0.0  ;;  %v4189_v59 = vmax.f32 %v2333_v29, 0.0  ;;  %v2336_v63 = vpop.f32.mrb[26].mxu0 }
 0x320   :  { %v5319_v34 = vadd.f32 %v5318_v41, %v4188_v23  ;;  %v4191_v4 = vmax.f32 %v2782_v6, 0.0  ;;  %v2337_v19 = vadd.f32 %v2336_v63, %v11029_v40  ;;  %v2785_v30 = vpop.f32.mrb[26].mxu1  ;;  %v2338_v57 = vpop.f32.mrb[27].mxu0  ;;  %8160 = vmatmul.mubr.msk.f32.gmra.mrb[132].mxu0 %vm203_vm0, %v8860_v38 }
 0x321   :  { %v5393_v26 = vadd.f32 %v5392_v5, %v4190_v18  ;;  %v5356_v55 = vadd.f32 %v5355_v61, %v4189_v59  ;;  %v2786_v31 = vadd.f32 %v2785_v30, %v11037_v36  ;;  %v2339_v20 = vadd.f32 %v2338_v57, %v11033_v11  ;;  %v2787_v47 = vpop.f32.mrb[27].mxu1  ;;  %8224 = vmatmul.mubr.msk.f32.gmra.mrb[132].mxu1 %vm203_vm0, %v8860_v38  ;;  %v8597_v30 = vld [vmem:[#allocation2 + $0x40] sm:$0xff]  }
 0x322   :  { %v5430_v46 = vadd.f32 %v5429_v3, %v4191_v4  ;;  %v4204_v14 = vmax.f32 %v2337_v19, 0.0  ;;  %v2788_v27 = vadd.f32 %v2787_v47, %v11054_v51  ;;  %3172 = vmatprep.mubr.f32.mxu0 %v8998_v0  ;;  %3621 = vmatprep.mubr.f32.mxu1 %v8998_v0  ;;  %v8862_v3 = vld [vmem:[%s12295_s0 + $0x20] sm:$0xff] }
 0x323   :  { %v4206_v45 = vmax.f32 %v2786_v31, 0.0  ;;  %v4205_v15 = vmax.f32 %v2339_v20, 0.0  ;;  %v2342_v9 = vpop.f32.mrb[28].mxu0  ;;  %8415 = vmatprep.subr.bf16.mxu0 %v8597_v30 }
 0x324   :  { %v5320_v35 = vadd.f32 %v5319_v34, %v4204_v14  ;;  %v4207_v43 = vmax.f32 %v2788_v27, 0.0  ;;  %v2343_v7 = vadd.f32 %v2342_v9, %v11029_v40  ;;  %v2791_v39 = vpop.f32.mrb[28].mxu1  ;;  %v2344_v22 = vpop.f32.mrb[29].mxu0  ;;  %8161 = vmatmul.mubr.msk.f32.gmra.mrb[134].mxu0 %vm203_vm0, %v8861_v54  ;;  %v8863_v14 = vld [vmem:[%s12295_s0 + $0x28] sm:$0xff] }
 0x325   :  { %v5394_v42 = vadd.f32 %v5393_v26, %v4206_v45  ;;  %v5357_v44 = vadd.f32 %v5356_v55, %v4205_v15  ;;  %v2792_v48 = vadd.f32 %v2791_v39, %v11037_v36  ;;  %v2345_v12 = vadd.f32 %v2344_v22, %v11033_v11  ;;  %v2793_v53 = vpop.f32.mrb[29].mxu1  ;;  %8225 = vmatmul.mubr.msk.f32.gmra.mrb[134].mxu1 %vm203_vm0, %v8861_v54  ;;  %v8599_v54 = vld [vmem:[#allocation2 + $0xc0] sm:$0xff]  }
 0x326   :  { %v5431_v41 = vadd.f32 %v5430_v46, %v4207_v43  ;;  %v4220_v2 = vmax.f32 %v2343_v7, 0.0  ;;  %v2794_v49 = vadd.f32 %v2793_v53, %v11054_v51  ;;  %3178 = vmatprep.mubr.f32.mxu0 %v8998_v0  ;;  %3627 = vmatprep.mubr.f32.mxu1 %v8998_v0  ;;  %v8598_v43 = vld [vmem:[#allocation2] sm:$0xff]  }
 0x327   :  { %v4222_v16 = vmax.f32 %v2792_v48, 0.0  ;;  %v4221_v56 = vmax.f32 %v2345_v12, 0.0  ;;  %v2348_v60 = vpop.f32.mrb[30].mxu0  ;;  %8416 = vmatpush3.bf16.msra.mxu0 %v8598_v43  ;;  %v8600_v12 = vld [vmem:[#allocation2 + $0x80] sm:$0xff]   ;;  %8437 = vmatprep.subr.bf16.mxu1 %v8599_v54 }
 0x328   :  { %v5321_v5 = vadd.f32 %v5320_v35, %v4220_v2  ;;  %v4223_v61 = vmax.f32 %v2794_v49, 0.0  ;;  %v2349_v33 = vadd.f32 %v2348_v60, %v11029_v40  ;;  %v2797_v29 = vpop.f32.mrb[30].mxu1  ;;  %v2350_v50 = vpop.f32.mrb[31].mxu0  ;;  %8162 = vmatmul.mubr.msk.f32.gmra.mrb[136].mxu0 %vm203_vm0, %v8862_v3  ;;  %8438 = vmatpush3.bf16.msra.mxu1 %v8600_v12 }
 0x329   :  { %v5395_v23 = vadd.f32 %v5394_v42, %v4222_v16  ;;  %v5358_v6 = vadd.f32 %v5357_v44, %v4221_v56  ;;  %v2798_v18 = vadd.f32 %v2797_v29, %v11037_v36  ;;  %v2351_v59 = vadd.f32 %v2350_v50, %v11033_v11  ;;  %v2799_v63 = vpop.f32.mrb[31].mxu1  ;;  %8226 = vmatmul.mubr.msk.f32.gmra.mrb[136].mxu1 %vm203_vm0, %v8862_v3  ;;  %v8864_v56 = vld [vmem:[%s12295_s0 + $0x30] sm:$0xff] }
 0x32a   :  { %v5432_v34 = vadd.f32 %v5431_v41, %v4223_v61  ;;  %v4236_v4 = vmax.f32 %v2349_v33, 0.0  ;;  %v2800_v19 = vadd.f32 %v2799_v63, %v11054_v51  ;;  %3184 = vmatprep.mubr.f32.mxu0 %v8998_v0  ;;  %3633 = vmatprep.mubr.f32.mxu1 %v8998_v0 }
 0x32b   :  { %v4238_v57 = vmax.f32 %v2798_v18, 0.0  ;;  %v4237_v38 = vmax.f32 %v2351_v59, 0.0  ;;  %v2354_v26 = vpop.f32.mrb[32].mxu0 }
 0x32c   :  { %v5322_v55 = vadd.f32 %v5321_v5, %v4236_v4  ;;  %v4239_v31 = vmax.f32 %v2800_v19, 0.0  ;;  %v2355_v20 = vadd.f32 %v2354_v26, %v11029_v40  ;;  %v2803_v47 = vpop.f32.mrb[32].mxu1  ;;  %v2356_v46 = vpop.f32.mrb[33].mxu0  ;;  %8163 = vmatmul.mubr.msk.f32.gmra.mrb[138].mxu0 %vm203_vm0, %v8863_v14 }
 0x32d   :  { %v5396_v27 = vadd.f32 %v5395_v23, %v4238_v57  ;;  %v5359_v45 = vadd.f32 %v5358_v6, %v4237_v38  ;;  %v2804_v15 = vadd.f32 %v2803_v47, %v11037_v36  ;;  %v2357_v9 = vadd.f32 %v2356_v46, %v11033_v11  ;;  %v2805_v35 = vpop.f32.mrb[33].mxu1  ;;  %8227 = vmatmul.mubr.msk.f32.gmra.mrb[138].mxu1 %vm203_vm0, %v8863_v14  ;;  %v8865_v57 = vld [vmem:[%s12295_s0 + $0x38] sm:$0xff] }
 0x32e   :  { %v5433_v7 = vadd.f32 %v5432_v34, %v4239_v31  ;;  %v4252_v39 = vmax.f32 %v2355_v20, 0.0  ;;  %v2806_v22 = vadd.f32 %v2805_v35, %v11054_v51  ;;  %3190 = vmatprep.mubr.f32.mxu0 %v8998_v0  ;;  %3639 = vmatprep.mubr.f32.mxu1 %v8998_v0 }
 0x32f   :  { %v4254_v42 = vmax.f32 %v2804_v15, 0.0  ;;  %v4253_v44 = vmax.f32 %v2357_v9, 0.0  ;;  %v2360_v48 = vpop.f32.mrb[34].mxu0 }
 0x330   :  { %v5323_v53 = vadd.f32 %v5322_v55, %v4252_v39  ;;  %v4255_v41 = vmax.f32 %v2806_v22, 0.0  ;;  %v2361_v2 = vadd.f32 %v2360_v48, %v11029_v40  ;;  %v2809_v49 = vpop.f32.mrb[34].mxu1  ;;  %v2362_v16 = vpop.f32.mrb[35].mxu0  ;;  %8164 = vmatmul.mubr.msk.f32.gmra.mrb[140].mxu0 %vm203_vm0, %v8864_v56  ;;  %v8866_v22 = vld [vmem:[%s12295_s0 + $0x40] sm:$0xff] }
 0x331   :  { %v5397_v60 = vadd.f32 %v5396_v27, %v4254_v42  ;;  %v5360_v5 = vadd.f32 %v5359_v45, %v4253_v44  ;;  %v2810_v61 = vadd.f32 %v2809_v49, %v11037_v36  ;;  %v2363_v33 = vadd.f32 %v2362_v16, %v11033_v11  ;;  %v2811_v29 = vpop.f32.mrb[35].mxu1  ;;  %8228 = vmatmul.mubr.msk.f32.gmra.mrb[140].mxu1 %vm203_vm0, %v8864_v56 }
 0x332   :  { %v5434_v50 = vadd.f32 %v5433_v7, %v4255_v41  ;;  %v4268_v3 = vmax.f32 %v2361_v2, 0.0  ;;  %v2812_v23 = vadd.f32 %v2811_v29, %v11054_v51  ;;  %3196 = vmatprep.mubr.f32.mxu0 %v8998_v0  ;;  %3645 = vmatprep.mubr.f32.mxu1 %v8998_v0 }
 0x333   :  { %v4270_v6 = vmax.f32 %v2810_v61, 0.0  ;;  %v4269_v18 = vmax.f32 %v2363_v33, 0.0  ;;  %v2366_v59 = vpop.f32.mrb[36].mxu0 }
 0x334   :  { %v5324_v63 = vadd.f32 %v5323_v53, %v4268_v3  ;;  %v4271_v34 = vmax.f32 %v2812_v23, 0.0  ;;  %v2367_v4 = vadd.f32 %v2366_v59, %v11029_v40  ;;  %v2815_v19 = vpop.f32.mrb[36].mxu1  ;;  %v2368_v30 = vpop.f32.mrb[37].mxu0  ;;  %8165 = vmatmul.mubr.msk.f32.gmra.mrb[142].mxu0 %vm203_vm0, %v8865_v57 }
 0x335   :  { %v5398_v38 = vadd.f32 %v5397_v60, %v4270_v6  ;;  %v5361_v26 = vadd.f32 %v5360_v5, %v4269_v18  ;;  %v2816_v55 = vadd.f32 %v2815_v19, %v11037_v36  ;;  %v2369_v31 = vadd.f32 %v2368_v30, %v11033_v11  ;;  %v2817_v20 = vpop.f32.mrb[37].mxu1  ;;  %8229 = vmatmul.mubr.msk.f32.gmra.mrb[142].mxu1 %vm203_vm0, %v8865_v57 }
 0x336   :  { %v5435_v47 = vadd.f32 %v5434_v50, %v4271_v34  ;;  %v4284_v46 = vmax.f32 %v2367_v4, 0.0  ;;  %v2818_v14 = vadd.f32 %v2817_v20, %v11054_v51  ;;  %3202 = vmatprep.mubr.f32.mxu0 %v8998_v0  ;;  %3651 = vmatprep.mubr.f32.mxu1 %v8998_v0  ;;  %v8867_v50 = vld [vmem:[%s12295_s0 + $0x48] sm:$0xff] }
 0x337   :  { %v4286_v27 = vmax.f32 %v2816_v55, 0.0  ;;  %v4285_v45 = vmax.f32 %v2369_v31, 0.0  ;;  %v2372_v15 = vpop.f32.mrb[38].mxu0 }
 0x338   :  { %v5325_v9 = vadd.f32 %v5324_v63, %v4284_v46  ;;  %v4287_v35 = vmax.f32 %v2818_v14, 0.0  ;;  %v2373_v43 = vadd.f32 %v2372_v15, %v11029_v40  ;;  %v2821_v7 = vpop.f32.mrb[38].mxu1  ;;  %v2374_v39 = vpop.f32.mrb[39].mxu0  ;;  %8166 = vmatmul.mubr.msk.f32.gmra.mrb[144].mxu0 %vm203_vm0, %v8866_v22 }
 0x339   :  { %v5399_v54 = vadd.f32 %v5398_v38, %v4286_v27  ;;  %v5362_v42 = vadd.f32 %v5361_v26, %v4285_v45  ;;  %v2822_v44 = vadd.f32 %v2821_v7, %v11037_v36  ;;  %v2375_v48 = vadd.f32 %v2374_v39, %v11033_v11  ;;  %v2823_v12 = vpop.f32.mrb[39].mxu1  ;;  %8230 = vmatmul.mubr.msk.f32.gmra.mrb[144].mxu1 %vm203_vm0, %v8866_v22 }
 0x33a   :  { %v5436_v53 = vadd.f32 %v5435_v47, %v4287_v35  ;;  %v4300_v41 = vmax.f32 %v2373_v43, 0.0  ;;  %v2824_v2 = vadd.f32 %v2823_v12, %v11054_v51  ;;  %3208 = vmatprep.mubr.f32.mxu0 %v8998_v0  ;;  %3657 = vmatprep.mubr.f32.mxu1 %v8998_v0  ;;  %v8868_v47 = vld [vmem:[%s12295_s0 + $0x50] sm:$0xff] }
 0x33b   :  { %v4302_v49 = vmax.f32 %v2822_v44, 0.0  ;;  %v4301_v16 = vmax.f32 %v2375_v48, 0.0  ;;  %v2378_v56 = vpop.f32.mrb[40].mxu0 }
 0x33c   :  { %v5326_v60 = vadd.f32 %v5325_v9, %v4300_v41  ;;  %v4303_v5 = vmax.f32 %v2824_v2, 0.0  ;;  %v2379_v61 = vadd.f32 %v2378_v56, %v11029_v40  ;;  %v2827_v33 = vpop.f32.mrb[40].mxu1  ;;  %v2380_v29 = vpop.f32.mrb[41].mxu0  ;;  %8167 = vmatmul.mubr.msk.f32.gmra.mrb[146].mxu0 %vm203_vm0, %v8867_v50 }
 0x33d   :  { %v5400_v3 = vadd.f32 %v5399_v54, %v4302_v49  ;;  %v5363_v23 = vadd.f32 %v5362_v42, %v4301_v16  ;;  %v2828_v6 = vadd.f32 %v2827_v33, %v11037_v36  ;;  %v2381_v18 = vadd.f32 %v2380_v29, %v11033_v11  ;;  %v2829_v59 = vpop.f32.mrb[41].mxu1  ;;  %8231 = vmatmul.mubr.msk.f32.gmra.mrb[146].mxu1 %vm203_vm0, %v8867_v50 }
 0x33e   :  { %v5437_v63 = vadd.f32 %v5436_v53, %v4303_v5  ;;  %v4316_v34 = vmax.f32 %v2379_v61, 0.0  ;;  %v2830_v4 = vadd.f32 %v2829_v59, %v11054_v51  ;;  %3214 = vmatprep.mubr.f32.mxu0 %v8998_v0  ;;  %3663 = vmatprep.mubr.f32.mxu1 %v8998_v0  ;;  %v8869_v53 = vld [vmem:[%s12295_s0 + $0x58] sm:$0xff] }
 0x33f   :  { %v4318_v19 = vmax.f32 %v2828_v6, 0.0  ;;  %v4317_v30 = vmax.f32 %v2381_v18, 0.0  ;;  %v2384_v57 = vpop.f32.mrb[42].mxu0 }
 0x340   :  { %v5327_v38 = vadd.f32 %v5326_v60, %v4316_v34  ;;  %v4319_v26 = vmax.f32 %v2830_v4, 0.0  ;;  %v2385_v55 = vadd.f32 %v2384_v57, %v11029_v40  ;;  %v2833_v31 = vpop.f32.mrb[42].mxu1  ;;  %v2386_v20 = vpop.f32.mrb[43].mxu0  ;;  %8168 = vmatmul.mubr.msk.f32.gmra.mrb[148].mxu0 %vm203_vm0, %v8868_v47 }
 0x341   :  { %v5401_v46 = vadd.f32 %v5400_v3, %v4318_v19  ;;  %v5364_v14 = vadd.f32 %v5363_v23, %v4317_v30  ;;  %v2834_v27 = vadd.f32 %v2833_v31, %v11037_v36  ;;  %v2387_v45 = vadd.f32 %v2386_v20, %v11033_v11  ;;  %v2835_v15 = vpop.f32.mrb[43].mxu1  ;;  %8232 = vmatmul.mubr.msk.f32.gmra.mrb[148].mxu1 %vm203_vm0, %v8868_v47  ;;  %v8601_v31 = vld [vmem:[#allocation2 + $0x48] sm:$0xff]  }
 0x342   :  { %v5438_v9 = vadd.f32 %v5437_v63, %v4319_v26  ;;  %v4332_v35 = vmax.f32 %v2385_v55, 0.0  ;;  %v2836_v43 = vadd.f32 %v2835_v15, %v11054_v51  ;;  %3220 = vmatprep.mubr.f32.mxu0 %v8998_v0  ;;  %3669 = vmatprep.mubr.f32.mxu1 %v8998_v0  ;;  %v8870_v63 = vld [vmem:[%s12295_s0 + $0x60] sm:$0xff] }
 0x343   :  { %v4334_v7 = vmax.f32 %v2834_v27, 0.0  ;;  %v4333_v39 = vmax.f32 %v2387_v45, 0.0  ;;  %v2390_v22 = vpop.f32.mrb[44].mxu0  ;;  %8417 = vmatprep.subr.bf16.mxu0 %v8601_v31 }
 0x344   :  { %v5328_v54 = vadd.f32 %v5327_v38, %v4332_v35  ;;  %v4335_v42 = vmax.f32 %v2836_v43, 0.0  ;;  %v2391_v44 = vadd.f32 %v2390_v22, %v11029_v40  ;;  %v2839_v48 = vpop.f32.mrb[44].mxu1  ;;  %v2392_v12 = vpop.f32.mrb[45].mxu0  ;;  %8169 = vmatmul.mubr.msk.f32.gmra.mrb[150].mxu0 %vm203_vm0, %v8869_v53  ;;  %v8871_v35 = vld [vmem:[%s12295_s0 + $0x68] sm:$0xff] }
 0x345   :  { %v5402_v41 = vadd.f32 %v5401_v46, %v4334_v7  ;;  %v5365_v2 = vadd.f32 %v5364_v14, %v4333_v39  ;;  %v2840_v49 = vadd.f32 %v2839_v48, %v11037_v36  ;;  %v2393_v16 = vadd.f32 %v2392_v12, %v11033_v11  ;;  %v2841_v56 = vpop.f32.mrb[45].mxu1  ;;  %8233 = vmatmul.mubr.msk.f32.gmra.mrb[150].mxu1 %vm203_vm0, %v8869_v53  ;;  %v8603_v53 = vld [vmem:[#allocation2 + $0xc8] sm:$0xff]  }
 0x346   :  { %v5439_v60 = vadd.f32 %v5438_v9, %v4335_v42  ;;  %v4348_v5 = vmax.f32 %v2391_v44, 0.0  ;;  %v2842_v61 = vadd.f32 %v2841_v56, %v11054_v51  ;;  %3226 = vmatprep.mubr.f32.mxu0 %v8998_v0  ;;  %3675 = vmatprep.mubr.f32.mxu1 %v8998_v0  ;;  %v8602_v42 = vld [vmem:[#allocation2 + $0x8] sm:$0xff]  }
 0x347   :  { %v4350_v33 = vmax.f32 %v2840_v49, 0.0  ;;  %v4349_v29 = vmax.f32 %v2393_v16, 0.0  ;;  %v2396_v50 = vpop.f32.mrb[46].mxu0  ;;  %8418 = vmatpush3.bf16.msra.mxu0 %v8602_v42  ;;  %v8604_v16 = vld [vmem:[#allocation2 + $0x88] sm:$0xff]   ;;  %8439 = vmatprep.subr.bf16.mxu1 %v8603_v53 }
 0x348   :  { %v5329_v3 = vadd.f32 %v5328_v54, %v4348_v5  ;;  %v4351_v23 = vmax.f32 %v2842_v61, 0.0  ;;  %v2397_v6 = vadd.f32 %v2396_v50, %v11029_v40  ;;  %v2845_v18 = vpop.f32.mrb[46].mxu1  ;;  %v2398_v59 = vpop.f32.mrb[47].mxu0  ;;  %8170 = vmatmul.mubr.msk.f32.gmra.mrb[152].mxu0 %vm203_vm0, %v8870_v63  ;;  %8440 = vmatpush3.bf16.msra.mxu1 %v8604_v16 }
 0x349   :  { %v5403_v34 = vadd.f32 %v5402_v41, %v4350_v33  ;;  %v5366_v4 = vadd.f32 %v5365_v2, %v4349_v29  ;;  %v2846_v19 = vadd.f32 %v2845_v18, %v11037_v36  ;;  %v2399_v30 = vadd.f32 %v2398_v59, %v11033_v11  ;;  %v2847_v57 = vpop.f32.mrb[47].mxu1  ;;  %8234 = vmatmul.mubr.msk.f32.gmra.mrb[152].mxu1 %vm203_vm0, %v8870_v63  ;;  %v8872_v29 = vld [vmem:[%s12295_s0 + $0x70] sm:$0xff] }
 0x34a   :  { %v5440_v38 = vadd.f32 %v5439_v60, %v4351_v23  ;;  %v4364_v26 = vmax.f32 %v2397_v6, 0.0  ;;  %v2848_v55 = vadd.f32 %v2847_v57, %v11054_v51  ;;  %3232 = vmatprep.mubr.f32.mxu0 %v8998_v0  ;;  %3681 = vmatprep.mubr.f32.mxu1 %v8998_v0 }
 0x34b   :  { %v4366_v20 = vmax.f32 %v2846_v19, 0.0  ;;  %v4365_v47 = vmax.f32 %v2399_v30, 0.0  ;;  %v2402_v46 = vpop.f32.mrb[48].mxu0 }
 0x34c   :  { %v5330_v14 = vadd.f32 %v5329_v3, %v4364_v26  ;;  %v4367_v27 = vmax.f32 %v2848_v55, 0.0  ;;  %v2403_v45 = vadd.f32 %v2402_v46, %v11029_v40  ;;  %v2851_v15 = vpop.f32.mrb[48].mxu1  ;;  %v2404_v9 = vpop.f32.mrb[49].mxu0  ;;  %8171 = vmatmul.mubr.msk.f32.gmra.mrb[154].mxu0 %vm203_vm0, %v8871_v35 }
 0x34d   :  { %v5404_v43 = vadd.f32 %v5403_v34, %v4366_v20  ;;  %v5367_v7 = vadd.f32 %v5366_v4, %v4365_v47  ;;  %v2852_v39 = vadd.f32 %v2851_v15, %v11037_v36  ;;  %v2405_v22 = vadd.f32 %v2404_v9, %v11033_v11  ;;  %v2853_v54 = vpop.f32.mrb[49].mxu1  ;;  %8235 = vmatmul.mubr.msk.f32.gmra.mrb[154].mxu1 %vm203_vm0, %v8871_v35  ;;  %v8873_v20 = vld [vmem:[%s12295_s0 + $0x78] sm:$0xff] }
 0x34e   :  { %v5441_v44 = vadd.f32 %v5440_v38, %v4367_v27  ;;  %v4380_v48 = vmax.f32 %v2403_v45, 0.0  ;;  %v2854_v12 = vadd.f32 %v2853_v54, %v11054_v51  ;;  %3238 = vmatprep.mubr.f32.mxu0 %v8998_v0  ;;  %3687 = vmatprep.mubr.f32.mxu1 %v8998_v0 }
 0x34f   :  { %v4382_v41 = vmax.f32 %v2852_v39, 0.0  ;;  %v4381_v2 = vmax.f32 %v2405_v22, 0.0  ;;  %v2408_v49 = vpop.f32.mrb[50].mxu0 }
 0x350   :  { %v5331_v56 = vadd.f32 %v5330_v14, %v4380_v48  ;;  %v4383_v60 = vmax.f32 %v2854_v12, 0.0  ;;  %v2409_v5 = vadd.f32 %v2408_v49, %v11029_v40  ;;  %v2857_v61 = vpop.f32.mrb[50].mxu1  ;;  %v2410_v33 = vpop.f32.mrb[51].mxu0  ;;  %8172 = vmatmul.mubr.msk.f32.gmra.mrb[156].mxu0 %vm203_vm0, %v8872_v29  ;;  %v8874_v12 = vld [vmem:[%s12295_s0 + $0x80] sm:$0xff] }
 0x351   :  { %v5405_v50 = vadd.f32 %v5404_v43, %v4382_v41  ;;  %v5368_v3 = vadd.f32 %v5367_v7, %v4381_v2  ;;  %v2858_v23 = vadd.f32 %v2857_v61, %v11037_v36  ;;  %v2411_v6 = vadd.f32 %v2410_v33, %v11033_v11  ;;  %v2859_v18 = vpop.f32.mrb[51].mxu1  ;;  %8236 = vmatmul.mubr.msk.f32.gmra.mrb[156].mxu1 %vm203_vm0, %v8872_v29 }
 0x352   :  { %v5442_v59 = vadd.f32 %v5441_v44, %v4383_v60  ;;  %v4396_v63 = vmax.f32 %v2409_v5, 0.0  ;;  %v2860_v34 = vadd.f32 %v2859_v18, %v11054_v51  ;;  %3244 = vmatprep.mubr.f32.mxu0 %v8998_v0  ;;  %3693 = vmatprep.mubr.f32.mxu1 %v8998_v0 }
 0x353   :  { %v4398_v4 = vmax.f32 %v2858_v23, 0.0  ;;  %v4397_v19 = vmax.f32 %v2411_v6, 0.0  ;;  %v2414_v30 = vpop.f32.mrb[52].mxu0 }
 0x354   :  { %v5332_v57 = vadd.f32 %v5331_v56, %v4396_v63  ;;  %v4399_v38 = vmax.f32 %v2860_v34, 0.0  ;;  %v2415_v26 = vadd.f32 %v2414_v30, %v11029_v40  ;;  %v2863_v55 = vpop.f32.mrb[52].mxu1  ;;  %v2416_v31 = vpop.f32.mrb[53].mxu0  ;;  %8173 = vmatmul.mubr.msk.f32.gmra.mrb[158].mxu0 %vm203_vm0, %v8873_v20 }
 0x355   :  { %v5406_v47 = vadd.f32 %v5405_v50, %v4398_v4  ;;  %v5369_v46 = vadd.f32 %v5368_v3, %v4397_v19  ;;  %v2864_v14 = vadd.f32 %v2863_v55, %v11037_v36  ;;  %v2417_v27 = vadd.f32 %v2416_v31, %v11033_v11  ;;  %v2865_v45 = vpop.f32.mrb[53].mxu1  ;;  %8237 = vmatmul.mubr.msk.f32.gmra.mrb[158].mxu1 %vm203_vm0, %v8873_v20 }
 0x356   :  { %v5443_v15 = vadd.f32 %v5442_v59, %v4399_v38  ;;  %v4412_v9 = vmax.f32 %v2415_v26, 0.0  ;;  %v2866_v35 = vadd.f32 %v2865_v45, %v11054_v51  ;;  %3250 = vmatprep.mubr.f32.mxu0 %v8998_v0  ;;  %3699 = vmatprep.mubr.f32.mxu1 %v8998_v0  ;;  %v8875_v59 = vld [vmem:[%s12295_s0 + $0x88] sm:$0xff] }
 0x357   :  { %v4414_v43 = vmax.f32 %v2864_v14, 0.0  ;;  %v4413_v7 = vmax.f32 %v2417_v27, 0.0  ;;  %v2420_v39 = vpop.f32.mrb[54].mxu0 }
 0x358   :  { %v5333_v22 = vadd.f32 %v5332_v57, %v4412_v9  ;;  %v4415_v54 = vmax.f32 %v2866_v35, 0.0  ;;  %v2421_v42 = vadd.f32 %v2420_v39, %v11029_v40  ;;  %v2869_v44 = vpop.f32.mrb[54].mxu1  ;;  %v2422_v48 = vpop.f32.mrb[55].mxu0  ;;  %8174 = vmatmul.mubr.msk.f32.gmra.mrb[160].mxu0 %vm203_vm0, %v8874_v12 }
 0x359   :  { %v5407_v53 = vadd.f32 %v5406_v47, %v4414_v43  ;;  %v5370_v41 = vadd.f32 %v5369_v46, %v4413_v7  ;;  %v2870_v2 = vadd.f32 %v2869_v44, %v11037_v36  ;;  %v2423_v49 = vadd.f32 %v2422_v48, %v11033_v11  ;;  %v2871_v16 = vpop.f32.mrb[55].mxu1  ;;  %8238 = vmatmul.mubr.msk.f32.gmra.mrb[160].mxu1 %vm203_vm0, %v8874_v12 }
 0x35a   :  { %v5444_v56 = vadd.f32 %v5443_v15, %v4415_v54  ;;  %v4428_v60 = vmax.f32 %v2421_v42, 0.0  ;;  %v2872_v5 = vadd.f32 %v2871_v16, %v11054_v51  ;;  %3256 = vmatprep.mubr.f32.mxu0 %v8998_v0  ;;  %3705 = vmatprep.mubr.f32.mxu1 %v8998_v0  ;;  %v8876_v15 = vld [vmem:[%s12295_s0 + $0x90] sm:$0xff] }
 0x35b   :  { %v4430_v61 = vmax.f32 %v2870_v2, 0.0  ;;  %v4429_v33 = vmax.f32 %v2423_v49, 0.0  ;;  %v2426_v29 = vpop.f32.mrb[56].mxu0 }
 0x35c   :  { %v5334_v50 = vadd.f32 %v5333_v22, %v4428_v60  ;;  %v4431_v3 = vmax.f32 %v2872_v5, 0.0  ;;  %v2427_v23 = vadd.f32 %v2426_v29, %v11029_v40  ;;  %v2875_v6 = vpop.f32.mrb[56].mxu1  ;;  %v2428_v18 = vpop.f32.mrb[57].mxu0  ;;  %8175 = vmatmul.mubr.msk.f32.gmra.mrb[162].mxu0 %vm203_vm0, %v8875_v59 }
 0x35d   :  { %v5408_v63 = vadd.f32 %v5407_v53, %v4430_v61  ;;  %v5371_v34 = vadd.f32 %v5370_v41, %v4429_v33  ;;  %v2876_v4 = vadd.f32 %v2875_v6, %v11037_v36  ;;  %v2429_v19 = vadd.f32 %v2428_v18, %v11033_v11  ;;  %v2877_v30 = vpop.f32.mrb[57].mxu1  ;;  %8239 = vmatmul.mubr.msk.f32.gmra.mrb[162].mxu1 %vm203_vm0, %v8875_v59 }
 0x35e   :  { %v5445_v57 = vadd.f32 %v5444_v56, %v4431_v3  ;;  %v4444_v38 = vmax.f32 %v2427_v23, 0.0  ;;  %v2878_v26 = vadd.f32 %v2877_v30, %v11054_v51  ;;  %3262 = vmatprep.mubr.f32.mxu0 %v8998_v0  ;;  %3711 = vmatprep.mubr.f32.mxu1 %v8998_v0  ;;  %v8877_v56 = vld [vmem:[%s12295_s0 + $0x98] sm:$0xff] }
 0x35f   :  { %v4446_v55 = vmax.f32 %v2876_v4, 0.0  ;;  %v4445_v31 = vmax.f32 %v2429_v19, 0.0  ;;  %v2432_v20 = vpop.f32.mrb[58].mxu0 }
 0x360   :  { %v5335_v47 = vadd.f32 %v5334_v50, %v4444_v38  ;;  %v4447_v46 = vmax.f32 %v2878_v26, 0.0  ;;  %v2433_v14 = vadd.f32 %v2432_v20, %v11029_v40  ;;  %v2881_v27 = vpop.f32.mrb[58].mxu1  ;;  %v2434_v45 = vpop.f32.mrb[59].mxu0  ;;  %8176 = vmatmul.mubr.msk.f32.gmra.mrb[164].mxu0 %vm203_vm0, %v8876_v15 }
 0x361   :  { %v5409_v9 = vadd.f32 %v5408_v63, %v4446_v55  ;;  %v5372_v35 = vadd.f32 %v5371_v34, %v4445_v31  ;;  %v2882_v43 = vadd.f32 %v2881_v27, %v11037_v36  ;;  %v2435_v7 = vadd.f32 %v2434_v45, %v11033_v11  ;;  %v2883_v39 = vpop.f32.mrb[59].mxu1  ;;  %8240 = vmatmul.mubr.msk.f32.gmra.mrb[164].mxu1 %vm203_vm0, %v8876_v15  ;;  %v8605_v27 = vld [vmem:[#allocation2 + $0x50] sm:$0xff]  }
 0x362   :  { %v5446_v22 = vadd.f32 %v5445_v57, %v4447_v46  ;;  %v4460_v54 = vmax.f32 %v2433_v14, 0.0  ;;  %v2884_v42 = vadd.f32 %v2883_v39, %v11054_v51  ;;  %3268 = vmatprep.mubr.f32.mxu0 %v8998_v0  ;;  %3717 = vmatprep.mubr.f32.mxu1 %v8998_v0  ;;  %v8878_v57 = vld [vmem:[%s12295_s0 + $0xa0] sm:$0xff]  ;;  %v8879_v39 = vld [vmem:[%s12295_s0 + $0xa8] sm:$0xff] }
 0x363   :  { %v4462_v44 = vmax.f32 %v2882_v43, 0.0  ;;  %v4461_v48 = vmax.f32 %v2435_v7, 0.0  ;;  %v2438_v12 = vpop.f32.mrb[60].mxu0  ;;  %8419 = vmatprep.subr.bf16.mxu0 %v8605_v27 }
 0x364   :  { %v5336_v53 = vadd.f32 %v5335_v47, %v4460_v54  ;;  %v4463_v41 = vmax.f32 %v2884_v42, 0.0  ;;  %v2439_v2 = vadd.f32 %v2438_v12, %v11029_v40  ;;  %v2887_v49 = vpop.f32.mrb[60].mxu1  ;;  %v2440_v16 = vpop.f32.mrb[61].mxu0  ;;  %8177 = vmatmul.mubr.msk.f32.gmra.mrb[166].mxu0 %vm203_vm0, %v8877_v56 }
 0x365   :  { %v5410_v60 = vadd.f32 %v5409_v9, %v4462_v44  ;;  %v5373_v5 = vadd.f32 %v5372_v35, %v4461_v48  ;;  %v2888_v61 = vadd.f32 %v2887_v49, %v11037_v36  ;;  %v2441_v33 = vadd.f32 %v2440_v16, %v11033_v11  ;;  %v2889_v29 = vpop.f32.mrb[61].mxu1  ;;  %8241 = vmatmul.mubr.msk.f32.gmra.mrb[166].mxu1 %vm203_vm0, %v8877_v56 }
 0x366   :  { %v5447_v50 = vadd.f32 %v5446_v22, %v4463_v41  ;;  %v4476_v3 = vmax.f32 %v2439_v2, 0.0  ;;  %v2890_v23 = vadd.f32 %v2889_v29, %v11054_v51  ;;  %3274 = vmatprep.mubr.f32.mxu0 %v8998_v0  ;;  %3723 = vmatprep.mubr.f32.mxu1 %v8998_v0 }
 0x367   :  { %v4478_v6 = vmax.f32 %v2888_v61, 0.0  ;;  %v4477_v18 = vmax.f32 %v2441_v33, 0.0  ;;  %v2444_v59 = vpop.f32.mrb[62].mxu0 }
 0x368   :  { %v5337_v63 = vadd.f32 %v5336_v53, %v4476_v3  ;;  %v4479_v34 = vmax.f32 %v2890_v23, 0.0  ;;  %v2445_v4 = vadd.f32 %v2444_v59, %v11029_v40  ;;  %v2893_v19 = vpop.f32.mrb[62].mxu1  ;;  %v2446_v30 = vpop.f32.mrb[63].mxu0  ;;  %8178 = vmatmul.mubr.msk.f32.gmra.mrb[168].mxu0 %vm203_vm0, %v8878_v57 }
 0x369   :  { %v5411_v38 = vadd.f32 %v5410_v60, %v4478_v6  ;;  %v5374_v26 = vadd.f32 %v5373_v5, %v4477_v18  ;;  %v2894_v55 = vadd.f32 %v2893_v19, %v11037_v36  ;;  %v2447_v31 = vadd.f32 %v2446_v30, %v11033_v11  ;;  %v2895_v20 = vpop.f32.mrb[63].mxu1  ;;  %8242 = vmatmul.mubr.msk.f32.gmra.mrb[168].mxu1 %vm203_vm0, %v8878_v57  ;;  %v8880_v5 = vld [vmem:[%s12295_s0 + $0xb0] sm:$0xff] }
 0x36a   :  { %v5448_v47 = vadd.f32 %v5447_v50, %v4479_v34  ;;  %v4492_v46 = vmax.f32 %v2445_v4, 0.0  ;;  %v2896_v14 = vadd.f32 %v2895_v20, %v11054_v51  ;;  %3280 = vmatprep.mubr.f32.mxu0 %v8998_v0  ;;  %3729 = vmatprep.mubr.f32.mxu1 %v8998_v0 }
 0x36b   :  { %v4494_v45 = vmax.f32 %v2894_v55, 0.0  ;;  %v4493_v15 = vmax.f32 %v2447_v31, 0.0  ;;  %v2450_v9 = vpop.f32.mrb[64].mxu0 }
 0x36c   :  { %v11452_v35 = vadd.f32 %v5337_v63, %v4492_v46  ;;  %v4495_v43 = vmax.f32 %v2896_v14, 0.0  ;;  %v2452_v7 = vpop.f32.mrb[65].mxu0  ;;  %8179 = vmatmul.mubr.msk.f32.gmra.mrb[170].mxu0 %vm203_vm0, %v8879_v39  ;;  %v2899_v22 = vpop.f32.mrb[64].mxu1  ;;  %v2451_v12 = vadd.f32 %v2450_v9, %v11029_v40 }
 0x36d   :  { %v11458_v54 = vadd.f32 %v5411_v38, %v4494_v45  ;;  %v11460_v42 = vadd.f32 %v5374_v26, %v4493_v15  ;;  %8243 = vmatmul.mubr.msk.f32.gmra.mrb[170].mxu1 %vm203_vm0, %v8879_v39  ;;  %v2901_v44 = vpop.f32.mrb[65].mxu1  ;;  %3286 = vmatprep.mubr.f32.mxu0 %v8998_v0  ;;  %v2453_v53 = vadd.f32 %v2452_v7, %v11033_v11  ;;  %v8881_v26 = vld [vmem:[%s12295_s0 + $0xb8] sm:$0xff]  ;;  %v8882_v39 = vld [vmem:[%s12295_s0 + $0xc0] sm:$0xff] }
 0x36e   :  { %v11463_v48 = vadd.f32 %v5448_v47, %v4495_v43  ;;  %3735 = vmatprep.mubr.f32.mxu1 %v8998_v0  ;;  %v2900_v41 = vadd.f32 %v2899_v22, %v11037_v36  ;;  %v2902_v49 = vadd.f32 %v2901_v44, %v11054_v51  ;;  %v4508_v50 = vmax.f32 %v2451_v12, 0.0 }
 0x36f   :  { %v2456_v2 = vpop.f32.mrb[66].mxu0  ;;  %v4509_v6 = vmax.f32 %v2453_v53, 0.0 }
 0x370   :  { %v2457_v16 = vadd.f32 %v2456_v2, %v11029_v40  ;;  %v2905_v56 = vpop.f32.mrb[66].mxu1  ;;  %v2458_v60 = vpop.f32.mrb[67].mxu0  ;;  %8180 = vmatmul.mubr.msk.f32.gmra.mrb[172].mxu0 %vm203_vm0, %v8880_v5  ;;  %v4510_v18 = vmax.f32 %v2900_v41, 0.0  ;;  %v4511_v4 = vmax.f32 %v2902_v49, 0.0 }
 0x371   :  { %v2906_v61 = vadd.f32 %v2905_v56, %v11037_v36  ;;  %v2459_v33 = vadd.f32 %v2458_v60, %v11033_v11  ;;  %v2907_v29 = vpop.f32.mrb[67].mxu1  ;;  %8244 = vmatmul.mubr.msk.f32.gmra.mrb[172].mxu1 %vm203_vm0, %v8880_v5  ;;  %3292 = vmatprep.mubr.f32.mxu0 %v8998_v0 }
 0x372   :  { %v4524_v3 = vmax.f32 %v2457_v16, 0.0  ;;  %v2908_v23 = vadd.f32 %v2907_v29, %v11054_v51  ;;  %3741 = vmatprep.mubr.f32.mxu1 %v8998_v0 }
 0x373   :  { %v4526_v59 = vmax.f32 %v2906_v61, 0.0  ;;  %v4525_v63 = vmax.f32 %v2459_v33, 0.0  ;;  %v2462_v34 = vpop.f32.mrb[68].mxu0  ;;  %v8883_v33 = vld [vmem:[%s12295_s0 + $0xc8] sm:$0xff] }
 0x374   :  { %v5900_v19 = vadd.f32 %v4524_v3, %v4508_v50  ;;  %v4527_v30 = vmax.f32 %v2908_v23, 0.0  ;;  %v2911_v57 = vpop.f32.mrb[68].mxu1  ;;  %v2464_v38 = vpop.f32.mrb[69].mxu0  ;;  %8181 = vmatmul.mubr.msk.f32.gmra.mrb[174].mxu0 %vm203_vm0, %v8881_v26  ;;  %v2463_v46 = vadd.f32 %v2462_v34, %v11029_v40 }
 0x375   :  { %v5974_v55 = vadd.f32 %v4526_v59, %v4510_v18  ;;  %v5937_v31 = vadd.f32 %v4525_v63, %v4509_v6  ;;  %v2913_v20 = vpop.f32.mrb[69].mxu1  ;;  %8245 = vmatmul.mubr.msk.f32.gmra.mrb[174].mxu1 %vm203_vm0, %v8881_v26  ;;  %3298 = vmatprep.mubr.f32.mxu0 %v8998_v0  ;;  %v2912_v14 = vadd.f32 %v2911_v57, %v11037_v36 }
 0x376   :  { %v6011_v47 = vadd.f32 %v4527_v30, %v4511_v4  ;;  %3747 = vmatprep.mubr.f32.mxu1 %v8998_v0  ;;  %v2465_v27 = vadd.f32 %v2464_v38, %v11033_v11  ;;  %v4540_v15 = vmax.f32 %v2463_v46, 0.0  ;;  %v2914_v9 = vadd.f32 %v2913_v20, %v11054_v51  ;;  %v8884_v20 = vld [vmem:[%s12295_s0 + $0xd0] sm:$0xff] }
 0x377   :  { %v2468_v45 = vpop.f32.mrb[70].mxu0  ;;  %v4542_v22 = vmax.f32 %v2912_v14, 0.0 }
 0x378   :  { %v2917_v43 = vpop.f32.mrb[70].mxu1  ;;  %v2470_v7 = vpop.f32.mrb[71].mxu0  ;;  %8182 = vmatmul.mubr.msk.f32.gmra.mrb[176].mxu0 %vm203_vm0, %v8882_v39  ;;  %v4541_v44 = vmax.f32 %v2465_v27, 0.0  ;;  %v5901_v53 = vadd.f32 %v5900_v19, %v4540_v15  ;;  %v4543_v41 = vmax.f32 %v2914_v9, 0.0  ;;  %v2469_v60 = vadd.f32 %v2468_v45, %v11029_v40 }
 0x379   :  { %v2919_v12 = vpop.f32.mrb[71].mxu1  ;;  %8246 = vmatmul.mubr.msk.f32.gmra.mrb[176].mxu1 %vm203_vm0, %v8882_v39  ;;  %3304 = vmatprep.mubr.f32.mxu0 %v8998_v0  ;;  %v5975_v2 = vadd.f32 %v5974_v55, %v4542_v22  ;;  %v2918_v29 = vadd.f32 %v2917_v43, %v11037_v36  ;;  %v2471_v50 = vadd.f32 %v2470_v7, %v11033_v11  ;;  %v8606_v39 = vld [vmem:[#allocation2 + $0x10] sm:$0xff]  }
 0x37a   :  { %3753 = vmatprep.mubr.f32.mxu1 %v8998_v0  ;;  %v5938_v49 = vadd.f32 %v5937_v31, %v4541_v44  ;;  %v6012_v56 = vadd.f32 %v6011_v47, %v4543_v41  ;;  %v2920_v3 = vadd.f32 %v2919_v12, %v11054_v51  ;;  %v4556_v6 = vmax.f32 %v2469_v60, 0.0  ;;  %v8607_v22 = vld [vmem:[#allocation2 + $0xd0] sm:$0xff]   ;;  %8420 = vmatpush3.bf16.msra.mxu0 %v8606_v39 }
 0x37b   :  { %v2474_v16 = vpop.f32.mrb[72].mxu0  ;;  %v4558_v63 = vmax.f32 %v2918_v29, 0.0  ;;  %v4557_v34 = vmax.f32 %v2471_v50, 0.0  ;;  %v8885_v29 = vld [vmem:[%s12295_s0 + $0xd8] sm:$0xff]  ;;  %8441 = vmatprep.subr.bf16.mxu1 %v8607_v22 }
 0x37c   :  { %v2923_v5 = vpop.f32.mrb[72].mxu1  ;;  %v2476_v61 = vpop.f32.mrb[73].mxu0  ;;  %8183 = vmatmul.mubr.msk.f32.gmra.mrb[178].mxu0 %vm203_vm0, %v8883_v33  ;;  %v2475_v18 = vadd.f32 %v2474_v16, %v11029_v40  ;;  %v4559_v4 = vmax.f32 %v2920_v3, 0.0  ;;  %v5902_v30 = vadd.f32 %v5901_v53, %v4556_v6 }
 0x37d   :  { %v2925_v23 = vpop.f32.mrb[73].mxu1  ;;  %8247 = vmatmul.mubr.msk.f32.gmra.mrb[178].mxu1 %vm203_vm0, %v8883_v33  ;;  %v2924_v59 = vadd.f32 %v2923_v5, %v11037_v36  ;;  %3310 = vmatprep.mubr.f32.mxu0 %v8998_v0  ;;  %v2477_v26 = vadd.f32 %v2476_v61, %v11033_v11  ;;  %v5976_v47 = vadd.f32 %v5975_v2, %v4558_v63 }
 0x37e   :  { %3759 = vmatprep.mubr.f32.mxu1 %v8998_v0  ;;  %v4572_v57 = vmax.f32 %v2475_v18, 0.0  ;;  %v5939_v46 = vadd.f32 %v5938_v49, %v4557_v34  ;;  %v6013_v14 = vadd.f32 %v6012_v56, %v4559_v4  ;;  %v2926_v27 = vadd.f32 %v2925_v23, %v11054_v51  ;;  %v8608_v49 = vld [vmem:[#allocation2 + $0x90] sm:$0xff]  }
 0x37f   :  { %v2480_v19 = vpop.f32.mrb[74].mxu0  ;;  %v4574_v38 = vmax.f32 %v2924_v59, 0.0  ;;  %v4573_v9 = vmax.f32 %v2477_v26, 0.0  ;;  %8442 = vmatpush3.bf16.msra.mxu1 %v8608_v49 }
 0x380   :  { %v2929_v55 = vpop.f32.mrb[74].mxu1  ;;  %v2482_v31 = vpop.f32.mrb[75].mxu0  ;;  %8184 = vmatmul.mubr.msk.f32.gmra.mrb[180].mxu0 %vm203_vm0, %v8884_v20  ;;  %v5903_v15 = vadd.f32 %v5902_v30, %v4572_v57  ;;  %v2481_v43 = vadd.f32 %v2480_v19, %v11029_v40  ;;  %v4575_v12 = vmax.f32 %v2926_v27, 0.0 }
 0x381   :  { %v2931_v45 = vpop.f32.mrb[75].mxu1  ;;  %8248 = vmatmul.mubr.msk.f32.gmra.mrb[180].mxu1 %vm203_vm0, %v8884_v20  ;;  %v2930_v7 = vadd.f32 %v2929_v55, %v11037_v36  ;;  %3316 = vmatprep.mubr.f32.mxu0 %v8998_v0  ;;  %v5977_v44 = vadd.f32 %v5976_v47, %v4574_v38  ;;  %v2483_v53 = vadd.f32 %v2482_v31, %v11033_v11  ;;  %v8609_v55 = vld [vmem:[#allocation2 + $0x58] sm:$0xff]  }
 0x382   :  { %3765 = vmatprep.mubr.f32.mxu1 %v8998_v0  ;;  %v2932_v41 = vadd.f32 %v2931_v45, %v11054_v51  ;;  %v5940_v16 = vadd.f32 %v5939_v46, %v4573_v9  ;;  %v4588_v56 = vmax.f32 %v2481_v43, 0.0  ;;  %v6014_v50 = vadd.f32 %v6013_v14, %v4575_v12  ;;  %v8610_v31 = vld [vmem:[#allocation2 + $0xd8] sm:$0xff]   ;;  %v8886_v45 = vld [vmem:[%s12295_s0 + $0xe0] sm:$0xff]  ;;  %8421 = vmatprep.subr.bf16.mxu0 %v8609_v55 }
 0x383   :  { %v2486_v2 = vpop.f32.mrb[76].mxu0  ;;  %v4590_v60 = vmax.f32 %v2930_v7, 0.0  ;;  %v4589_v3 = vmax.f32 %v2483_v53, 0.0  ;;  %v8612_v9 = vld [vmem:[#allocation2 + $0x98] sm:$0xff]   ;;  %8443 = vmatprep.subr.bf16.mxu1 %v8610_v31  ;;  %v8615_v31 = vld [vmem:[#allocation2 + $0x20] sm:$0xff]  }
 0x384   :  { %v2487_v5 = vadd.f32 %v2486_v2, %v11029_v40  ;;  %v2935_v61 = vpop.f32.mrb[76].mxu1  ;;  %v2488_v33 = vpop.f32.mrb[77].mxu0  ;;  %8185 = vmatmul.mubr.msk.f32.gmra.mrb[182].mxu0 %vm203_vm0, %v8885_v29  ;;  %v4591_v23 = vmax.f32 %v2932_v41, 0.0  ;;  %v5904_v59 = vadd.f32 %v5903_v15, %v4588_v56  ;;  %v8611_v15 = vld [vmem:[#allocation2 + $0x18] sm:$0xff]   ;;  %8444 = vmatpush3.bf16.msra.mxu1 %v8612_v9  ;;  %v8617_v9 = vld [vmem:[#allocation2 + $0x68] sm:$0xff]  }
 0x385   :  { %v2936_v6 = vadd.f32 %v2935_v61, %v11037_v36  ;;  %v2937_v18 = vpop.f32.mrb[77].mxu1  ;;  %8249 = vmatmul.mubr.msk.f32.gmra.mrb[182].mxu1 %vm203_vm0, %v8885_v29  ;;  %3322 = vmatprep.mubr.f32.mxu0 %v8998_v0  ;;  %v5978_v63 = vadd.f32 %v5977_v44, %v4590_v60  ;;  %v2489_v4 = vadd.f32 %v2488_v33, %v11033_v11  ;;  %v8613_v60 = vld [vmem:[#allocation2 + $0x60] sm:$0xff]  }
 0x386   :  { %v4604_v34 = vmax.f32 %v2487_v5, 0.0  ;;  %3771 = vmatprep.mubr.f32.mxu1 %v8998_v0  ;;  %v5941_v19 = vadd.f32 %v5940_v16, %v4589_v3  ;;  %v6015_v30 = vadd.f32 %v6014_v50, %v4591_v23  ;;  %v2938_v38 = vadd.f32 %v2937_v18, %v11054_v51  ;;  %8422 = vmatpush3.bf16.msra.mxu0 %v8611_v15  ;;  %v8614_v5 = vld [vmem:[#allocation2 + $0xe0] sm:$0xff]   ;;  %v8887_v23 = vld [vmem:[%s12295_s0 + $0xe8] sm:$0xff]  ;;  %v8888_v15 = vld [vmem:[%s12295_s0 + $0xf0] sm:$0xff] }
 0x387   :  { %v4606_v57 = vmax.f32 %v2936_v6, 0.0  ;;  %v2492_v26 = vpop.f32.mrb[78].mxu0  ;;  %v4605_v47 = vmax.f32 %v2489_v4, 0.0  ;;  %v8616_v6 = vld [vmem:[#allocation2 + $0xa0] sm:$0xff]   ;;  %8423 = vmatprep.subr.bf16.mxu0 %v8613_v60  ;;  %8445 = vmatprep.subr.bf16.mxu1 %v8614_v5  ;;  %v8620_v60 = vld [vmem:[#allocation2 + $0xa8] sm:$0xff]  }
 0x388   :  { %v5905_v20 = vadd.f32 %v5904_v59, %v4604_v34  ;;  %v2493_v46 = vadd.f32 %v2492_v26, %v11029_v40  ;;  %v2941_v14 = vpop.f32.mrb[78].mxu1  ;;  %v2494_v27 = vpop.f32.mrb[79].mxu0  ;;  %8186 = vmatmul.mubr.msk.f32.gmra.mrb[184].mxu0 %vm203_vm0, %v8886_v45  ;;  %v4607_v7 = vmax.f32 %v2938_v38, 0.0  ;;  %8446 = vmatpush3.bf16.msra.mxu1 %v8616_v6 }
 0x389   :  { %v5979_v43 = vadd.f32 %v5978_v63, %v4606_v57  ;;  %v2942_v39 = vadd.f32 %v2941_v14, %v11037_v36  ;;  %v2495_v22 = vadd.f32 %v2494_v27, %v11033_v11  ;;  %v2943_v44 = vpop.f32.mrb[79].mxu1  ;;  %8250 = vmatmul.mubr.msk.f32.gmra.mrb[184].mxu1 %vm203_vm0, %v8886_v45  ;;  %3328 = vmatprep.mubr.f32.mxu0 %v8998_v0 }
 0x38a   :  { %v5942_v12 = vadd.f32 %v5941_v19, %v4605_v47  ;;  %v4620_v53 = vmax.f32 %v2493_v46, 0.0  ;;  %v2944_v41 = vadd.f32 %v2943_v44, %v11054_v51  ;;  %3777 = vmatprep.mubr.f32.mxu1 %v8998_v0  ;;  %v6016_v2 = vadd.f32 %v6015_v30, %v4607_v7  ;;  %8424 = vmatpush3.bf16.msra.mxu0 %v8615_v31  ;;  %v8623_v31 = vld [vmem:[#allocation2 + $0x30] sm:$0xff]  }
 0x38b   :  { %v4622_v49 = vmax.f32 %v2942_v39, 0.0  ;;  %v4621_v16 = vmax.f32 %v2495_v22, 0.0  ;;  %v2498_v56 = vpop.f32.mrb[80].mxu0  ;;  %8425 = vmatprep.subr.bf16.mxu0 %v8617_v9 }
 0x38c   :  { %v5906_v61 = vadd.f32 %v5905_v20, %v4620_v53  ;;  %v4623_v33 = vmax.f32 %v2944_v41, 0.0  ;;  %v2499_v29 = vadd.f32 %v2498_v56, %v11029_v40  ;;  %v2947_v50 = vpop.f32.mrb[80].mxu1  ;;  %v2500_v3 = vpop.f32.mrb[81].mxu0  ;;  %8187 = vmatmul.mubr.msk.f32.gmra.mrb[186].mxu0 %vm203_vm0, %v8887_v23  ;;  %v8618_v20 = vld [vmem:[#allocation2 + $0xe8] sm:$0xff]  }
 0x38d   :  { %v5980_v18 = vadd.f32 %v5979_v43, %v4622_v49  ;;  %v5943_v59 = vadd.f32 %v5942_v12, %v4621_v16  ;;  %v2948_v63 = vadd.f32 %v2947_v50, %v11037_v36  ;;  %v2501_v34 = vadd.f32 %v2500_v3, %v11033_v11  ;;  %v2949_v4 = vpop.f32.mrb[81].mxu1  ;;  %8251 = vmatmul.mubr.msk.f32.gmra.mrb[186].mxu1 %vm203_vm0, %v8887_v23  ;;  %v8619_v56 = vld [vmem:[#allocation2 + $0x28] sm:$0xff]   ;;  %v8889_v3 = vld [vmem:[%s12295_s0 + $0xf8] sm:$0xff]  ;;  %v8621_v23 = vld [vmem:[#allocation2 + $0x70] sm:$0xff]  }
 0x38e   :  { %v6017_v19 = vadd.f32 %v6016_v2, %v4623_v33  ;;  %v4636_v30 = vmax.f32 %v2499_v29, 0.0  ;;  %v2950_v57 = vadd.f32 %v2949_v4, %v11054_v51  ;;  %3334 = vmatprep.mubr.f32.mxu0 %v8998_v0  ;;  %3783 = vmatprep.mubr.f32.mxu1 %v8998_v0 }
 0x38f   :  { %v4638_v38 = vmax.f32 %v2948_v63, 0.0  ;;  %v4637_v26 = vmax.f32 %v2501_v34, 0.0  ;;  %v2504_v55 = vpop.f32.mrb[82].mxu0  ;;  %8447 = vmatprep.subr.bf16.mxu1 %v8618_v20  ;;  %8426 = vmatpush3.bf16.msra.mxu0 %v8619_v56  ;;  %v8626_v56 = vld [vmem:[#allocation2 + $0xf8] sm:$0xff]  }
 0x390   :  { %v5907_v47 = vadd.f32 %v5906_v61, %v4636_v30  ;;  %v4639_v46 = vmax.f32 %v2950_v57, 0.0  ;;  %v2505_v14 = vadd.f32 %v2504_v55, %v11029_v40  ;;  %v2953_v27 = vpop.f32.mrb[82].mxu1  ;;  %v2506_v45 = vpop.f32.mrb[83].mxu0  ;;  %8188 = vmatmul.mubr.msk.f32.gmra.mrb[188].mxu0 %vm203_vm0, %v8888_v15  ;;  %8448 = vmatpush3.bf16.msra.mxu1 %v8620_v60  ;;  %v8622_v55 = vld [vmem:[#allocation2 + $0xf0] sm:$0xff]  }
 0x391   :  { %v5981_v43 = vadd.f32 %v5980_v18, %v4638_v38  ;;  %v5944_v7 = vadd.f32 %v5943_v59, %v4637_v26  ;;  %v2954_v39 = vadd.f32 %v2953_v27, %v11037_v36  ;;  %v2507_v22 = vadd.f32 %v2506_v45, %v11033_v11  ;;  %v2955_v44 = vpop.f32.mrb[83].mxu1  ;;  %8252 = vmatmul.mubr.msk.f32.gmra.mrb[188].mxu1 %vm203_vm0, %v8888_v15  ;;  %v8890_v45 = vld [vmem:[%s12295_s0 + $0x100] sm:$0xff]  ;;  %v8624_v15 = vld [vmem:[#allocation2 + $0xb0] sm:$0xff]  }
 0x392   :  { %v6018_v12 = vadd.f32 %v6017_v19, %v4639_v46  ;;  %v4652_v53 = vmax.f32 %v2505_v14, 0.0  ;;  %v2956_v41 = vadd.f32 %v2955_v44, %v11054_v51  ;;  %3340 = vmatprep.mubr.f32.mxu0 %v8998_v0  ;;  %3789 = vmatprep.mubr.f32.mxu1 %v8998_v0 }
 0x393   :  { %v4654_v2 = vmax.f32 %v2954_v39, 0.0  ;;  %v4653_v49 = vmax.f32 %v2507_v22, 0.0  ;;  %v2510_v16 = vpop.f32.mrb[84].mxu0  ;;  %8427 = vmatprep.subr.bf16.mxu0 %v8621_v23  ;;  %8449 = vmatprep.subr.bf16.mxu1 %v8622_v55  ;;  %v8630_v55 = vld [vmem:[#allocation2 + $0x1c0] sm:$0xff]  }
 0x394   :  { %v5908_v5 = vadd.f32 %v5907_v47, %v4652_v53  ;;  %v4655_v61 = vmax.f32 %v2956_v41, 0.0  ;;  %v2511_v33 = vadd.f32 %v2510_v16, %v11029_v40  ;;  %v2959_v29 = vpop.f32.mrb[84].mxu1  ;;  %v2512_v50 = vpop.f32.mrb[85].mxu0  ;;  %8189 = vmatmul.mubr.msk.f32.gmra.mrb[190].mxu0 %vm203_vm0, %v8889_v3  ;;  %v8625_v16 = vld [vmem:[#allocation2 + $0x78] sm:$0xff]   ;;  %8450 = vmatpush3.bf16.msra.mxu1 %v8624_v15 }
 0x395   :  { %v5982_v6 = vadd.f32 %v5981_v43, %v4654_v2  ;;  %v5945_v18 = vadd.f32 %v5944_v7, %v4653_v49  ;;  %v2960_v59 = vadd.f32 %v2959_v29, %v11037_v36  ;;  %v2513_v63 = vadd.f32 %v2512_v50, %v11033_v11  ;;  %v2961_v34 = vpop.f32.mrb[85].mxu1  ;;  %8253 = vmatmul.mubr.msk.f32.gmra.mrb[190].mxu1 %vm203_vm0, %v8889_v3  ;;  %v8891_v50 = vld [vmem:[%s12295_s0 + $0x108] sm:$0xff]  ;;  %v8628_v3 = vld [vmem:[#allocation2 + $0xb8] sm:$0xff]  }
 0x396   :  { %v6019_v4 = vadd.f32 %v6018_v12, %v4655_v61  ;;  %v4668_v19 = vmax.f32 %v2511_v33, 0.0  ;;  %v2962_v30 = vadd.f32 %v2961_v34, %v11054_v51  ;;  %3346 = vmatprep.mubr.f32.mxu0 %v8998_v0  ;;  %3795 = vmatprep.mubr.f32.mxu1 %v8998_v0 }
 0x397   :  { %v4670_v57 = vmax.f32 %v2960_v59, 0.0  ;;  %v4669_v38 = vmax.f32 %v2513_v63, 0.0  ;;  %v2516_v26 = vpop.f32.mrb[86].mxu0  ;;  %8428 = vmatpush3.bf16.msra.mxu0 %v8623_v31  ;;  %8451 = vmatprep.subr.bf16.mxu1 %v8626_v56 }
 0x398   :  { %v5909_v20 = vadd.f32 %v5908_v5, %v4668_v19  ;;  %v4671_v47 = vmax.f32 %v2962_v30, 0.0  ;;  %v2517_v46 = vadd.f32 %v2516_v26, %v11029_v40  ;;  %v2965_v14 = vpop.f32.mrb[86].mxu1  ;;  %v2518_v27 = vpop.f32.mrb[87].mxu0  ;;  %8190 = vmatmul.mubr.msk.f32.gmra.mrb[192].mxu0 %vm203_vm0, %v8890_v45  ;;  %8429 = vmatprep.subr.bf16.mxu0 %v8625_v16  ;;  %v8627_v26 = vld [vmem:[#allocation2 + $0x38] sm:$0xff]  }
 0x399   :  { %v5983_v9 = vadd.f32 %v5982_v6, %v4670_v57  ;;  %v5946_v43 = vadd.f32 %v5945_v18, %v4669_v38  ;;  %v2966_v7 = vadd.f32 %v2965_v14, %v11037_v36  ;;  %v2519_v39 = vadd.f32 %v2518_v27, %v11033_v11  ;;  %v2967_v22 = vpop.f32.mrb[87].mxu1  ;;  %8254 = vmatmul.mubr.msk.f32.gmra.mrb[192].mxu1 %vm203_vm0, %v8890_v45  ;;  %v8892_v27 = vld [vmem:[%s12295_s0 + $0x110] sm:$0xff]  ;;  %v8629_v45 = vld [vmem:[#allocation2 + $0x140] sm:$0xff]  }
 0x39a   :  { %v6020_v44 = vadd.f32 %v6019_v4, %v4671_v47  ;;  %v4684_v12 = vmax.f32 %v2517_v46, 0.0  ;;  %v2968_v53 = vadd.f32 %v2967_v22, %v11054_v51  ;;  %3352 = vmatprep.mubr.f32.mxu0 %v8998_v0  ;;  %3801 = vmatprep.mubr.f32.mxu1 %v8998_v0 }
 0x39b   :  { %v4686_v41 = vmax.f32 %v2966_v7, 0.0  ;;  %v4685_v2 = vmax.f32 %v2519_v39, 0.0  ;;  %v2522_v49 = vpop.f32.mrb[88].mxu0  ;;  %8452 = vmatpush3.bf16.msra.mxu1 %v8628_v3  ;;  %8430 = vmatpush3.bf16.msra.mxu0 %v8627_v26 }
 0x39c   :  { %v5910_v60 = vadd.f32 %v5909_v20, %v4684_v12  ;;  %v4687_v5 = vmax.f32 %v2968_v53, 0.0  ;;  %v2523_v61 = vadd.f32 %v2522_v49, %v11029_v40  ;;  %v2971_v33 = vpop.f32.mrb[88].mxu1  ;;  %v2524_v29 = vpop.f32.mrb[89].mxu0  ;;  %8191 = vmatmul.mubr.msk.f32.gmra.mrb[194].mxu0 %vm203_vm0, %v8891_v50  ;;  %8481 = vmatprep.subr.bf16.mxu1 %v8630_v55  ;;  %v8894_v55 = vld [vmem:[%s12295_s0 + $0x120] sm:$0xff] }
 0x39d   :  { %v5984_v23 = vadd.f32 %v5983_v9, %v4686_v41  ;;  %v5947_v6 = vadd.f32 %v5946_v43, %v4685_v2  ;;  %v2972_v18 = vadd.f32 %v2971_v33, %v11037_v36  ;;  %v2525_v59 = vadd.f32 %v2524_v29, %v11033_v11  ;;  %v2973_v63 = vpop.f32.mrb[89].mxu1  ;;  %8255 = vmatmul.mubr.msk.f32.gmra.mrb[194].mxu1 %vm203_vm0, %v8891_v50 }
 0x39e   :  { %v6021_v34 = vadd.f32 %v6020_v44, %v4687_v5  ;;  %v4700_v4 = vmax.f32 %v2523_v61, 0.0  ;;  %v2974_v19 = vadd.f32 %v2973_v63, %v11054_v51  ;;  %3358 = vmatprep.mubr.f32.mxu0 %v8998_v0  ;;  %3807 = vmatprep.mubr.f32.mxu1 %v8998_v0  ;;  %v8893_v61 = vld [vmem:[%s12295_s0 + $0x118] sm:$0xff] }
 0x39f   :  { %v4702_v30 = vmax.f32 %v2972_v18, 0.0  ;;  %v4701_v57 = vmax.f32 %v2525_v59, 0.0  ;;  %v2528_v38 = vpop.f32.mrb[90].mxu0  ;;  %8459 = vmatprep.subr.bf16.mxu0 %v8629_v45 }
 0x3a0   :  { %v5911_v31 = vadd.f32 %v5910_v60, %v4700_v4  ;;  %v4703_v20 = vmax.f32 %v2974_v19, 0.0  ;;  %v2529_v47 = vadd.f32 %v2528_v38, %v11029_v40  ;;  %v2977_v46 = vpop.f32.mrb[90].mxu1  ;;  %v2530_v14 = vpop.f32.mrb[91].mxu0  ;;  %8192 = vmatmul.mubr.msk.f32.gmra.mrb[196].mxu0 %vm203_vm0, %v8892_v27 }
 0x3a1   :  { %v5985_v15 = vadd.f32 %v5984_v23, %v4702_v30  ;;  %v5948_v9 = vadd.f32 %v5947_v6, %v4701_v57  ;;  %v2978_v43 = vadd.f32 %v2977_v46, %v11037_v36  ;;  %v2531_v7 = vadd.f32 %v2530_v14, %v11033_v11  ;;  %v2979_v39 = vpop.f32.mrb[91].mxu1  ;;  %8256 = vmatmul.mubr.msk.f32.gmra.mrb[196].mxu1 %vm203_vm0, %v8892_v27 }
 0x3a2   :  { %v6022_v22 = vadd.f32 %v6021_v34, %v4703_v20  ;;  %v4716_v44 = vmax.f32 %v2529_v47, 0.0  ;;  %v2980_v12 = vadd.f32 %v2979_v39, %v11054_v51  ;;  %3364 = vmatprep.mubr.f32.mxu0 %v8998_v0  ;;  %3813 = vmatprep.mubr.f32.mxu1 %v8998_v0 }
 0x3a3   :  { %v4718_v53 = vmax.f32 %v2978_v43, 0.0  ;;  %v4717_v41 = vmax.f32 %v2531_v7, 0.0  ;;  %v2534_v2 = vpop.f32.mrb[92].mxu0 }
 0x3a4   :  { %v5912_v49 = vadd.f32 %v5911_v31, %v4716_v44  ;;  %v4719_v16 = vmax.f32 %v2980_v12, 0.0  ;;  %v2535_v56 = vadd.f32 %v2534_v2, %v11029_v40  ;;  %v2983_v60 = vpop.f32.mrb[92].mxu1  ;;  %v2536_v5 = vpop.f32.mrb[93].mxu0  ;;  %8193 = vmatmul.mubr.msk.f32.gmra.mrb[198].mxu0 %vm203_vm0, %v8893_v61 }
 0x3a5   :  { %v5986_v33 = vadd.f32 %v5985_v15, %v4718_v53  ;;  %v5949_v29 = vadd.f32 %v5948_v9, %v4717_v41  ;;  %v2984_v50 = vadd.f32 %v2983_v60, %v11037_v36  ;;  %v2537_v3 = vadd.f32 %v2536_v5, %v11033_v11  ;;  %v2985_v23 = vpop.f32.mrb[93].mxu1  ;;  %8257 = vmatmul.mubr.msk.f32.gmra.mrb[198].mxu1 %vm203_vm0, %v8893_v61  ;;  %v8895_v41 = vld [vmem:[%s12295_s0 + $0x128] sm:$0xff] }
 0x3a6   :  { %v6023_v6 = vadd.f32 %v6022_v22, %v4719_v16  ;;  %v4732_v18 = vmax.f32 %v2535_v56, 0.0  ;;  %v2986_v59 = vadd.f32 %v2985_v23, %v11054_v51  ;;  %3370 = vmatprep.mubr.f32.mxu0 %v8998_v0  ;;  %3819 = vmatprep.mubr.f32.mxu1 %v8998_v0 }
 0x3a7   :  { %v4734_v63 = vmax.f32 %v2984_v50, 0.0  ;;  %v4733_v34 = vmax.f32 %v2537_v3, 0.0  ;;  %v2540_v4 = vpop.f32.mrb[94].mxu0 }
 0x3a8   :  { %v5913_v19 = vadd.f32 %v5912_v49, %v4732_v18  ;;  %v4735_v30 = vmax.f32 %v2986_v59, 0.0  ;;  %v2541_v57 = vadd.f32 %v2540_v4, %v11029_v40  ;;  %v2989_v38 = vpop.f32.mrb[94].mxu1  ;;  %v2542_v26 = vpop.f32.mrb[95].mxu0  ;;  %8194 = vmatmul.mubr.msk.f32.gmra.mrb[200].mxu0 %vm203_vm0, %v8894_v55 }
 0x3a9   :  { %v5987_v31 = vadd.f32 %v5986_v33, %v4734_v63  ;;  %v5950_v20 = vadd.f32 %v5949_v29, %v4733_v34  ;;  %v2990_v47 = vadd.f32 %v2989_v38, %v11037_v36  ;;  %v2543_v46 = vadd.f32 %v2542_v26, %v11033_v11  ;;  %v2991_v14 = vpop.f32.mrb[95].mxu1  ;;  %8258 = vmatmul.mubr.msk.f32.gmra.mrb[200].mxu1 %vm203_vm0, %v8894_v55  ;;  %v8896_v34 = vld [vmem:[%s12295_s0 + $0x130] sm:$0xff] }
 0x3aa   :  { %v6024_v27 = vadd.f32 %v6023_v6, %v4735_v30  ;;  %v4748_v45 = vmax.f32 %v2541_v57, 0.0  ;;  %v2992_v15 = vadd.f32 %v2991_v14, %v11054_v51  ;;  %3376 = vmatprep.mubr.f32.mxu0 %v8998_v0  ;;  %3825 = vmatprep.mubr.f32.mxu1 %v8998_v0 }
 0x3ab   :  { %v4750_v9 = vmax.f32 %v2990_v47, 0.0  ;;  %v4749_v43 = vmax.f32 %v2543_v46, 0.0  ;;  %v2546_v7 = vpop.f32.mrb[96].mxu0 }
 0x3ac   :  { %v5914_v39 = vadd.f32 %v5913_v19, %v4748_v45  ;;  %v4751_v22 = vmax.f32 %v2992_v15, 0.0  ;;  %v2547_v44 = vadd.f32 %v2546_v7, %v11029_v40  ;;  %v2995_v12 = vpop.f32.mrb[96].mxu1  ;;  %v2548_v53 = vpop.f32.mrb[97].mxu0  ;;  %8195 = vmatmul.mubr.msk.f32.gmra.mrb[202].mxu0 %vm203_vm0, %v8895_v41 }
 0x3ad   :  { %v5988_v2 = vadd.f32 %v5987_v31, %v4750_v9  ;;  %v5951_v49 = vadd.f32 %v5950_v20, %v4749_v43  ;;  %v2996_v16 = vadd.f32 %v2995_v12, %v11037_v36  ;;  %v2549_v56 = vadd.f32 %v2548_v53, %v11033_v11  ;;  %v2997_v60 = vpop.f32.mrb[97].mxu1  ;;  %8259 = vmatmul.mubr.msk.f32.gmra.mrb[202].mxu1 %vm203_vm0, %v8895_v41  ;;  %v8897_v43 = vld [vmem:[%s12295_s0 + $0x138] sm:$0xff] }
 0x3ae   :  { %v6025_v5 = vadd.f32 %v6024_v27, %v4751_v22  ;;  %v4764_v61 = vmax.f32 %v2547_v44, 0.0  ;;  %v2998_v33 = vadd.f32 %v2997_v60, %v11054_v51  ;;  %3382 = vmatprep.mubr.f32.mxu0 %v8998_v0  ;;  %3831 = vmatprep.mubr.f32.mxu1 %v8998_v0 }
 0x3af   :  { %v4766_v29 = vmax.f32 %v2996_v16, 0.0  ;;  %v4765_v50 = vmax.f32 %v2549_v56, 0.0  ;;  %v2552_v3 = vpop.f32.mrb[98].mxu0 }
 0x3b0   :  { %v5915_v23 = vadd.f32 %v5914_v39, %v4764_v61  ;;  %v4767_v6 = vmax.f32 %v2998_v33, 0.0  ;;  %v2553_v18 = vadd.f32 %v2552_v3, %v11029_v40  ;;  %v3001_v59 = vpop.f32.mrb[98].mxu1  ;;  %v2554_v63 = vpop.f32.mrb[99].mxu0  ;;  %8196 = vmatmul.mubr.msk.f32.gmra.mrb[204].mxu0 %vm203_vm0, %v8896_v34 }
 0x3b1   :  { %v5989_v4 = vadd.f32 %v5988_v2, %v4766_v29  ;;  %v5952_v19 = vadd.f32 %v5951_v49, %v4765_v50  ;;  %v3002_v30 = vadd.f32 %v3001_v59, %v11037_v36  ;;  %v2555_v57 = vadd.f32 %v2554_v63, %v11033_v11  ;;  %v3003_v38 = vpop.f32.mrb[99].mxu1  ;;  %8260 = vmatmul.mubr.msk.f32.gmra.mrb[204].mxu1 %vm203_vm0, %v8896_v34  ;;  %v8898_v50 = vld [vmem:[%s12295_s0 + $0x140] sm:$0xff] }
 0x3b2   :  { %v6026_v26 = vadd.f32 %v6025_v5, %v4767_v6  ;;  %v4780_v55 = vmax.f32 %v2553_v18, 0.0  ;;  %v3004_v31 = vadd.f32 %v3003_v38, %v11054_v51  ;;  %3388 = vmatprep.mubr.f32.mxu0 %v8998_v0  ;;  %3837 = vmatprep.mubr.f32.mxu1 %v8998_v0 }
 0x3b3   :  { %v4782_v20 = vmax.f32 %v3002_v30, 0.0  ;;  %v4781_v47 = vmax.f32 %v2555_v57, 0.0  ;;  %v2558_v46 = vpop.f32.mrb[100].mxu0 }
 0x3b4   :  { %v5916_v14 = vadd.f32 %v5915_v23, %v4780_v55  ;;  %v4783_v27 = vmax.f32 %v3004_v31, 0.0  ;;  %v2559_v45 = vadd.f32 %v2558_v46, %v11029_v40  ;;  %v3007_v15 = vpop.f32.mrb[100].mxu1  ;;  %v2560_v9 = vpop.f32.mrb[101].mxu0  ;;  %8197 = vmatmul.mubr.msk.f32.gmra.mrb[206].mxu0 %vm203_vm0, %v8897_v43 }
 0x3b5   :  { %v5990_v7 = vadd.f32 %v5989_v4, %v4782_v20  ;;  %v5953_v39 = vadd.f32 %v5952_v19, %v4781_v47  ;;  %v3008_v22 = vadd.f32 %v3007_v15, %v11037_v36  ;;  %v2561_v44 = vadd.f32 %v2560_v9, %v11033_v11  ;;  %v3009_v12 = vpop.f32.mrb[101].mxu1  ;;  %8261 = vmatmul.mubr.msk.f32.gmra.mrb[206].mxu1 %vm203_vm0, %v8897_v43  ;;  %v8899_v47 = vld [vmem:[%s12295_s0 + $0x148] sm:$0xff] }
 0x3b6   :  { %v6027_v53 = vadd.f32 %v6026_v26, %v4783_v27  ;;  %v4796_v41 = vmax.f32 %v2559_v45, 0.0  ;;  %v3010_v2 = vadd.f32 %v3009_v12, %v11054_v51  ;;  %3394 = vmatprep.mubr.f32.mxu0 %v8998_v0  ;;  %3843 = vmatprep.mubr.f32.mxu1 %v8998_v0 }
 0x3b7   :  { %v4798_v49 = vmax.f32 %v3008_v22, 0.0  ;;  %v4797_v16 = vmax.f32 %v2561_v44, 0.0  ;;  %v2564_v56 = vpop.f32.mrb[102].mxu0 }
 0x3b8   :  { %v5917_v60 = vadd.f32 %v5916_v14, %v4796_v41  ;;  %v4799_v5 = vmax.f32 %v3010_v2, 0.0  ;;  %v2565_v61 = vadd.f32 %v2564_v56, %v11029_v40  ;;  %v3013_v33 = vpop.f32.mrb[102].mxu1  ;;  %v2566_v29 = vpop.f32.mrb[103].mxu0  ;;  %8198 = vmatmul.mubr.msk.f32.gmra.mrb[208].mxu0 %vm203_vm0, %v8898_v50 }
 0x3b9   :  { %v5991_v3 = vadd.f32 %v5990_v7, %v4798_v49  ;;  %v5954_v23 = vadd.f32 %v5953_v39, %v4797_v16  ;;  %v3014_v6 = vadd.f32 %v3013_v33, %v11037_v36  ;;  %v2567_v18 = vadd.f32 %v2566_v29, %v11033_v11  ;;  %v3015_v59 = vpop.f32.mrb[103].mxu1  ;;  %8262 = vmatmul.mubr.msk.f32.gmra.mrb[208].mxu1 %vm203_vm0, %v8898_v50  ;;  %v8900_v16 = vld [vmem:[%s12295_s0 + $0x150] sm:$0xff] }
 0x3ba   :  { %v6028_v63 = vadd.f32 %v6027_v53, %v4799_v5  ;;  %v4812_v34 = vmax.f32 %v2565_v61, 0.0  ;;  %v3016_v4 = vadd.f32 %v3015_v59, %v11054_v51  ;;  %3400 = vmatprep.mubr.f32.mxu0 %v8998_v0  ;;  %3849 = vmatprep.mubr.f32.mxu1 %v8998_v0 }
 0x3bb   :  { %v4814_v19 = vmax.f32 %v3014_v6, 0.0  ;;  %v4813_v30 = vmax.f32 %v2567_v18, 0.0  ;;  %v2570_v57 = vpop.f32.mrb[104].mxu0 }
 0x3bc   :  { %v5918_v38 = vadd.f32 %v5917_v60, %v4812_v34  ;;  %v4815_v26 = vmax.f32 %v3016_v4, 0.0  ;;  %v2571_v55 = vadd.f32 %v2570_v57, %v11029_v40  ;;  %v3019_v31 = vpop.f32.mrb[104].mxu1  ;;  %v2572_v20 = vpop.f32.mrb[105].mxu0  ;;  %8199 = vmatmul.mubr.msk.f32.gmra.mrb[210].mxu0 %vm203_vm0, %v8899_v47 }
 0x3bd   :  { %v5992_v46 = vadd.f32 %v5991_v3, %v4814_v19  ;;  %v5955_v14 = vadd.f32 %v5954_v23, %v4813_v30  ;;  %v3020_v27 = vadd.f32 %v3019_v31, %v11037_v36  ;;  %v2573_v45 = vadd.f32 %v2572_v20, %v11033_v11  ;;  %v3021_v15 = vpop.f32.mrb[105].mxu1  ;;  %8263 = vmatmul.mubr.msk.f32.gmra.mrb[210].mxu1 %vm203_vm0, %v8899_v47  ;;  %v8901_v30 = vld [vmem:[%s12295_s0 + $0x158] sm:$0xff] }
 0x3be   :  { %v6029_v9 = vadd.f32 %v6028_v63, %v4815_v26  ;;  %v4828_v43 = vmax.f32 %v2571_v55, 0.0  ;;  %v3022_v7 = vadd.f32 %v3021_v15, %v11054_v51  ;;  %3406 = vmatprep.mubr.f32.mxu0 %v8998_v0  ;;  %3855 = vmatprep.mubr.f32.mxu1 %v8998_v0  ;;  %v5339_v20 = vrot.slane %v11452_v35, 4 }
 0x3bf   :  { %v4830_v39 = vmax.f32 %v3020_v27, 0.0  ;;  %v4829_v22 = vmax.f32 %v2573_v45, 0.0  ;;  %v2576_v44 = vpop.f32.mrb[106].mxu0 }
 0x3c0   :  { %v5919_v12 = vadd.f32 %v5918_v38, %v4828_v43  ;;  %v4831_v53 = vmax.f32 %v3022_v7, 0.0  ;;  %v2577_v41 = vadd.f32 %v2576_v44, %v11029_v40  ;;  %v3025_v2 = vpop.f32.mrb[106].mxu1  ;;  %v2578_v49 = vpop.f32.mrb[107].mxu0  ;;  %8200 = vmatmul.mubr.msk.f32.gmra.mrb[212].mxu0 %vm203_vm0, %v8900_v16 }
 0x3c1   :  { %v5993_v56 = vadd.f32 %v5992_v46, %v4830_v39  ;;  %v5956_v60 = vadd.f32 %v5955_v14, %v4829_v22  ;;  %v3026_v5 = vadd.f32 %v3025_v2, %v11037_v36  ;;  %v2579_v61 = vadd.f32 %v2578_v49, %v11033_v11  ;;  %v3027_v33 = vpop.f32.mrb[107].mxu1  ;;  %8264 = vmatmul.mubr.msk.f32.gmra.mrb[212].mxu1 %vm203_vm0, %v8900_v16 }
 0x3c2   :  { %v6030_v29 = vadd.f32 %v6029_v9, %v4831_v53  ;;  %v4844_v50 = vmax.f32 %v2577_v41, 0.0  ;;  %v3028_v3 = vadd.f32 %v3027_v33, %v11054_v51  ;;  %3412 = vmatprep.mubr.f32.mxu0 %v8998_v0  ;;  %3861 = vmatprep.mubr.f32.mxu1 %v8998_v0  ;;  %v5413_v9 = vrot.slane %v11458_v54, 4 }
 0x3c3   :  { %v4846_v23 = vmax.f32 %v3026_v5, 0.0  ;;  %v4845_v6 = vmax.f32 %v2579_v61, 0.0  ;;  %v2582_v18 = vpop.f32.mrb[108].mxu0  ;;  %v5376_v33 = vrot.slane %v11460_v42, 4 }
 0x3c4   :  { %v5920_v59 = vadd.f32 %v5919_v12, %v4844_v50  ;;  %v4847_v63 = vmax.f32 %v3028_v3, 0.0  ;;  %v2583_v34 = vadd.f32 %v2582_v18, %v11029_v40  ;;  %v3031_v4 = vpop.f32.mrb[108].mxu1  ;;  %v2584_v19 = vpop.f32.mrb[109].mxu0  ;;  %8201 = vmatmul.mubr.msk.f32.gmra.mrb[214].mxu0 %vm203_vm0, %v8901_v30  ;;  %v8902_v12 = vld [vmem:[%s12295_s0 + $0x160] sm:$0xff] }
 0x3c5   :  { %v5994_v57 = vadd.f32 %v5993_v56, %v4846_v23  ;;  %v5957_v38 = vadd.f32 %v5956_v60, %v4845_v6  ;;  %v3032_v26 = vadd.f32 %v3031_v4, %v11037_v36  ;;  %v2585_v55 = vadd.f32 %v2584_v19, %v11033_v11  ;;  %v3033_v31 = vpop.f32.mrb[109].mxu1  ;;  %8265 = vmatmul.mubr.msk.f32.gmra.mrb[214].mxu1 %vm203_vm0, %v8901_v30  ;;  %v8903_v4 = vld [vmem:[%s12295_s0 + $0x168] sm:$0xff] }
 0x3c6   :  { %v6031_v47 = vadd.f32 %v6030_v29, %v4847_v63  ;;  %v4860_v46 = vmax.f32 %v2583_v34, 0.0  ;;  %v3034_v14 = vadd.f32 %v3033_v31, %v11054_v51  ;;  %3418 = vmatprep.mubr.f32.mxu0 %v8998_v0  ;;  %3867 = vmatprep.mubr.f32.mxu1 %v8998_v0  ;;  %v5340_v56 = vadd.f32 %v5339_v20, %v11452_v35 }
 0x3c7   :  { %v4862_v27 = vmax.f32 %v3032_v26, 0.0  ;;  %v4861_v45 = vmax.f32 %v2585_v55, 0.0  ;;  %v2588_v15 = vpop.f32.mrb[110].mxu0  ;;  %v5450_v29 = vrot.slane %v11463_v48, 4  ;;  %v5414_v6 = vadd.f32 %v5413_v9, %v11458_v54 }
 0x3c8   :  { %v5921_v43 = vadd.f32 %v5920_v59, %v4860_v46  ;;  %v4863_v7 = vmax.f32 %v3034_v14, 0.0  ;;  %v2589_v39 = vadd.f32 %v2588_v15, %v11029_v40  ;;  %v3037_v22 = vpop.f32.mrb[110].mxu1  ;;  %v2590_v44 = vpop.f32.mrb[111].mxu0  ;;  %8202 = vmatmul.mubr.msk.f32.gmra.mrb[216].mxu0 %vm203_vm0, %v8902_v12  ;;  %v5341_v54 = vrot.slane %v5340_v56, 2 }
 0x3c9   :  { %v5995_v53 = vadd.f32 %v5994_v57, %v4862_v27  ;;  %v5958_v41 = vadd.f32 %v5957_v38, %v4861_v45  ;;  %v3038_v2 = vadd.f32 %v3037_v22, %v11037_v36  ;;  %v2591_v49 = vadd.f32 %v2590_v44, %v11033_v11  ;;  %v3039_v16 = vpop.f32.mrb[111].mxu1  ;;  %8266 = vmatmul.mubr.msk.f32.gmra.mrb[216].mxu1 %vm203_vm0, %v8902_v12  ;;  %v8904_v44 = vld [vmem:[%s12295_s0 + $0x170] sm:$0xff] }
 0x3ca   :  { %v6032_v60 = vadd.f32 %v6031_v47, %v4863_v7  ;;  %v4876_v5 = vmax.f32 %v2589_v39, 0.0  ;;  %v3040_v61 = vadd.f32 %v3039_v16, %v11054_v51  ;;  %3424 = vmatprep.mubr.f32.mxu0 %v8998_v0  ;;  %3873 = vmatprep.mubr.f32.mxu1 %v8998_v0  ;;  %v5377_v47 = vadd.f32 %v5376_v33, %v11460_v42 }
 0x3cb   :  { %v4878_v50 = vmax.f32 %v3038_v2, 0.0  ;;  %v4877_v3 = vmax.f32 %v2591_v49, 0.0  ;;  %v2594_v23 = vpop.f32.mrb[112].mxu0  ;;  %v5451_v46 = vadd.f32 %v5450_v29, %v11463_v48  ;;  %v5415_v15 = vrot.slane %v5414_v6, 2 }
 0x3cc   :  { %v5922_v18 = vadd.f32 %v5921_v43, %v4876_v5  ;;  %v4879_v59 = vmax.f32 %v3040_v61, 0.0  ;;  %v2595_v35 = vadd.f32 %v2594_v23, %v11029_v40  ;;  %v3043_v63 = vpop.f32.mrb[112].mxu1  ;;  %v2596_v34 = vpop.f32.mrb[113].mxu0  ;;  %8203 = vmatmul.mubr.msk.f32.gmra.mrb[218].mxu0 %vm203_vm0, %v8903_v4  ;;  %v5342_v2 = vadd.f32 %v5341_v54, %v5340_v56 }
 0x3cd   :  { %v5996_v19 = vadd.f32 %v5995_v53, %v4878_v50  ;;  %v5959_v30 = vadd.f32 %v5958_v41, %v4877_v3  ;;  %v3044_v57 = vadd.f32 %v3043_v63, %v11037_v36  ;;  %v2597_v38 = vadd.f32 %v2596_v34, %v11033_v11  ;;  %v3045_v26 = vpop.f32.mrb[113].mxu1  ;;  %8267 = vmatmul.mubr.msk.f32.gmra.mrb[218].mxu1 %vm203_vm0, %v8903_v4  ;;  %v8905_v63 = vld [vmem:[%s12295_s0 + $0x178] sm:$0xff] }
 0x3ce   :  { %v6033_v55 = vadd.f32 %v6032_v60, %v4879_v59  ;;  %v4892_v31 = vmax.f32 %v2595_v35, 0.0  ;;  %v3046_v20 = vadd.f32 %v3045_v26, %v11054_v51  ;;  %3430 = vmatprep.mubr.f32.mxu0 %v8998_v0  ;;  %3879 = vmatprep.mubr.f32.mxu1 %v8998_v0  ;;  %v5378_v5 = vrot.slane %v5377_v47, 2 }
 0x3cf   :  { %v4894_v14 = vmax.f32 %v3044_v57, 0.0  ;;  %v4893_v27 = vmax.f32 %v2597_v38, 0.0  ;;  %v2600_v45 = vpop.f32.mrb[114].mxu0  ;;  %v5452_v61 = vrot.slane %v5451_v46, 2  ;;  %v5416_v3 = vadd.f32 %v5415_v15, %v5414_v6 }
 0x3d0   :  { %v5923_v9 = vadd.f32 %v5922_v18, %v4892_v31  ;;  %v4895_v43 = vmax.f32 %v3046_v20, 0.0  ;;  %v2601_v7 = vadd.f32 %v2600_v45, %v11029_v40  ;;  %v3049_v39 = vpop.f32.mrb[114].mxu1  ;;  %v2602_v22 = vpop.f32.mrb[115].mxu0  ;;  %8204 = vmatmul.mubr.msk.f32.gmra.mrb[220].mxu0 %vm203_vm0, %v8904_v44  ;;  %v5343_v6 = vrot.slane %v5342_v2, 1 }
 0x3d1   :  { %v5997_v12 = vadd.f32 %v5996_v19, %v4894_v14  ;;  %v5960_v42 = vadd.f32 %v5959_v30, %v4893_v27  ;;  %v3050_v48 = vadd.f32 %v3049_v39, %v11037_v36  ;;  %v2603_v53 = vadd.f32 %v2602_v22, %v11033_v11  ;;  %v3051_v41 = vpop.f32.mrb[115].mxu1  ;;  %8268 = vmatmul.mubr.msk.f32.gmra.mrb[220].mxu1 %vm203_vm0, %v8904_v44  ;;  %v8906_v22 = vld [vmem:[%s12295_s0 + $0x180] sm:$0xff] }
 0x3d2   :  { %v6034_v49 = vadd.f32 %v6033_v55, %v4895_v43  ;;  %v4908_v16 = vmax.f32 %v2601_v7, 0.0  ;;  %v3052_v60 = vadd.f32 %v3051_v41, %v11054_v51  ;;  %3436 = vmatprep.mubr.f32.mxu0 %v8998_v0  ;;  %3885 = vmatprep.mubr.f32.mxu1 %v8998_v0  ;;  %v5379_v55 = vadd.f32 %v5378_v5, %v5377_v47 }
 0x3d3   :  { %v4910_v33 = vmax.f32 %v3050_v48, 0.0  ;;  %v4909_v29 = vmax.f32 %v2603_v53, 0.0  ;;  %v2606_v50 = vpop.f32.mrb[116].mxu0  ;;  %v5453_v31 = vadd.f32 %v5452_v61, %v5451_v46  ;;  %v5417_v45 = vrot.slane %v5416_v3, 1 }
 0x3d4   :  { %v5924_v23 = vadd.f32 %v5923_v9, %v4908_v16  ;;  %v4911_v18 = vmax.f32 %v3052_v60, 0.0  ;;  %v2607_v59 = vadd.f32 %v2606_v50, %v11029_v40  ;;  %v3055_v35 = vpop.f32.mrb[116].mxu1  ;;  %v2608_v56 = vpop.f32.mrb[117].mxu0  ;;  %8205 = vmatmul.mubr.msk.f32.gmra.mrb[222].mxu0 %vm203_vm0, %v8905_v63  ;;  %v5344_v48 = vadd.f32 %v5343_v6, %v5342_v2 }
 0x3d5   :  { %v5998_v34 = vadd.f32 %v5997_v12, %v4910_v33  ;;  %v5961_v4 = vadd.f32 %v5960_v42, %v4909_v29  ;;  %v3056_v19 = vadd.f32 %v3055_v35, %v11037_v36  ;;  %v2609_v30 = vadd.f32 %v2608_v56, %v11033_v11  ;;  %v3057_v57 = vpop.f32.mrb[117].mxu1  ;;  %8269 = vmatmul.mubr.msk.f32.gmra.mrb[222].mxu1 %vm203_vm0, %v8905_v63  ;;  %v8907_v35 = vld [vmem:[%s12295_s0 + $0x188] sm:$0xff] }
 0x3d6   :  { %v6035_v38 = vadd.f32 %v6034_v49, %v4911_v18  ;;  %v4924_v26 = vmax.f32 %v2607_v59, 0.0  ;;  %v3058_v54 = vadd.f32 %v3057_v57, %v11054_v51  ;;  %3442 = vmatprep.mubr.f32.mxu0 %v8998_v0  ;;  %3891 = vmatprep.mubr.f32.mxu1 %v8998_v0  ;;  %v5380_v16 = vrot.slane %v5379_v55, 1 }
 0x3d7   :  { %v4926_v20 = vmax.f32 %v3056_v19, 0.0  ;;  %v4925_v14 = vmax.f32 %v2609_v30, 0.0  ;;  %v2612_v27 = vpop.f32.mrb[118].mxu0  ;;  %v5454_v60 = vrot.slane %v5453_v31, 1  ;;  %v5418_v29 = vadd.f32 %v5417_v45, %v5416_v3 }
 0x3d8   :  { %v5925_v15 = vadd.f32 %v5924_v23, %v4924_v26  ;;  %v4927_v9 = vmax.f32 %v3058_v54, 0.0  ;;  %v2613_v43 = vadd.f32 %v2612_v27, %v11029_v40  ;;  %v3061_v7 = vpop.f32.mrb[118].mxu1  ;;  %v2614_v39 = vpop.f32.mrb[119].mxu0  ;;  %8206 = vmatmul.mubr.msk.f32.gmra.mrb[224].mxu0 %vm203_vm0, %v8906_v22  ;;  %v6205_v3 = vmul.f32 0.00390625, %v5344_v48 }
 0x3d9   :  { %v5999_v44 = vadd.f32 %v5998_v34, %v4926_v20  ;;  %v5962_v12 = vadd.f32 %v5961_v4, %v4925_v14  ;;  %v3062_v47 = vadd.f32 %v3061_v7, %v11037_v36  ;;  %v2615_v46 = vadd.f32 %v2614_v39, %v11033_v11  ;;  %v3063_v42 = vpop.f32.mrb[119].mxu1  ;;  %8270 = vmatmul.mubr.msk.f32.gmra.mrb[224].mxu1 %vm203_vm0, %v8906_v22  ;;  %v8908_v39 = vld [vmem:[%s12295_s0 + $0x190] sm:$0xff] }
 0x3da   :  { %v6036_v53 = vadd.f32 %v6035_v38, %v4927_v9  ;;  %v4940_v41 = vmax.f32 %v2613_v43, 0.0  ;;  %v3064_v49 = vadd.f32 %v3063_v42, %v11054_v51  ;;  %3448 = vmatprep.mubr.f32.mxu0 %v8998_v0  ;;  %3897 = vmatprep.mubr.f32.mxu1 %v8998_v0  ;;  %v5381_v38 = vadd.f32 %v5380_v16, %v5379_v55 }
 0x3db   :  { %v4942_v5 = vmax.f32 %v3062_v47, 0.0  ;;  %v4941_v61 = vmax.f32 %v2615_v46, 0.0  ;;  %v2618_v33 = vpop.f32.mrb[120].mxu0  ;;  %v5455_v26 = vadd.f32 %v5454_v60, %v5453_v31  ;;  %v11787_v27 = vmul.f32 0.00390625, %v5418_v29 }
 0x3dc   :  { %v5926_v50 = vadd.f32 %v5925_v15, %v4940_v41  ;;  %v4943_v23 = vmax.f32 %v3064_v49, 0.0  ;;  %v2619_v18 = vadd.f32 %v2618_v33, %v11029_v40  ;;  %v3067_v59 = vpop.f32.mrb[120].mxu1  ;;  %v2620_v2 = vpop.f32.mrb[121].mxu0  ;;  %8207 = vmatmul.mubr.msk.f32.gmra.mrb[226].mxu0 %vm203_vm0, %v8907_v35  ;;  %v6237_v47 = vpack.c.bf16 %v6205_v3, %v6205_v3 }
 0x3dd   :  { %v6000_v56 = vadd.f32 %v5999_v44, %v4942_v5  ;;  %v5963_v63 = vadd.f32 %v5962_v12, %v4941_v61  ;;  %v3068_v34 = vadd.f32 %v3067_v59, %v11037_v36  ;;  %v2621_v4 = vadd.f32 %v2620_v2, %v11033_v11  ;;  %v3069_v19 = vpop.f32.mrb[121].mxu1  ;;  %8271 = vmatmul.mubr.msk.f32.gmra.mrb[226].mxu1 %vm203_vm0, %v8907_v35 }
 0x3de   :  { %v6037_v30 = vadd.f32 %v6036_v53, %v4943_v23  ;;  %v4956_v57 = vmax.f32 %v2619_v18, 0.0  ;;  %v3070_v6 = vadd.f32 %v3069_v19, %v11054_v51  ;;  %3454 = vmatprep.mubr.f32.mxu0 %v8998_v0  ;;  %3903 = vmatprep.mubr.f32.mxu1 %v8998_v0  ;;  %v11800_v53 = vmul.f32 0.00390625, %v5381_v38  ;;  %v8909_v18 = vld [vmem:[%s12295_s0 + $0x198] sm:$0xff]  ;;  %v8910_v38 = vld [vmem:[%s12297_s2 + $0x8] sm:$0xff] }
 0x3df   :  { %v4958_v54 = vmax.f32 %v3068_v34, 0.0  ;;  %v4957_v20 = vmax.f32 %v2621_v4, 0.0  ;;  %v2624_v14 = vpop.f32.mrb[122].mxu0  ;;  %v11802_v41 = vmul.f32 0.00390625, %v5455_v26  ;;  %v6239_v5 = vpack.c.bf16 %v11787_v27, %v11787_v27 }
 0x3e0   :  { %v5927_v45 = vadd.f32 %v5926_v50, %v4956_v57  ;;  %v4959_v15 = vmax.f32 %v3070_v6, 0.0  ;;  %v2625_v9 = vadd.f32 %v2624_v14, %v11029_v40  ;;  %v3073_v43 = vpop.f32.mrb[122].mxu1  ;;  %v2626_v7 = vpop.f32.mrb[123].mxu0  ;;  %8208 = vmatmul.mubr.msk.f32.gmra.mrb[228].mxu0 %vm203_vm0, %v8908_v39  ;;  %v11814_v34 = vunpack.c.l.b16 %v6237_v47 }
 0x3e1   :  { %v6001_v22 = vadd.f32 %v6000_v56, %v4958_v54  ;;  %v5964_v55 = vadd.f32 %v5963_v63, %v4957_v20  ;;  %v3074_v31 = vadd.f32 %v3073_v43, %v11037_v36  ;;  %v2627_v44 = vadd.f32 %v2626_v7, %v11033_v11  ;;  %v3075_v12 = vpop.f32.mrb[123].mxu1  ;;  %8272 = vmatmul.mubr.msk.f32.gmra.mrb[228].mxu1 %vm203_vm0, %v8908_v39 }
 0x3e2   :  { %v6038_v46 = vadd.f32 %v6037_v30, %v4959_v15  ;;  %v4972_v42 = vmax.f32 %v2625_v9, 0.0  ;;  %v3076_v48 = vadd.f32 %v3075_v12, %v11054_v51  ;;  %3460 = vmatprep.mubr.f32.mxu0 %v8998_v0  ;;  %3909 = vmatprep.mubr.f32.mxu1 %v8998_v0  ;;  %v11824_v26 = vrot.slane %v8910_v38, %v141_v8  ;;  %v8911_v9 = vld [vmem:[%s12295_s0 + $0x1a0] sm:$0xff] }
 0x3e3   :  { %v4974_v49 = vmax.f32 %v3074_v31, 0.0  ;;  %v4973_v16 = vmax.f32 %v2627_v44, 0.0  ;;  %v2630_v60 = vpop.f32.mrb[124].mxu0  ;;  %v11828_v54 = vrot.slane %v8910_v38, %v145_v58  ;;  %v11837_v8 = vrot.slane %v8910_v38, %v149_v13 }
 0x3e4   :  { %v5928_v61 = vadd.f32 %v5927_v45, %v4972_v42  ;;  %v4975_v33 = vmax.f32 %v3076_v48, 0.0  ;;  %v2631_v29 = vadd.f32 %v2630_v60, %v11029_v40  ;;  %v3079_v50 = vpop.f32.mrb[124].mxu1  ;;  %v2632_v23 = vpop.f32.mrb[125].mxu0  ;;  %8209 = vmatmul.mubr.msk.f32.gmra.mrb[230].mxu0 %vm203_vm0, %v8909_v18  ;;  %v11847_v13 = vrot.slane %v8910_v38, %v153_v25  ;;  %v8913_v38 = vld [vmem:[%s12295_s0 + $0x1b0] sm:$0xff] }
 0x3e5   :  { %v6002_v59 = vadd.f32 %v6001_v22, %v4974_v49  ;;  %v5965_v2 = vadd.f32 %v5964_v55, %v4973_v16  ;;  %v3080_v35 = vadd.f32 %v3079_v50, %v11037_v36  ;;  %v2633_v56 = vadd.f32 %v2632_v23, %v11033_v11  ;;  %v3081_v63 = vpop.f32.mrb[125].mxu1  ;;  %8273 = vmatmul.mubr.msk.f32.gmra.mrb[230].mxu1 %vm203_vm0, %v8909_v18  ;;  %v8912_v49 = vld [vmem:[%s12295_s0 + $0x1a8] sm:$0xff] }
 0x3e6   :  { %v6039_v4 = vadd.f32 %v6038_v46, %v4975_v33  ;;  %v4988_v19 = vmax.f32 %v2631_v29, 0.0  ;;  %v3082_v3 = vadd.f32 %v3081_v63, %v11054_v51  ;;  %3466 = vmatprep.mubr.f32.mxu0 %v8998_v0  ;;  %3915 = vmatprep.mubr.f32.mxu1 %v8998_v0  ;;  %v11849_v44 = vunpack.c.l.b16 %v6239_v5 }
 0x3e7   :  { %v4990_v30 = vmax.f32 %v3080_v35, 0.0  ;;  %v4989_v57 = vmax.f32 %v2633_v56, 0.0  ;;  %v2636_v6 = vpop.f32.mrb[126].mxu0  ;;  %v6238_v47 = vpack.c.bf16 %v11800_v53, %v11800_v53  ;;  %v6240_v25 = vpack.c.bf16 %v11802_v41, %v11802_v41 }
 0x3e8   :  { %v5929_v20 = vadd.f32 %v5928_v61, %v4988_v19  ;;  %v4991_v14 = vmax.f32 %v3082_v3, 0.0  ;;  %v2637_v27 = vadd.f32 %v2636_v6, %v11029_v40  ;;  %v3085_v45 = vpop.f32.mrb[126].mxu1  ;;  %v2638_v15 = vpop.f32.mrb[127].mxu0  ;;  %8210 = vmatmul.mubr.msk.f32.gmra.mrb[232].mxu0 %vm203_vm0, %v8911_v9 }
 0x3e9   :  { %v6003_v43 = vadd.f32 %v6002_v59, %v4990_v30  ;;  %v5966_v7 = vadd.f32 %v5965_v2, %v4989_v57  ;;  %v3086_v58 = vadd.f32 %v3085_v45, %v11037_v36  ;;  %v2639_v39 = vadd.f32 %v2638_v15, %v11033_v11  ;;  %v3087_v22 = vpop.f32.mrb[127].mxu1  ;;  %8274 = vmatmul.mubr.msk.f32.gmra.mrb[232].mxu1 %vm203_vm0, %v8911_v9 }
 0x3ea   :  { %v6040_v40 = vadd.f32 %v6039_v4, %v4991_v14  ;;  %v5004_v55 = vmax.f32 %v2637_v27, 0.0  ;;  %v3088_v31 = vadd.f32 %v3087_v22, %v11054_v51  ;;  %3472 = vmatprep.mubr.f32.mxu0 %v8998_v0  ;;  %3921 = vmatprep.mubr.f32.mxu1 %v8998_v0 }
 0x3eb   :  { %v5006_v36 = vmax.f32 %v3086_v58, 0.0  ;;  %v5005_v12 = vmax.f32 %v2639_v39, 0.0  ;;  %v3156_v11 = vpop.f32.mrb[128].mxu0 }
 0x3ec   :  { %v5930_v46 = vadd.f32 %v5929_v20, %v5004_v55  ;;  %v5007_v42 = vmax.f32 %v3088_v31, 0.0  ;;  %v3157_v51 = vadd.f32 %v3156_v11, %v11824_v26  ;;  %v3158_v48 = vpop.f32.mrb[129].mxu0  ;;  %8211 = vmatmul.mubr.msk.f32.gmra.mrb[234].mxu0 %vm203_vm0, %v8912_v49  ;;  %v3605_v1 = vpop.f32.mrb[128].mxu1 }
 0x3ed   :  { %v6004_v16 = vadd.f32 %v6003_v43, %v5006_v36  ;;  %v5967_v60 = vadd.f32 %v5966_v7, %v5005_v12  ;;  %v3159_v5 = vadd.f32 %v3158_v48, %v11828_v54  ;;  %8275 = vmatmul.mubr.msk.f32.gmra.mrb[234].mxu1 %vm203_vm0, %v8912_v49  ;;  %v3606_v61 = vadd.f32 %v3605_v1, %v11837_v8  ;;  %v3607_v33 = vpop.f32.mrb[129].mxu1  ;;  %v8914_v48 = vld [vmem:[%s12295_s0 + $0x1b8] sm:$0xff] }
 0x3ee   :  { %v5931_v29 = vrot.slane %v5930_v46, 4  ;;  %v6041_v50 = vadd.f32 %v6040_v40, %v5007_v42  ;;  %v4000_v23 = vmax.f32 %v3157_v51, 0.0  ;;  %v3608_v18 = vadd.f32 %v3607_v33, %v11847_v13  ;;  %3478 = vmatprep.mubr.f32.mxu0 %v8998_v0  ;;  %3927 = vmatprep.mubr.f32.mxu1 %v8998_v0 }
 0x3ef   :  { %v6005_v59 = vrot.slane %v6004_v16, 4  ;;  %v5968_v2 = vrot.slane %v5967_v60, 4  ;;  %v4001_v35 = vmax.f32 %v3159_v5, 0.0  ;;  %v4002_v56 = vmax.f32 %v3606_v61, 0.0  ;;  %v3162_v63 = vpop.f32.mrb[130].mxu0 }
 0x3f0   :  { %v5932_v4 = vadd.f32 %v5931_v29, %v5930_v46  ;;  %v6042_v19 = vrot.slane %v6041_v50, 4  ;;  %v4003_v3 = vmax.f32 %v3608_v18, 0.0  ;;  %v3163_v30 = vadd.f32 %v3162_v63, %v11824_v26  ;;  %v3611_v57 = vpop.f32.mrb[130].mxu1  ;;  %v3164_v6 = vpop.f32.mrb[131].mxu0  ;;  %8212 = vmatmul.mubr.msk.f32.gmra.mrb[236].mxu0 %vm203_vm0, %v8913_v38 }
 0x3f1   :  { %v6006_v20 = vadd.f32 %v6005_v59, %v6004_v16  ;;  %v5969_v14 = vadd.f32 %v5968_v2, %v5967_v60  ;;  %v3612_v27 = vadd.f32 %v3611_v57, %v11837_v8  ;;  %v3165_v45 = vadd.f32 %v3164_v6, %v11828_v54  ;;  %v3613_v15 = vpop.f32.mrb[131].mxu1  ;;  %8276 = vmatmul.mubr.msk.f32.gmra.mrb[236].mxu1 %vm203_vm0, %v8913_v38  ;;  %v8915_v57 = vld [vmem:[%s12295_s0 + $0x1c0] sm:$0xff] }
 0x3f2   :  { %v5933_v9 = vrot.slane %v5932_v4, 2  ;;  %v6043_v43 = vadd.f32 %v6042_v19, %v6041_v50  ;;  %v4016_v7 = vmax.f32 %v3163_v30, 0.0  ;;  %v3614_v58 = vadd.f32 %v3613_v15, %v11847_v13  ;;  %3484 = vmatprep.mubr.f32.mxu0 %v8998_v0  ;;  %3933 = vmatprep.mubr.f32.mxu1 %v8998_v0 }
 0x3f3   :  { %v6007_v39 = vrot.slane %v6006_v20, 2  ;;  %v5970_v22 = vrot.slane %v5969_v14, 2  ;;  %v4018_v40 = vmax.f32 %v3612_v27, 0.0  ;;  %v4017_v55 = vmax.f32 %v3165_v45, 0.0  ;;  %v3168_v31 = vpop.f32.mrb[132].mxu0 }
 0x3f4   :  { %v5934_v36 = vadd.f32 %v5933_v9, %v5932_v4  ;;  %v6044_v12 = vrot.slane %v6043_v43, 2  ;;  %v5456_v11 = vadd.f32 %v4016_v7, %v4000_v23  ;;  %v4019_v46 = vmax.f32 %v3614_v58, 0.0  ;;  %v3617_v42 = vpop.f32.mrb[132].mxu1  ;;  %v3170_v51 = vpop.f32.mrb[133].mxu0  ;;  %8213 = vmatmul.mubr.msk.f32.gmra.mrb[238].mxu0 %vm203_vm0, %v8914_v48 }
 0x3f5   :  { %v6008_v49 = vadd.f32 %v6007_v39, %v6006_v20  ;;  %v5971_v1 = vadd.f32 %v5970_v22, %v5969_v14  ;;  %v5530_v16 = vadd.f32 %v4018_v40, %v4002_v56  ;;  %v5493_v60 = vadd.f32 %v4017_v55, %v4001_v35  ;;  %v3619_v5 = vpop.f32.mrb[133].mxu1  ;;  %8277 = vmatmul.mubr.msk.f32.gmra.mrb[238].mxu1 %vm203_vm0, %v8914_v48 }
 0x3f6   :  { %v5935_v61 = vrot.slane %v5934_v36, 1  ;;  %v6045_v33 = vadd.f32 %v6044_v12, %v6043_v43  ;;  %v5567_v29 = vadd.f32 %v4019_v46, %v4003_v3  ;;  %v3169_v50 = vadd.f32 %v3168_v31, %v11824_v26  ;;  %3490 = vmatprep.mubr.f32.mxu0 %v8998_v0  ;;  %3939 = vmatprep.mubr.f32.mxu1 %v8998_v0 }
 0x3f7   :  { %v6009_v23 = vrot.slane %v6008_v49, 1  ;;  %v5972_v18 = vrot.slane %v5971_v1, 1  ;;  %v3618_v59 = vadd.f32 %v3617_v42, %v11837_v8  ;;  %v3171_v2 = vadd.f32 %v3170_v51, %v11828_v54  ;;  %v3174_v56 = vpop.f32.mrb[134].mxu0 }
 0x3f8   :  { %v5936_v35 = vadd.f32 %v5935_v61, %v5934_v36  ;;  %v6046_v63 = vrot.slane %v6045_v33, 1  ;;  %v4032_v4 = vmax.f32 %v3169_v50, 0.0  ;;  %v3620_v19 = vadd.f32 %v3619_v5, %v11847_v13  ;;  %v3623_v30 = vpop.f32.mrb[134].mxu1  ;;  %v3176_v3 = vpop.f32.mrb[135].mxu0  ;;  %8214 = vmatmul.mubr.msk.f32.gmra.mrb[240].mxu0 %vm203_vm0, %v8915_v57 }
 0x3f9   :  { %v6010_v6 = vadd.f32 %v6009_v23, %v6008_v49  ;;  %v4034_v38 = vmax.f32 %v3618_v59, 0.0  ;;  %v4033_v20 = vmax.f32 %v3171_v2, 0.0  ;;  %v3625_v14 = vpop.f32.mrb[135].mxu1  ;;  %8278 = vmatmul.mubr.msk.f32.gmra.mrb[240].mxu1 %vm203_vm0, %v8915_v57  ;;  %3496 = vmatprep.mubr.f32.mxu0 %v8998_v0  ;;  %v11897_v27 = vunpack.c.l.b16 %v6238_v47 }
 0x3fa   :  { %v6221_v45 = vmul.f32 0.00390625, %v5936_v35  ;;  %v5457_v15 = vadd.f32 %v5456_v11, %v4032_v4  ;;  %v4035_v9 = vmax.f32 %v3620_v19, 0.0  ;;  %3945 = vmatprep.mubr.f32.mxu1 %v8998_v0  ;;  %v11903_v43 = vunpack.c.l.b16 %v6240_v25  ;;  %v8916_v11 = vld [vmem:[%s12295_s0 + $0x1c8] sm:$0xff]  ;;  %v8917_v35 = vld [vmem:[%s12295_s0 + $0x1d0] sm:$0xff] }
 0x3fb   :  { %v6223_v7 = vmul.f32 0.00390625, %v6010_v6  ;;  %v5973_v58 = vadd.f32 %v5972_v18, %v5971_v1  ;;  %v5531_v39 = vadd.f32 %v5530_v16, %v4034_v38  ;;  %v5494_v22 = vadd.f32 %v5493_v60, %v4033_v20  ;;  %v3180_v40 = vpop.f32.mrb[136].mxu0 }
 0x3fc   :  { %v6253_v55 = vpack.c.bf16 %v6221_v45, %v6221_v45  ;;  %v6047_v31 = vadd.f32 %v6046_v63, %v6045_v33  ;;  %v5568_v53 = vadd.f32 %v5567_v29, %v4035_v9  ;;  %v3175_v47 = vadd.f32 %v3174_v56, %v11824_v26  ;;  %v3629_v36 = vpop.f32.mrb[136].mxu1  ;;  %v3182_v12 = vpop.f32.mrb[137].mxu0  ;;  %8215 = vmatmul.mubr.msk.f32.gmra.mrb[242].mxu0 %vm203_vm0, %v8916_v11 }
 0x3fd   :  { %v6255_v41 = vpack.c.bf16 %v6223_v7, %v6223_v7  ;;  %v3624_v25 = vadd.f32 %v3623_v30, %v11837_v8  ;;  %v3177_v46 = vadd.f32 %v3176_v3, %v11828_v54  ;;  %v3626_v42 = vadd.f32 %v3625_v14, %v11847_v13  ;;  %v3631_v51 = vpop.f32.mrb[137].mxu1  ;;  %8279 = vmatmul.mubr.msk.f32.gmra.mrb[242].mxu1 %vm203_vm0, %v8916_v11 }
 0x3fe   :  { %v6580_v48 = vunpack.c.l.b16 %v6253_v55  ;;  %v4048_v49 = vmax.f32 %v3175_v47, 0.0  ;;  %v3181_v1 = vadd.f32 %v3180_v40, %v11824_v26  ;;  %v3630_v16 = vadd.f32 %v3629_v36, %v11837_v8  ;;  %3502 = vmatprep.mubr.f32.mxu0 %v8998_v0  ;;  %3951 = vmatprep.mubr.f32.mxu1 %v8998_v0  ;;  %v8918_v55 = vld [vmem:[%s12295_s0 + $0x1d8] sm:$0xff] }
 0x3ff   :  { %v6582_v60 = vunpack.c.l.b16 %v6255_v41  ;;  %v4050_v5 = vmax.f32 %v3624_v25, 0.0  ;;  %v4049_v61 = vmax.f32 %v3177_v46, 0.0  ;;  %v4051_v33 = vmax.f32 %v3626_v42, 0.0  ;;  %v3186_v29 = vpop.f32.mrb[138].mxu0 }
 0x400   :  { %v11920_v50 = vsel %vm6588_vm1, %v6580_v48, %v11814_v34  ;;  %v5458_v23 = vadd.f32 %v5457_v15, %v4048_v49  ;;  %v4064_v18 = vmax.f32 %v3181_v1, 0.0  ;;  %v4066_v59 = vmax.f32 %v3630_v16, 0.0  ;;  %v3635_v2 = vpop.f32.mrb[138].mxu1  ;;  %v3188_v56 = vpop.f32.mrb[139].mxu0  ;;  %8216 = vmatmul.mubr.msk.f32.gmra.mrb[244].mxu0 %vm203_vm0, %v8917_v35 }
 0x401   :  { %v11928_v63 = vsel %vm6588_vm1, %v6582_v60, %v11849_v44  ;;  %v11930_v4 = vmul.f32 0.00390625, %v5973_v58  ;;  %v5532_v19 = vadd.f32 %v5531_v39, %v4050_v5  ;;  %v5495_v34 = vadd.f32 %v5494_v22, %v4049_v61  ;;  %v3637_v30 = vpop.f32.mrb[139].mxu1  ;;  %8280 = vmatmul.mubr.msk.f32.gmra.mrb[244].mxu1 %vm203_vm0, %v8917_v35  ;;  %3508 = vmatprep.mubr.f32.mxu0 %v8998_v0 }
 0x402   :  { %v11933_v3 = vmul.f32 0.00390625, %v6047_v31  ;;  %v5569_v57 = vadd.f32 %v5568_v53, %v4051_v33  ;;  %v5459_v6 = vadd.f32 %v5458_v23, %v4064_v18  ;;  %v3183_v38 = vadd.f32 %v3182_v12, %v11828_v54  ;;  %3957 = vmatprep.mubr.f32.mxu1 %v8998_v0  ;;  %v8919_v23 = vld [vmem:[%s12295_s0 + $0x1e0] sm:$0xff] }
 0x403   :  { %v5533_v20 = vadd.f32 %v5532_v19, %v4066_v59  ;;  %v3632_v14 = vadd.f32 %v3631_v51, %v11847_v13  ;;  %v3187_v44 = vadd.f32 %v3186_v29, %v11824_v26  ;;  %v3636_v45 = vadd.f32 %v3635_v2, %v11837_v8  ;;  %v3192_v15 = vpop.f32.mrb[140].mxu0 }
 0x404   :  { %v4065_v9 = vmax.f32 %v3183_v38, 0.0  ;;  %v3189_v7 = vadd.f32 %v3188_v56, %v11828_v54  ;;  %v3638_v58 = vadd.f32 %v3637_v30, %v11847_v13  ;;  %v3193_v39 = vadd.f32 %v3192_v15, %v11824_v26  ;;  %v3641_v22 = vpop.f32.mrb[140].mxu1  ;;  %v3194_v40 = vpop.f32.mrb[141].mxu0  ;;  %8217 = vmatmul.mubr.msk.f32.gmra.mrb[246].mxu0 %vm203_vm0, %v8918_v55 }
 0x405   :  { %v4067_v31 = vmax.f32 %v3632_v14, 0.0  ;;  %v4080_v53 = vmax.f32 %v3187_v44, 0.0  ;;  %v4082_v47 = vmax.f32 %v3636_v45, 0.0  ;;  %v3642_v36 = vadd.f32 %v3641_v22, %v11837_v8  ;;  %v3643_v12 = vpop.f32.mrb[141].mxu1  ;;  %8281 = vmatmul.mubr.msk.f32.gmra.mrb[246].mxu1 %vm203_vm0, %v8918_v55  ;;  %3514 = vmatprep.mubr.f32.mxu0 %v8998_v0  ;;  %v8920_v22 = vld [vmem:[%s12295_s0 + $0x1e8] sm:$0xff] }
 0x406   :  { %v5496_v11 = vadd.f32 %v5495_v34, %v4065_v9  ;;  %v4081_v41 = vmax.f32 %v3189_v7, 0.0  ;;  %v4083_v25 = vmax.f32 %v3638_v58, 0.0  ;;  %v4096_v46 = vmax.f32 %v3193_v39, 0.0  ;;  %3963 = vmatprep.mubr.f32.mxu1 %v8998_v0 }
 0x407   :  { %v5570_v42 = vadd.f32 %v5569_v57, %v4067_v31  ;;  %v5460_v51 = vadd.f32 %v5459_v6, %v4080_v53  ;;  %v5534_v48 = vadd.f32 %v5533_v20, %v4082_v47  ;;  %v4098_v49 = vmax.f32 %v3642_v36, 0.0  ;;  %v3198_v1 = vpop.f32.mrb[142].mxu0 }
 0x408   :  { %v5497_v16 = vadd.f32 %v5496_v11, %v4081_v41  ;;  %v3195_v60 = vadd.f32 %v3194_v40, %v11828_v54  ;;  %v3644_v5 = vadd.f32 %v3643_v12, %v11847_v13  ;;  %v3199_v61 = vadd.f32 %v3198_v1, %v11824_v26  ;;  %v3647_v33 = vpop.f32.mrb[142].mxu1  ;;  %v3200_v29 = vpop.f32.mrb[143].mxu0  ;;  %8218 = vmatmul.mubr.msk.f32.gmra.mrb[248].mxu0 %vm203_vm0, %v8919_v23 }
 0x409   :  { %v5571_v18 = vadd.f32 %v5570_v42, %v4083_v25  ;;  %v5461_v59 = vadd.f32 %v5460_v51, %v4096_v46  ;;  %v5535_v2 = vadd.f32 %v5534_v48, %v4098_v49  ;;  %v3648_v56 = vadd.f32 %v3647_v33, %v11837_v8  ;;  %v3649_v35 = vpop.f32.mrb[143].mxu1  ;;  %8282 = vmatmul.mubr.msk.f32.gmra.mrb[248].mxu1 %vm203_vm0, %v8919_v23 }
 0x40a   :  { %v4097_v19 = vmax.f32 %v3195_v60, 0.0  ;;  %v4099_v34 = vmax.f32 %v3644_v5, 0.0  ;;  %v4112_v30 = vmax.f32 %v3199_v61, 0.0  ;;  %v3201_v57 = vadd.f32 %v3200_v29, %v11828_v54  ;;  %3520 = vmatprep.mubr.f32.mxu0 %v8998_v0  ;;  %3969 = vmatprep.mubr.f32.mxu1 %v8998_v0  ;;  %v8921_v60 = vld [vmem:[%s12295_s0 + $0x1f0] sm:$0xff] }
 0x40b   :  { %v4114_v6 = vmax.f32 %v3648_v56, 0.0  ;;  %v3650_v38 = vadd.f32 %v3649_v35, %v11847_v13  ;;  %v3204_v20 = vpop.f32.mrb[144].mxu0  ;;  %v6254_v14 = vpack.c.bf16 %v11930_v4, %v11930_v4  ;;  %v6256_v44 = vpack.c.bf16 %v11933_v3, %v11933_v3 }
 0x40c   :  { %v5498_v45 = vadd.f32 %v5497_v16, %v4097_v19  ;;  %v5572_v15 = vadd.f32 %v5571_v18, %v4099_v34  ;;  %v5462_v9 = vadd.f32 %v5461_v59, %v4112_v30  ;;  %v4113_v7 = vmax.f32 %v3201_v57, 0.0  ;;  %v3653_v58 = vpop.f32.mrb[144].mxu1  ;;  %v3206_v39 = vpop.f32.mrb[145].mxu0  ;;  %8219 = vmatmul.mubr.msk.f32.gmra.mrb[250].mxu0 %vm203_vm0, %v8920_v22 }
 0x40d   :  { %v5536_v40 = vadd.f32 %v5535_v2, %v4114_v6  ;;  %v4115_v55 = vmax.f32 %v3650_v38, 0.0  ;;  %v3205_v31 = vadd.f32 %v3204_v20, %v11824_v26  ;;  %v3654_v4 = vadd.f32 %v3653_v58, %v11837_v8  ;;  %v3655_v53 = vpop.f32.mrb[145].mxu1  ;;  %8283 = vmatmul.mubr.msk.f32.gmra.mrb[250].mxu1 %vm203_vm0, %v8920_v22  ;;  %3526 = vmatprep.mubr.f32.mxu0 %v8998_v0 }
 0x40e   :  { %v5499_v3 = vadd.f32 %v5498_v45, %v4113_v7  ;;  %v3207_v47 = vadd.f32 %v3206_v39, %v11828_v54  ;;  %v3656_v36 = vadd.f32 %v3655_v53, %v11847_v13  ;;  %3975 = vmatprep.mubr.f32.mxu1 %v8998_v0  ;;  %v6581_v12 = vunpack.c.l.b16 %v6254_v14 }
 0x40f   :  { %v5573_v11 = vadd.f32 %v5572_v15, %v4115_v55  ;;  %v4128_v41 = vmax.f32 %v3205_v31, 0.0  ;;  %v4130_v25 = vmax.f32 %v3654_v4, 0.0  ;;  %v3210_v46 = vpop.f32.mrb[146].mxu0  ;;  %v6583_v42 = vunpack.c.l.b16 %v6256_v44  ;;  %v8631_v55 = vld [vmem:[#allocation2 + $0x100] sm:$0xff]  }
 0x410   :  { %v4129_v51 = vmax.f32 %v3207_v47, 0.0  ;;  %v4131_v48 = vmax.f32 %v3656_v36, 0.0  ;;  %v3211_v49 = vadd.f32 %v3210_v46, %v11824_v26  ;;  %v3659_v1 = vpop.f32.mrb[146].mxu1  ;;  %v3212_v16 = vpop.f32.mrb[147].mxu0  ;;  %8220 = vmatmul.mubr.msk.f32.gmra.mrb[252].mxu0 %vm203_vm0, %v8921_v60  ;;  %v11987_v5 = vsel %vm6588_vm1, %v6581_v12, %v11897_v27  ;;  %v8633_v46 = vld [vmem:[#allocation2 + $0x148] sm:$0xff]  }
 0x411   :  { %v5463_v61 = vadd.f32 %v5462_v9, %v4128_v41  ;;  %v5537_v33 = vadd.f32 %v5536_v40, %v4130_v25  ;;  %v3660_v29 = vadd.f32 %v3659_v1, %v11837_v8  ;;  %v3213_v23 = vadd.f32 %v3212_v16, %v11828_v54  ;;  %v3661_v18 = vpop.f32.mrb[147].mxu1  ;;  %8284 = vmatmul.mubr.msk.f32.gmra.mrb[252].mxu1 %vm203_vm0, %v8921_v60 }
 0x412   :  { %v5500_v59 = vadd.f32 %v5499_v3, %v4129_v51  ;;  %v5574_v2 = vadd.f32 %v5573_v11, %v4131_v48  ;;  %v4144_v56 = vmax.f32 %v3211_v49, 0.0  ;;  %v3662_v35 = vadd.f32 %v3661_v18, %v11847_v13  ;;  %3532 = vmatprep.mubr.f32.mxu0 %v8998_v0  ;;  %3981 = vmatprep.mubr.f32.mxu1 %v8998_v0  ;;  %v8922_v0 = vld [vmem:[%s12295_s0 + $0x1f8] sm:$0xff]  ;;  %v8637_v18 = vld [vmem:[#allocation2 + $0x150] sm:$0xff]  }
 0x413   :  { %v4146_v27 = vmax.f32 %v3660_v29, 0.0  ;;  %v4145_v19 = vmax.f32 %v3213_v23, 0.0  ;;  %v3216_v34 = vpop.f32.mrb[148].mxu0  ;;  %v6606_v30 = vpack.c.b16 %v10405_v32, %v10405_v32  ;;  %v11999_v57 = vsel %vm6588_vm1, %v6583_v42, %v11903_v43  ;;  %v8634_v42 = vld [vmem:[#allocation2 + $0x1c8] sm:$0xff]  }
 0x414   :  { %v5464_v6 = vadd.f32 %v5463_v61, %v4144_v56  ;;  %v4147_v38 = vmax.f32 %v3662_v35, 0.0  ;;  %v3217_v20 = vadd.f32 %v3216_v34, %v11824_v26  ;;  %v3665_v14 = vpop.f32.mrb[148].mxu1  ;;  %v3218_v44 = vpop.f32.mrb[149].mxu0  ;;  %8221 = vmatmul.mubr.msk.f32.gmra.mrb[254].mxu0 %vm203_vm0, %v8922_v0  ;;  %v6608_v45 = vpack.c.b16 %v10430_v17, %v10430_v17  ;;  %v8632_v17 = vld [vmem:[#allocation2 + $0x180] sm:$0xff]   ;;  %v8635_v61 = vld [vmem:[#allocation2 + $0x108] sm:$0xff]  }
 0x415   :  { %v5538_v32 = vadd.f32 %v5537_v33, %v4146_v27  ;;  %v5501_v15 = vadd.f32 %v5500_v59, %v4145_v19  ;;  %v3666_v43 = vadd.f32 %v3665_v14, %v11837_v8  ;;  %v3219_v9 = vadd.f32 %v3218_v44, %v11828_v54  ;;  %v3667_v7 = vpop.f32.mrb[149].mxu1  ;;  %8285 = vmatmul.mubr.msk.f32.gmra.mrb[254].mxu1 %vm203_vm0, %v8922_v0  ;;  %v8636_v33 = vld [vmem:[#allocation2 + $0x188] sm:$0xff]   ;;  %v8638_v59 = vld [vmem:[#allocation2 + $0x1d0] sm:$0xff]  }
 0x416   :  { %v6605_v58 = vpack.c.b16 %v10328_v37, %v10328_v37  ;;  %v5575_v39 = vadd.f32 %v5574_v2, %v4147_v38  ;;  %v4160_v22 = vmax.f32 %v3217_v20, 0.0  ;;  %v3668_v40 = vadd.f32 %v3667_v7, %v11847_v13  ;;  %7437 = vmatprep.mubr.bf16.mxu0 %v6606_v30  ;;  %7477 = vmatprep.mubr.bf16.mxu1 %v6608_v45  ;;  %v8639_v45 = vld [vmem:[#allocation2 + $0x110] sm:$0xff]   ;;  %v8641_v7 = vld [vmem:[#allocation2 + $0x158] sm:$0xff]  }
 0x417   :  { %v6607_v31 = vpack.c.b16 %v10337_v24, %v10337_v24  ;;  %v4162_v4 = vmax.f32 %v3666_v43, 0.0  ;;  %v4161_v53 = vmax.f32 %v3219_v9, 0.0  ;;  %v3222_v3 = vpop.f32.mrb[150].mxu0  ;;  %v6610_v47 = vpack.c.b16 %v11199_v10, %v11199_v10 }
 0x418   :  { %v5465_v36 = vadd.f32 %v5464_v6, %v4160_v22  ;;  %v4163_v12 = vmax.f32 %v3668_v40, 0.0  ;;  %v3223_v37 = vadd.f32 %v3222_v3, %v11824_v26  ;;  %v3671_v11 = vpop.f32.mrb[150].mxu1  ;;  %v3224_v41 = vpop.f32.mrb[151].mxu0  ;;  %7438 = vmatmul.mubr.bf16.vlgmr.msra.gmra.mrb[0].mxu0 %v6605_v58  ;;  %v6612_v25 = vpack.c.b16 %v11224_v28, %v11224_v28  ;;  %v8642_v58 = vld [vmem:[#allocation2 + $0x1d8] sm:$0xff]  }
 0x419   :  { %v5539_v51 = vadd.f32 %v5538_v32, %v4162_v4  ;;  %v5502_v24 = vadd.f32 %v5501_v15, %v4161_v53  ;;  %v3672_v48 = vadd.f32 %v3671_v11, %v11837_v8  ;;  %v3225_v49 = vadd.f32 %v3224_v41, %v11828_v54  ;;  %v3673_v1 = vpop.f32.mrb[151].mxu1  ;;  %7478 = vmatmul.mubr.bf16.vlgmr.msra.gmra.mrb[0].mxu1 %v6607_v31  ;;  %v8640_v32 = vld [vmem:[#allocation2 + $0x190] sm:$0xff]   ;;  %v8643_v11 = vld [vmem:[#allocation2 + $0x118] sm:$0xff]  }
 0x41a   :  { %v5576_v10 = vadd.f32 %v5575_v39, %v4163_v12  ;;  %v4176_v16 = vmax.f32 %v3223_v37, 0.0  ;;  %v3674_v60 = vadd.f32 %v3673_v1, %v11847_v13  ;;  %8460 = vmatpush3.bf16.msra.mxu0 %v8631_v55  ;;  %8482 = vmatpush3.bf16.msra.mxu1 %v8632_v17  ;;  %v8644_v41 = vld [vmem:[#allocation2 + $0x198] sm:$0xff]  }
 0x41b   :  { %v4178_v29 = vmax.f32 %v3672_v48, 0.0  ;;  %v4177_v28 = vmax.f32 %v3225_v49, 0.0  ;;  %7517 = vmatprep.mubr.bf16.mxu0 %v6610_v47  ;;  %7557 = vmatprep.mubr.bf16.mxu1 %v6612_v25  ;;  %v3228_v23 = vpop.f32.mrb[152].mxu0 }
 0x41c   :  { %v5466_v2 = vadd.f32 %v5465_v36, %v4176_v16  ;;  %v4179_v56 = vmax.f32 %v3674_v60, 0.0  ;;  %v3229_v35 = vadd.f32 %v3228_v23, %v11824_v26  ;;  %v3677_v27 = vpop.f32.mrb[152].mxu1  ;;  %8461 = vmatprep.subr.bf16.mxu0 %v8633_v46  ;;  %8483 = vmatprep.subr.bf16.mxu1 %v8634_v42  ;;  %v3230_v19 = vpop.f32.mrb[153].mxu0 }
 0x41d   :  { %v5540_v34 = vadd.f32 %v5539_v51, %v4178_v29  ;;  %v5503_v30 = vadd.f32 %v5502_v24, %v4177_v28  ;;  %v3678_v6 = vadd.f32 %v3677_v27, %v11837_v8  ;;  %v3231_v38 = vadd.f32 %v3230_v19, %v11828_v54  ;;  %v3679_v20 = vpop.f32.mrb[153].mxu1  ;;  %v8645_v51 = vld [vmem:[#allocation2 + $0x160] sm:$0xff]  }
 0x41e   :  { %v5577_v14 = vadd.f32 %v5576_v10, %v4179_v56  ;;  %v4192_v44 = vmax.f32 %v3229_v35, 0.0  ;;  %v3680_v0 = vadd.f32 %v3679_v20, %v11847_v13  ;;  %8462 = vmatpush3.bf16.msra.mxu0 %v8635_v61  ;;  %8484 = vmatpush3.bf16.msra.mxu1 %v8636_v33  ;;  %v8646_v24 = vld [vmem:[#allocation2 + $0x1e0] sm:$0xff]  }
 0x41f   :  { %v4194_v15 = vmax.f32 %v3678_v6, 0.0  ;;  %v4193_v43 = vmax.f32 %v3231_v38, 0.0  ;;  %v3234_v9 = vpop.f32.mrb[154].mxu0  ;;  %8463 = vmatprep.subr.bf16.mxu0 %v8637_v18  ;;  %8485 = vmatprep.subr.bf16.mxu1 %v8638_v59  ;;  %v8648_v56 = vld [vmem:[#allocation2 + $0x1a0] sm:$0xff]  }
 0x420   :  { %v5467_v39 = vadd.f32 %v5466_v2, %v4192_v44  ;;  %v4195_v22 = vmax.f32 %v3680_v0, 0.0  ;;  %v3235_v40 = vadd.f32 %v3234_v9, %v11824_v26  ;;  %v3683_v55 = vpop.f32.mrb[154].mxu1  ;;  %v3236_v17 = vpop.f32.mrb[155].mxu0  ;;  %v8647_v2 = vld [vmem:[#allocation2 + $0x120] sm:$0xff]  }
 0x421   :  { %v5541_v31 = vadd.f32 %v5540_v34, %v4194_v15  ;;  %v5504_v4 = vadd.f32 %v5503_v30, %v4193_v43  ;;  %v3684_v53 = vadd.f32 %v3683_v55, %v11837_v8  ;;  %v3237_v3 = vadd.f32 %v3236_v17, %v11828_v54  ;;  %v3685_v47 = vpop.f32.mrb[155].mxu1  ;;  %v8649_v34 = vld [vmem:[#allocation2 + $0x168] sm:$0xff]  }
 0x422   :  { %v5578_v36 = vadd.f32 %v5577_v14, %v4195_v22  ;;  %v4208_v12 = vmax.f32 %v3235_v40, 0.0  ;;  %v3686_v37 = vadd.f32 %v3685_v47, %v11847_v13  ;;  %8464 = vmatpush3.bf16.msra.mxu0 %v8639_v45  ;;  %8486 = vmatpush3.bf16.msra.mxu1 %v8640_v32  ;;  %v8650_v30 = vld [vmem:[#allocation2 + $0x1e8] sm:$0xff]  }
 0x423   :  { %v4210_v25 = vmax.f32 %v3684_v53, 0.0  ;;  %v4209_v46 = vmax.f32 %v3237_v3, 0.0  ;;  %v3240_v42 = vpop.f32.mrb[156].mxu0  ;;  %8465 = vmatprep.subr.bf16.mxu0 %v8641_v7  ;;  %8487 = vmatprep.subr.bf16.mxu1 %v8642_v58  ;;  %v8652_v22 = vld [vmem:[#allocation2 + $0x1a8] sm:$0xff]  }
 0x424   :  { %v5468_v48 = vadd.f32 %v5467_v39, %v4208_v12  ;;  %v4211_v49 = vmax.f32 %v3686_v37, 0.0  ;;  %v3241_v1 = vadd.f32 %v3240_v42, %v11824_v26  ;;  %v3689_v10 = vpop.f32.mrb[156].mxu1  ;;  %v3242_v16 = vpop.f32.mrb[157].mxu0  ;;  %v8651_v39 = vld [vmem:[#allocation2 + $0x128] sm:$0xff]  }
 0x425   :  { %v5542_v60 = vadd.f32 %v5541_v31, %v4210_v25  ;;  %v5505_v61 = vadd.f32 %v5504_v4, %v4209_v46  ;;  %v3690_v33 = vadd.f32 %v3689_v10, %v11837_v8  ;;  %v3243_v29 = vadd.f32 %v3242_v16, %v11828_v54  ;;  %v3691_v28 = vpop.f32.mrb[157].mxu1  ;;  %v8653_v31 = vld [vmem:[#allocation2 + $0x170] sm:$0xff]  }
 0x426   :  { %v5579_v23 = vadd.f32 %v5578_v36, %v4211_v49  ;;  %v4224_v18 = vmax.f32 %v3241_v1, 0.0  ;;  %v3692_v59 = vadd.f32 %v3691_v28, %v11847_v13  ;;  %8466 = vmatpush3.bf16.msra.mxu0 %v8643_v11  ;;  %8488 = vmatpush3.bf16.msra.mxu1 %v8644_v41  ;;  %v8654_v4 = vld [vmem:[#allocation2 + $0x1f0] sm:$0xff]  }
 0x427   :  { %v4226_v35 = vmax.f32 %v3690_v33, 0.0  ;;  %v4225_v27 = vmax.f32 %v3243_v29, 0.0  ;;  %v3246_v19 = vpop.f32.mrb[158].mxu0  ;;  %8467 = vmatprep.subr.bf16.mxu0 %v8645_v51  ;;  %8489 = vmatprep.subr.bf16.mxu1 %v8646_v24  ;;  %v8656_v49 = vld [vmem:[#allocation2 + $0x1b0] sm:$0xff]  }
 0x428   :  { %v5469_v6 = vadd.f32 %v5468_v48, %v4224_v18  ;;  %v4227_v38 = vmax.f32 %v3692_v59, 0.0  ;;  %v3247_v20 = vadd.f32 %v3246_v19, %v11824_v26  ;;  %v3695_v14 = vpop.f32.mrb[158].mxu1  ;;  %v3248_v44 = vpop.f32.mrb[159].mxu0  ;;  %v8655_v48 = vld [vmem:[#allocation2 + $0x130] sm:$0xff]  }
 0x429   :  { %v5543_v0 = vadd.f32 %v5542_v60, %v4226_v35  ;;  %v5506_v45 = vadd.f32 %v5505_v61, %v4225_v27  ;;  %v3696_v32 = vadd.f32 %v3695_v14, %v11837_v8  ;;  %v3249_v15 = vadd.f32 %v3248_v44, %v11828_v54  ;;  %v3697_v43 = vpop.f32.mrb[159].mxu1  ;;  %v8657_v60 = vld [vmem:[#allocation2 + $0x178] sm:$0xff]  }
 0x42a   :  { %v5580_v9 = vadd.f32 %v5579_v23, %v4227_v38  ;;  %v4240_v7 = vmax.f32 %v3247_v20, 0.0  ;;  %v3698_v58 = vadd.f32 %v3697_v43, %v11847_v13  ;;  %8468 = vmatpush3.bf16.msra.mxu0 %v8647_v2  ;;  %8490 = vmatpush3.bf16.msra.mxu1 %v8648_v56  ;;  %v8658_v61 = vld [vmem:[#allocation2 + $0x1f8] sm:$0xff]  }
 0x42b   :  { %v4242_v40 = vmax.f32 %v3696_v32, 0.0  ;;  %v4241_v55 = vmax.f32 %v3249_v15, 0.0  ;;  %v3252_v17 = vpop.f32.mrb[160].mxu0  ;;  %8469 = vmatprep.subr.bf16.mxu0 %v8649_v34  ;;  %8491 = vmatprep.subr.bf16.mxu1 %v8650_v30  ;;  %v8660_v38 = vld [vmem:[#allocation2 + $0x1b8] sm:$0xff]  }
 0x42c   :  { %v5470_v53 = vadd.f32 %v5469_v6, %v4240_v7  ;;  %v4243_v3 = vmax.f32 %v3698_v58, 0.0  ;;  %v3253_v47 = vadd.f32 %v3252_v17, %v11824_v26  ;;  %v3701_v36 = vpop.f32.mrb[160].mxu1  ;;  %v3254_v12 = vpop.f32.mrb[161].mxu0  ;;  %v8659_v6 = vld [vmem:[#allocation2 + $0x138] sm:$0xff]   ;;  %v6609_v17 = vpack.c.b16 %v11127_v52, %v11127_v52 }
 0x42d   :  { %v5544_v37 = vadd.f32 %v5543_v0, %v4242_v40  ;;  %v5507_v11 = vadd.f32 %v5506_v45, %v4241_v55  ;;  %v3702_v41 = vadd.f32 %v3701_v36, %v11837_v8  ;;  %v3255_v25 = vadd.f32 %v3254_v12, %v11828_v54  ;;  %v3703_v46 = vpop.f32.mrb[161].mxu1  ;;  %v8661_v0 = vld [vmem:[#allocation2 + $0x240] sm:$0xff]  }
 0x42e   :  { %v5581_v42 = vadd.f32 %v5580_v9, %v4243_v3  ;;  %v4256_v51 = vmax.f32 %v3253_v47, 0.0  ;;  %v3704_v24 = vadd.f32 %v3703_v46, %v11847_v13  ;;  %8470 = vmatpush3.bf16.msra.mxu0 %v8651_v39  ;;  %8492 = vmatpush3.bf16.msra.mxu1 %v8652_v22  ;;  %v8662_v45 = vld [vmem:[#allocation2 + $0x2c0] sm:$0xff]   ;;  %v6611_v47 = vpack.c.b16 %v11136_v21, %v11136_v21  ;;  %v8666_v21 = vld [vmem:[#allocation2 + $0x2c8] sm:$0xff]  }
 0x42f   :  { %v4258_v1 = vmax.f32 %v3702_v41, 0.0  ;;  %v4257_v10 = vmax.f32 %v3255_v25, 0.0  ;;  %v3258_v16 = vpop.f32.mrb[162].mxu0  ;;  %8471 = vmatprep.subr.bf16.mxu0 %v8653_v31  ;;  %8493 = vmatprep.subr.bf16.mxu1 %v8654_v4  ;;  %v8663_v3 = vld [vmem:[#allocation2 + $0x200] sm:$0xff]  }
 0x430   :  { %v5471_v33 = vadd.f32 %v5470_v53, %v4256_v51  ;;  %v4259_v29 = vmax.f32 %v3704_v24, 0.0  ;;  %v3259_v28 = vadd.f32 %v3258_v16, %v11824_v26  ;;  %v3707_v23 = vpop.f32.mrb[162].mxu1  ;;  %v3260_v18 = vpop.f32.mrb[163].mxu0  ;;  %v8664_v41 = vld [vmem:[#allocation2 + $0x280] sm:$0xff]   ;;  %v6616_v24 = vpack.c.b16 %v11999_v57, %v11999_v57 }
 0x431   :  { %v5545_v59 = vadd.f32 %v5544_v37, %v4258_v1  ;;  %v5508_v2 = vadd.f32 %v5507_v11, %v4257_v10  ;;  %v3708_v56 = vadd.f32 %v3707_v23, %v11837_v8  ;;  %v3261_v35 = vadd.f32 %v3260_v18, %v11828_v54  ;;  %v3709_v27 = vpop.f32.mrb[163].mxu1  ;;  %v8668_v23 = vld [vmem:[#allocation2 + $0x288] sm:$0xff]   ;;  %v8669_v18 = vld [vmem:[#allocation2 + $0x250] sm:$0xff]  }
 0x432   :  { %v5582_v19 = vadd.f32 %v5581_v42, %v4259_v29  ;;  %v4272_v34 = vmax.f32 %v3259_v28, 0.0  ;;  %v3710_v30 = vadd.f32 %v3709_v27, %v11847_v13  ;;  %8472 = vmatpush3.bf16.msra.mxu0 %v8655_v48  ;;  %8494 = vmatpush3.bf16.msra.mxu1 %v8656_v49  ;;  %v6614_v11 = vpack.c.b16 %v11987_v5, %v11987_v5  ;;  %v8665_v48 = vld [vmem:[#allocation2 + $0x248] sm:$0xff]  }
 0x433   :  { %v4274_v20 = vmax.f32 %v3708_v56, 0.0  ;;  %v4273_v14 = vmax.f32 %v3261_v35, 0.0  ;;  %v3264_v44 = vpop.f32.mrb[164].mxu0  ;;  %8473 = vmatprep.subr.bf16.mxu0 %v8657_v60  ;;  %8495 = vmatprep.subr.bf16.mxu1 %v8658_v61  ;;  %v8667_v29 = vld [vmem:[#allocation2 + $0x208] sm:$0xff]  }
 0x434   :  { %v5472_v32 = vadd.f32 %v5471_v33, %v4272_v34  ;;  %v4275_v15 = vmax.f32 %v3710_v30, 0.0  ;;  %v3265_v43 = vadd.f32 %v3264_v44, %v11824_v26  ;;  %v3713_v9 = vpop.f32.mrb[164].mxu1  ;;  %v3266_v7 = vpop.f32.mrb[165].mxu0  ;;  %v8670_v34 = vld [vmem:[#allocation2 + $0x2d0] sm:$0xff]  }
 0x435   :  { %v5546_v58 = vadd.f32 %v5545_v59, %v4274_v20  ;;  %v5509_v39 = vadd.f32 %v5508_v2, %v4273_v14  ;;  %v3714_v22 = vadd.f32 %v3713_v9, %v11837_v8  ;;  %v3267_v40 = vadd.f32 %v3266_v7, %v11828_v54  ;;  %v3715_v55 = vpop.f32.mrb[165].mxu1  ;;  %v8672_v7 = vld [vmem:[#allocation2 + $0x290] sm:$0xff]  }
 0x436   :  { %v5583_v31 = vadd.f32 %v5582_v19, %v4275_v15  ;;  %v4288_v4 = vmax.f32 %v3265_v43, 0.0  ;;  %v3716_v53 = vadd.f32 %v3715_v55, %v11847_v13  ;;  %8474 = vmatpush3.bf16.msra.mxu0 %v8659_v6  ;;  %8496 = vmatpush3.bf16.msra.mxu1 %v8660_v38 }
 0x437   :  { %v4290_v36 = vmax.f32 %v3714_v22, 0.0  ;;  %v4289_v12 = vmax.f32 %v3267_v40, 0.0  ;;  %v3270_v37 = vpop.f32.mrb[166].mxu0  ;;  %8503 = vmatprep.subr.bf16.mxu0 %v8661_v0  ;;  %8525 = vmatprep.subr.bf16.mxu1 %v8662_v45 }
 0x438   :  { %v5473_v52 = vadd.f32 %v5472_v32, %v4288_v4  ;;  %v4291_v25 = vmax.f32 %v3716_v53, 0.0  ;;  %v3271_v46 = vadd.f32 %v3270_v37, %v11824_v26  ;;  %v3719_v42 = vpop.f32.mrb[166].mxu1  ;;  %v3272_v51 = vpop.f32.mrb[167].mxu0  ;;  %v8671_v32 = vld [vmem:[#allocation2 + $0x210] sm:$0xff]  }
 0x439   :  { %v5547_v49 = vadd.f32 %v5546_v58, %v4290_v36  ;;  %v5510_v1 = vadd.f32 %v5509_v39, %v4289_v12  ;;  %v3720_v10 = vadd.f32 %v3719_v42, %v11837_v8  ;;  %7518 = vmatmul.mubr.bf16.vlgmr.msra.gmra.mrb[4].mxu0 %v6609_v17  ;;  %7558 = vmatmul.mubr.bf16.vlgmr.msra.gmra.mrb[4].mxu1 %v6611_v47  ;;  %v3721_v16 = vpop.f32.mrb[167].mxu1  ;;  %v8673_v58 = vld [vmem:[#allocation2 + $0x258] sm:$0xff]  }
 0x43a   :  { %v5584_v5 = vadd.f32 %v5583_v31, %v4291_v25  ;;  %v4304_v60 = vmax.f32 %v3271_v46, 0.0  ;;  %v3273_v61 = vadd.f32 %v3272_v51, %v11828_v54  ;;  %v3722_v33 = vadd.f32 %v3721_v16, %v11847_v13  ;;  %8504 = vmatpush3.bf16.msra.mxu0 %v8663_v3  ;;  %7597 = vmatprep.mubr.bf16.mxu0 %v6614_v11  ;;  %v8674_v31 = vld [vmem:[#allocation2 + $0x2d8] sm:$0xff]   ;;  %v8677_v51 = vld [vmem:[#allocation2 + $0x260] sm:$0xff]  }
 0x43b   :  { %v4306_v28 = vmax.f32 %v3720_v10, 0.0  ;;  %8526 = vmatpush3.bf16.msra.mxu1 %v8664_v41  ;;  %7637 = vmatprep.mubr.bf16.mxu1 %v6616_v24  ;;  %v3276_v57 = vpop.f32.mrb[168].mxu0  ;;  %v8675_v41 = vld [vmem:[#allocation2 + $0x218] sm:$0xff]   ;;  %v8678_v10 = vld [vmem:[#allocation2 + $0x2e0] sm:$0xff]  }
 0x43c   :  { %v5474_v59 = vadd.f32 %v5473_v52, %v4304_v60  ;;  %v4305_v2 = vmax.f32 %v3273_v61, 0.0  ;;  %v4307_v56 = vmax.f32 %v3722_v33, 0.0  ;;  %v3277_v35 = vadd.f32 %v3276_v57, %v11824_v26  ;;  %v3725_v27 = vpop.f32.mrb[168].mxu1  ;;  %8505 = vmatprep.subr.bf16.mxu0 %v8665_v48  ;;  %8527 = vmatprep.subr.bf16.mxu1 %v8666_v21  ;;  %v3278_v19 = vpop.f32.mrb[169].mxu0  ;;  %v8676_v42 = vld [vmem:[#allocation2 + $0x298] sm:$0xff]  }
 0x43d   :  { %v5548_v30 = vadd.f32 %v5547_v49, %v4306_v28  ;;  %v3726_v6 = vadd.f32 %v3725_v27, %v11837_v8  ;;  %v3279_v38 = vadd.f32 %v3278_v19, %v11828_v54  ;;  %v3727_v20 = vpop.f32.mrb[169].mxu1 }
 0x43e   :  { %v5511_v14 = vadd.f32 %v5510_v1, %v4305_v2  ;;  %v5585_v44 = vadd.f32 %v5584_v5, %v4307_v56  ;;  %v4320_v0 = vmax.f32 %v3277_v35, 0.0  ;;  %v3728_v45 = vadd.f32 %v3727_v20, %v11847_v13  ;;  %8506 = vmatpush3.bf16.msra.mxu0 %v8667_v29  ;;  %v8680_v56 = vld [vmem:[#allocation2 + $0x2a0] sm:$0xff]   ;;  %v8681_v35 = vld [vmem:[#allocation2 + $0x268] sm:$0xff]  }
 0x43f   :  { %v4322_v15 = vmax.f32 %v3726_v6, 0.0  ;;  %v4321_v43 = vmax.f32 %v3279_v38, 0.0  ;;  %8528 = vmatpush3.bf16.msra.mxu1 %v8668_v23  ;;  %v3282_v9 = vpop.f32.mrb[170].mxu0  ;;  %8507 = vmatprep.subr.bf16.mxu0 %v8669_v18  ;;  %v8679_v23 = vld [vmem:[#allocation2 + $0x220] sm:$0xff]   ;;  %v8682_v38 = vld [vmem:[#allocation2 + $0x2e8] sm:$0xff]  }
 0x440   :  { %v5475_v39 = vadd.f32 %v5474_v59, %v4320_v0  ;;  %v4323_v22 = vmax.f32 %v3728_v45, 0.0  ;;  %v3283_v40 = vadd.f32 %v3282_v9, %v11824_v26  ;;  %v3731_v55 = vpop.f32.mrb[170].mxu1  ;;  %8529 = vmatprep.subr.bf16.mxu1 %v8670_v34  ;;  %v3284_v17 = vpop.f32.mrb[171].mxu0  ;;  %v8683_v9 = vld [vmem:[#allocation2 + $0x228] sm:$0xff]  }
 0x441   :  { %v5549_v4 = vadd.f32 %v5548_v30, %v4322_v15  ;;  %v5512_v53 = vadd.f32 %v5511_v14, %v4321_v43  ;;  %v3732_v3 = vadd.f32 %v3731_v55, %v11837_v8  ;;  %v3285_v47 = vadd.f32 %v3284_v17, %v11828_v54  ;;  %v3733_v36 = vpop.f32.mrb[171].mxu1 }
 0x442   :  { %v5586_v12 = vadd.f32 %v5585_v44, %v4323_v22  ;;  %v4336_v37 = vmax.f32 %v3283_v40, 0.0  ;;  %v3734_v11 = vadd.f32 %v3733_v36, %v11847_v13  ;;  %8508 = vmatpush3.bf16.msra.mxu0 %v8671_v32  ;;  %v8684_v22 = vld [vmem:[#allocation2 + $0x2a8] sm:$0xff]   ;;  %v8685_v40 = vld [vmem:[#allocation2 + $0x270] sm:$0xff]  }
 0x443   :  { %v4338_v52 = vmax.f32 %v3732_v3, 0.0  ;;  %v4337_v25 = vmax.f32 %v3285_v47, 0.0  ;;  %8530 = vmatpush3.bf16.msra.mxu1 %v8672_v7  ;;  %v3288_v46 = vpop.f32.mrb[172].mxu0  ;;  %8509 = vmatprep.subr.bf16.mxu0 %v8673_v58  ;;  %v8686_v3 = vld [vmem:[#allocation2 + $0x2f0] sm:$0xff]  }
 0x444   :  { %v5476_v24 = vadd.f32 %v5475_v39, %v4336_v37  ;;  %v4339_v48 = vmax.f32 %v3734_v11, 0.0  ;;  %v3289_v21 = vadd.f32 %v3288_v46, %v11824_v26  ;;  %v3737_v49 = vpop.f32.mrb[172].mxu1  ;;  %8531 = vmatprep.subr.bf16.mxu1 %v8674_v31  ;;  %v3290_v1 = vpop.f32.mrb[173].mxu0  ;;  %v8687_v46 = vld [vmem:[#allocation2 + $0x230] sm:$0xff]  }
 0x445   :  { %v5550_v16 = vadd.f32 %v5549_v4, %v4338_v52  ;;  %v5513_v5 = vadd.f32 %v5512_v53, %v4337_v25  ;;  %v3738_v60 = vadd.f32 %v3737_v49, %v11837_v8  ;;  %v3291_v61 = vadd.f32 %v3290_v1, %v11828_v54  ;;  %v3739_v33 = vpop.f32.mrb[173].mxu1 }
 0x446   :  { %v5587_v29 = vadd.f32 %v5586_v12, %v4339_v48  ;;  %v4352_v28 = vmax.f32 %v3289_v21, 0.0  ;;  %v3740_v57 = vadd.f32 %v3739_v33, %v11847_v13  ;;  %8510 = vmatpush3.bf16.msra.mxu0 %v8675_v41  ;;  %v8688_v48 = vld [vmem:[#allocation2 + $0x2b0] sm:$0xff]   ;;  %v8689_v21 = vld [vmem:[#allocation2 + $0x278] sm:$0xff]  }
 0x447   :  { %v4354_v18 = vmax.f32 %v3738_v60, 0.0  ;;  %v4353_v59 = vmax.f32 %v3291_v61, 0.0  ;;  %8532 = vmatpush3.bf16.msra.mxu1 %v8676_v42  ;;  %v3294_v2 = vpop.f32.mrb[174].mxu0  ;;  %8511 = vmatprep.subr.bf16.mxu0 %v8677_v51  ;;  %v8690_v60 = vld [vmem:[#allocation2 + $0x2f8] sm:$0xff]  }
 0x448   :  { %v5477_v27 = vadd.f32 %v5476_v24, %v4352_v28  ;;  %v4355_v19 = vmax.f32 %v3740_v57, 0.0  ;;  %v3295_v34 = vadd.f32 %v3294_v2, %v11824_v26  ;;  %v3743_v30 = vpop.f32.mrb[174].mxu1  ;;  %8533 = vmatprep.subr.bf16.mxu1 %v8678_v10  ;;  %v3296_v6 = vpop.f32.mrb[175].mxu0  ;;  %v8691_v2 = vld [vmem:[#allocation2 + $0x238] sm:$0xff]  }
 0x449   :  { %v5551_v20 = vadd.f32 %v5550_v16, %v4354_v18  ;;  %v5514_v14 = vadd.f32 %v5513_v5, %v4353_v59  ;;  %v3744_v44 = vadd.f32 %v3743_v30, %v11837_v8  ;;  %v3297_v0 = vadd.f32 %v3296_v6, %v11828_v54  ;;  %v3745_v45 = vpop.f32.mrb[175].mxu1 }
 0x44a   :  { %v5588_v32 = vadd.f32 %v5587_v29, %v4355_v19  ;;  %v4368_v15 = vmax.f32 %v3295_v34, 0.0  ;;  %v3746_v43 = vadd.f32 %v3745_v45, %v11847_v13  ;;  %8512 = vmatpush3.bf16.msra.mxu0 %v8679_v23  ;;  %v8692_v19 = vld [vmem:[#allocation2 + $0x2b8] sm:$0xff]  }
 0x44b   :  { %v4370_v7 = vmax.f32 %v3744_v44, 0.0  ;;  %v4369_v58 = vmax.f32 %v3297_v0, 0.0  ;;  %8534 = vmatpush3.bf16.msra.mxu1 %v8680_v56  ;;  %v3300_v39 = vpop.f32.mrb[176].mxu0  ;;  %8513 = vmatprep.subr.bf16.mxu0 %v8681_v35 }
 0x44c   :  { %v5478_v55 = vadd.f32 %v5477_v27, %v4368_v15  ;;  %v4371_v17 = vmax.f32 %v3746_v43, 0.0  ;;  %v3301_v31 = vadd.f32 %v3300_v39, %v11824_v26  ;;  %v3749_v4 = vpop.f32.mrb[176].mxu1  ;;  %8535 = vmatprep.subr.bf16.mxu1 %v8682_v38  ;;  %v3302_v53 = vpop.f32.mrb[177].mxu0 }
 0x44d   :  { %v5552_v47 = vadd.f32 %v5551_v20, %v4370_v7  ;;  %v5515_v36 = vadd.f32 %v5514_v14, %v4369_v58  ;;  %v3750_v12 = vadd.f32 %v3749_v4, %v11837_v8  ;;  %v3303_v37 = vadd.f32 %v3302_v53, %v11828_v54  ;;  %v3751_v11 = vpop.f32.mrb[177].mxu1 }
 0x44e   :  { %v5589_v41 = vadd.f32 %v5588_v32, %v4371_v17  ;;  %v4384_v52 = vmax.f32 %v3301_v31, 0.0  ;;  %v3752_v25 = vadd.f32 %v3751_v11, %v11847_v13  ;;  %8514 = vmatpush3.bf16.msra.mxu0 %v8683_v9  ;;  %v6613_v7 = vpack.c.b16 %v11920_v50, %v11920_v50 }
 0x44f   :  { %v4386_v42 = vmax.f32 %v3750_v12, 0.0  ;;  %v4385_v51 = vmax.f32 %v3303_v37, 0.0  ;;  %8536 = vmatpush3.bf16.msra.mxu1 %v8684_v22  ;;  %v3306_v24 = vpop.f32.mrb[178].mxu0  ;;  %8515 = vmatprep.subr.bf16.mxu0 %v8685_v40  ;;  %v6615_v40 = vpack.c.b16 %v11928_v63, %v11928_v63 }
 0x450   :  { %v5479_v49 = vadd.f32 %v5478_v55, %v4384_v52  ;;  %v4387_v1 = vmax.f32 %v3752_v25, 0.0  ;;  %v3307_v10 = vadd.f32 %v3306_v24, %v11824_v26  ;;  %v3755_v16 = vpop.f32.mrb[178].mxu1  ;;  %8537 = vmatprep.subr.bf16.mxu1 %v8686_v3  ;;  %v3308_v5 = vpop.f32.mrb[179].mxu0 }
 0x451   :  { %v5553_v61 = vadd.f32 %v5552_v47, %v4386_v42  ;;  %v5516_v33 = vadd.f32 %v5515_v36, %v4385_v51  ;;  %v3756_v29 = vadd.f32 %v3755_v16, %v11837_v8  ;;  %v3309_v28 = vadd.f32 %v3308_v5, %v11828_v54  ;;  %v3757_v57 = vpop.f32.mrb[179].mxu1 }
 0x452   :  { %v5590_v23 = vadd.f32 %v5589_v41, %v4387_v1  ;;  %v4400_v18 = vmax.f32 %v3307_v10, 0.0  ;;  %v3758_v59 = vadd.f32 %v3757_v57, %v11847_v13  ;;  %8516 = vmatpush3.bf16.msra.mxu0 %v8687_v46 }
 0x453   :  { %v4402_v56 = vmax.f32 %v3756_v29, 0.0  ;;  %v4401_v35 = vmax.f32 %v3309_v28, 0.0  ;;  %8538 = vmatpush3.bf16.msra.mxu1 %v8688_v48  ;;  %v3312_v27 = vpop.f32.mrb[180].mxu0  ;;  %8517 = vmatprep.subr.bf16.mxu0 %v8689_v21 }
 0x454   :  { %v5480_v34 = vadd.f32 %v5479_v49, %v4400_v18  ;;  %v4403_v30 = vmax.f32 %v3758_v59, 0.0  ;;  %v3313_v6 = vadd.f32 %v3312_v27, %v11824_v26  ;;  %v3761_v38 = vpop.f32.mrb[180].mxu1  ;;  %8539 = vmatprep.subr.bf16.mxu1 %v8690_v60  ;;  %v3314_v20 = vpop.f32.mrb[181].mxu0 }
 0x455   :  { %v5554_v14 = vadd.f32 %v5553_v61, %v4402_v56  ;;  %v5517_v44 = vadd.f32 %v5516_v33, %v4401_v35  ;;  %v3762_v0 = vadd.f32 %v3761_v38, %v11837_v8  ;;  %v3315_v45 = vadd.f32 %v3314_v20, %v11828_v54  ;;  %v3763_v32 = vpop.f32.mrb[181].mxu1 }
 0x456   :  { %v5591_v15 = vadd.f32 %v5590_v23, %v4403_v30  ;;  %v4416_v43 = vmax.f32 %v3313_v6, 0.0  ;;  %v3764_v9 = vadd.f32 %v3763_v32, %v11847_v13  ;;  %8518 = vmatpush3.bf16.msra.mxu0 %v8691_v2 }
 0x457   :  { %v4418_v58 = vmax.f32 %v3762_v0, 0.0  ;;  %v4417_v39 = vmax.f32 %v3315_v45, 0.0  ;;  %8540 = vmatpush3.bf16.msra.mxu1 %v8692_v19  ;;  %v3318_v22 = vpop.f32.mrb[182].mxu0 }
 0x458   :  { %v5481_v55 = vadd.f32 %v5480_v34, %v4416_v43  ;;  %v4419_v17 = vmax.f32 %v3764_v9, 0.0  ;;  %v3319_v31 = vadd.f32 %v3318_v22, %v11824_v26  ;;  %v3767_v4 = vpop.f32.mrb[182].mxu1  ;;  %v3320_v53 = vpop.f32.mrb[183].mxu0 }
 0x459   :  { %v5555_v3 = vadd.f32 %v5554_v14, %v4418_v58  ;;  %v5518_v47 = vadd.f32 %v5517_v44, %v4417_v39  ;;  %v3768_v36 = vadd.f32 %v3767_v4, %v11837_v8  ;;  %7598 = vmatmul.mubr.bf16.vlgmr.msra.gmra.mrb[8].mxu0 %v6613_v7  ;;  %v3321_v50 = vadd.f32 %v3320_v53, %v11828_v54  ;;  %v3769_v12 = vpop.f32.mrb[183].mxu1 }
 0x45a   :  { %v5592_v37 = vadd.f32 %v5591_v15, %v4419_v17  ;;  %v4432_v11 = vmax.f32 %v3319_v31, 0.0  ;;  %7638 = vmatmul.mubr.bf16.vlgmr.msra.gmra.mrb[8].mxu1 %v6615_v40  ;;  %v3770_v41 = vadd.f32 %v3769_v12, %v11847_v13 }
 0x45b   :  { %v4434_v63 = vmax.f32 %v3768_v36, 0.0  ;;  %v4433_v52 = vmax.f32 %v3321_v50, 0.0  ;;  %v3324_v25 = vpop.f32.mrb[184].mxu0 }
 0x45c   :  { %v5482_v46 = vadd.f32 %v5481_v55, %v4432_v11  ;;  %v4435_v42 = vmax.f32 %v3770_v41, 0.0  ;;  %v3325_v51 = vadd.f32 %v3324_v25, %v11824_v26  ;;  %v3773_v24 = vpop.f32.mrb[184].mxu1  ;;  %v3326_v48 = vpop.f32.mrb[185].mxu0 }
 0x45d   :  { %v5556_v21 = vadd.f32 %v5555_v3, %v4434_v63  ;;  %v5519_v49 = vadd.f32 %v5518_v47, %v4433_v52  ;;  %v3774_v1 = vadd.f32 %v3773_v24, %v11837_v8  ;;  %v3327_v10 = vadd.f32 %v3326_v48, %v11828_v54  ;;  %v3775_v16 = vpop.f32.mrb[185].mxu1  ;;  %v8694_v24 = vld [vmem:[#allocation2 + $0x3c0] sm:$0xff]  }
 0x45e   :  { %v5593_v5 = vadd.f32 %v5592_v37, %v4435_v42  ;;  %v4448_v60 = vmax.f32 %v3325_v51, 0.0  ;;  %v3776_v61 = vadd.f32 %v3775_v16, %v11847_v13  ;;  %v8693_v51 = vld [vmem:[#allocation2 + $0x340] sm:$0xff]   ;;  %8569 = vmatprep.subr.bf16.mxu1 %v8694_v24 }
 0x45f   :  { %v4450_v33 = vmax.f32 %v3774_v1, 0.0  ;;  %v4449_v29 = vmax.f32 %v3327_v10, 0.0  ;;  %v3330_v28 = vpop.f32.mrb[186].mxu0  ;;  %v8695_v48 = vld [vmem:[#allocation2 + $0x300] sm:$0xff]   ;;  %8547 = vmatprep.subr.bf16.mxu0 %v8693_v51 }
 0x460   :  { %v5483_v57 = vadd.f32 %v5482_v46, %v4448_v60  ;;  %v4451_v23 = vmax.f32 %v3776_v61, 0.0  ;;  %v3331_v18 = vadd.f32 %v3330_v28, %v11824_v26  ;;  %v3779_v59 = vpop.f32.mrb[186].mxu1  ;;  %v3332_v2 = vpop.f32.mrb[187].mxu0  ;;  %v8696_v10 = vld [vmem:[#allocation2 + $0x380] sm:$0xff]   ;;  %8548 = vmatpush3.bf16.msra.mxu0 %v8695_v48 }
 0x461   :  { %v5557_v56 = vadd.f32 %v5556_v21, %v4450_v33  ;;  %v5520_v35 = vadd.f32 %v5519_v49, %v4449_v29  ;;  %v3780_v27 = vadd.f32 %v3779_v59, %v11837_v8  ;;  %v3333_v19 = vadd.f32 %v3332_v2, %v11828_v54  ;;  %v3781_v34 = vpop.f32.mrb[187].mxu1  ;;  %8570 = vmatpush3.bf16.msra.mxu1 %v8696_v10 }
 0x462   :  { %v5594_v30 = vadd.f32 %v5593_v5, %v4451_v23  ;;  %v4464_v6 = vmax.f32 %v3331_v18, 0.0  ;;  %v3782_v38 = vadd.f32 %v3781_v34, %v11847_v13 }
 0x463   :  { %v4466_v20 = vmax.f32 %v3780_v27, 0.0  ;;  %v4465_v14 = vmax.f32 %v3333_v19, 0.0  ;;  %v3336_v44 = vpop.f32.mrb[188].mxu0 }
 0x464   :  { %v5484_v0 = vadd.f32 %v5483_v57, %v4464_v6  ;;  %v4467_v45 = vmax.f32 %v3782_v38, 0.0  ;;  %v3337_v32 = vadd.f32 %v3336_v44, %v11824_v26  ;;  %v3785_v15 = vpop.f32.mrb[188].mxu1  ;;  %v3338_v43 = vpop.f32.mrb[189].mxu0 }
 0x465   :  { %v5558_v9 = vadd.f32 %v5557_v56, %v4466_v20  ;;  %v5521_v7 = vadd.f32 %v5520_v35, %v4465_v14  ;;  %v3786_v58 = vadd.f32 %v3785_v15, %v11837_v8  ;;  %v3339_v39 = vadd.f32 %v3338_v43, %v11828_v54  ;;  %v3787_v22 = vpop.f32.mrb[189].mxu1 }
 0x466   :  { %v5595_v40 = vadd.f32 %v5594_v30, %v4467_v45  ;;  %v4480_v55 = vmax.f32 %v3337_v32, 0.0  ;;  %v3788_v17 = vadd.f32 %v3787_v22, %v11847_v13 }
 0x467   :  { %v4482_v31 = vmax.f32 %v3786_v58, 0.0  ;;  %v4481_v4 = vmax.f32 %v3339_v39, 0.0  ;;  %v3342_v53 = vpop.f32.mrb[190].mxu0 }
 0x468   :  { %v5485_v3 = vadd.f32 %v5484_v0, %v4480_v55  ;;  %v4483_v47 = vmax.f32 %v3788_v17, 0.0  ;;  %v3343_v36 = vadd.f32 %v3342_v53, %v11824_v26  ;;  %v3791_v50 = vpop.f32.mrb[190].mxu1  ;;  %v3344_v12 = vpop.f32.mrb[191].mxu0 }
 0x469   :  { %v5559_v37 = vadd.f32 %v5558_v9, %v4482_v31  ;;  %v5522_v11 = vadd.f32 %v5521_v7, %v4481_v4  ;;  %v3792_v41 = vadd.f32 %v3791_v50, %v11837_v8  ;;  %v3345_v63 = vadd.f32 %v3344_v12, %v11828_v54  ;;  %v3793_v52 = vpop.f32.mrb[191].mxu1 }
 0x46a   :  { %v5596_v25 = vadd.f32 %v5595_v40, %v4483_v47  ;;  %v4496_v46 = vmax.f32 %v3343_v36, 0.0  ;;  %v3794_v42 = vadd.f32 %v3793_v52, %v11847_v13 }
 0x46b   :  { %v4498_v21 = vmax.f32 %v3792_v41, 0.0  ;;  %v4497_v49 = vmax.f32 %v3345_v63, 0.0  ;;  %v3348_v1 = vpop.f32.mrb[192].mxu0 }
 0x46c   :  { %v12116_v16 = vadd.f32 %v5485_v3, %v4496_v46  ;;  %v4499_v5 = vmax.f32 %v3794_v42, 0.0  ;;  %v3350_v60 = vpop.f32.mrb[193].mxu0  ;;  %v3797_v61 = vpop.f32.mrb[192].mxu1  ;;  %v3349_v23 = vadd.f32 %v3348_v1, %v11824_v26 }
 0x46d   :  { %v12118_v33 = vadd.f32 %v5559_v37, %v4498_v21  ;;  %v12120_v29 = vadd.f32 %v5522_v11, %v4497_v49  ;;  %v3799_v28 = vpop.f32.mrb[193].mxu1  ;;  %v3351_v18 = vadd.f32 %v3350_v60, %v11828_v54  ;;  %v3798_v59 = vadd.f32 %v3797_v61, %v11837_v8 }
 0x46e   :  { %v12122_v57 = vadd.f32 %v5596_v25, %v4499_v5  ;;  %v3800_v56 = vadd.f32 %v3799_v28, %v11847_v13  ;;  %v4512_v38 = vmax.f32 %v3349_v23, 0.0 }
 0x46f   :  { %v3354_v2 = vpop.f32.mrb[194].mxu0  ;;  %v4513_v44 = vmax.f32 %v3351_v18, 0.0  ;;  %v4514_v0 = vmax.f32 %v3798_v59, 0.0 }
 0x470   :  { %v3355_v35 = vadd.f32 %v3354_v2, %v11824_v26  ;;  %v3803_v27 = vpop.f32.mrb[194].mxu1  ;;  %v3356_v19 = vpop.f32.mrb[195].mxu0  ;;  %v4515_v43 = vmax.f32 %v3800_v56, 0.0  ;;  %v8697_v56 = vld [vmem:[#allocation2 + $0x348] sm:$0xff]  }
 0x471   :  { %v3804_v34 = vadd.f32 %v3803_v27, %v11837_v8  ;;  %v3357_v30 = vadd.f32 %v3356_v19, %v11828_v54  ;;  %v3805_v6 = vpop.f32.mrb[195].mxu1  ;;  %8549 = vmatprep.subr.bf16.mxu0 %v8697_v56 }
 0x472   :  { %v4528_v20 = vmax.f32 %v3355_v35, 0.0  ;;  %v3806_v14 = vadd.f32 %v3805_v6, %v11847_v13  ;;  %v8698_v35 = vld [vmem:[#allocation2 + $0x3c8] sm:$0xff]  }
 0x473   :  { %v4530_v45 = vmax.f32 %v3804_v34, 0.0  ;;  %v4529_v32 = vmax.f32 %v3357_v30, 0.0  ;;  %v3360_v15 = vpop.f32.mrb[196].mxu0  ;;  %8571 = vmatprep.subr.bf16.mxu1 %v8698_v35 }
 0x474   :  { %v6048_v9 = vadd.f32 %v4528_v20, %v4512_v38  ;;  %v4531_v7 = vmax.f32 %v3806_v14, 0.0  ;;  %v3809_v58 = vpop.f32.mrb[196].mxu1  ;;  %v3362_v39 = vpop.f32.mrb[197].mxu0  ;;  %v3361_v31 = vadd.f32 %v3360_v15, %v11824_v26  ;;  %v8699_v20 = vld [vmem:[#allocation2 + $0x308] sm:$0xff]  }
 0x475   :  { %v6122_v22 = vadd.f32 %v4530_v45, %v4514_v0  ;;  %v6085_v40 = vadd.f32 %v4529_v32, %v4513_v44  ;;  %v3811_v55 = vpop.f32.mrb[197].mxu1  ;;  %v3810_v4 = vadd.f32 %v3809_v58, %v11837_v8  ;;  %v3363_v53 = vadd.f32 %v3362_v39, %v11828_v54  ;;  %v8700_v14 = vld [vmem:[#allocation2 + $0x388] sm:$0xff]   ;;  %8550 = vmatpush3.bf16.msra.mxu0 %v8699_v20  ;;  %v8701_v39 = vld [vmem:[#allocation2 + $0x350] sm:$0xff]  }
 0x476   :  { %v6159_v17 = vadd.f32 %v4531_v7, %v4515_v43  ;;  %v4544_v47 = vmax.f32 %v3361_v31, 0.0  ;;  %v3812_v36 = vadd.f32 %v3811_v55, %v11847_v13  ;;  %8572 = vmatpush3.bf16.msra.mxu1 %v8700_v14  ;;  %8551 = vmatprep.subr.bf16.mxu0 %v8701_v39 }
 0x477   :  { %v3366_v3 = vpop.f32.mrb[198].mxu0  ;;  %v4546_v37 = vmax.f32 %v3810_v4, 0.0  ;;  %v4545_v11 = vmax.f32 %v3363_v53, 0.0  ;;  %v8703_v53 = vld [vmem:[#allocation2 + $0x310] sm:$0xff]  }
 0x478   :  { %v3815_v50 = vpop.f32.mrb[198].mxu1  ;;  %v3368_v12 = vpop.f32.mrb[199].mxu0  ;;  %v6049_v63 = vadd.f32 %v6048_v9, %v4544_v47  ;;  %v4547_v52 = vmax.f32 %v3812_v36, 0.0  ;;  %v3367_v24 = vadd.f32 %v3366_v3, %v11824_v26  ;;  %v8704_v3 = vld [vmem:[#allocation2 + $0x390] sm:$0xff]   ;;  %v8705_v47 = vld [vmem:[#allocation2 + $0x358] sm:$0xff]  }
 0x479   :  { %v3817_v41 = vpop.f32.mrb[199].mxu1  ;;  %v6123_v25 = vadd.f32 %v6122_v22, %v4546_v37  ;;  %v6086_v46 = vadd.f32 %v6085_v40, %v4545_v11  ;;  %v3816_v49 = vadd.f32 %v3815_v50, %v11837_v8  ;;  %v3369_v1 = vadd.f32 %v3368_v12, %v11828_v54  ;;  %v8702_v22 = vld [vmem:[#allocation2 + $0x3d0] sm:$0xff]   ;;  %8552 = vmatpush3.bf16.msra.mxu0 %v8703_v53 }
 0x47a   :  { %v6160_v51 = vadd.f32 %v6159_v17, %v4547_v52  ;;  %v3818_v10 = vadd.f32 %v3817_v41, %v11847_v13  ;;  %v4560_v60 = vmax.f32 %v3367_v24, 0.0  ;;  %8573 = vmatprep.subr.bf16.mxu1 %v8702_v22  ;;  %8553 = vmatprep.subr.bf16.mxu0 %v8705_v47 }
 0x47b   :  { %v3372_v42 = vpop.f32.mrb[200].mxu0  ;;  %v4562_v23 = vmax.f32 %v3816_v49, 0.0  ;;  %v4561_v18 = vmax.f32 %v3369_v1, 0.0  ;;  %v8707_v1 = vld [vmem:[#allocation2 + $0x318] sm:$0xff]   ;;  %8574 = vmatpush3.bf16.msra.mxu1 %v8704_v3 }
 0x47c   :  { %v3821_v48 = vpop.f32.mrb[200].mxu1  ;;  %v3374_v21 = vpop.f32.mrb[201].mxu0  ;;  %v3373_v61 = vadd.f32 %v3372_v42, %v11824_v26  ;;  %v4563_v59 = vmax.f32 %v3818_v10, 0.0  ;;  %v6050_v27 = vadd.f32 %v6049_v63, %v4560_v60  ;;  %v8706_v63 = vld [vmem:[#allocation2 + $0x3d8] sm:$0xff]  }
 0x47d   :  { %v3823_v5 = vpop.f32.mrb[201].mxu1  ;;  %v3822_v28 = vadd.f32 %v3821_v48, %v11837_v8  ;;  %v3375_v30 = vadd.f32 %v3374_v21, %v11828_v54  ;;  %v6124_v44 = vadd.f32 %v6123_v25, %v4562_v23  ;;  %v6087_v0 = vadd.f32 %v6086_v46, %v4561_v18  ;;  %v8708_v23 = vld [vmem:[#allocation2 + $0x398] sm:$0xff]   ;;  %v8709_v18 = vld [vmem:[#allocation2 + $0x360] sm:$0xff]   ;;  %8575 = vmatprep.subr.bf16.mxu1 %v8706_v63 }
 0x47e   :  { %v4576_v19 = vmax.f32 %v3373_v61, 0.0  ;;  %v6161_v45 = vadd.f32 %v6160_v51, %v4563_v59  ;;  %v3824_v32 = vadd.f32 %v3823_v5, %v11847_v13  ;;  %8554 = vmatpush3.bf16.msra.mxu0 %v8707_v1 }
 0x47f   :  { %v3378_v2 = vpop.f32.mrb[202].mxu0  ;;  %v4578_v34 = vmax.f32 %v3822_v28, 0.0  ;;  %v4577_v9 = vmax.f32 %v3375_v30, 0.0  ;;  %8576 = vmatpush3.bf16.msra.mxu1 %v8708_v23  ;;  %8555 = vmatprep.subr.bf16.mxu0 %v8709_v18 }
 0x480   :  { %v3827_v6 = vpop.f32.mrb[202].mxu1  ;;  %v3380_v38 = vpop.f32.mrb[203].mxu0  ;;  %v6051_v43 = vadd.f32 %v6050_v27, %v4576_v19  ;;  %v3379_v7 = vadd.f32 %v3378_v2, %v11824_v26  ;;  %v4579_v55 = vmax.f32 %v3824_v32, 0.0  ;;  %v8710_v19 = vld [vmem:[#allocation2 + $0x3e0] sm:$0xff]  }
 0x481   :  { %v3829_v15 = vpop.f32.mrb[203].mxu1  ;;  %v3828_v58 = vadd.f32 %v3827_v6, %v11837_v8  ;;  %v6125_v40 = vadd.f32 %v6124_v44, %v4578_v34  ;;  %v3381_v17 = vadd.f32 %v3380_v38, %v11828_v54  ;;  %v6088_v36 = vadd.f32 %v6087_v0, %v4577_v9  ;;  %8577 = vmatprep.subr.bf16.mxu1 %v8710_v19  ;;  %v8721_v19 = vld [vmem:[#allocation2 + $0x378] sm:$0xff]  }
 0x482   :  { %v3830_v31 = vadd.f32 %v3829_v15, %v11847_v13  ;;  %v4592_v50 = vmax.f32 %v3379_v7, 0.0  ;;  %v6162_v52 = vadd.f32 %v6161_v45, %v4579_v55  ;;  %v8711_v45 = vld [vmem:[#allocation2 + $0x320] sm:$0xff]  }
 0x483   :  { %v3384_v4 = vpop.f32.mrb[204].mxu0  ;;  %v4594_v12 = vmax.f32 %v3828_v58, 0.0  ;;  %v4593_v25 = vmax.f32 %v3381_v17, 0.0  ;;  %v8712_v7 = vld [vmem:[#allocation2 + $0x3a0] sm:$0xff]   ;;  %v8713_v58 = vld [vmem:[#allocation2 + $0x368] sm:$0xff]   ;;  %8556 = vmatpush3.bf16.msra.mxu0 %v8711_v45 }
 0x484   :  { %v3385_v37 = vadd.f32 %v3384_v4, %v11824_v26  ;;  %v3833_v11 = vpop.f32.mrb[204].mxu1  ;;  %v3386_v41 = vpop.f32.mrb[205].mxu0  ;;  %v4595_v46 = vmax.f32 %v3830_v31, 0.0  ;;  %v6052_v24 = vadd.f32 %v6051_v43, %v4592_v50  ;;  %v8714_v31 = vld [vmem:[#allocation2 + $0x3e8] sm:$0xff]   ;;  %8578 = vmatpush3.bf16.msra.mxu1 %v8712_v7  ;;  %8557 = vmatprep.subr.bf16.mxu0 %v8713_v58  ;;  %v8723_v58 = vld [vmem:[#allocation2 + $0x338] sm:$0xff]  }
 0x485   :  { %v3834_v42 = vadd.f32 %v3833_v11, %v11837_v8  ;;  %v3835_v51 = vpop.f32.mrb[205].mxu1  ;;  %v6126_v48 = vadd.f32 %v6125_v40, %v4594_v12  ;;  %v3387_v49 = vadd.f32 %v3386_v41, %v11828_v54  ;;  %v6089_v10 = vadd.f32 %v6088_v36, %v4593_v25  ;;  %v8715_v11 = vld [vmem:[#allocation2 + $0x328] sm:$0xff]   ;;  %8579 = vmatprep.subr.bf16.mxu1 %v8714_v31 }
 0x486   :  { %v4608_v21 = vmax.f32 %v3385_v37, 0.0  ;;  %v6163_v5 = vadd.f32 %v6162_v52, %v4595_v46  ;;  %v3836_v61 = vadd.f32 %v3835_v51, %v11847_v13  ;;  %v8716_v25 = vld [vmem:[#allocation2 + $0x3a8] sm:$0xff]   ;;  %v8717_v46 = vld [vmem:[#allocation2 + $0x370] sm:$0xff]  }
 0x487   :  { %v4610_v60 = vmax.f32 %v3834_v42, 0.0  ;;  %v3390_v28 = vpop.f32.mrb[206].mxu0  ;;  %v4609_v2 = vmax.f32 %v3387_v49, 0.0  ;;  %v8718_v49 = vld [vmem:[#allocation2 + $0x3f0] sm:$0xff]   ;;  %8558 = vmatpush3.bf16.msra.mxu0 %v8715_v11 }
 0x488   :  { %v6053_v59 = vadd.f32 %v6052_v24, %v4608_v21  ;;  %v3391_v56 = vadd.f32 %v3390_v28, %v11824_v26  ;;  %v3839_v35 = vpop.f32.mrb[206].mxu1  ;;  %v3392_v27 = vpop.f32.mrb[207].mxu0  ;;  %v4611_v30 = vmax.f32 %v3836_v61, 0.0  ;;  %8580 = vmatpush3.bf16.msra.mxu1 %v8716_v25  ;;  %8559 = vmatprep.subr.bf16.mxu0 %v8717_v46 }
 0x489   :  { %v6127_v34 = vadd.f32 %v6126_v48, %v4610_v60  ;;  %v3840_v6 = vadd.f32 %v3839_v35, %v11837_v8  ;;  %v3393_v38 = vadd.f32 %v3392_v27, %v11828_v54  ;;  %v3841_v20 = vpop.f32.mrb[207].mxu1  ;;  %v6090_v14 = vadd.f32 %v6089_v10, %v4609_v2  ;;  %v8720_v27 = vld [vmem:[#allocation2 + $0x3b0] sm:$0xff]   ;;  %8581 = vmatprep.subr.bf16.mxu1 %v8718_v49 }
 0x48a   :  { %v4624_v44 = vmax.f32 %v3391_v56, 0.0  ;;  %v3842_v0 = vadd.f32 %v3841_v20, %v11847_v13  ;;  %v6164_v32 = vadd.f32 %v6163_v5, %v4611_v30 }
 0x48b   :  { %v4626_v15 = vmax.f32 %v3840_v6, 0.0  ;;  %v4625_v43 = vmax.f32 %v3393_v38, 0.0  ;;  %v3396_v9 = vpop.f32.mrb[208].mxu0 }
 0x48c   :  { %v6054_v39 = vadd.f32 %v6053_v59, %v4624_v44  ;;  %v4627_v22 = vmax.f32 %v3842_v0, 0.0  ;;  %v3397_v40 = vadd.f32 %v3396_v9, %v11824_v26  ;;  %v3845_v55 = vpop.f32.mrb[208].mxu1  ;;  %v3398_v17 = vpop.f32.mrb[209].mxu0  ;;  %v8719_v59 = vld [vmem:[#allocation2 + $0x330] sm:$0xff]   ;;  %8582 = vmatpush3.bf16.msra.mxu1 %v8720_v27 }
 0x48d   :  { %v6128_v4 = vadd.f32 %v6127_v34, %v4626_v15  ;;  %v6091_v53 = vadd.f32 %v6090_v14, %v4625_v43  ;;  %v3846_v3 = vadd.f32 %v3845_v55, %v11837_v8  ;;  %v3399_v47 = vadd.f32 %v3398_v17, %v11828_v54  ;;  %v3847_v36 = vpop.f32.mrb[209].mxu1  ;;  %v8722_v14 = vld [vmem:[#allocation2 + $0x3f8] sm:$0xff]   ;;  %8560 = vmatpush3.bf16.msra.mxu0 %v8719_v59 }
 0x48e   :  { %v6165_v50 = vadd.f32 %v6164_v32, %v4627_v22  ;;  %v4640_v12 = vmax.f32 %v3397_v40, 0.0  ;;  %v3848_v37 = vadd.f32 %v3847_v36, %v11847_v13  ;;  %8561 = vmatprep.subr.bf16.mxu0 %v8721_v19  ;;  %v8724_v55 = vld [vmem:[#allocation2 + $0x3b8] sm:$0xff]   ;;  %8583 = vmatprep.subr.bf16.mxu1 %v8722_v14 }
 0x48f   :  { %v4642_v41 = vmax.f32 %v3846_v3, 0.0  ;;  %v4641_v63 = vmax.f32 %v3399_v47, 0.0  ;;  %v3402_v52 = vpop.f32.mrb[210].mxu0 }
 0x490   :  { %v6055_v42 = vadd.f32 %v6054_v39, %v4640_v12  ;;  %v4643_v51 = vmax.f32 %v3848_v37, 0.0  ;;  %v3403_v24 = vadd.f32 %v3402_v52, %v11824_v26  ;;  %v3851_v48 = vpop.f32.mrb[210].mxu1  ;;  %v3404_v21 = vpop.f32.mrb[211].mxu0  ;;  %8584 = vmatpush3.bf16.msra.mxu1 %v8724_v55 }
 0x491   :  { %v6129_v1 = vadd.f32 %v6128_v4, %v4642_v41  ;;  %v6092_v10 = vadd.f32 %v6091_v53, %v4641_v63  ;;  %v3852_v5 = vadd.f32 %v3851_v48, %v11837_v8  ;;  %v3405_v60 = vadd.f32 %v3404_v21, %v11828_v54  ;;  %v3853_v61 = vpop.f32.mrb[211].mxu1  ;;  %8562 = vmatpush3.bf16.msra.mxu0 %v8723_v58 }
 0x492   :  { %v6166_v28 = vadd.f32 %v6165_v50, %v4643_v51  ;;  %v4656_v23 = vmax.f32 %v3403_v24, 0.0  ;;  %v3854_v18 = vadd.f32 %v3853_v61, %v11847_v13 }
 0x493   :  { %v4658_v2 = vmax.f32 %v3852_v5, 0.0  ;;  %v4657_v56 = vmax.f32 %v3405_v60, 0.0  ;;  %v3408_v35 = vpop.f32.mrb[212].mxu0 }
 0x494   :  { %v6056_v34 = vadd.f32 %v6055_v42, %v4656_v23  ;;  %v4659_v30 = vmax.f32 %v3854_v18, 0.0  ;;  %v3409_v6 = vadd.f32 %v3408_v35, %v11824_v26  ;;  %v3857_v38 = vpop.f32.mrb[212].mxu1  ;;  %v3410_v20 = vpop.f32.mrb[213].mxu0 }
 0x495   :  { %v6130_v44 = vadd.f32 %v6129_v1, %v4658_v2  ;;  %v6093_v0 = vadd.f32 %v6092_v10, %v4657_v56  ;;  %v3858_v45 = vadd.f32 %v3857_v38, %v11837_v8  ;;  %v3411_v32 = vadd.f32 %v3410_v20, %v11828_v54  ;;  %v3859_v15 = vpop.f32.mrb[213].mxu1 }
 0x496   :  { %v6167_v43 = vadd.f32 %v6166_v28, %v4659_v30  ;;  %v4672_v9 = vmax.f32 %v3409_v6, 0.0  ;;  %v3860_v7 = vadd.f32 %v3859_v15, %v11847_v13 }
 0x497   :  { %v4674_v39 = vmax.f32 %v3858_v45, 0.0  ;;  %v4673_v22 = vmax.f32 %v3411_v32, 0.0  ;;  %v3414_v40 = vpop.f32.mrb[214].mxu0 }
 0x498   :  { %v6057_v17 = vadd.f32 %v6056_v34, %v4672_v9  ;;  %v4675_v31 = vmax.f32 %v3860_v7, 0.0  ;;  %v3415_v4 = vadd.f32 %v3414_v40, %v11824_v26  ;;  %v3863_v53 = vpop.f32.mrb[214].mxu1  ;;  %v3416_v3 = vpop.f32.mrb[215].mxu0 }
 0x499   :  { %v6131_v47 = vadd.f32 %v6130_v44, %v4674_v39  ;;  %v6094_v36 = vadd.f32 %v6093_v0, %v4673_v22  ;;  %v3864_v50 = vadd.f32 %v3863_v53, %v11837_v8  ;;  %v3417_v12 = vadd.f32 %v3416_v3, %v11828_v54  ;;  %v3865_v37 = vpop.f32.mrb[215].mxu1 }
 0x49a   :  { %v6168_v11 = vadd.f32 %v6167_v43, %v4675_v31  ;;  %v4688_v41 = vmax.f32 %v3415_v4, 0.0  ;;  %v3866_v63 = vadd.f32 %v3865_v37, %v11847_v13 }
 0x49b   :  { %v4690_v52 = vmax.f32 %v3864_v50, 0.0  ;;  %v4689_v25 = vmax.f32 %v3417_v12, 0.0  ;;  %v3420_v46 = vpop.f32.mrb[216].mxu0 }
 0x49c   :  { %v6058_v42 = vadd.f32 %v6057_v17, %v4688_v41  ;;  %v4691_v51 = vmax.f32 %v3866_v63, 0.0  ;;  %v3421_v24 = vadd.f32 %v3420_v46, %v11824_v26  ;;  %v3869_v48 = vpop.f32.mrb[216].mxu1  ;;  %v3422_v21 = vpop.f32.mrb[217].mxu0 }
 0x49d   :  { %v6132_v49 = vadd.f32 %v6131_v47, %v4690_v52  ;;  %v6095_v1 = vadd.f32 %v6094_v36, %v4689_v25  ;;  %v3870_v10 = vadd.f32 %v3869_v48, %v11837_v8  ;;  %v3423_v5 = vadd.f32 %v3422_v21, %v11828_v54  ;;  %v3871_v60 = vpop.f32.mrb[217].mxu1 }
 0x49e   :  { %v6169_v61 = vadd.f32 %v6168_v11, %v4691_v51  ;;  %v4704_v28 = vmax.f32 %v3421_v24, 0.0  ;;  %v3872_v23 = vadd.f32 %v3871_v60, %v11847_v13 }
 0x49f   :  { %v4706_v18 = vmax.f32 %v3870_v10, 0.0  ;;  %v4705_v59 = vmax.f32 %v3423_v5, 0.0  ;;  %v3426_v2 = vpop.f32.mrb[218].mxu0 }
 0x4a0   :  { %v6059_v56 = vadd.f32 %v6058_v42, %v4704_v28  ;;  %v4707_v35 = vmax.f32 %v3872_v23, 0.0  ;;  %v3427_v27 = vadd.f32 %v3426_v2, %v11824_v26  ;;  %v3875_v19 = vpop.f32.mrb[218].mxu1  ;;  %v3428_v34 = vpop.f32.mrb[219].mxu0 }
 0x4a1   :  { %v6133_v30 = vadd.f32 %v6132_v49, %v4706_v18  ;;  %v6096_v6 = vadd.f32 %v6095_v1, %v4705_v59  ;;  %v3876_v38 = vadd.f32 %v3875_v19, %v11837_v8  ;;  %v3429_v20 = vadd.f32 %v3428_v34, %v11828_v54  ;;  %v3877_v14 = vpop.f32.mrb[219].mxu1 }
 0x4a2   :  { %v6170_v44 = vadd.f32 %v6169_v61, %v4707_v35  ;;  %v4720_v0 = vmax.f32 %v3427_v27, 0.0  ;;  %v3878_v45 = vadd.f32 %v3877_v14, %v11847_v13 }
 0x4a3   :  { %v4722_v32 = vmax.f32 %v3876_v38, 0.0  ;;  %v4721_v15 = vmax.f32 %v3429_v20, 0.0  ;;  %v3432_v43 = vpop.f32.mrb[220].mxu0 }
 0x4a4   :  { %v6060_v9 = vadd.f32 %v6059_v56, %v4720_v0  ;;  %v4723_v7 = vmax.f32 %v3878_v45, 0.0  ;;  %v3433_v58 = vadd.f32 %v3432_v43, %v11824_v26  ;;  %v3881_v39 = vpop.f32.mrb[220].mxu1  ;;  %v3434_v22 = vpop.f32.mrb[221].mxu0 }
 0x4a5   :  { %v6134_v40 = vadd.f32 %v6133_v30, %v4722_v32  ;;  %v6097_v55 = vadd.f32 %v6096_v6, %v4721_v15  ;;  %v3882_v17 = vadd.f32 %v3881_v39, %v11837_v8  ;;  %v3435_v31 = vadd.f32 %v3434_v22, %v11828_v54  ;;  %v3883_v4 = vpop.f32.mrb[221].mxu1 }
 0x4a6   :  { %v6171_v53 = vadd.f32 %v6170_v44, %v4723_v7  ;;  %v4736_v3 = vmax.f32 %v3433_v58, 0.0  ;;  %v3884_v47 = vadd.f32 %v3883_v4, %v11847_v13 }
 0x4a7   :  { %v4738_v36 = vmax.f32 %v3882_v17, 0.0  ;;  %v4737_v50 = vmax.f32 %v3435_v31, 0.0  ;;  %v3438_v12 = vpop.f32.mrb[222].mxu0 }
 0x4a8   :  { %v6061_v37 = vadd.f32 %v6060_v9, %v4736_v3  ;;  %v4739_v11 = vmax.f32 %v3884_v47, 0.0  ;;  %v3439_v41 = vadd.f32 %v3438_v12, %v11824_v26  ;;  %v3887_v63 = vpop.f32.mrb[222].mxu1  ;;  %v3440_v52 = vpop.f32.mrb[223].mxu0 }
 0x4a9   :  { %v6135_v25 = vadd.f32 %v6134_v40, %v4738_v36  ;;  %v6098_v46 = vadd.f32 %v6097_v55, %v4737_v50  ;;  %v3888_v42 = vadd.f32 %v3887_v63, %v11837_v8  ;;  %v3441_v51 = vadd.f32 %v3440_v52, %v11828_v54  ;;  %v3889_v24 = vpop.f32.mrb[223].mxu1 }
 0x4aa   :  { %v6172_v48 = vadd.f32 %v6171_v53, %v4739_v11  ;;  %v4752_v21 = vmax.f32 %v3439_v41, 0.0  ;;  %v3890_v49 = vadd.f32 %v3889_v24, %v11847_v13 }
 0x4ab   :  { %v4754_v1 = vmax.f32 %v3888_v42, 0.0  ;;  %v4753_v10 = vmax.f32 %v3441_v51, 0.0  ;;  %v3444_v5 = vpop.f32.mrb[224].mxu0 }
 0x4ac   :  { %v6062_v60 = vadd.f32 %v6061_v37, %v4752_v21  ;;  %v4755_v61 = vmax.f32 %v3890_v49, 0.0  ;;  %v3445_v28 = vadd.f32 %v3444_v5, %v11824_v26  ;;  %v3893_v23 = vpop.f32.mrb[224].mxu1  ;;  %v3446_v18 = vpop.f32.mrb[225].mxu0 }
 0x4ad   :  { %v6136_v59 = vadd.f32 %v6135_v25, %v4754_v1  ;;  %v6099_v2 = vadd.f32 %v6098_v46, %v4753_v10  ;;  %v3894_v56 = vadd.f32 %v3893_v23, %v11837_v8  ;;  %v3447_v35 = vadd.f32 %v3446_v18, %v11828_v54  ;;  %v3895_v27 = vpop.f32.mrb[225].mxu1 }
 0x4ae   :  { %v6173_v19 = vadd.f32 %v6172_v48, %v4755_v61  ;;  %v4768_v34 = vmax.f32 %v3445_v28, 0.0  ;;  %v3896_v30 = vadd.f32 %v3895_v27, %v11847_v13 }
 0x4af   :  { %v4770_v6 = vmax.f32 %v3894_v56, 0.0  ;;  %v4769_v38 = vmax.f32 %v3447_v35, 0.0  ;;  %v3450_v20 = vpop.f32.mrb[226].mxu0 }
 0x4b0   :  { %v6063_v14 = vadd.f32 %v6062_v60, %v4768_v34  ;;  %v4771_v44 = vmax.f32 %v3896_v30, 0.0  ;;  %v3451_v0 = vadd.f32 %v3450_v20, %v11824_v26  ;;  %v3899_v45 = vpop.f32.mrb[226].mxu1  ;;  %v3452_v32 = vpop.f32.mrb[227].mxu0 }
 0x4b1   :  { %v6137_v15 = vadd.f32 %v6136_v59, %v4770_v6  ;;  %v6100_v43 = vadd.f32 %v6099_v2, %v4769_v38  ;;  %v3900_v9 = vadd.f32 %v3899_v45, %v11837_v8  ;;  %v3453_v7 = vadd.f32 %v3452_v32, %v11828_v54  ;;  %v3901_v58 = vpop.f32.mrb[227].mxu1 }
 0x4b2   :  { %v6174_v39 = vadd.f32 %v6173_v19, %v4771_v44  ;;  %v4784_v22 = vmax.f32 %v3451_v0, 0.0  ;;  %v3902_v40 = vadd.f32 %v3901_v58, %v11847_v13 }
 0x4b3   :  { %v4786_v55 = vmax.f32 %v3900_v9, 0.0  ;;  %v4785_v17 = vmax.f32 %v3453_v7, 0.0  ;;  %v3456_v31 = vpop.f32.mrb[228].mxu0 }
 0x4b4   :  { %v6064_v4 = vadd.f32 %v6063_v14, %v4784_v22  ;;  %v4787_v53 = vmax.f32 %v3902_v40, 0.0  ;;  %v3457_v3 = vadd.f32 %v3456_v31, %v11824_v26  ;;  %v3905_v47 = vpop.f32.mrb[228].mxu1  ;;  %v3458_v36 = vpop.f32.mrb[229].mxu0 }
 0x4b5   :  { %v6138_v50 = vadd.f32 %v6137_v15, %v4786_v55  ;;  %v6101_v12 = vadd.f32 %v6100_v43, %v4785_v17  ;;  %v3906_v37 = vadd.f32 %v3905_v47, %v11837_v8  ;;  %v3459_v11 = vadd.f32 %v3458_v36, %v11828_v54  ;;  %v3907_v41 = vpop.f32.mrb[229].mxu1 }
 0x4b6   :  { %v6175_v63 = vadd.f32 %v6174_v39, %v4787_v53  ;;  %v4800_v52 = vmax.f32 %v3457_v3, 0.0  ;;  %v3908_v25 = vadd.f32 %v3907_v41, %v11847_v13 }
 0x4b7   :  { %v4802_v46 = vmax.f32 %v3906_v37, 0.0  ;;  %v4801_v42 = vmax.f32 %v3459_v11, 0.0  ;;  %v3462_v51 = vpop.f32.mrb[230].mxu0 }
 0x4b8   :  { %v6065_v24 = vadd.f32 %v6064_v4, %v4800_v52  ;;  %v4803_v48 = vmax.f32 %v3908_v25, 0.0  ;;  %v3463_v21 = vadd.f32 %v3462_v51, %v11824_v26  ;;  %v3911_v49 = vpop.f32.mrb[230].mxu1  ;;  %v3464_v1 = vpop.f32.mrb[231].mxu0 }
 0x4b9   :  { %v6139_v10 = vadd.f32 %v6138_v50, %v4802_v46  ;;  %v6102_v5 = vadd.f32 %v6101_v12, %v4801_v42  ;;  %v3912_v60 = vadd.f32 %v3911_v49, %v11837_v8  ;;  %v3465_v61 = vadd.f32 %v3464_v1, %v11828_v54  ;;  %v3913_v28 = vpop.f32.mrb[231].mxu1 }
 0x4ba   :  { %v6176_v23 = vadd.f32 %v6175_v63, %v4803_v48  ;;  %v4816_v18 = vmax.f32 %v3463_v21, 0.0  ;;  %v3914_v59 = vadd.f32 %v3913_v28, %v11847_v13 }
 0x4bb   :  { %v4818_v2 = vmax.f32 %v3912_v60, 0.0  ;;  %v4817_v56 = vmax.f32 %v3465_v61, 0.0  ;;  %v3468_v35 = vpop.f32.mrb[232].mxu0 }
 0x4bc   :  { %v6066_v27 = vadd.f32 %v6065_v24, %v4816_v18  ;;  %v4819_v19 = vmax.f32 %v3914_v59, 0.0  ;;  %v3469_v34 = vadd.f32 %v3468_v35, %v11824_v26  ;;  %v3917_v30 = vpop.f32.mrb[232].mxu1  ;;  %v3470_v6 = vpop.f32.mrb[233].mxu0 }
 0x4bd   :  { %v6140_v38 = vadd.f32 %v6139_v10, %v4818_v2  ;;  %v6103_v20 = vadd.f32 %v6102_v5, %v4817_v56  ;;  %v3918_v14 = vadd.f32 %v3917_v30, %v11837_v8  ;;  %v3471_v44 = vadd.f32 %v3470_v6, %v11828_v54  ;;  %v3919_v0 = vpop.f32.mrb[233].mxu1 }
 0x4be   :  { %v6177_v45 = vadd.f32 %v6176_v23, %v4819_v19  ;;  %v4832_v32 = vmax.f32 %v3469_v34, 0.0  ;;  %v3920_v15 = vadd.f32 %v3919_v0, %v11847_v13 }
 0x4bf   :  { %v4834_v43 = vmax.f32 %v3918_v14, 0.0  ;;  %v4833_v9 = vmax.f32 %v3471_v44, 0.0  ;;  %v3474_v7 = vpop.f32.mrb[234].mxu0 }
 0x4c0   :  { %v6067_v58 = vadd.f32 %v6066_v27, %v4832_v32  ;;  %v4835_v39 = vmax.f32 %v3920_v15, 0.0  ;;  %v3475_v22 = vadd.f32 %v3474_v7, %v11824_v26  ;;  %v3923_v40 = vpop.f32.mrb[234].mxu1  ;;  %v3476_v55 = vpop.f32.mrb[235].mxu0 }
 0x4c1   :  { %v6141_v17 = vadd.f32 %v6140_v38, %v4834_v43  ;;  %v6104_v31 = vadd.f32 %v6103_v20, %v4833_v9  ;;  %v3924_v4 = vadd.f32 %v3923_v40, %v11837_v8  ;;  %v3477_v53 = vadd.f32 %v3476_v55, %v11828_v54  ;;  %v3925_v3 = vpop.f32.mrb[235].mxu1 }
 0x4c2   :  { %v6178_v47 = vadd.f32 %v6177_v45, %v4835_v39  ;;  %v4848_v36 = vmax.f32 %v3475_v22, 0.0  ;;  %v3926_v50 = vadd.f32 %v3925_v3, %v11847_v13 }
 0x4c3   :  { %v4850_v12 = vmax.f32 %v3924_v4, 0.0  ;;  %v4849_v37 = vmax.f32 %v3477_v53, 0.0  ;;  %v3480_v11 = vpop.f32.mrb[236].mxu0 }
 0x4c4   :  { %v6068_v41 = vadd.f32 %v6067_v58, %v4848_v36  ;;  %v4851_v63 = vmax.f32 %v3926_v50, 0.0  ;;  %v3481_v52 = vadd.f32 %v3480_v11, %v11824_v26  ;;  %v3929_v25 = vpop.f32.mrb[236].mxu1  ;;  %v3482_v46 = vpop.f32.mrb[237].mxu0 }
 0x4c5   :  { %v6142_v42 = vadd.f32 %v6141_v17, %v4850_v12  ;;  %v6105_v51 = vadd.f32 %v6104_v31, %v4849_v37  ;;  %v3930_v24 = vadd.f32 %v3929_v25, %v11837_v8  ;;  %v3483_v48 = vadd.f32 %v3482_v46, %v11828_v54  ;;  %v3931_v21 = vpop.f32.mrb[237].mxu1 }
 0x4c6   :  { %v6179_v49 = vadd.f32 %v6178_v47, %v4851_v63  ;;  %v4864_v1 = vmax.f32 %v3481_v52, 0.0  ;;  %v3932_v10 = vadd.f32 %v3931_v21, %v11847_v13 }
 0x4c7   :  { %v4866_v5 = vmax.f32 %v3930_v24, 0.0  ;;  %v4865_v60 = vmax.f32 %v3483_v48, 0.0  ;;  %v3486_v61 = vpop.f32.mrb[238].mxu0 }
 0x4c8   :  { %v6069_v28 = vadd.f32 %v6068_v41, %v4864_v1  ;;  %v4867_v23 = vmax.f32 %v3932_v10, 0.0  ;;  %v3487_v18 = vadd.f32 %v3486_v61, %v11824_v26  ;;  %v3935_v59 = vpop.f32.mrb[238].mxu1  ;;  %v3488_v2 = vpop.f32.mrb[239].mxu0 }
 0x4c9   :  { %v6143_v56 = vadd.f32 %v6142_v42, %v4866_v5  ;;  %v6106_v35 = vadd.f32 %v6105_v51, %v4865_v60  ;;  %v3936_v27 = vadd.f32 %v3935_v59, %v11837_v8  ;;  %v3489_v19 = vadd.f32 %v3488_v2, %v11828_v54  ;;  %v3937_v34 = vpop.f32.mrb[239].mxu1 }
 0x4ca   :  { %v6180_v30 = vadd.f32 %v6179_v49, %v4867_v23  ;;  %v4880_v6 = vmax.f32 %v3487_v18, 0.0  ;;  %v3938_v38 = vadd.f32 %v3937_v34, %v11847_v13 }
 0x4cb   :  { %v4882_v20 = vmax.f32 %v3936_v27, 0.0  ;;  %v4881_v14 = vmax.f32 %v3489_v19, 0.0  ;;  %v3492_v44 = vpop.f32.mrb[240].mxu0 }
 0x4cc   :  { %v6070_v0 = vadd.f32 %v6069_v28, %v4880_v6  ;;  %v4883_v45 = vmax.f32 %v3938_v38, 0.0  ;;  %v3493_v32 = vadd.f32 %v3492_v44, %v11824_v26  ;;  %v3941_v15 = vpop.f32.mrb[240].mxu1  ;;  %v3494_v43 = vpop.f32.mrb[241].mxu0 }
 0x4cd   :  { %v6144_v9 = vadd.f32 %v6143_v56, %v4882_v20  ;;  %v6107_v7 = vadd.f32 %v6106_v35, %v4881_v14  ;;  %v3942_v58 = vadd.f32 %v3941_v15, %v11837_v8  ;;  %v3495_v39 = vadd.f32 %v3494_v43, %v11828_v54  ;;  %v3943_v22 = vpop.f32.mrb[241].mxu1 }
 0x4ce   :  { %v6181_v40 = vadd.f32 %v6180_v30, %v4883_v45  ;;  %v4896_v55 = vmax.f32 %v3493_v32, 0.0  ;;  %v3944_v17 = vadd.f32 %v3943_v22, %v11847_v13 }
 0x4cf   :  { %v4898_v31 = vmax.f32 %v3942_v58, 0.0  ;;  %v4897_v4 = vmax.f32 %v3495_v39, 0.0  ;;  %v3498_v53 = vpop.f32.mrb[242].mxu0 }
 0x4d0   :  { %v6071_v3 = vadd.f32 %v6070_v0, %v4896_v55  ;;  %v4899_v47 = vmax.f32 %v3944_v17, 0.0  ;;  %v3499_v36 = vadd.f32 %v3498_v53, %v11824_v26  ;;  %v3947_v50 = vpop.f32.mrb[242].mxu1  ;;  %v3500_v12 = vpop.f32.mrb[243].mxu0 }
 0x4d1   :  { %v6145_v37 = vadd.f32 %v6144_v9, %v4898_v31  ;;  %v6108_v11 = vadd.f32 %v6107_v7, %v4897_v4  ;;  %v3948_v41 = vadd.f32 %v3947_v50, %v11837_v8  ;;  %v3501_v63 = vadd.f32 %v3500_v12, %v11828_v54  ;;  %v3949_v52 = vpop.f32.mrb[243].mxu1 }
 0x4d2   :  { %v6182_v25 = vadd.f32 %v6181_v40, %v4899_v47  ;;  %v4912_v46 = vmax.f32 %v3499_v36, 0.0  ;;  %v3950_v42 = vadd.f32 %v3949_v52, %v11847_v13  ;;  %v5487_v7 = vrot.slane %v12116_v16, 4 }
 0x4d3   :  { %v4914_v51 = vmax.f32 %v3948_v41, 0.0  ;;  %v4913_v24 = vmax.f32 %v3501_v63, 0.0  ;;  %v3504_v48 = vpop.f32.mrb[244].mxu0  ;;  %v5561_v12 = vrot.slane %v12118_v33, 4  ;;  %v5524_v52 = vrot.slane %v12120_v29, 4 }
 0x4d4   :  { %v6072_v21 = vadd.f32 %v6071_v3, %v4912_v46  ;;  %v4915_v49 = vmax.f32 %v3950_v42, 0.0  ;;  %v3505_v1 = vadd.f32 %v3504_v48, %v11824_v26  ;;  %v3953_v10 = vpop.f32.mrb[244].mxu1  ;;  %v3506_v5 = vpop.f32.mrb[245].mxu0  ;;  %v5488_v63 = vadd.f32 %v5487_v7, %v12116_v16 }
 0x4d5   :  { %v6146_v60 = vadd.f32 %v6145_v37, %v4914_v51  ;;  %v6109_v61 = vadd.f32 %v6108_v11, %v4913_v24  ;;  %v3954_v28 = vadd.f32 %v3953_v10, %v11837_v8  ;;  %v3507_v23 = vadd.f32 %v3506_v5, %v11828_v54  ;;  %v3955_v18 = vpop.f32.mrb[245].mxu1 }
 0x4d6   :  { %v6183_v59 = vadd.f32 %v6182_v25, %v4915_v49  ;;  %v4928_v2 = vmax.f32 %v3505_v1, 0.0  ;;  %v3956_v56 = vadd.f32 %v3955_v18, %v11847_v13  ;;  %v5598_v51 = vrot.slane %v12122_v57, 4 }
 0x4d7   :  { %v4930_v35 = vmax.f32 %v3954_v28, 0.0  ;;  %v4929_v27 = vmax.f32 %v3507_v23, 0.0  ;;  %v3510_v19 = vpop.f32.mrb[246].mxu0  ;;  %v5562_v28 = vadd.f32 %v5561_v12, %v12118_v33 }
 0x4d8   :  { %v6073_v34 = vadd.f32 %v6072_v21, %v4928_v2  ;;  %v4931_v30 = vmax.f32 %v3956_v56, 0.0  ;;  %v3511_v6 = vadd.f32 %v3510_v19, %v11824_v26  ;;  %v3959_v38 = vpop.f32.mrb[246].mxu1  ;;  %v3512_v20 = vpop.f32.mrb[247].mxu0  ;;  %v5489_v2 = vrot.slane %v5488_v63, 2 }
 0x4d9   :  { %v6147_v14 = vadd.f32 %v6146_v60, %v4930_v35  ;;  %v6110_v44 = vadd.f32 %v6109_v61, %v4929_v27  ;;  %v3960_v0 = vadd.f32 %v3959_v38, %v11837_v8  ;;  %v3513_v45 = vadd.f32 %v3512_v20, %v11828_v54  ;;  %v3961_v32 = vpop.f32.mrb[247].mxu1 }
 0x4da   :  { %v6184_v15 = vadd.f32 %v6183_v59, %v4931_v30  ;;  %v4944_v43 = vmax.f32 %v3511_v6, 0.0  ;;  %v3962_v9 = vadd.f32 %v3961_v32, %v11847_v13  ;;  %v5525_v56 = vadd.f32 %v5524_v52, %v12120_v29 }
 0x4db   :  { %v4946_v58 = vmax.f32 %v3960_v0, 0.0  ;;  %v4945_v39 = vmax.f32 %v3513_v45, 0.0  ;;  %v3516_v22 = vpop.f32.mrb[248].mxu0  ;;  %v5490_v7 = vadd.f32 %v5489_v2, %v5488_v63 }
 0x4dc   :  { %v6074_v40 = vadd.f32 %v6073_v34, %v4944_v43  ;;  %v4947_v55 = vmax.f32 %v3962_v9, 0.0  ;;  %v3517_v17 = vadd.f32 %v3516_v22, %v11824_v26  ;;  %v3965_v31 = vpop.f32.mrb[248].mxu1  ;;  %v3518_v4 = vpop.f32.mrb[249].mxu0  ;;  %v5599_v34 = vadd.f32 %v5598_v51, %v12122_v57 }
 0x4dd   :  { %v6148_v53 = vadd.f32 %v6147_v14, %v4946_v58  ;;  %v6111_v3 = vadd.f32 %v6110_v44, %v4945_v39  ;;  %v3966_v47 = vadd.f32 %v3965_v31, %v11837_v8  ;;  %v3519_v36 = vadd.f32 %v3518_v4, %v11828_v54  ;;  %v3967_v50 = vpop.f32.mrb[249].mxu1 }
 0x4de   :  { %v6185_v37 = vadd.f32 %v6184_v15, %v4947_v55  ;;  %v4960_v11 = vmax.f32 %v3517_v17, 0.0  ;;  %v3968_v41 = vadd.f32 %v3967_v50, %v11847_v13  ;;  %v5563_v15 = vrot.slane %v5562_v28, 2 }
 0x4df   :  { %v4962_v25 = vmax.f32 %v3966_v47, 0.0  ;;  %v4961_v46 = vmax.f32 %v3519_v36, 0.0  ;;  %v3522_v42 = vpop.f32.mrb[250].mxu0  ;;  %v5526_v57 = vrot.slane %v5525_v56, 2 }
 0x4e0   :  { %v6075_v24 = vadd.f32 %v6074_v40, %v4960_v11  ;;  %v4963_v48 = vmax.f32 %v3968_v41, 0.0  ;;  %v3523_v21 = vadd.f32 %v3522_v42, %v11824_v26  ;;  %v3971_v49 = vpop.f32.mrb[250].mxu1  ;;  %v3524_v1 = vpop.f32.mrb[251].mxu0  ;;  %v5600_v40 = vrot.slane %v5599_v34, 2 }
 0x4e1   :  { %v6149_v10 = vadd.f32 %v6148_v53, %v4962_v25  ;;  %v6112_v5 = vadd.f32 %v6111_v3, %v4961_v46  ;;  %v3972_v60 = vadd.f32 %v3971_v49, %v11837_v8  ;;  %v3525_v61 = vadd.f32 %v3524_v1, %v11828_v54  ;;  %v3973_v16 = vpop.f32.mrb[251].mxu1 }
 0x4e2   :  { %v6186_v23 = vadd.f32 %v6185_v37, %v4963_v48  ;;  %v4976_v18 = vmax.f32 %v3523_v21, 0.0  ;;  %v3974_v59 = vadd.f32 %v3973_v16, %v11847_v13  ;;  %v5564_v37 = vadd.f32 %v5563_v15, %v5562_v28 }
 0x4e3   :  { %v4978_v35 = vmax.f32 %v3972_v60, 0.0  ;;  %v4977_v27 = vmax.f32 %v3525_v61, 0.0  ;;  %v3528_v19 = vpop.f32.mrb[252].mxu0  ;;  %v5527_v52 = vadd.f32 %v5526_v57, %v5525_v56  ;;  %v5601_v51 = vadd.f32 %v5600_v40, %v5599_v34 }
 0x4e4   :  { %v6076_v30 = vadd.f32 %v6075_v24, %v4976_v18  ;;  %v4979_v6 = vmax.f32 %v3974_v59, 0.0  ;;  %v3529_v38 = vadd.f32 %v3528_v19, %v11824_v26  ;;  %v3977_v20 = vpop.f32.mrb[252].mxu1  ;;  %v3530_v14 = vpop.f32.mrb[253].mxu0 }
 0x4e5   :  { %v6150_v44 = vadd.f32 %v6149_v10, %v4978_v35  ;;  %v6113_v33 = vadd.f32 %v6112_v5, %v4977_v27  ;;  %v3978_v0 = vadd.f32 %v3977_v20, %v11837_v8  ;;  %v3531_v45 = vadd.f32 %v3530_v14, %v11828_v54  ;;  %v3979_v32 = vpop.f32.mrb[253].mxu1 }
 0x4e6   :  { %v6187_v29 = vadd.f32 %v6186_v23, %v4979_v6  ;;  %v4992_v43 = vmax.f32 %v3529_v38, 0.0  ;;  %v3980_v9 = vadd.f32 %v3979_v32, %v11847_v13  ;;  %v5528_v59 = vrot.slane %v5527_v52, 1 }
 0x4e7   :  { %v4994_v58 = vmax.f32 %v3978_v0, 0.0  ;;  %v4993_v39 = vmax.f32 %v3531_v45, 0.0  ;;  %v3534_v22 = vpop.f32.mrb[254].mxu0  ;;  %v5602_v19 = vrot.slane %v5601_v51, 1 }
 0x4e8   :  { %v6077_v55 = vadd.f32 %v6076_v30, %v4992_v43  ;;  %v4995_v17 = vmax.f32 %v3980_v9, 0.0  ;;  %v3535_v31 = vadd.f32 %v3534_v22, %v11824_v26  ;;  %v3983_v4 = vpop.f32.mrb[254].mxu1  ;;  %v3536_v53 = vpop.f32.mrb[255].mxu0  ;;  %v5529_v45 = vadd.f32 %v5528_v59, %v5527_v52 }
 0x4e9   :  { %v6151_v3 = vadd.f32 %v6150_v44, %v4994_v58  ;;  %v6114_v47 = vadd.f32 %v6113_v33, %v4993_v39  ;;  %v3984_v36 = vadd.f32 %v3983_v4, %v11837_v8  ;;  %v3537_v50 = vadd.f32 %v3536_v53, %v11828_v54  ;;  %v3985_v12 = vpop.f32.mrb[255].mxu1  ;;  %v8286_v8 = vld [vmem:[%s12299_s4] ss:$0 sm:$0xff]  ;;  %s8999_s4 = smov [#allocation6]  }
 0x4ea   :  { %v6188_v11 = vadd.f32 %v6187_v29, %v4995_v17  ;;  %v5008_v41 = vmax.f32 %v3535_v31, 0.0  ;;  %v3986_v63 = vadd.f32 %v3985_v12, %v11847_v13  ;;  %v5491_v54 = vrot.slane %v5490_v7, 1  ;;  %s7761_s27 = sshll.u32 %s8999_s4, 4  ;;  %s7762_s27 = int_to_ptr.vmem [resolvable:$true] %s7761_s27 }
 0x4eb   :  { %v5010_v25 = vmax.f32 %v3984_v36, 0.0  ;;  %v5009_v46 = vmax.f32 %v3537_v50, 0.0  ;;  %v8431_v42 = vpop.f32.mrb[0].mxu0  ;;  %v5565_v13 = vrot.slane %v5564_v37, 1  ;;  %v5603_v29 = vadd.f32 %v5602_v19, %v5601_v51  ;;  %s8945_s28 = scalar_lea.vmem %s7762_s27, 32  ;;  %p8950_p9 = scmp.lt.s32.totalorder %s7762_s27, %s7762_s27 }
 0x4ec   :  { %v6078_v26 = vadd.f32 %v6077_v55, %v5008_v41  ;;  %v5011_v24 = vmax.f32 %v3986_v63, 0.0  ;;  %v8453_v48 = vpop.f32.mrb[0].mxu1  ;;  %v8432_v21 = vpop.f32.mrb[1].mxu0  ;;  %v5492_v14 = vadd.f32 %v5491_v54, %v5490_v7  ;;  %v6210_v17 = vmul.f32 0.00390625, %v5529_v45  ;;  %p8946_p8 = scmp.ne.s32.totalorder %s7762_s27, %s8945_s28  ;;  %p8951_p10 = scmp.lt.s32.totalorder %s8945_s28, %s8945_s28 }
 0x4ed   :  { %v6152_v49 = vadd.f32 %v6151_v3, %v5010_v25  ;;  %v6115_v1 = vadd.f32 %v6114_v47, %v5009_v46  ;;  %v8433_v10 = vadd.f32 %v8432_v21, %v8431_v42  ;;  %v8454_v5 = vpop.f32.mrb[1].mxu1  ;;  %v8434_v60 = vpop.f32.mrb[2].mxu0  ;;  %v5566_v0 = vadd.f32 %v5565_v13, %v5564_v37 }
 0x4ee   :  { %v6079_v61 = vrot.slane %v6078_v26, 4  ;;  %v6189_v16 = vadd.f32 %v6188_v11, %v5011_v24  ;;  %v8455_v28 = vadd.f32 %v8454_v5, %v8453_v48  ;;  %v8456_v23 = vpop.f32.mrb[2].mxu1  ;;  %v8435_v18 = vpop.f32.mrb[3].mxu0  ;;  %v6209_v39 = vmul.f32 0.00390625, %v5492_v14  ;;  %p8952_p11 = por %p8951_p10, %p8950_p9 }
 0x4ef   :  { %v6153_v2 = vrot.slane %v6152_v49, 4  ;;  %v6116_v56 = vrot.slane %v6115_v1, 4  ;;  %v7440_v35 = vadd.f32 %v8433_v10, %v8286_v8  ;;  %v8457_v27 = vpop.f32.mrb[3].mxu1  ;;  %v6211_v55 = vmul.f32 0.00390625, %v5566_v0 }
 0x4f0   :  { %v6080_v34 = vadd.f32 %v6079_v61, %v6078_v26  ;;  %v6190_v30 = vrot.slane %v6189_v16, 4  ;;  %v6212_v53 = vmul.f32 0.00390625, %v5603_v29  ;;  %v6241_v50 = vpack.c.bf16 %v6209_v39, %v6209_v39  ;;  %p8953_p12 = pnand %p8952_p11, %p8946_p8 }
 0x4f1   :  { %v6154_v6 = vadd.f32 %v6153_v2, %v6152_v49  ;;  %v6117_v38 = vadd.f32 %v6116_v56, %v6115_v1  ;;  %v12263_v20 = vadd.f32 %v8455_v28, %v7440_v35  ;;  %v6243_v11 = vpack.c.bf16 %v6211_v55, %v6211_v55 }
 0x4f2   :  { %v6081_v44 = vrot.slane %v6080_v34, 2  ;;  %v6191_v33 = vadd.f32 %v6190_v30, %v6189_v16  ;;  %v6242_v52 = vpack.c.bf16 %v6210_v17, %v6210_v17  ;;  %v6244_v42 = vpack.c.bf16 %v6212_v53, %v6212_v53 }
 0x4f3   :  { %v6155_v32 = vrot.slane %v6154_v6, 2  ;;  %v6118_v15 = vrot.slane %v6117_v38, 2  ;;  %v6568_v24 = vunpack.c.l.b16 %v6241_v50  ;;  %v6570_v21 = vunpack.c.l.b16 %v6243_v11 }
 0x4f4   :  { %v6082_v43 = vadd.f32 %v6081_v44, %v6080_v34  ;;  %v6192_v9 = vrot.slane %v6191_v33, 2  ;;  %v6569_v49 = vunpack.c.l.b16 %v6242_v52  ;;  %v6571_v5 = vunpack.c.l.b16 %v6244_v42 }
 0x4f5   :  { %v6156_v57 = vadd.f32 %v6155_v32, %v6154_v6  ;;  %v6119_v58 = vadd.f32 %v6118_v15, %v6117_v38 }
 0x4f6   :  { %v6083_v22 = vrot.slane %v6082_v43, 1  ;;  %v6193_v40 = vadd.f32 %v6192_v9, %v6191_v33 }
 0x4f7   :  { %v6157_v31 = vrot.slane %v6156_v57, 1  ;;  %v6120_v4 = vrot.slane %v6119_v58, 1 }
 0x4f8   :  { %v6084_v7 = vadd.f32 %v6083_v22, %v6082_v43  ;;  %v6194_v3 = vrot.slane %v6193_v40, 1 }
 0x4f9   :  { %v6158_v47 = vadd.f32 %v6157_v31, %v6156_v57  ;;  %v6121_v36 = vadd.f32 %v6120_v4, %v6119_v58  ;;  %v7726_v4 = vand.u32 127, %v123_v62 }
 0x4fa   :  { %v6225_v12 = vmul.f32 0.00390625, %v6084_v7  ;;  %v6195_v37 = vadd.f32 %v6194_v3, %v6193_v40 }
 0x4fb   :  { %v6227_v41 = vmul.f32 0.00390625, %v6158_v47  ;;  %v6226_v63 = vmul.f32 0.00390625, %v6121_v36  ;;  %vm7727_vm2 = vcmp.lt.s32.totalorder %v7726_v4, 30 }
 0x4fc   :  { %v6257_v25 = vpack.c.bf16 %v6225_v12, %v6225_v12  ;;  %v6228_v46 = vmul.f32 0.00390625, %v6195_v37 }
 0x4fd   :  { %v6259_v51 = vpack.c.bf16 %v6227_v41, %v6227_v41  ;;  %v6258_v26 = vpack.c.bf16 %v6226_v63, %v6226_v63 }
 0x4fe   :  { %v6584_v48 = vunpack.c.l.b16 %v6257_v25  ;;  %v6260_v8 = vpack.c.bf16 %v6228_v46, %v6228_v46 }
 0x4ff   :  { %v6586_v54 = vunpack.c.l.b16 %v6259_v51  ;;  %v6585_v1 = vunpack.c.l.b16 %v6258_v26 }
 0x500   :  { %v6601_v10 = vsel %vm6588_vm1, %v6584_v48, %v6568_v24  ;;  %v6587_v60 = vunpack.c.l.b16 %v6260_v8 }
 0x501   :  { %v6603_v13 = vsel %vm6588_vm1, %v6586_v54, %v6570_v21  ;;  %v6602_v61 = vsel %vm6588_vm1, %v6585_v1, %v6569_v49  ;;  %v6617_v23 = vpack.c.b16 %v6601_v10, %v6601_v10 }
 0x502   :  { %v6618_v16 = vpack.c.b16 %v6602_v61, %v6602_v61  ;;  %v6604_v28 = vsel %vm6588_vm1, %v6587_v60, %v6571_v5  ;;  %v6619_v59 = vpack.c.b16 %v6603_v13, %v6603_v13 }
 0x503   :  { %v6620_v18 = vpack.c.b16 %v6604_v28, %v6604_v28 }
 0x504   :  { %7677 = vmatprep.mubr.bf16.mxu0 %v6618_v16 }
 0x505   :  { %7717 = vmatprep.mubr.bf16.mxu1 %v6620_v18  ;;  %7678 = vmatmul.mubr.bf16.vlgmr.msra.gmra.mrb[12].mxu0 %v6617_v23 }
 0x506   :  { %7718 = vmatmul.mubr.bf16.vlgmr.msra.gmra.mrb[12].mxu1 %v6619_v59 }
 0x50c   :  { %v8475_v2 = vpop.f32.mrb[4].mxu0  ;;  %v8497_v56 = vpop.f32.mrb[4].mxu1 }
 0x50d   :  { %v8476_v35 = vpop.f32.mrb[5].mxu0  ;;  %v8498_v27 = vpop.f32.mrb[5].mxu1 }
 0x50e   :  { %v8477_v19 = vadd.f32 %v8476_v35, %v8475_v2  ;;  %v8499_v34 = vadd.f32 %v8498_v27, %v8497_v56  ;;  %v8478_v30 = vpop.f32.mrb[6].mxu0  ;;  %v8500_v6 = vpop.f32.mrb[6].mxu1 }
 0x50f   :  { %v8479_v38 = vpop.f32.mrb[7].mxu0  ;;  %v8501_v14 = vpop.f32.mrb[7].mxu1 }
 0x510   :  { %v7520_v44 = vadd.f32 %v8477_v19, %v12263_v20 }
 0x512   :  { %v7560_v33 = vadd.f32 %v8499_v34, %v7520_v44 }
 0x52c   :  { %v8519_v0 = vpop.f32.mrb[8].mxu0 }
 0x52d   :  { %v8541_v45 = vpop.f32.mrb[8].mxu1  ;;  %v8520_v32 = vpop.f32.mrb[9].mxu0 }
 0x52e   :  { %v8521_v15 = vadd.f32 %v8520_v32, %v8519_v0  ;;  %v8542_v29 = vpop.f32.mrb[9].mxu1  ;;  %v8522_v43 = vpop.f32.mrb[10].mxu0 }
 0x52f   :  { %v8543_v9 = vadd.f32 %v8542_v29, %v8541_v45  ;;  %v8544_v57 = vpop.f32.mrb[10].mxu1  ;;  %v8523_v58 = vpop.f32.mrb[11].mxu0 }
 0x530   :  { %v7600_v39 = vadd.f32 %v8521_v15, %v7560_v33  ;;  %v8545_v22 = vpop.f32.mrb[11].mxu1 }
 0x532   :  { %v7640_v40 = vadd.f32 %v8543_v9, %v7600_v39 }
 0x5d8   :  { %v8563_v55 = vpop.f32.mrb[12].mxu0 }
 0x5d9   :  { %v8585_v17 = vpop.f32.mrb[12].mxu1  ;;  %v8564_v31 = vpop.f32.mrb[13].mxu0 }
 0x5da   :  { %v8565_v53 = vadd.f32 %v8564_v31, %v8563_v55  ;;  %v8586_v20 = vpop.f32.mrb[13].mxu1  ;;  %v8566_v7 = vpop.f32.mrb[14].mxu0 }
 0x5db   :  { %v8587_v3 = vadd.f32 %v8586_v20, %v8585_v17  ;;  %v8588_v47 = vpop.f32.mrb[14].mxu1  ;;  %v8567_v36 = vpop.f32.mrb[15].mxu0 }
 0x5dc   :  { %v7680_v50 = vadd.f32 %v8565_v53, %v7640_v40  ;;  %v8589_v12 = vpop.f32.mrb[15].mxu1 }
 0x5de   :  { %v7720_v37 = vadd.f32 %v8587_v3, %v7680_v50 }
 0x5e0   :  { %7742 = vst [vmem:[#allocation6] sm:$0x3] %v7720_v37  ;;  %v7728_v11 = vsel %vm7727_vm2, %v7720_v37, -1e+30 }
 0x5e1   :  { %v7730_v41 = vsel %vm7729_vm3, %v7728_v11, -inf }
 0x5e2   :  { %7731 = vmax.xlane.f32.xlu0 %v7730_v41 }
 0x66f   :  { %v7732_v63 = vpop.xlane.xlu0 %7731 }
 0x670   :  { %v7733_v52 = vsub.f32 %v7720_v37, %v7732_v63 }
 0x672   :  { %v7734_v25 = vmul.f32 1.442695, %v7733_v52 }
 0x674   :  { %8725 = vpow2.f32 %v7734_v25 }
 0x67e   :  { %v8726_v62 = vpop.eup %8725 }
 0x67f   :  { %v7736_v46 = vsel %vm7727_vm2, %v8726_v62, 0.0 }
 0x680   :  { %v7737_v42 = vsel %vm7729_vm3, %v7736_v46, 0.0 }
 0x681   :  { %7738 = vadd.xlane.f32.xlu0 %v7737_v42 }
 0x682   :  { %8956 = shalt.err (!%p8953_p12)
}
 0x683   :  { %s8957_s2 = scalar_lea.hbm %s12301_s6, 32 }
 0x684   :  { %p8958_p13 = scmp.ne.s32.totalorder %s12301_s6, %s8957_s2  ;;  %p8961_p0 = scmp.lt.u32.totalorder %s8957_s2, %s12301_s6 }
 0x686   :  { %p8963_p1 = pnand %p8961_p0, %p8958_p13 }
 0x688   :  { %8966 = shalt.err (!%p8963_p1)
}
 0x689   :  { %7764 = dma.vmem_to_hbm [thread:$0]  %s7762_s27, 32, %s12301_s6, [#allocation7]  }
 0x68a   :  { %s9000_s12 = smov [#allocation5]  }
 0x68b   :  { %s7751_s13 = sshll.u32 %s9000_s12, 4  ;;  %s7752_s13 = int_to_ptr.vmem [resolvable:$true] %s7751_s13 }
 0x68c   :  { %s8967_s14 = scalar_lea.vmem %s7752_s13, 32  ;;  %p8972_p3 = scmp.lt.s32.totalorder %s7752_s13, %s7752_s13 }
 0x68d   :  { %p8968_p2 = scmp.ne.s32.totalorder %s7752_s13, %s8967_s14  ;;  %p8973_p4 = scmp.lt.s32.totalorder %s8967_s14, %s8967_s14 }
 0x68f   :  { %p8974_p5 = por %p8973_p4, %p8972_p3 }
 0x691   :  { %p8975_p6 = pnand %p8974_p5, %p8968_p2 }
 0x70e   :  { %v7739_v51 = vpop.xlane.xlu0 %7738 }
 0x70f   :  { %8727 = vlog2.f32 %v7739_v51 }
 0x719   :  { %v8728_v26 = vpop.eup %8727 }
 0x71a   :  { %v7741_v24 = vmul.f32 0.6931472, %v8728_v26 }
 0x71c   :  { %v7743_v48 = vsub.f32 %v7733_v52, %v7741_v24 }
 0x71e   :  { %7744 = vst [vmem:[#allocation5] sm:$0x3] %v7743_v48 }
 0x71f   :  { %8978 = shalt.err (!%p8975_p6)
}
 0x720   :  { %s8979_s6 = scalar_lea.hbm %s12300_s5, 32 }
 0x721   :  { %p8980_p7 = scmp.ne.s32.totalorder %s12300_s5, %s8979_s6  ;;  %p8983_p8 = scmp.lt.u32.totalorder %s8979_s6, %s12300_s5 }
 0x723   :  { %p8985_p9 = pnand %p8983_p8, %p8980_p7 }
 0x725   :  { %8988 = shalt.err (!%p8985_p9)
}
 0x726   :  { %7754 = dma.vmem_to_hbm [thread:$0]  %s7752_s13, 32, %s12300_s5, [#allocation4]  }
 0x727   :  { %8991 = dma.done.wait [#allocation4], 32  }
 0x728   :  { %8992 = vsyncadd [#allocation4], 4294967264 }
 0x729   :  { %8993 = dma.done.wait [#allocation7], 32  }
 0x72a   :  { %8994 = vsyncadd [#allocation7], 4294967264 }
 0x72b   :  { %7771 = vsyncpa [#allocation3], 1 }
 0x72c   :  { %7772 = vsyncpa [#allocation4], 1 }
 0x72d   :  { %7773 = vsyncpa [#allocation7], 1 }

</bundles_post_ra>
